<compile_context>
chip_gen: v7x
topology: tpu7x:2x2x1
jax: 0.10.0
libtpu: 0.0.40
codegen_flags: <defaults>
</compile_context>

<pallas_src>
import jax
import jax.numpy as jnp
from jax.experimental import pallas as pl
from jax.experimental.pallas import tpu as pltpu


def _upsample_fused_kernel(xd_ref, skip_ref, wup_ref, bup_ref,
                           w1_ref, b1_ref, w2_ref, b2_ref,
                           o_ref, cat_ref, ypad_ref):
    """One batch image: up-conv -> concat -> conv1+ReLU -> conv2+ReLU.

    xd_ref  : (1, OH+3, OW+3, Cin)  bf16 zero-dilated+padded input (stride-1
                                    equivalent of ConvTranspose2d(4, 2, 1))
    skip_ref: (1, OH, OW, Chalf)    bf16 skip connection
    wup_ref : (16*Cin, Chalf)       bf16 flipped ConvTranspose weights (HWIO flat)
    w1_ref  : (9*Ccat, Cout)        bf16 conv_1 HWIO flattened
    w2_ref  : (9*Cout, Cout)        bf16 conv_2 HWIO flattened
    b*_ref  : (1, C)                f32 biases
    o_ref   : (1, OH, OW, Cout)     f32 output
    cat_ref : VMEM (OH+2, OW+2, Ccat) bf16 zero-bordered concat buffer
    ypad_ref: VMEM (OH+2, OW+2, Cout) bf16 zero-bordered conv_1 output
    """
    oh, ow, cout = o_ref.shape[1], o_ref.shape[2], o_ref.shape[3]
    chalf = skip_ref.shape[3]
    m = oh * ow

    # Zero only the 1-pixel halo of the padded scratch buffers; the interiors
    # are fully overwritten below.  Done every grid step: scratch persists
    # across steps and under "parallel" sharding each core owns its own copy.
    for ref in (cat_ref, ypad_ref):
        c = ref.shape[2]
        ref[0:1, :, :] = jnp.zeros((1, ow + 2, c), ref.dtype)
        ref[oh + 1:oh + 2, :, :] = jnp.zeros((1, ow + 2, c), ref.dtype)
        ref[:, 0:1, :] = jnp.zeros((oh + 2, 1, c), ref.dtype)
        ref[:, ow + 1:ow + 2, :] = jnp.zeros((oh + 2, 1, c), ref.dtype)

    def im2col(src, k):
        # Build the GEMM LHS as a value: concat the k*k shifted windows along
        # the lane axis -> (m, k*k*C) bf16 operand consumed directly by the
        # MXU dot (no scratch stores, no stale columns).
        c = src.shape[-1]
        parts = [src[a:a + oh, b:b + ow, :].reshape(m, c)
                 for a in range(k) for b in range(k)]
        return jnp.concatenate(parts, axis=-1)

    # ---- 1) ConvTranspose2d(k=4, s=2, p=1) as a stride-1 4x4 conv over the
    #         zero-dilated+padded input: one (m, 16*Cin)x(16*Cin, Chalf) GEMM.
    up = jnp.dot(im2col(xd_ref[0], 4), wup_ref[...],
                 preferred_element_type=jnp.float32) + bup_ref[...]

    # ---- 2) channel concat [up, skip] into the zero-bordered cat buffer -----
    cat_ref[1:1 + oh, 1:1 + ow, :] = jnp.concatenate(
        [up.reshape(oh, ow, chalf).astype(cat_ref.dtype),
         skip_ref[0].astype(cat_ref.dtype)], axis=-1)

    # ---- 3) conv_1 (3x3, pad 1) + bias + ReLU: one (m, 9*Ccat) GEMM ---------
    y = jnp.dot(im2col(cat_ref[...], 3), w1_ref[...],
                preferred_element_type=jnp.float32) + b1_ref[...]
    y = jnp.maximum(y, 0.0)
    ypad_ref[1:1 + oh, 1:1 + ow, :] = y.reshape(oh, ow, cout).astype(ypad_ref.dtype)

    # ---- 4) conv_2 (3x3, pad 1) + bias + ReLU: one (m, 9*Cout) GEMM ---------
    z = jnp.dot(im2col(ypad_ref[...], 3), w2_ref[...],
                preferred_element_type=jnp.float32) + b2_ref[...]
    z = jnp.maximum(z, 0.0)

    o_ref[...] = z.reshape(1, oh, ow, cout).astype(o_ref.dtype)


@jax.jit
def upsample_forward(params, x_skip_nchw, x_nchw):
    """Pallas implementation of UpSample.forward (NCHW in, NCHW out)."""
    wt = params["up_w"]                       # ConvTranspose layout (Cin, Chalf, 4, 4)
    cin, chalf = wt.shape[0], wt.shape[1]
    cout = params["c1_w"].shape[0]
    cdt = jnp.bfloat16                        # MXU-native GEMM operand dtype

    x = jnp.transpose(x_nchw, (0, 2, 3, 1)).astype(cdt)        # NHWC
    skip = jnp.transpose(x_skip_nchw, (0, 2, 3, 1)).astype(cdt)
    n, h, w, _ = x.shape
    oh, ow = 2 * h, 2 * w
    cskip = skip.shape[-1]
    ccat = chalf + cskip
    m = oh * ow

    # Dilate-by-2 + pad-2 in one lax.pad (interior padding): stride-1 4x4-conv
    # equivalent input of ConvTranspose2d(4, stride=2, padding=1).
    xd = jax.lax.pad(x, jnp.array(0, x.dtype),
                     ((0, 0, 0), (2, 2, 1), (2, 2, 1), (0, 0, 0)))  # (n, oh+3, ow+3, cin)

    # Transposed-conv weight as a stride-1 conv: flip spatially, -> HWIO, flatten.
    w_up = (jnp.flip(wt, axis=(2, 3)).transpose(2, 3, 0, 1)
            .reshape(16 * cin, chalf).astype(cdt))
    w1 = jnp.transpose(params["c1_w"], (2, 3, 1, 0)).reshape(9 * ccat, cout).astype(cdt)
    w2 = jnp.transpose(params["c2_w"], (2, 3, 1, 0)).reshape(9 * cout, cout).astype(cdt)
    b_up = params["up_b"].reshape(1, chalf).astype(jnp.float32)
    b1 = params["c1_b"].reshape(1, cout).astype(jnp.float32)
    b2 = params["c2_b"].reshape(1, cout).astype(jnp.float32)

    flops = 2 * n * m * (16 * cin * chalf + 9 * ccat * cout + 9 * cout * cout)
    bytes_accessed = (2 * (xd.size + skip.size + w_up.size + w1.size + w2.size)
                      + 4 * (b_up.size + b1.size + b2.size + n * m * cout))

    out = pl.pallas_call(
        _upsample_fused_kernel,
        out_shape=jax.ShapeDtypeStruct((n, oh, ow, cout), jnp.float32),
        grid=(n,),
        in_specs=[
            pl.BlockSpec((1, oh + 3, ow + 3, cin), lambda i: (i, 0, 0, 0)),
            pl.BlockSpec((1, oh, ow, cskip), lambda i: (i, 0, 0, 0)),
            pl.BlockSpec((16 * cin, chalf), lambda i: (0, 0)),
            pl.BlockSpec((1, chalf), lambda i: (0, 0)),
            pl.BlockSpec((9 * ccat, cout), lambda i: (0, 0)),
            pl.BlockSpec((1, cout), lambda i: (0, 0)),
            pl.BlockSpec((9 * cout, cout), lambda i: (0, 0)),
            pl.BlockSpec((1, cout), lambda i: (0, 0)),
        ],
        out_specs=pl.BlockSpec((1, oh, ow, cout), lambda i: (i, 0, 0, 0)),
        scratch_shapes=[
            pltpu.VMEM((oh + 2, ow + 2, ccat), cdt),   # padded concat buffer
            pltpu.VMEM((oh + 2, ow + 2, cout), cdt),   # padded conv_1 output
        ],
        compiler_params=pltpu.CompilerParams(
            dimension_semantics=("parallel",)),
        cost_estimate=pl.CostEstimate(flops=int(flops), transcendentals=0,
                                      bytes_accessed=int(bytes_accessed)),
    )(xd, skip, w_up, b_up, w1, b1, w2, b2)

    return jnp.transpose(out, (0, 3, 1, 2))                   # back to NCHW


def reference_forward(params, x_skip_nchw, x_nchw):
    """Pure-JAX (lax.conv, f32) reference with identical semantics."""
    dn = ("NCHW", "OIHW", "NCHW")
    wt = params["up_w"]
    w_eq = jnp.flip(wt, axis=(2, 3)).transpose(1, 0, 2, 3)    # -> OIHW
    up = jax.lax.conv_general_dilated(
        x_nchw, w_eq, window_strides=(1, 1), padding=[(2, 2), (2, 2)],
        lhs_dilation=(2, 2), dimension_numbers=dn)
    up = up + params["up_b"][None, :, None, None]
    cat = jnp.concatenate([up, x_skip_nchw], axis=1)
    y = jax.lax.conv_general_dilated(cat, params["c1_w"], (1, 1),
                                     [(1, 1), (1, 1)], dimension_numbers=dn)
    y = jnp.maximum(y + params["c1_b"][None, :, None, None], 0.0)
    y = jax.lax.conv_general_dilated(y, params["c2_w"], (1, 1),
                                     [(1, 1), (1, 1)], dimension_numbers=dn)
    y = jnp.maximum(y + params["c2_b"][None, :, None, None], 0.0)
    return y


def init_params(key, in_channels, out_channels):
    ks = jax.random.split(key, 6)
    half = in_channels // 2
    return {
        # ConvTranspose2d weight layout: (in_ch, out_ch, kH, kW)
        "up_w": jax.random.normal(ks[0], (in_channels, half, 4, 4), jnp.float32) * 0.1,
        "up_b": jax.random.normal(ks[1], (half,), jnp.float32) * 0.1,
        # Conv2d weight layout: (out_ch, in_ch, kH, kW)
        "c1_w": jax.random.normal(ks[2], (out_channels, in_channels, 3, 3), jnp.float32) * 0.1,
        "c1_b": jax.random.normal(ks[3], (out_channels,), jnp.float32) * 0.1,
        "c2_w": jax.random.normal(ks[4], (out_channels, out_channels, 3, 3), jnp.float32) * 0.1,
        "c2_b": jax.random.normal(ks[5], (out_channels,), jnp.float32) * 0.1,
    }


if __name__ == "__main__":
    key = jax.random.PRNGKey(0)
    k_p, k_x, k_s = jax.random.split(key, 3)

    in_channels, out_channels = 8, 8
    # x comes from the deeper (coarser) stage: (N, in_ch, 8, 8)
    x = jax.random.normal(k_x, (2, in_channels, 8, 8), jnp.float32)
    # skip connection: (N, in_ch // 2, 16, 16)
    x_skip = jax.random.normal(k_s, (2, in_channels // 2, 16, 16), jnp.float32)

    params = init_params(k_p, in_channels, out_channels)

    out = jax.block_until_ready(upsample_forward(params, x_skip, x))
    ref = jax.block_until_ready(reference_forward(params, x_skip, x))

    assert out.shape == (2, out_channels, 16, 16), out.shape
    # bf16 GEMM operands (f32 accumulation) vs. an f32 reference -> tolerance
    # is loosened accordingly; a real indexing/layout bug would give O(1) error.
    max_err = float(jnp.max(jnp.abs(out - ref)))
    assert jnp.allclose(out, ref, atol=5e-2, rtol=5e-2), max_err

    print("KERNEL_OK")
</pallas_src>

<mosaic_0001>
module attributes {stable_mosaic.version = 11 : i64} {
  func.func @_upsample_fused_kernel(%arg0: i32, %arg1: memref<1x19x19x8xbf16, #tpu.memory_space<vmem>>, %arg2: memref<1x16x16x4xbf16, #tpu.memory_space<vmem>>, %arg3: memref<128x4xbf16, #tpu.memory_space<vmem>>, %arg4: memref<1x4xf32, #tpu.memory_space<vmem>>, %arg5: memref<72x8xbf16, #tpu.memory_space<vmem>>, %arg6: memref<1x8xf32, #tpu.memory_space<vmem>>, %arg7: memref<72x8xbf16, #tpu.memory_space<vmem>>, %arg8: memref<1x8xf32, #tpu.memory_space<vmem>>, %arg9: memref<1x16x16x8xf32, #tpu.memory_space<vmem>>, %arg10: memref<18x18x8xbf16, #tpu.memory_space<vmem>>, %arg11: memref<18x18x8xbf16, #tpu.memory_space<vmem>>) attributes {dimension_semantics = [#tpu.dimension_semantics<parallel>], iteration_bounds = array<i64: 2>, scalar_prefetch = 0 : i64, scratch_operands = 2 : i64, tpu.core_type = #tpu.core_type<tc>, window_params = [{transform_indices = @transform_0, window_bounds = array<i64: 1, 19, 19, 8>}, {transform_indices = @transform_1, window_bounds = array<i64: 1, 16, 16, 4>}, {pipeline_mode = #tpu.pipeline_mode<synchronous>, transform_indices = @transform_2, window_bounds = array<i64: 128, 4>}, {pipeline_mode = #tpu.pipeline_mode<synchronous>, transform_indices = @transform_3, window_bounds = array<i64: 1, 4>}, {pipeline_mode = #tpu.pipeline_mode<synchronous>, transform_indices = @transform_4, window_bounds = array<i64: 72, 8>}, {pipeline_mode = #tpu.pipeline_mode<synchronous>, transform_indices = @transform_5, window_bounds = array<i64: 1, 8>}, {pipeline_mode = #tpu.pipeline_mode<synchronous>, transform_indices = @transform_6, window_bounds = array<i64: 72, 8>}, {pipeline_mode = #tpu.pipeline_mode<synchronous>, transform_indices = @transform_7, window_bounds = array<i64: 1, 8>}, {transform_indices = @transform_8, window_bounds = array<i64: 1, 16, 16, 8>}]} {
    %cst = arith.constant 0.000000e+00 : bf16
    %0 = vector.broadcast %cst : bf16 to vector<1x18x8xbf16>
    %c0 = arith.constant 0 : index
    %c0_0 = arith.constant 0 : index
    %c0_1 = arith.constant 0 : index
    %1 = vector.load %arg10[%c0, %c0_0, %c0_1] : memref<18x18x8xbf16, #tpu.memory_space<vmem>>, vector<1x18x8xbf16>
    tpu.vector_store %arg10[%c0, %c0_0, %c0_1], %0 {strides = array<i32>} : memref<18x18x8xbf16, #tpu.memory_space<vmem>>, vector<1x18x8xbf16>,
    %cst_2 = arith.constant 0.000000e+00 : bf16
    %2 = vector.broadcast %cst_2 : bf16 to vector<1x18x8xbf16>
    %c17 = arith.constant 17 : index
    %c0_3 = arith.constant 0 : index
    %c0_4 = arith.constant 0 : index
    %3 = vector.load %arg10[%c17, %c0_3, %c0_4] : memref<18x18x8xbf16, #tpu.memory_space<vmem>>, vector<1x18x8xbf16>
    tpu.vector_store %arg10[%c17, %c0_3, %c0_4], %2 {strides = array<i32>} : memref<18x18x8xbf16, #tpu.memory_space<vmem>>, vector<1x18x8xbf16>,
    %cst_5 = arith.constant 0.000000e+00 : bf16
    %4 = vector.broadcast %cst_5 : bf16 to vector<18x1x8xbf16>
    %c0_6 = arith.constant 0 : index
    %c0_7 = arith.constant 0 : index
    %c0_8 = arith.constant 0 : index
    %5 = vector.load %arg10[%c0_6, %c0_7, %c0_8] : memref<18x18x8xbf16, #tpu.memory_space<vmem>>, vector<18x1x8xbf16>
    tpu.vector_store %arg10[%c0_6, %c0_7, %c0_8], %4 {strides = array<i32>} : memref<18x18x8xbf16, #tpu.memory_space<vmem>>, vector<18x1x8xbf16>,
    %cst_9 = arith.constant 0.000000e+00 : bf16
    %6 = vector.broadcast %cst_9 : bf16 to vector<18x1x8xbf16>
    %c0_10 = arith.constant 0 : index
    %c17_11 = arith.constant 17 : index
    %c0_12 = arith.constant 0 : index
    %7 = vector.load %arg10[%c0_10, %c17_11, %c0_12] : memref<18x18x8xbf16, #tpu.memory_space<vmem>>, vector<18x1x8xbf16>
    tpu.vector_store %arg10[%c0_10, %c17_11, %c0_12], %6 {strides = array<i32>} : memref<18x18x8xbf16, #tpu.memory_space<vmem>>, vector<18x1x8xbf16>,
    %cst_13 = arith.constant 0.000000e+00 : bf16
    %8 = vector.broadcast %cst_13 : bf16 to vector<1x18x8xbf16>
    %c0_14 = arith.constant 0 : index
    %c0_15 = arith.constant 0 : index
    %c0_16 = arith.constant 0 : index
    %9 = vector.load %arg11[%c0_14, %c0_15, %c0_16] : memref<18x18x8xbf16, #tpu.memory_space<vmem>>, vector<1x18x8xbf16>
    tpu.vector_store %arg11[%c0_14, %c0_15, %c0_16], %8 {strides = array<i32>} : memref<18x18x8xbf16, #tpu.memory_space<vmem>>, vector<1x18x8xbf16>,
    %cst_17 = arith.constant 0.000000e+00 : bf16
    %10 = vector.broadcast %cst_17 : bf16 to vector<1x18x8xbf16>
    %c17_18 = arith.constant 17 : index
    %c0_19 = arith.constant 0 : index
    %c0_20 = arith.constant 0 : index
    %11 = vector.load %arg11[%c17_18, %c0_19, %c0_20] : memref<18x18x8xbf16, #tpu.memory_space<vmem>>, vector<1x18x8xbf16>
    tpu.vector_store %arg11[%c17_18, %c0_19, %c0_20], %10 {strides = array<i32>} : memref<18x18x8xbf16, #tpu.memory_space<vmem>>, vector<1x18x8xbf16>,
    %cst_21 = arith.constant 0.000000e+00 : bf16
    %12 = vector.broadcast %cst_21 : bf16 to vector<18x1x8xbf16>
    %c0_22 = arith.constant 0 : index
    %c0_23 = arith.constant 0 : index
    %c0_24 = arith.constant 0 : index
    %13 = vector.load %arg11[%c0_22, %c0_23, %c0_24] : memref<18x18x8xbf16, #tpu.memory_space<vmem>>, vector<18x1x8xbf16>
    tpu.vector_store %arg11[%c0_22, %c0_23, %c0_24], %12 {strides = array<i32>} : memref<18x18x8xbf16, #tpu.memory_space<vmem>>, vector<18x1x8xbf16>,
    %cst_25 = arith.constant 0.000000e+00 : bf16
    %14 = vector.broadcast %cst_25 : bf16 to vector<18x1x8xbf16>
    %c0_26 = arith.constant 0 : index
    %c17_27 = arith.constant 17 : index
    %c0_28 = arith.constant 0 : index
    %15 = vector.load %arg11[%c0_26, %c17_27, %c0_28] : memref<18x18x8xbf16, #tpu.memory_space<vmem>>, vector<18x1x8xbf16>
    tpu.vector_store %arg11[%c0_26, %c17_27, %c0_28], %14 {strides = array<i32>} : memref<18x18x8xbf16, #tpu.memory_space<vmem>>, vector<18x1x8xbf16>,
    %c0_29 = arith.constant 0 : index
    %c0_30 = arith.constant 0 : index
    %c0_31 = arith.constant 0 : index
    %c0_32 = arith.constant 0 : index
    %16 = vector.load %arg1[%c0_29, %c0_30, %c0_31, %c0_32] : memref<1x19x19x8xbf16, #tpu.memory_space<vmem>>, vector<1x19x19x8xbf16>
    %17 = vector.shape_cast %16 : vector<1x19x19x8xbf16> to vector<19x19x8xbf16>
    %18 = vector.extract_strided_slice %17 {offsets = [0, 0, 0], sizes = [16, 16, 8], strides = [1, 1, 1]} : vector<19x19x8xbf16> to vector<16x16x8xbf16>
    %19 = vector.shape_cast %18 : vector<16x16x8xbf16> to vector<256x8xbf16>
    %20 = vector.extract_strided_slice %17 {offsets = [0, 1, 0], sizes = [16, 16, 8], strides = [1, 1, 1]} : vector<19x19x8xbf16> to vector<16x16x8xbf16>
    %21 = vector.shape_cast %20 : vector<16x16x8xbf16> to vector<256x8xbf16>
    %22 = vector.extract_strided_slice %17 {offsets = [0, 2, 0], sizes = [16, 16, 8], strides = [1, 1, 1]} : vector<19x19x8xbf16> to vector<16x16x8xbf16>
    %23 = vector.shape_cast %22 : vector<16x16x8xbf16> to vector<256x8xbf16>
    %24 = vector.extract_strided_slice %17 {offsets = [0, 3, 0], sizes = [16, 16, 8], strides = [1, 1, 1]} : vector<19x19x8xbf16> to vector<16x16x8xbf16>
    %25 = vector.shape_cast %24 : vector<16x16x8xbf16> to vector<256x8xbf16>
    %26 = vector.extract_strided_slice %17 {offsets = [1, 0, 0], sizes = [16, 16, 8], strides = [1, 1, 1]} : vector<19x19x8xbf16> to vector<16x16x8xbf16>
    %27 = vector.shape_cast %26 : vector<16x16x8xbf16> to vector<256x8xbf16>
    %28 = vector.extract_strided_slice %17 {offsets = [1, 1, 0], sizes = [16, 16, 8], strides = [1, 1, 1]} : vector<19x19x8xbf16> to vector<16x16x8xbf16>
    %29 = vector.shape_cast %28 : vector<16x16x8xbf16> to vector<256x8xbf16>
    %30 = vector.extract_strided_slice %17 {offsets = [1, 2, 0], sizes = [16, 16, 8], strides = [1, 1, 1]} : vector<19x19x8xbf16> to vector<16x16x8xbf16>
    %31 = vector.shape_cast %30 : vector<16x16x8xbf16> to vector<256x8xbf16>
    %32 = vector.extract_strided_slice %17 {offsets = [1, 3, 0], sizes = [16, 16, 8], strides = [1, 1, 1]} : vector<19x19x8xbf16> to vector<16x16x8xbf16>
    %33 = vector.shape_cast %32 : vector<16x16x8xbf16> to vector<256x8xbf16>
    %34 = vector.extract_strided_slice %17 {offsets = [2, 0, 0], sizes = [16, 16, 8], strides = [1, 1, 1]} : vector<19x19x8xbf16> to vector<16x16x8xbf16>
    %35 = vector.shape_cast %34 : vector<16x16x8xbf16> to vector<256x8xbf16>
    %36 = vector.extract_strided_slice %17 {offsets = [2, 1, 0], sizes = [16, 16, 8], strides = [1, 1, 1]} : vector<19x19x8xbf16> to vector<16x16x8xbf16>
    %37 = vector.shape_cast %36 : vector<16x16x8xbf16> to vector<256x8xbf16>
    %38 = vector.extract_strided_slice %17 {offsets = [2, 2, 0], sizes = [16, 16, 8], strides = [1, 1, 1]} : vector<19x19x8xbf16> to vector<16x16x8xbf16>
    %39 = vector.shape_cast %38 : vector<16x16x8xbf16> to vector<256x8xbf16>
    %40 = vector.extract_strided_slice %17 {offsets = [2, 3, 0], sizes = [16, 16, 8], strides = [1, 1, 1]} : vector<19x19x8xbf16> to vector<16x16x8xbf16>
    %41 = vector.shape_cast %40 : vector<16x16x8xbf16> to vector<256x8xbf16>
    %42 = vector.extract_strided_slice %17 {offsets = [3, 0, 0], sizes = [16, 16, 8], strides = [1, 1, 1]} : vector<19x19x8xbf16> to vector<16x16x8xbf16>
    %43 = vector.shape_cast %42 : vector<16x16x8xbf16> to vector<256x8xbf16>
    %44 = vector.extract_strided_slice %17 {offsets = [3, 1, 0], sizes = [16, 16, 8], strides = [1, 1, 1]} : vector<19x19x8xbf16> to vector<16x16x8xbf16>
    %45 = vector.shape_cast %44 : vector<16x16x8xbf16> to vector<256x8xbf16>
    %46 = vector.extract_strided_slice %17 {offsets = [3, 2, 0], sizes = [16, 16, 8], strides = [1, 1, 1]} : vector<19x19x8xbf16> to vector<16x16x8xbf16>
    %47 = vector.shape_cast %46 : vector<16x16x8xbf16> to vector<256x8xbf16>
    %48 = vector.extract_strided_slice %17 {offsets = [3, 3, 0], sizes = [16, 16, 8], strides = [1, 1, 1]} : vector<19x19x8xbf16> to vector<16x16x8xbf16>
    %49 = vector.shape_cast %48 : vector<16x16x8xbf16> to vector<256x8xbf16>
    %50 = tpu.concatenate %19, %21, %23, %25, %27, %29, %31, %33, %35, %37, %39, %41, %43, %45, %47, %49 in 1 : vector<256x8xbf16>, vector<256x8xbf16>, vector<256x8xbf16>, vector<256x8xbf16>, vector<256x8xbf16>, vector<256x8xbf16>, vector<256x8xbf16>, vector<256x8xbf16>, vector<256x8xbf16>, vector<256x8xbf16>, vector<256x8xbf16>, vector<256x8xbf16>, vector<256x8xbf16>, vector<256x8xbf16>, vector<256x8xbf16>, vector<256x8xbf16> -> vector<256x128xbf16>
    %c0_33 = arith.constant 0 : index
    %c0_34 = arith.constant 0 : index
    %51 = vector.load %arg3[%c0_33, %c0_34] : memref<128x4xbf16, #tpu.memory_space<vmem>>, vector<128x4xbf16>
    %cst_35 = arith.constant dense<0.000000e+00> : vector<256x4xf32>
    %52 = tpu.matmul %50, %51, %cst_35 {dimension_numbers = #tpu.dot_dimension_numbers<[1], [0], [0], [1], [0, 0, 1, 1], [], []>} : vector<256x128xbf16>, vector<128x4xbf16>, vector<256x4xf32> -> vector<256x4xf32>
    %c0_36 = arith.constant 0 : index
    %c0_37 = arith.constant 0 : index
    %53 = vector.load %arg4[%c0_36, %c0_37] : memref<1x4xf32, #tpu.memory_space<vmem>>, vector<1x4xf32>
    %54 = vector.broadcast %53 : vector<1x4xf32> to vector<256x4xf32>
    %55 = arith.addf %52, %54 : vector<256x4xf32>
    %56 = vector.shape_cast %55 : vector<256x4xf32> to vector<16x16x4xf32>
    %57 = arith.truncf %56 : vector<16x16x4xf32> to vector<16x16x4xbf16>
    %c0_38 = arith.constant 0 : index
    %c0_39 = arith.constant 0 : index
    %c0_40 = arith.constant 0 : index
    %c0_41 = arith.constant 0 : index
    %58 = vector.load %arg2[%c0_38, %c0_39, %c0_40, %c0_41] : memref<1x16x16x4xbf16, #tpu.memory_space<vmem>>, vector<1x16x16x4xbf16>
    %59 = vector.shape_cast %58 : vector<1x16x16x4xbf16> to vector<16x16x4xbf16>
    %60 = tpu.concatenate %57, %59 in 2 : vector<16x16x4xbf16>, vector<16x16x4xbf16> -> vector<16x16x8xbf16>
    %c1 = arith.constant 1 : index
    %c1_42 = arith.constant 1 : index
    %c0_43 = arith.constant 0 : index
    %61 = vector.load %arg10[%c1, %c1_42, %c0_43] : memref<18x18x8xbf16, #tpu.memory_space<vmem>>, vector<16x16x8xbf16>
    tpu.vector_store %arg10[%c1, %c1_42, %c0_43], %60 {strides = array<i32>} : memref<18x18x8xbf16, #tpu.memory_space<vmem>>, vector<16x16x8xbf16>,
    %c0_44 = arith.constant 0 : index
    %c0_45 = arith.constant 0 : index
    %c0_46 = arith.constant 0 : index
    %62 = vector.load %arg10[%c0_44, %c0_45, %c0_46] : memref<18x18x8xbf16, #tpu.memory_space<vmem>>, vector<18x18x8xbf16>
    %63 = vector.extract_strided_slice %62 {offsets = [0, 0, 0], sizes = [16, 16, 8], strides = [1, 1, 1]} : vector<18x18x8xbf16> to vector<16x16x8xbf16>
    %64 = vector.shape_cast %63 : vector<16x16x8xbf16> to vector<256x8xbf16>
    %65 = vector.extract_strided_slice %62 {offsets = [0, 1, 0], sizes = [16, 16, 8], strides = [1, 1, 1]} : vector<18x18x8xbf16> to vector<16x16x8xbf16>
    %66 = vector.shape_cast %65 : vector<16x16x8xbf16> to vector<256x8xbf16>
    %67 = vector.extract_strided_slice %62 {offsets = [0, 2, 0], sizes = [16, 16, 8], strides = [1, 1, 1]} : vector<18x18x8xbf16> to vector<16x16x8xbf16>
    %68 = vector.shape_cast %67 : vector<16x16x8xbf16> to vector<256x8xbf16>
    %69 = vector.extract_strided_slice %62 {offsets = [1, 0, 0], sizes = [16, 16, 8], strides = [1, 1, 1]} : vector<18x18x8xbf16> to vector<16x16x8xbf16>
    %70 = vector.shape_cast %69 : vector<16x16x8xbf16> to vector<256x8xbf16>
    %71 = vector.extract_strided_slice %62 {offsets = [1, 1, 0], sizes = [16, 16, 8], strides = [1, 1, 1]} : vector<18x18x8xbf16> to vector<16x16x8xbf16>
    %72 = vector.shape_cast %71 : vector<16x16x8xbf16> to vector<256x8xbf16>
    %73 = vector.extract_strided_slice %62 {offsets = [1, 2, 0], sizes = [16, 16, 8], strides = [1, 1, 1]} : vector<18x18x8xbf16> to vector<16x16x8xbf16>
    %74 = vector.shape_cast %73 : vector<16x16x8xbf16> to vector<256x8xbf16>
    %75 = vector.extract_strided_slice %62 {offsets = [2, 0, 0], sizes = [16, 16, 8], strides = [1, 1, 1]} : vector<18x18x8xbf16> to vector<16x16x8xbf16>
    %76 = vector.shape_cast %75 : vector<16x16x8xbf16> to vector<256x8xbf16>
    %77 = vector.extract_strided_slice %62 {offsets = [2, 1, 0], sizes = [16, 16, 8], strides = [1, 1, 1]} : vector<18x18x8xbf16> to vector<16x16x8xbf16>
    %78 = vector.shape_cast %77 : vector<16x16x8xbf16> to vector<256x8xbf16>
    %79 = vector.extract_strided_slice %62 {offsets = [2, 2, 0], sizes = [16, 16, 8], strides = [1, 1, 1]} : vector<18x18x8xbf16> to vector<16x16x8xbf16>
    %80 = vector.shape_cast %79 : vector<16x16x8xbf16> to vector<256x8xbf16>
    %81 = tpu.concatenate %64, %66, %68, %70, %72, %74, %76, %78, %80 in 1 : vector<256x8xbf16>, vector<256x8xbf16>, vector<256x8xbf16>, vector<256x8xbf16>, vector<256x8xbf16>, vector<256x8xbf16>, vector<256x8xbf16>, vector<256x8xbf16>, vector<256x8xbf16> -> vector<256x72xbf16>
    %c0_47 = arith.constant 0 : index
    %c0_48 = arith.constant 0 : index
    %82 = vector.load %arg5[%c0_47, %c0_48] : memref<72x8xbf16, #tpu.memory_space<vmem>>, vector<72x8xbf16>
    %cst_49 = arith.constant dense<0.000000e+00> : vector<256x8xf32>
    %83 = tpu.matmul %81, %82, %cst_49 {dimension_numbers = #tpu.dot_dimension_numbers<[1], [0], [0], [1], [0, 0, 1, 1], [], []>} : vector<256x72xbf16>, vector<72x8xbf16>, vector<256x8xf32> -> vector<256x8xf32>
    %c0_50 = arith.constant 0 : index
    %c0_51 = arith.constant 0 : index
    %84 = vector.load %arg6[%c0_50, %c0_51] : memref<1x8xf32, #tpu.memory_space<vmem>>, vector<1x8xf32>
    %85 = vector.broadcast %84 : vector<1x8xf32> to vector<256x8xf32>
    %86 = arith.addf %83, %85 : vector<256x8xf32>
    %cst_52 = arith.constant 0.000000e+00 : f32
    %87 = vector.broadcast %cst_52 : f32 to vector<256x8xf32>
    %88 = arith.maximumf %86, %87 : vector<256x8xf32>
    %89 = vector.shape_cast %88 : vector<256x8xf32> to vector<16x16x8xf32>
    %90 = arith.truncf %89 : vector<16x16x8xf32> to vector<16x16x8xbf16>
    %c1_53 = arith.constant 1 : index
    %c1_54 = arith.constant 1 : index
    %c0_55 = arith.constant 0 : index
    %91 = vector.load %arg11[%c1_53, %c1_54, %c0_55] : memref<18x18x8xbf16, #tpu.memory_space<vmem>>, vector<16x16x8xbf16>
    tpu.vector_store %arg11[%c1_53, %c1_54, %c0_55], %90 {strides = array<i32>} : memref<18x18x8xbf16, #tpu.memory_space<vmem>>, vector<16x16x8xbf16>,
    %c0_56 = arith.constant 0 : index
    %c0_57 = arith.constant 0 : index
    %c0_58 = arith.constant 0 : index
    %92 = vector.load %arg11[%c0_56, %c0_57, %c0_58] : memref<18x18x8xbf16, #tpu.memory_space<vmem>>, vector<18x18x8xbf16>
    %93 = vector.extract_strided_slice %92 {offsets = [0, 0, 0], sizes = [16, 16, 8], strides = [1, 1, 1]} : vector<18x18x8xbf16> to vector<16x16x8xbf16>
    %94 = vector.shape_cast %93 : vector<16x16x8xbf16> to vector<256x8xbf16>
    %95 = vector.extract_strided_slice %92 {offsets = [0, 1, 0], sizes = [16, 16, 8], strides = [1, 1, 1]} : vector<18x18x8xbf16> to vector<16x16x8xbf16>
    %96 = vector.shape_cast %95 : vector<16x16x8xbf16> to vector<256x8xbf16>
    %97 = vector.extract_strided_slice %92 {offsets = [0, 2, 0], sizes = [16, 16, 8], strides = [1, 1, 1]} : vector<18x18x8xbf16> to vector<16x16x8xbf16>
    %98 = vector.shape_cast %97 : vector<16x16x8xbf16> to vector<256x8xbf16>
    %99 = vector.extract_strided_slice %92 {offsets = [1, 0, 0], sizes = [16, 16, 8], strides = [1, 1, 1]} : vector<18x18x8xbf16> to vector<16x16x8xbf16>
    %100 = vector.shape_cast %99 : vector<16x16x8xbf16> to vector<256x8xbf16>
    %101 = vector.extract_strided_slice %92 {offsets = [1, 1, 0], sizes = [16, 16, 8], strides = [1, 1, 1]} : vector<18x18x8xbf16> to vector<16x16x8xbf16>
    %102 = vector.shape_cast %101 : vector<16x16x8xbf16> to vector<256x8xbf16>
    %103 = vector.extract_strided_slice %92 {offsets = [1, 2, 0], sizes = [16, 16, 8], strides = [1, 1, 1]} : vector<18x18x8xbf16> to vector<16x16x8xbf16>
    %104 = vector.shape_cast %103 : vector<16x16x8xbf16> to vector<256x8xbf16>
    %105 = vector.extract_strided_slice %92 {offsets = [2, 0, 0], sizes = [16, 16, 8], strides = [1, 1, 1]} : vector<18x18x8xbf16> to vector<16x16x8xbf16>
    %106 = vector.shape_cast %105 : vector<16x16x8xbf16> to vector<256x8xbf16>
    %107 = vector.extract_strided_slice %92 {offsets = [2, 1, 0], sizes = [16, 16, 8], strides = [1, 1, 1]} : vector<18x18x8xbf16> to vector<16x16x8xbf16>
    %108 = vector.shape_cast %107 : vector<16x16x8xbf16> to vector<256x8xbf16>
    %109 = vector.extract_strided_slice %92 {offsets = [2, 2, 0], sizes = [16, 16, 8], strides = [1, 1, 1]} : vector<18x18x8xbf16> to vector<16x16x8xbf16>
    %110 = vector.shape_cast %109 : vector<16x16x8xbf16> to vector<256x8xbf16>
    %111 = tpu.concatenate %94, %96, %98, %100, %102, %104, %106, %108, %110 in 1 : vector<256x8xbf16>, vector<256x8xbf16>, vector<256x8xbf16>, vector<256x8xbf16>, vector<256x8xbf16>, vector<256x8xbf16>, vector<256x8xbf16>, vector<256x8xbf16>, vector<256x8xbf16> -> vector<256x72xbf16>
    %c0_59 = arith.constant 0 : index
    %c0_60 = arith.constant 0 : index
    %112 = vector.load %arg7[%c0_59, %c0_60] : memref<72x8xbf16, #tpu.memory_space<vmem>>, vector<72x8xbf16>
    %cst_61 = arith.constant dense<0.000000e+00> : vector<256x8xf32>
    %113 = tpu.matmul %111, %112, %cst_61 {dimension_numbers = #tpu.dot_dimension_numbers<[1], [0], [0], [1], [0, 0, 1, 1], [], []>} : vector<256x72xbf16>, vector<72x8xbf16>, vector<256x8xf32> -> vector<256x8xf32>
    %c0_62 = arith.constant 0 : index
    %c0_63 = arith.constant 0 : index
    %114 = vector.load %arg8[%c0_62, %c0_63] : memref<1x8xf32, #tpu.memory_space<vmem>>, vector<1x8xf32>
    %115 = vector.broadcast %114 : vector<1x8xf32> to vector<256x8xf32>
    %116 = arith.addf %113, %115 : vector<256x8xf32>
    %cst_64 = arith.constant 0.000000e+00 : f32
    %117 = vector.broadcast %cst_64 : f32 to vector<256x8xf32>
    %118 = arith.maximumf %116, %117 : vector<256x8xf32>
    %119 = vector.shape_cast %118 : vector<256x8xf32> to vector<1x16x16x8xf32>
    %c0_65 = arith.constant 0 : index
    %c0_66 = arith.constant 0 : index
    %c0_67 = arith.constant 0 : index
    %c0_68 = arith.constant 0 : index
    %120 = vector.load %arg9[%c0_65, %c0_66, %c0_67, %c0_68] : memref<1x16x16x8xf32, #tpu.memory_space<vmem>>, vector<1x16x16x8xf32>
    tpu.vector_store %arg9[%c0_65, %c0_66, %c0_67, %c0_68], %119 {strides = array<i32>} : memref<1x16x16x8xf32, #tpu.memory_space<vmem>>, vector<1x16x16x8xf32>,
    return
  }
  func.func @transform_0(%arg0: i32) -> (i32, i32, i32, i32) {
    %c0_i32 = arith.constant 0 : i32
    %c0_i32_0 = arith.constant 0 : i32
    %c0_i32_1 = arith.constant 0 : i32
    %c0_i32_2 = arith.constant 0 : i32
    return %arg0, %c0_i32, %c0_i32_0, %c0_i32_1 : i32, i32, i32, i32
  }
  func.func @transform_1(%arg0: i32) -> (i32, i32, i32, i32) {
    %c0_i32 = arith.constant 0 : i32
    %c0_i32_0 = arith.constant 0 : i32
    %c0_i32_1 = arith.constant 0 : i32
    %c0_i32_2 = arith.constant 0 : i32
    return %arg0, %c0_i32, %c0_i32_0, %c0_i32_1 : i32, i32, i32, i32
  }
  func.func @transform_2(%arg0: i32) -> (i32, i32) {
    %c0_i32 = arith.constant 0 : i32
    %c0_i32_0 = arith.constant 0 : i32
    %c0_i32_1 = arith.constant 0 : i32
    return %c0_i32, %c0_i32_0 : i32, i32
  }
  func.func @transform_3(%arg0: i32) -> (i32, i32) {
    %c0_i32 = arith.constant 0 : i32
    %c0_i32_0 = arith.constant 0 : i32
    %c0_i32_1 = arith.constant 0 : i32
    return %c0_i32, %c0_i32_0 : i32, i32
  }
  func.func @transform_4(%arg0: i32) -> (i32, i32) {
    %c0_i32 = arith.constant 0 : i32
    %c0_i32_0 = arith.constant 0 : i32
    %c0_i32_1 = arith.constant 0 : i32
    return %c0_i32, %c0_i32_0 : i32, i32
  }
  func.func @transform_5(%arg0: i32) -> (i32, i32) {
    %c0_i32 = arith.constant 0 : i32
    %c0_i32_0 = arith.constant 0 : i32
    %c0_i32_1 = arith.constant 0 : i32
    return %c0_i32, %c0_i32_0 : i32, i32
  }
  func.func @transform_6(%arg0: i32) -> (i32, i32) {
    %c0_i32 = arith.constant 0 : i32
    %c0_i32_0 = arith.constant 0 : i32
    %c0_i32_1 = arith.constant 0 : i32
    return %c0_i32, %c0_i32_0 : i32, i32
  }
  func.func @transform_7(%arg0: i32) -> (i32, i32) {
    %c0_i32 = arith.constant 0 : i32
    %c0_i32_0 = arith.constant 0 : i32
    %c0_i32_1 = arith.constant 0 : i32
    return %c0_i32, %c0_i32_0 : i32, i32
  }
  func.func @transform_8(%arg0: i32) -> (i32, i32, i32, i32) {
    %c0_i32 = arith.constant 0 : i32
    %c0_i32_0 = arith.constant 0 : i32
    %c0_i32_1 = arith.constant 0 : i32
    %c0_i32_2 = arith.constant 0 : i32
    return %arg0, %c0_i32, %c0_i32_0, %c0_i32_1 : i32, i32, i32, i32
  }
}

</mosaic_0001>

<bundles_post_ra>
// kernel: upsample_forward.1
= control target key start
LH: loop header
LB: loop body
LE: loop exit
PB: predicated region body
PF: predicated region fallthrough
CT: control target
= control target key end

     0   :  { %s8487_s27 = smov 0   ;;  %s13164_s0 = inlined_call_operand.vmem [shape: bf16[2,19,19,8], index: 0, kind: input, shape index: {}]   ;;  %s13165_s1 = inlined_call_operand.vmem [shape: bf16[2,16,16,4], index: 1, kind: input, shape index: {}]   ;;  %s13166_s2 = inlined_call_operand.vmem [shape: bf16[128,4], index: 2, kind: input, shape index: {}]   ;;  %s13167_s3 = inlined_call_operand.vmem [shape: f32[1,4], index: 3, kind: input, shape index: {}]   ;;  %s13168_s4 = inlined_call_operand.vmem [shape: bf16[72,8], index: 4, kind: input, shape index: {}]   ;;  %s13169_s5 = inlined_call_operand.vmem [shape: f32[1,8], index: 5, kind: input, shape index: {}]   ;;  %s13170_s6 = inlined_call_operand.vmem [shape: bf16[72,8], index: 6, kind: input, shape index: {}]   ;;  %s13171_s7 = inlined_call_operand.vmem [shape: f32[1,8], index: 7, kind: input, shape index: {}]   ;;  %s13172_s8 = inlined_call_operand.vmem [shape: f32[2,16,16,8], index: 8, kind: output, shape index: {}]  }
   0x1 LB: > { %s7637_s28 = sadd.s32 4294967295, %s8423_s27   ;;  %p7641_p0 = scmp.ge.s32.totalorder %s8423_s27, 1  ;;  %s8423_s27 = sphi %s8487_s27, %s18_s27  }
   0x2   : > { %p272_p1 = scmp.lt.s32.totalorder %s8423_s27, 3 }
   0x4   : > { %p273_p2 = pnand %p7641_p0, %p272_p1 }
   0x6   : > { %276 = sbr.rel (%p273_p2) target bundleno = 1691 (0x69b), region = 52 }
   0xd   : > { %p311_p3 = scmp.lt.s32.totalorder %s7637_s28, 1  ;;  %vm621_vm0 = vsmask.f32 3328  ;;  %vm622_vm1 = vsmask.f32 7440  ;;  %v13317_v25 = vmov 0 }
   0xe   : > { %vm8548_vm2 = vmor %vm621_vm0, %vm622_vm1  ;;  %s8425_s11 = smov 8   ;;  %vm1056_vm3 = vcmask 1042432   ;;  %vm1057_vm4 = vcmask 1046532   ;;  %vm1171_vm6 = vsmask.f32 2304  ;;  %s8426_s12 = smov 16  }
   0xf   : > { %s13804_s28 = smov (!%p311_p3, %s7637_s28), 1  ;;  %v13318_v25 = vsel %vm8548_vm2, 4294967295, %v13317_v25  ;;  %vm9002_vm5 = vmor %vm1056_vm3, %vm1057_vm4  ;;  %vm1172_vm7 = vsmask.f32 6416  ;;  %s8427_s13 = smov 24   ;;  %vm13300_vm9 = vcmask 64512  }
  0x10   : > { %s8266_s29 = smul.u32 228, %s13804_s28  ;;  %13319 = vst [vmem:[#allocation4_spill] sm:$0xff] %v13318_v25  ;;  %vm9090_vm8 = vmor %vm1171_vm6, %vm1172_vm7  ;;  %s8428_s14 = smov 32   ;;  %vm13302_vm10 = vcmask 130048   ;;  %vm13301_vm11 = vcmask 195584   ;;  %vm13303_vm12 = vcmask 261120  }
  0x11   : > { %s8429_s15 = smov 40   ;;  %s8430_s16 = smov 48   ;;  %vm13299_vm13 = vcmask 326656   ;;  %vm13298_vm14 = vcmask 392192   ;;  %vm2483_vm15 = vcmask 457728   ;;  %vm2516_vm0 = vcmask 523264  }
  0x12   : > { %s8501_s10 = scalar_lea.vmem %s13164_s0, %s8266_s29  ;;  %s8431_s17 = smov 56   ;;  %vm13316_vm1 = vcmask 588800   ;;  %vm2582_vm3 = vcmask 654336   ;;  %vm2615_vm4 = vcmask 719872   ;;  %vm13315_vm6 = vcmask 785408  }
  0x13   : > { %v8504_v0 = vld [vmem:[%s8501_s10 + $0x18] sm:$0xf]  ;;  %v8507_v1 = vld [vmem:[%s8501_s10 + $0x1c] sm:$0xf]  ;;  %v8510_v2 = vld [vmem:[%s8501_s10 + $0x20] sm:$0x3] }
  0x14   : > { %v13205_v3 = vshrl.u32 %v8504_v0, 16  ;;  %v13201_v4 = vshll.u32 %v8504_v0, 16  ;;  %v13197_v5 = vshll.u32 %v8507_v1, 16  ;;  %v13198_v6 = vshrl.u32 %v8507_v1, 16  ;;  %v8517_v7 = vld [vmem:[%s8501_s10] sm:$0xf] }
  0x15   : > { %v13196_v8 = vshll.u32 %v8510_v2, 16  ;;  %v8521_v9 = vld [vmem:[%s8501_s10 + $0x4] sm:$0xf]  ;;  %v8524_v10 = vld [vmem:[%s8501_s10 + $0x8] sm:$0x3]  ;;  %v13220_v11 = vshrl.u32 %v8517_v7, 16 }
  0x16   : > { %v675_v12 = vrot.slane %v13205_v3, 4  ;;  %v678_v13 = vrot.slane %v13201_v4, 5  ;;  %v684_v14 = vrot.slane %v13197_v5, 5  ;;  %v688_v15 = vrot.slane %v13198_v6, 4  ;;  %v8536_v16 = vld [vmem:[%s8501_s10 + $0x24] sm:$0xf] }
  0x17   : > { %v694_v17 = vrot.slane %v13196_v8, 5  ;;  %v627_v18 = vrot.slane %v13220_v11, 4  ;;  %v13216_v19 = vshll.u32 %v8517_v7, 16  ;;  %v634_v20 = vshll.u32 %v8521_v9, 16  ;;  %v8557_v29 = vld [vmem:[%s8501_s10 + $0x28] sm:$0xf] }
  0x18   : > { %v679_v21 = vor.u32 %v678_v13, %v675_v12  ;;  %v689_v22 = vor.u32 %v688_v15, %v684_v14  ;;  %v13215_v23 = vshrl.u32 %v8521_v9, 16  ;;  %v644_v24 = vshll.u32 %v8524_v10, 16  ;;  %v8563_v35 = vld [vmem:[%s8501_s10 + $0x2c] sm:$0x3]  ;;  %v8584_v49 = vld [vmem:[%s8501_s10 + $0x10] sm:$0xf] }
  0x19   : > { %v630_v26 = vrot.slane %v13216_v19, 5  ;;  %v636_v27 = vrot.slane %v634_v20, 5  ;;  %v8554_v28 = vrot.slane %v634_v20, 6  ;;  %v13192_v30 = vshrl.u32 %v8536_v16, 16  ;;  %v8571_v40 = vld [vmem:[%s8501_s10 + $0xc] sm:$0xf] }
  0x1a   : > { %v680_v31 = vrot.slane %v679_v21, 4  ;;  %v690_v32 = vrot.slane %v689_v22, 4  ;;  %v640_v33 = vrot.slane %v13215_v23, 4  ;;  %v646_v34 = vrot.slane %v644_v24, 5  ;;  %v8597_v57 = vld [vmem:[%s8501_s10 + $0x14] sm:$0x3] }
  0x1b   : > { %v631_v36 = vor.u32 %v630_v26, %v627_v18  ;;  %v8565_v37 = vrot.slane %v644_v24, 6  ;;  %v699_v38 = vrot.slane %v13192_v30, 4  ;;  %v13191_v39 = vshll.u32 %v8536_v16, 16  ;;  %v8601_v59 = vld [vmem:[%s8501_s10 + $0x3c] sm:$0xf]  ;;  %s8432_s18 = smov 64  }
  0x1c   : > { %v685_v41 = vsel %vm8548_vm2, %v680_v31, %v684_v14  ;;  %v695_v42 = vsel %vm8548_vm2, %v690_v32, %v694_v17  ;;  %v641_v43 = vor.u32 %v640_v33, %v636_v27  ;;  %v13188_v44 = vshll.u32 %v8557_v29, 16  ;;  %v8613_v17 = vld [vmem:[%s8501_s10 + $0x40] sm:$0xf]  ;;  %v8624_v31 = vld [vmem:[%s8501_s10 + $0x44] sm:$0x3]  ;;  %s8433_s19 = smov 72  }
  0x1d   : > { %v8578_v45 = vcombine.low %v685_v41, %v695_v42  ;;  %v632_v46 = vrot.slane %v631_v36, 4  ;;  %v702_v47 = vrot.slane %v13191_v39, 5  ;;  %v13189_v48 = vshrl.u32 %v8557_v29, 16  ;;  %v8635_v41 = vld [vmem:[%s8501_s10 + $0x30] sm:$0xf]  ;;  %s8434_s20 = smov 80  }
  0x1e   : > { %v642_v50 = vrot.slane %v641_v43, 4  ;;  %v708_v51 = vrot.slane %v13188_v44, 5  ;;  %v13187_v52 = vshll.u32 %v8563_v35, 16  ;;  %v13214_v53 = vshrl.u32 %v8571_v40, 16  ;;  %v8818_v23 = vld [vmem:[%s8501_s10 + $0x78] sm:$0xf] }
  0x1f   : > { %1661 = vrot.lane.b32.xlu1 %v8578_v45, %s8425_s11  ;;  %v637_v54 = vsel %vm8548_vm2, %v632_v46, %v636_v27  ;;  %v703_v55 = vor.u32 %v702_v47, %v699_v38  ;;  %v712_v56 = vrot.slane %v13189_v48, 4  ;;  %v13211_v58 = vshll.u32 %v8571_v40, 16  ;;  %v8731_v48 = vld [vmem:[%s8501_s10 + $0x6c] sm:$0xf]  ;;  %13324 = vst [vmem:[#allocation9_spill] sm:$0xff] %v8818_v23  ;;  %s8435_s29 = smov 88  }
  0x20   : > { %v647_v60 = vsel %vm8548_vm2, %v642_v50, %v646_v34  ;;  %v718_v61 = vrot.slane %v13187_v52, 5  ;;  %v651_v62 = vrot.slane %v13214_v53, 4  ;;  %v13207_v63 = vshll.u32 %v8584_v49, 16  ;;  %v8643_v50 = vld [vmem:[%s8501_s10 + $0x34] sm:$0xf]  ;;  %s8436_s23 = smov 96  }
  0x21   : > { %v7682_v12 = vcombine.low %v637_v54, %v647_v60  ;;  %v704_v13 = vrot.slane %v703_v55, 4  ;;  %v713_v14 = vor.u32 %v712_v56, %v708_v51  ;;  %v654_v15 = vrot.slane %v13211_v58, 5  ;;  %s8437_s9 = smov 104   ;;  %s8438_s24 = smov 112  }
  0x22   : > { %v660_v18 = vrot.slane %v13207_v63, 5  ;;  %v13210_v20 = vshrl.u32 %v8584_v49, 16  ;;  %v13206_v21 = vshll.u32 %v8597_v57, 16  ;;  %v13177_v22 = vshrl.u32 %v8601_v59, 16  ;;  %v8796_v63 = vld [vmem:[%s8501_s10 + $0x88] sm:$0xf] }
  0x23   : > { %1657 = vrot.lane.b32.xlu0 %v7682_v12, %s8425_s11  ;;  %v709_v24 = vsel %vm8548_vm2, %v704_v13, %v708_v51  ;;  %v714_v26 = vrot.slane %v713_v14, 4  ;;  %v655_v27 = vor.u32 %v654_v15, %v651_v62  ;;  %v13176_v32 = vshll.u32 %v8601_v59, 16  ;;  %v8655_v12 = vld [vmem:[%s8501_s10 + $0x38] sm:$0x3]  ;;  %13322 = vst [vmem:[#allocation7_spill] sm:$0xff] %v8796_v63  ;;  %s8439_s25 = smov 120  }
  0x24   : > { %v664_v33 = vrot.slane %v13210_v20, 4  ;;  %v670_v34 = vrot.slane %v13206_v21, 5  ;;  %v747_v36 = vrot.slane %v13177_v22, 4  ;;  %v13174_v38 = vshll.u32 %v8613_v17, 16  ;;  %v8689_v22 = vld [vmem:[%s8501_s10 + $0x5c] sm:$0x3] }
  0x25   : > { %v719_v42 = vsel %vm8548_vm2, %v714_v26, %v718_v61  ;;  %v656_v43 = vrot.slane %v655_v27, 4  ;;  %v750_v46 = vrot.slane %v13176_v32, 5  ;;  %v13175_v47 = vshrl.u32 %v8613_v17, 16  ;;  %s8021_s26 = sshll.u32 %s13804_s28, 7 }
  0x26   : > { %v8645_v51 = vcombine.low %v709_v24, %v719_v42  ;;  %v665_v54 = vor.u32 %v664_v33, %v660_v18  ;;  %v756_v55 = vrot.slane %v13174_v38, 5  ;;  %v13173_v56 = vshll.u32 %v8624_v31, 16  ;;  %v8668_v42 = vld [vmem:[%s8501_s10 + $0x54] sm:$0xf]  ;;  %s10067_s22 = scalar_lea.vmem %s13165_s1, %s8021_s26 }
  0x27   : > { %v661_v60 = vsel %vm8548_vm2, %v656_v43, %v660_v18  ;;  %v751_v61 = vor.u32 %v750_v46, %v747_v36  ;;  %v760_v62 = vrot.slane %v13175_v47, 4  ;;  %v13182_v13 = vshrl.u32 %v8635_v41, 16 }
  0x28   : > { %1663 = vrot.lane.b32.xlu1 %v8645_v51, %s8425_s11  ;;  %v666_v14 = vrot.slane %v665_v54, 4  ;;  %v766_v15 = vrot.slane %v13173_v56, 5  ;;  %v13179_v24 = vshll.u32 %v8635_v41, 16  ;;  %v13178_v18 = vshll.u32 %v8643_v50, 16 }
  0x29   : > { %v752_v26 = vrot.slane %v751_v61, 4  ;;  %v761_v27 = vor.u32 %v760_v62, %v756_v55  ;;  %v723_v33 = vrot.slane %v13182_v13, 4  ;;  %v13181_v36 = vshrl.u32 %v8643_v50, 16  ;;  %v8678_v62 = vld [vmem:[%s8501_s10 + $0x58] sm:$0xf] }
  0x2a   : > { %v671_v43 = vsel %vm8548_vm2, %v666_v14, %v670_v34  ;;  %v726_v46 = vrot.slane %v13179_v24, 5  ;;  %v732_v54 = vrot.slane %v13178_v18, 5  ;;  %v13180_v61 = vshll.u32 %v8655_v12, 16  ;;  %v8709_v13 = vld [vmem:[%s8501_s10 + $0x4c] sm:$0xf] }
  0x2b   : > { %v8680_v56 = vcombine.low %v661_v60, %v671_v43  ;;  %v757_v38 = vsel %vm8548_vm2, %v752_v26, %v756_v55  ;;  %v762_v47 = vrot.slane %v761_v27, 4  ;;  %v736_v34 = vrot.slane %v13181_v36, 4 }
  0x2c   : > { %v727_v14 = vor.u32 %v726_v46, %v723_v33  ;;  %v742_v32 = vrot.slane %v13180_v61, 5  ;;  %v13184_v18 = vshrl.u32 %v8668_v42, 16  ;;  %v13183_v24 = vshll.u32 %v8668_v42, 16  ;;  %v8700_v33 = vld [vmem:[%s8501_s10 + $0x48] sm:$0xf] }
  0x2d   : > { %1659 = vrot.lane.b32.xlu0 %v8680_v56, %s8425_s11  ;;  %v767_v55 = vsel %vm8548_vm2, %v762_v47, %v766_v15  ;;  %v737_v60 = vor.u32 %v736_v34, %v732_v54  ;;  %v13185_v26 = vshll.u32 %v8678_v62, 16  ;;  %v13186_v27 = vshrl.u32 %v8678_v62, 16 }
  0x2e   : > { %v8702_v43 = vcombine.low %v757_v38, %v767_v55  ;;  %v728_v46 = vrot.slane %v727_v14, 4  ;;  %v795_v61 = vrot.slane %v13184_v18, 4  ;;  %v798_v36 = vrot.slane %v13183_v24, 5  ;;  %v8721_v24 = vld [vmem:[%s8501_s10 + $0x50] sm:$0x3] }
  0x2f   : > { %v738_v47 = vrot.slane %v737_v60, 4  ;;  %v804_v15 = vrot.slane %v13185_v26, 5  ;;  %v808_v34 = vrot.slane %v13186_v27, 4  ;;  %v13190_v38 = vshll.u32 %v8689_v22, 16 }
  0x30   : > { %1667 = vrot.lane.b32.xlu1 %v8702_v43, %s8425_s11  ;;  %v733_v14 = vsel %vm8548_vm2, %v728_v46, %v732_v54  ;;  %v799_v55 = vor.u32 %v798_v36, %v795_v61  ;;  %v13194_v60 = vshrl.u32 %v8700_v33, 16  ;;  %v13193_v18 = vshll.u32 %v8700_v33, 16  ;;  %v8734_v54 = vld [vmem:[%s8501_s10 + $0x70] sm:$0xf] }
  0x31   : > { %v743_v26 = vsel %vm8548_vm2, %v738_v47, %v742_v32  ;;  %v809_v27 = vor.u32 %v808_v34, %v804_v15  ;;  %v814_v52 = vrot.slane %v13190_v38, 5  ;;  %v13195_v44 = vshll.u32 %v8709_v13, 16  ;;  %v8743_v47 = vld [vmem:[%s8501_s10 + $0x74] sm:$0x3] }
  0x32   : > { %v8736_v36 = vcombine.low %v733_v14, %v743_v26  ;;  %v800_v61 = vrot.slane %v799_v55, 4  ;;  %v771_v46 = vrot.slane %v13194_v60, 4  ;;  %v774_v32 = vrot.slane %v13193_v18, 5  ;;  %13320 = vst [vmem:[#allocation5_spill] sm:$0xff] %v8743_v47  ;;  %v8750_v26 = vld [vmem:[%s8501_s10 + $0x60] sm:$0xf] }
  0x33   : > { %v810_v34 = vrot.slane %v809_v27, 4  ;;  %v780_v38 = vrot.slane %v13195_v44, 5  ;;  %v13199_v39 = vshrl.u32 %v8709_v13, 16  ;;  %v13200_v30 = vshll.u32 %v8721_v24, 16  ;;  %v8759_v60 = vld [vmem:[%s8501_s10 + $0x64] sm:$0xf] }
  0x34   : > { %1665 = vrot.lane.b32.xlu0 %v8736_v36, %s8425_s11  ;;  %v805_v14 = vsel %vm8548_vm2, %v800_v61, %v804_v15  ;;  %v775_v55 = vor.u32 %v774_v32, %v771_v46  ;;  %v13203_v18 = vshrl.u32 %v8731_v48, 16  ;;  %v13202_v27 = vshll.u32 %v8731_v48, 16 }
  0x35   : > { %v815_v44 = vsel %vm8548_vm2, %v810_v34, %v814_v52  ;;  %v784_v8 = vrot.slane %v13199_v39, 4  ;;  %v790_v5 = vrot.slane %v13200_v30, 5  ;;  %v13204_v6 = vshll.u32 %v8734_v54, 16  ;;  %v8775_v52 = vld [vmem:[%s8501_s10 + $0x68] sm:$0x3] }
  0x36   : > { %v8768_v15 = vcombine.low %v805_v14, %v815_v44  ;;  %v776_v61 = vrot.slane %v775_v55, 4  ;;  %v843_v46 = vrot.slane %v13203_v18, 4  ;;  %v846_v32 = vrot.slane %v13202_v27, 5 }
  0x37   : > { %v785_v34 = vor.u32 %v784_v8, %v780_v38  ;;  %v852_v39 = vrot.slane %v13204_v6, 5  ;;  %v13209_v30 = vshrl.u32 %v8734_v54, 16  ;;  %v13208_v4 = vshll.u32 %v8743_v47, 16  ;;  %v8788_v8 = vld [vmem:[%s8501_s10 + $0x84] sm:$0xf] }
  0x38   : > { %1671 = vrot.lane.b32.xlu1 %v8768_v15, %s8425_s11  ;;  %v781_v44 = vsel %vm8548_vm2, %v776_v61, %v780_v38  ;;  %v847_v14 = vor.u32 %v846_v32, %v843_v46  ;;  %v13212_v55 = vshrl.u32 %v8750_v26, 16  ;;  %v13213_v27 = vshll.u32 %v8750_v26, 16  ;;  %13321 = vst [vmem:[#allocation6_spill] sm:$0xff] %v8788_v8 }
  0x39   : > { %v786_v18 = vrot.slane %v785_v34, 4  ;;  %v856_v6 = vrot.slane %v13209_v30, 4  ;;  %v862_v3 = vrot.slane %v13208_v4, 5  ;;  %v13218_v21 = vshll.u32 %v8759_v60, 16  ;;  %v8804_v34 = vld [vmem:[%s8501_s10 + $0x8c] sm:$0x3] }
  0x3a   : > { %v848_v38 = vrot.slane %v847_v14, 4  ;;  %v819_v61 = vrot.slane %v13212_v55, 4  ;;  %v822_v46 = vrot.slane %v13213_v27, 5  ;;  %v13219_v32 = vshrl.u32 %v8759_v60, 16  ;;  %13323 = vst [vmem:[#allocation8_spill] sm:$0xff] %v8804_v34 }
  0x3b   : > { %v791_v4 = vsel %vm8548_vm2, %v786_v18, %v790_v5  ;;  %v857_v30 = vor.u32 %v856_v6, %v852_v39  ;;  %v828_v20 = vrot.slane %v13218_v21, 5  ;;  %v13217_v14 = vshll.u32 %v8775_v52, 16 }
  0x3c   : > { %v8811_v58 = vcombine.low %v781_v44, %v791_v4  ;;  %v853_v55 = vsel %vm8548_vm2, %v848_v38, %v852_v39  ;;  %v823_v27 = vor.u32 %v822_v46, %v819_v61  ;;  %v832_v53 = vrot.slane %v13219_v32, 4  ;;  %v8825_v4 = vld [vmem:[%s8501_s10 + $0x7c] sm:$0xf]  ;;  %v8839_v32 = vld [vmem:[%s8501_s10 + $0x80] sm:$0x3] }
  0x3d   : > { %v858_v19 = vrot.slane %v857_v30, 4  ;;  %v838_v5 = vrot.slane %v13217_v14, 5  ;;  %v13221_v6 = vshrl.u32 %v8788_v8, 16  ;;  %v13224_v18 = vshll.u32 %v8788_v8, 16  ;;  %13325 = vst [vmem:[#allocation10_spill] sm:$0xff] %v8825_v4  ;;  %13326 = vst [vmem:[#allocation11_spill] sm:$0xff] %v8839_v32 }
  0x3e   : > { %1669 = vrot.lane.b32.xlu0 %v8811_v58, %s8425_s11  ;;  %v824_v39 = vrot.slane %v823_v27, 4  ;;  %v833_v44 = vor.u32 %v832_v53, %v828_v20  ;;  %v13226_v38 = vshll.u32 %v8796_v63, 16  ;;  %v13225_v21 = vshll.u32 %v8804_v34, 16 }
  0x3f   : > { %v863_v61 = vsel %vm8548_vm2, %v858_v19, %v862_v3  ;;  %v891_v46 = vrot.slane %v13221_v6, 4  ;;  %v894_v14 = vrot.slane %v13224_v18, 5  ;;  %v8848_v3 = vld [vmem:[%s8501_s10 + $0x9c] sm:$0xf]  ;;  %v13329_v6 = vshrl.u32 %v8796_v63, 16 }
  0x40   : > { %v8841_v27 = vcombine.low %v853_v55, %v863_v61  ;;  %v829_v53 = vsel %vm8548_vm2, %v824_v39, %v828_v20  ;;  %v834_v11 = vrot.slane %v833_v44, 4  ;;  %v900_v30 = vrot.slane %v13226_v38, 5  ;;  %13328 = vst [vmem:[#allocation13_spill] sm:$0xff] %v8848_v3  ;;  %v8856_v61 = vld [vmem:[%s8501_s10 + $0xa0] sm:$0xf] }
  0x41   : > { %v895_v19 = vor.u32 %v894_v14, %v891_v46  ;;  %v904_v8 = vrot.slane %v13329_v6, 4  ;;  %v910_v18 = vrot.slane %v13225_v21, 5  ;;  %v13235_v55 = vshrl.u32 %v8818_v23, 16  ;;  %13330 = vst [vmem:[#allocation14_spill] sm:$0xff] %v8856_v61 }
  0x42   : > { %13327 = vst [vmem:[#allocation12_spill] sm:$0xff] %v8841_v27  ;;  %1675 = vrot.lane.b32.xlu1 %v8841_v27, %s8425_s11  ;;  %v839_v20 = vsel %vm8548_vm2, %v834_v11, %v838_v5  ;;  %v13233_v14 = vshll.u32 %v8818_v23, 16  ;;  %v13232_v39 = vshll.u32 %v8825_v4, 16  ;;  %v13234_v6 = vshrl.u32 %v8825_v4, 16  ;;  %v8877_v27 = vld [vmem:[%s8501_s10 + $0xa4] sm:$0x3] }
  0x43   : > { %v8865_v44 = vcombine.low %v829_v53, %v839_v20  ;;  %v896_v46 = vrot.slane %v895_v19, 4  ;;  %v905_v21 = vor.u32 %v904_v8, %v900_v30  ;;  %v867_v38 = vrot.slane %v13235_v55, 4  ;;  %13331 = vst [vmem:[#allocation15_spill] sm:$0xff] %v8877_v27  ;;  %v8880_v53 = vld [vmem:[%s8501_s10 + $0x90] sm:$0xf] }
  0x44   : > { %v870_v34 = vrot.slane %v13233_v14, 5  ;;  %v876_v63 = vrot.slane %v13232_v39, 5  ;;  %v880_v11 = vrot.slane %v13234_v6, 4  ;;  %v13241_v5 = vshll.u32 %v8839_v32, 16  ;;  %13332 = vst [vmem:[#allocation16_spill] sm:$0xff] %v8880_v53 }
  0x45   : > { %1673 = vrot.lane.b32.xlu0 %v8865_v44, %s8425_s11  ;;  %v901_v8 = vsel %vm8548_vm2, %v896_v46, %v900_v30  ;;  %v906_v19 = vrot.slane %v905_v21, 4  ;;  %v13242_v20 = vshrl.u32 %v8848_v3, 16  ;;  %v13243_v39 = vshll.u32 %v8848_v3, 16  ;;  %v8965_v32 = vld [vmem:[%s8501_s10 + $0xac] sm:$0xf] }
  0x46   : > { %v871_v14 = vor.u32 %v870_v34, %v867_v38  ;;  %v881_v6 = vor.u32 %v880_v11, %v876_v63  ;;  %v886_v55 = vrot.slane %v13241_v5, 5  ;;  %v13244_v4 = vshll.u32 %v8856_v61, 16  ;;  %v8899_v34 = vld [vmem:[%s8501_s10 + $0x94] sm:$0xf]  ;;  %13344 = vst [vmem:[#allocation26_spill] sm:$0xff] %v8965_v32 }
  0x47   : > { %v911_v23 = vsel %vm8548_vm2, %v906_v19, %v910_v18  ;;  %v939_v47 = vrot.slane %v13242_v20, 4  ;;  %v942_v21 = vrot.slane %v13243_v39, 5  ;;  %v13245_v30 = vshrl.u32 %v8856_v61, 16  ;;  %13333 = vst [vmem:[#allocation17_spill] sm:$0xff] %v8899_v34 }
  0x48   : > { %v8901_v38 = vcombine.low %v901_v8, %v911_v23  ;;  %v872_v46 = vrot.slane %v871_v14, 4  ;;  %v882_v11 = vrot.slane %v881_v6, 4  ;;  %v948_v5 = vrot.slane %v13244_v4, 5  ;;  %v8916_v6 = vld [vmem:[%s8501_s10 + $0x98] sm:$0x3] }
  0x49   : > { %v943_v18 = vor.u32 %v942_v21, %v939_v47  ;;  %v952_v19 = vrot.slane %v13245_v30, 4  ;;  %v13248_v20 = vshll.u32 %v8877_v27, 16  ;;  %13335 = vst [vmem:[#allocation19_spill] sm:$0xff] %v8916_v6  ;;  %v13250_v47 = vshll.u32 %v8880_v53, 16  ;;  %v8921_v21 = vld [vmem:[%s8501_s10 + $0xb4] sm:$0xf] }
  0x4a   : > { %13334 = vst [vmem:[#allocation18_spill] sm:$0xff] %v8901_v38  ;;  %1679 = vrot.lane.b32.xlu1 %v8901_v38, %s8425_s11  ;;  %v877_v23 = vsel %vm8548_vm2, %v872_v46, %v876_v63  ;;  %v887_v14 = vsel %vm8548_vm2, %v882_v11, %v886_v55  ;;  %v13251_v8 = vshll.u32 %v8899_v34, 16  ;;  %13336 = vst [vmem:[#allocation20_spill] sm:$0xff] %v8921_v21  ;;  %v8928_v63 = vld [vmem:[%s8501_s10 + $0xb8] sm:$0xf]  ;;  %v13339_v55 = vshrl.u32 %v8880_v53, 16 }
  0x4b   : > { %v8923_v4 = vcombine.low %v877_v23, %v887_v14  ;;  %v944_v30 = vrot.slane %v943_v18, 4  ;;  %v953_v39 = vor.u32 %v952_v19, %v948_v5  ;;  %v958_v61 = vrot.slane %v13248_v20, 5  ;;  %13338 = vst [vmem:[#allocation22_spill] sm:$0xff] %v8928_v63  ;;  %v8943_v27 = vld [vmem:[%s8501_s10 + $0xbc] sm:$0x3] }
  0x4c   : > { %v915_v46 = vrot.slane %v13339_v55, 4  ;;  %v918_v11 = vrot.slane %v13250_v47, 5  ;;  %v924_v23 = vrot.slane %v13251_v8, 5  ;;  %v13258_v18 = vshrl.u32 %v8899_v34, 16  ;;  %13340 = vst [vmem:[#allocation23_spill] sm:$0xff] %v8943_v27 }
  0x4d   : > { %13337 = vst [vmem:[#allocation21_spill] sm:$0xff] %v8923_v4  ;;  %1677 = vrot.lane.b32.xlu0 %v8923_v4, %s8425_s11  ;;  %v949_v19 = vsel %vm8548_vm2, %v944_v30, %v948_v5  ;;  %v954_v14 = vrot.slane %v953_v39, 4  ;;  %v13262_v20 = vshll.u32 %v8916_v6, 16  ;;  %v13264_v55 = vshrl.u32 %v8921_v21, 16  ;;  %v8951_v38 = vld [vmem:[%s8501_s10 + $0xa8] sm:$0xf] }
  0x4e   : > { %v919_v47 = vor.u32 %v918_v11, %v915_v46  ;;  %v928_v8 = vrot.slane %v13258_v18, 4  ;;  %13341 = vst [vmem:[#allocation24_spill] sm:$0xff] %v8951_v38  ;;  %v13265_v46 = vshrl.u32 %v8928_v63, 16  ;;  %v13343_v53 = vshll.u32 %v8921_v21, 16 }
  0x4f   : > { %v959_v39 = vsel %vm8548_vm2, %v954_v14, %v958_v61  ;;  %v934_v5 = vrot.slane %v13262_v20, 5  ;;  %v987_v30 = vrot.slane %v13264_v55, 4  ;;  %v13345_v61 = vshll.u32 %v8928_v63, 16 }
  0x50   : > { %v8960_v11 = vcombine.low %v949_v19, %v959_v39  ;;  %v920_v18 = vrot.slane %v919_v47, 4  ;;  %v929_v3 = vor.u32 %v928_v8, %v924_v23  ;;  %v990_v34 = vrot.slane %v13343_v53, 5  ;;  %v8978_v19 = vld [vmem:[%s8501_s10 + $0xb0] sm:$0x3] }
  0x51   : > { %v996_v14 = vrot.slane %v13345_v61, 5  ;;  %v1000_v20 = vrot.slane %v13265_v46, 4  ;;  %v13274_v6 = vshll.u32 %v8943_v27, 16  ;;  %v13275_v55 = vshrl.u32 %v8951_v38, 16  ;;  %13346 = vst [vmem:[#allocation27_spill] sm:$0xff] %v8978_v19 }
  0x52   : > { %13342 = vst [vmem:[#allocation25_spill] sm:$0xff] %v8960_v11  ;;  %1683 = vrot.lane.b32.xlu1 %v8960_v11, %s8425_s11  ;;  %v925_v47 = vsel %vm8548_vm2, %v920_v18, %v924_v23  ;;  %v930_v8 = vrot.slane %v929_v3, 4  ;;  %v991_v53 = vor.u32 %v990_v34, %v987_v30  ;;  %v13278_v39 = vshll.u32 %v8951_v38, 16 }
  0x53   : > { %v1001_v61 = vor.u32 %v1000_v20, %v996_v14  ;;  %v1006_v46 = vrot.slane %v13274_v6, 5  ;;  %v963_v63 = vrot.slane %v13275_v55, 4  ;;  %v13276_v21 = vshll.u32 %v8965_v32, 16 }
  0x54   : > { %v935_v11 = vsel %vm8548_vm2, %v930_v8, %v934_v5  ;;  %v992_v4 = vrot.slane %v991_v53, 4  ;;  %v966_v3 = vrot.slane %v13278_v39, 5  ;;  %v13277_v34 = vshrl.u32 %v8965_v32, 16 }
  0x55   : > { %v8991_v23 = vcombine.low %v925_v47, %v935_v11  ;;  %v1002_v20 = vrot.slane %v1001_v61, 4  ;;  %v972_v18 = vrot.slane %v13276_v21, 5  ;;  %v13280_v30 = vshll.u32 %v8978_v19, 16 }
  0x56   : > { %v997_v6 = vsel %vm8548_vm2, %v992_v4, %v996_v14  ;;  %v967_v55 = vor.u32 %v966_v3, %v963_v63  ;;  %v976_v5 = vrot.slane %v13277_v34, 4  ;;  %v7648_v11 = vrot.slane %v8571_v40, 9 }
  0x57   : > { %13347 = vst [vmem:[#allocation28_spill] sm:$0xff] %v8991_v23  ;;  %1681 = vrot.lane.b32.xlu0 %v8991_v23, %s8425_s11  ;;  %v1007_v47 = vsel %vm8548_vm2, %v1002_v20, %v1006_v46  ;;  %v982_v4 = vrot.slane %v13280_v30, 5  ;;  %v1068_v63 = vrot.slane %v8584_v49, 5  ;;  %v1071_v14 = vrot.slane %v8597_v57, 5 }
  0x58   : > { %v9015_v53 = vcombine.low %v997_v6, %v1007_v47  ;;  %v968_v61 = vrot.slane %v967_v55, 4  ;;  %v977_v3 = vor.u32 %v976_v5, %v972_v18  ;;  %v7647_v21 = vrot.slane %v8517_v7, 9 }
  0x59   : > { %v1069_v34 = vsel %vm9002_vm5, %v7648_v11, %v1068_v63  ;;  %v1070_v39 = vrot.slane %v1068_v63, 4  ;;  %v1061_v27 = vrot.slane %v8521_v9, 5  ;;  %v1064_v46 = vrot.slane %v8524_v10, 5 }
  0x5a   : > { %13350 = vst [vmem:[#allocation29_spill] sm:$0xff] %v9015_v53  ;;  %1687 = vrot.lane.b32.xlu1 %v9015_v53, %s8425_s11  ;;  %v973_v20 = vsel %vm8548_vm2, %v968_v61, %v972_v18  ;;  %v978_v6 = vrot.slane %v977_v3, 4  ;;  %v7650_v55 = vrot.slane %v8536_v16, 9  ;;  %v1082_v5 = vrot.slane %v8557_v29, 5 }
  0x5b   : > { %v1072_v11 = vsel %vm9002_vm5, %v1070_v39, %v1071_v14  ;;  %v1062_v47 = vsel %vm9002_vm5, %v7647_v21, %v1061_v27  ;;  %v1063_v63 = vrot.slane %v1061_v27, 4  ;;  %v1085_v30 = vrot.slane %v8563_v35, 5 }
  0x5c   : > { %v983_v53 = vsel %vm8548_vm2, %v978_v6, %v982_v4  ;;  %v9035_v18 = vcombine.low %v1069_v34, %v1072_v11  ;;  %v1083_v61 = vsel %vm9002_vm5, %v7650_v55, %v1082_v5  ;;  %v1084_v3 = vrot.slane %v1082_v5, 4 }
  0x5d   : > { %v9039_v19 = vcombine.low %v973_v20, %v983_v53  ;;  %v1065_v39 = vsel %vm9002_vm5, %v1063_v63, %v1064_v46  ;;  %v7649_v14 = vrot.slane %v8504_v0, 9  ;;  %v1075_v27 = vrot.slane %v8507_v1, 5 }
  0x5e   : > { %1739 = vrot.lane.b32.xlu1 %v9035_v18, %s8426_s12  ;;  %v7698_v21 = vcombine.low %v1062_v47, %v1065_v39  ;;  %v1086_v34 = vsel %vm9002_vm5, %v1084_v3, %v1085_v30  ;;  %v1078_v4 = vrot.slane %v8510_v2, 5  ;;  %v7652_v53 = vrot.slane %v8601_v59, 9 }
  0x5f   : > { %13351 = vst [vmem:[#allocation30_spill] sm:$0xff] %v9039_v19  ;;  %1685 = vrot.lane.b32.xlu0 %v9039_v19, %s8425_s11  ;;  %v9053_v46 = vcombine.low %v1083_v61, %v1086_v34  ;;  %v1076_v20 = vsel %vm9002_vm5, %v7649_v14, %v1075_v27  ;;  %v1077_v6 = vrot.slane %v1075_v27, 4  ;;  %v1096_v55 = vrot.slane %v8613_v17, 5 }
  0x60   : > { %v1099_v5 = vrot.slane %v8624_v31, 5  ;;  %v7651_v11 = vrot.slane %v8635_v41, 9  ;;  %v1089_v30 = vrot.slane %v8643_v50, 5  ;;  %v1092_v47 = vrot.slane %v8655_v12, 5 }
  0x61   : > { %v1079_v63 = vsel %vm9002_vm5, %v1077_v6, %v1078_v4  ;;  %v1097_v61 = vsel %vm9002_vm5, %v7652_v53, %v1096_v55  ;;  %v1098_v3 = vrot.slane %v1096_v55, 4  ;;  %v13352_v39 = vshrl.u32 %v8517_v7, 16 }
  0x62   : > { %1743 = vrot.lane.b32.xlu1 %v9053_v46, %s8426_s12  ;;  %v9070_v27 = vcombine.low %v1076_v20, %v1079_v63  ;;  %v1090_v34 = vsel %vm9002_vm5, %v7651_v11, %v1089_v30  ;;  %v1091_v25 = vrot.slane %v1089_v30, 4  ;;  %v13353_v19 = vshll.u32 %v8517_v7, 16 }
  0x63   : > { %v1174_v14 = vrot.slane %v13352_v39, 5  ;;  %1737 = vrot.lane.b32.xlu0 %v7698_v21, %s8426_s12  ;;  %v1100_v4 = vsel %vm9002_vm5, %v1098_v3, %v1099_v5  ;;  %v13354_v53 = vshrl.u32 %v8521_v9, 16  ;;  %v1183_v55 = vshrl.u32 %v8524_v10, 16 }
  0x64   : > { %v1175_v32 = vrot.slane %v13353_v19, 6  ;;  %v7653_v20 = vrot.slane %v8700_v33, 9  ;;  %v9083_v63 = vcombine.low %v1097_v61, %v1100_v4  ;;  %v1093_v11 = vsel %vm9002_vm5, %v1091_v25, %v1092_v47 }
  0x65   : > { %v1178_v6 = vrot.slane %v13354_v53, 5  ;;  %v1103_v7 = vrot.slane %v8709_v13, 5  ;;  %v1185_v21 = vrot.slane %v1183_v55, 5  ;;  %v1106_v10 = vrot.slane %v8721_v24, 5 }
  0x66   : > { %v1176_v30 = vor.u32 %v1175_v32, %v1174_v14  ;;  %1747 = vrot.lane.b32.xlu1 %v9083_v63, %s8426_s12  ;;  %v9098_v5 = vcombine.low %v1090_v34, %v1093_v11  ;;  %v13358_v14 = vshll.u32 %v8571_v40, 16  ;;  %v13413_v38 = vshll.u32 %v8759_v60, 16 }
  0x67   : > { %v1180_v9 = vor.u32 %v8554_v28, %v1178_v6  ;;  %v1104_v32 = vsel %vm9002_vm5, %v7653_v20, %v1103_v7  ;;  %v1105_v47 = vrot.slane %v1103_v7, 4  ;;  %1741 = vrot.lane.b32.xlu0 %v9070_v27, %s8426_s12  ;;  %v1187_v3 = vor.u32 %v8565_v37, %v1185_v21 }
  0x68   : > { %v1177_v25 = vrot.slane %v1176_v30, 4  ;;  %v13357_v28 = vshrl.u32 %v8571_v40, 16  ;;  %v1190_v4 = vrot.slane %v13358_v14, 6  ;;  %v13359_v6 = vshrl.u32 %v8584_v49, 16 }
  0x69   : > { %v1182_v61 = vrot.slane %v1180_v9, 4  ;;  %v1107_v53 = vsel %vm9002_vm5, %v1105_v47, %v1106_v10  ;;  %v13360_v20 = vshll.u32 %v8584_v49, 16  ;;  %v1198_v7 = vshrl.u32 %v8597_v57, 16 }
  0x6a   : > { %v1189_v39 = vrot.slane %v13357_v28, 5  ;;  %v1181_v34 = vsel %vm9090_vm8, %v1177_v25, %v1180_v9  ;;  %v1193_v55 = vrot.slane %v13359_v6, 5  ;;  %v13361_v14 = vshll.u32 %v8597_v57, 16 }
  0x6b   : > { %v1194_v11 = vrot.slane %v13360_v20, 6  ;;  %v1188_v37 = vsel %vm9090_vm8, %v1182_v61, %v1187_v3  ;;  %1745 = vrot.lane.b32.xlu0 %v9098_v5, %s8426_s12  ;;  %v9124_v10 = vcombine.low %v1104_v32, %v1107_v53  ;;  %v1200_v47 = vrot.slane %v1198_v7, 5 }
  0x6c   : > { %v1191_v30 = vor.u32 %v1190_v4, %v1189_v39  ;;  %v7714_v21 = vcombine.low %v1181_v34, %v1188_v37  ;;  %v1201_v9 = vrot.slane %v13361_v14, 6  ;;  %v9129_v61 = vcombine.low %v8571_v40, %v8584_v49 }
  0x6d   : > { %v1195_v28 = vor.u32 %v1194_v11, %v1193_v55  ;;  %v13362_v4 = vshrl.u32 %v8504_v0, 16  ;;  %v13363_v53 = vshll.u32 %v8504_v0, 16  ;;  %v13364_v49 = vshrl.u32 %v8507_v1, 16 }
  0x6e   : > { %v1192_v25 = vrot.slane %v1191_v30, 4  ;;  %1817 = vrot.lane.b32.xlu1 %v7714_v21, %s8427_s13  ;;  %v1202_v57 = vor.u32 %v1201_v9, %v1200_v47  ;;  %v13365_v20 = vshll.u32 %v8507_v1, 16  ;;  %v1213_v37 = vshrl.u32 %v8510_v2, 16 }
  0x6f   : > { %v1197_v3 = vrot.slane %v1195_v28, 4  ;;  %1749 = vrot.lane.b32.xlu0 %v9124_v10, %s8426_s12  ;;  %v1204_v34 = vrot.slane %v13362_v4, 5  ;;  %v1205_v6 = vrot.slane %v13363_v53, 6  ;;  %v1208_v55 = vrot.slane %v13364_v49, 5 }
  0x70   : > { %v1196_v39 = vsel %vm9090_vm8, %v1192_v25, %v1195_v28  ;;  %v1209_v11 = vrot.slane %v13365_v20, 6  ;;  %v9151_v30 = vcombine.low %v8504_v0, %v8507_v1  ;;  %v1215_v28 = vrot.slane %v1213_v37, 5 }
  0x71   : > { %v1203_v32 = vsel %vm9090_vm8, %v1197_v3, %v1202_v57  ;;  %v1206_v7 = vor.u32 %v1205_v6, %v1204_v34  ;;  %v13366_v14 = vshll.u32 %v8510_v2, 16  ;;  %v13367_v47 = vshrl.u32 %v8536_v16, 16 }
  0x72   : > { %1852 = vrot.lane.b32.xlu1 %v9129_v61, %s8428_s14  ;;  %v7715_v40 = vcombine.low %v1196_v39, %v1203_v32  ;;  %v1210_v21 = vor.u32 %v1209_v11, %v1208_v55  ;;  %v13369_v57 = vshrl.u32 %v8557_v29, 16  ;;  %v13370_v4 = vshll.u32 %v8557_v29, 16 }
  0x73   : > { %v1216_v9 = vrot.slane %v13366_v14, 6  ;;  %v1207_v25 = vrot.slane %v1206_v7, 4  ;;  %v1219_v3 = vrot.slane %v13367_v47, 5  ;;  %v1228_v53 = vshrl.u32 %v8563_v35, 16  ;;  %v8310_v14 = vld [vmem:[%s13166_s2 + $0x10] sm:$0xff]  }
  0x74   : > { %1819 = vrot.lane.b32.xlu0 %v7715_v40, %s8427_s13  ;;  %v1212_v0 = vrot.slane %v1210_v21, 4  ;;  %v1223_v32 = vrot.slane %v13369_v57, 5  ;;  %v1224_v34 = vrot.slane %v13370_v4, 6  ;;  %v13371_v20 = vshll.u32 %v8563_v35, 16  ;;  %v8313_v4 = vld [vmem:[%s13166_s2 + $0x28] sm:$0xff]  }
  0x75   : > { %v1217_v1 = vor.u32 %v1216_v9, %v1215_v28  ;;  %v1211_v2 = vsel %vm9090_vm8, %v1207_v25, %v1210_v21  ;;  %v1230_v55 = vrot.slane %v1228_v53, 5  ;;  %v9186_v37 = vcombine.low %v8536_v16, %v8557_v29  ;;  %v8308_v29 = vld [vmem:[%s13166_s2] sm:$0xff]   ;;  %v8311_v25 = vld [vmem:[%s13166_s2 + $0x18] sm:$0xff]  }
  0x76   : > { %1887 = vrot.lane.b32.xlu1 %v8680_v56, %s8429_s15  ;;  %v1225_v49 = vor.u32 %v1224_v34, %v1223_v32  ;;  %v1231_v11 = vrot.slane %v13371_v20, 6  ;;  %8121 = vmatprep.subr.bf16.mxu0 %v8308_v29  ;;  %v9221_v9 = vcombine.low %v8635_v41, %v8643_v50  ;;  %v1243_v32 = vshrl.u32 %v8655_v12, 16 }
  0x77   : > { %v1218_v56 = vsel %vm9090_vm8, %v1212_v0, %v1217_v1  ;;  %8122 = vmatpush3.bf16.msra.mxu0 %v8308_v29  ;;  %v8312_v0 = vld [vmem:[%s13166_s2 + $0x20] sm:$0xff]   ;;  %v13373_v1 = vshrl.u32 %v8635_v41, 16  ;;  %vm13314_vm7 = vcmask 850944  }
  0x78   : > { %1854 = vrot.lane.b32.xlu0 %v9151_v30, %s8428_s14  ;;  %v7716_v6 = vcombine.low %v1211_v2, %v1218_v56  ;;  %v1227_v21 = vrot.slane %v1225_v49, 4  ;;  %v1232_v28 = vor.u32 %v1231_v11, %v1230_v55  ;;  %13372 = vst [vmem:[#allocation31_spill] sm:$0xff] %v9221_v9  ;;  %v13374_v56 = vshll.u32 %v8635_v41, 16 }
  0x79   : > { %v1234_v2 = vrot.slane %v13373_v1, 5  ;;  %v1245_v53 = vrot.slane %v1243_v32, 5  ;;  %v13384_v32 = vshll.u32 %v8624_v31, 16 }
  0x7a   : > { %1922 = vrot.lane.b32.xlu1 %v9035_v18, %s8430_s16  ;;  %v13368_v18 = vshll.u32 %v8536_v16, 16  ;;  %v1233_v16 = vsel %vm9090_vm8, %v1227_v21, %v1232_v28  ;;  %v1235_v47 = vrot.slane %v13374_v56, 6 }
  0x7c   : > { %1889 = vrot.lane.b32.xlu0 %v8578_v45, %s8429_s15  ;;  %v1220_v39 = vrot.slane %v13368_v18, 6  ;;  %v1236_v41 = vor.u32 %v1235_v47, %v1234_v2  ;;  %v13382_v2 = vshll.u32 %v8613_v17, 16  ;;  %v1258_v47 = vshrl.u32 %v8624_v31, 16 }
  0x7e   : > { %1957 = vrot.lane.b32.xlu1 %v7715_v40, %s8431_s17  ;;  %v1221_v40 = vor.u32 %v1220_v39, %v1219_v3  ;;  %v13375_v3 = vshrl.u32 %v8643_v50, 16  ;;  %v13376_v39 = vshll.u32 %v8643_v50, 16  ;;  %v13377_v50 = vshll.u32 %v8655_v12, 16  ;;  %v8315_v12 = vld [vmem:[%s13166_s2 + $0x38] sm:$0xff]  }
  0x7f   : > { %v1237_v55 = vrot.slane %v1236_v41, 4  ;;  %v1254_v56 = vrot.slane %v13382_v2, 6  ;;  %v8380_v41 = vld [vmem:[%s8501_s10 + $0x40] sm:$0xf]  ;;  %v13398_v2 = vshrl.u32 %v8709_v13, 16 }
  0x80   : > { %1924 = vrot.lane.b32.xlu0 %v9070_v27, %s8430_s16  ;;  %v1222_v7 = vrot.slane %v1221_v40, 4  ;;  %v1238_v18 = vrot.slane %v13375_v3, 5  ;;  %v1239_v57 = vrot.slane %v13376_v39, 6  ;;  %v8314_v40 = vld [vmem:[%s13166_s2 + $0x30] sm:$0xff]  }
  0x82   : > { %1992 = vrot.lane.b32.xlu1 %v9151_v30, %s8432_s18  ;;  %v1226_v35 = vsel %vm9090_vm8, %v1222_v7, %v1225_v49  ;;  %v1240_v34 = vor.u32 %v1239_v57, %v1238_v18  ;;  %v1260_v57 = vrot.slane %v1258_v47, 5  ;;  %v13399_v47 = vshll.u32 %v8709_v13, 16 }
  0x84   : > { %1959 = vrot.lane.b32.xlu0 %v7716_v6, %s8431_s17  ;;  %v1242_v20 = vrot.slane %v1240_v34, 4  ;;  %v1241_v21 = vsel %vm9090_vm8, %v1237_v55, %v1240_v34 }
  0x86   : > { %2027 = vrot.lane.b32.xlu1 %v8578_v45, %s8433_s19  ;;  %v9205_v45 = vcombine.low %v1226_v35, %v1233_v16 }
  0x88   : > { %1994 = vrot.lane.b32.xlu0 %v9186_v37, %s8432_s18 }
  0x8a   : > { %2062 = vrot.lane.b32.xlu1 %v9070_v27, %s8434_s20  ;;  %v8309_v27 = vld [vmem:[%s13166_s2 + $0x8] sm:$0xff]  }
  0x8b   : > { %8123 = vmatprep.subr.bf16.mxu0 %v8309_v27 }
  0x8c   : > { %2029 = vrot.lane.b32.xlu0 %v8645_v51, %s8433_s19  ;;  %8124 = vmatpush3.bf16.msra.mxu0 %v8309_v27  ;;  %v13379_v27 = vshrl.u32 %v8601_v59, 16 }
  0x8d   : > { %8125 = vmatprep.subr.bf16.mxu0 %v8310_v14 }
  0x8e   : > { %2064 = vrot.lane.b32.xlu1 %v9053_v46, %s8434_s20 }
  0x90   : > { %1821 = vrot.lane.b32.xlu0 %v7716_v6, %s8427_s13  ;;  %8126 = vmatpush3.bf16.msra.mxu0 %v8310_v14  ;;  %v1249_v14 = vrot.slane %v13379_v27, 5 }
  0x91   : > { %8127 = vmatprep.subr.bf16.mxu0 %v8311_v25  ;;  %v9258_v49 = vpop.permute.xlu1 %1661 }
  0x92   : > { %1823 = vrot.lane.b32.xlu1 %v9205_v45, %s8427_s13 }
  0x94   : > { %2097 = vrot.lane.b32.xlu0 %v7716_v6, %s8435_s29  ;;  %8128 = vmatpush3.bf16.msra.mxu0 %v8311_v25  ;;  %v1246_v6 = vrot.slane %v13377_v50, 6  ;;  %v13380_v25 = vshll.u32 %v8601_v59, 16 }
  0x95   : > { %8129 = vmatprep.subr.bf16.mxu0 %v8312_v0  ;;  %v9269_v7 = vpop.permute.xlu0 %1657 }
  0x96   : > { %2099 = vrot.lane.b32.xlu1 %v9205_v45, %s8435_s29  ;;  %v1247_v11 = vor.u32 %v1246_v6, %v1245_v53 }
  0x98   : > { %1856 = vrot.lane.b32.xlu0 %v9186_v37, %s8428_s14  ;;  %8130 = vmatpush3.bf16.msra.mxu0 %v8312_v0  ;;  %v1248_v28 = vsel %vm9090_vm8, %v1242_v20, %v1247_v11  ;;  %v13381_v0 = vshrl.u32 %v8613_v17, 16  ;;  %v8379_v17 = vld [vmem:[%s8501_s10 + $0x3c] sm:$0xf] }
  0x99   : > { %8131 = vmatprep.subr.bf16.mxu0 %v8313_v4  ;;  %v7718_v35 = vcombine.low %v1241_v21, %v1248_v28  ;;  %v9312_v34 = vcombine.low %v8379_v17, %v8380_v41  ;;  %v9346_v21 = vcombine.low %v8700_v33, %v8709_v13  ;;  %v13400_v41 = vshll.u32 %v8721_v24, 16 }
  0x9a   : > { %1858 = vrot.lane.b32.xlu1 %v9221_v9, %s8428_s14  ;;  %v1253_v1 = vrot.slane %v13381_v0, 5  ;;  %v13397_v0 = vshll.u32 %v8700_v33, 16 }
  0x9b   : > { %13385 = vst [vmem:[#allocation34_spill] sm:$0xff] %v9312_v34  ;;  %13392 = vst [vmem:[#allocation41_spill] sm:$0xff] %v9346_v21 }
  0x9c   : > { %2132 = vrot.lane.b32.xlu0 %v9186_v37, %s8436_s23  ;;  %8132 = vmatpush3.bf16.msra.mxu0 %v8313_v4  ;;  %v1255_v39 = vor.u32 %v1254_v56, %v1253_v1  ;;  %v1261_v4 = vrot.slane %v13384_v32, 6  ;;  %v1265_v1 = vrot.slane %v13397_v0, 6  ;;  %v1268_v56 = vrot.slane %v13398_v2, 5 }
  0x9d   : > { %8133 = vmatprep.subr.bf16.mxu0 %v8314_v40 }
  0x9e   : > { %2134 = vrot.lane.b32.xlu1 %v9221_v9, %s8436_s23  ;;  %v1257_v50 = vrot.slane %v1255_v39, 4  ;;  %v1262_v6 = vor.u32 %v1261_v4, %v1260_v57 }
  0x9f   : > { %v9283_v16 = vpop.permute.xlu0 %1659 }
  0xa0   : > { %1891 = vrot.lane.b32.xlu0 %v8645_v51, %s8429_s15  ;;  %8134 = vmatpush3.bf16.msra.mxu0 %v8314_v40  ;;  %v1263_v55 = vsel %vm9090_vm8, %v1257_v50, %v1262_v6 }
  0xa1   : > { %8135 = vmatprep.subr.bf16.mxu0 %v8315_v12 }
  0xa2   : > { %1893 = vrot.lane.b32.xlu1 %v8736_v36, %s8429_s15 }
  0xa4   : > { %2167 = vrot.lane.b32.xlu0 %v8645_v51, %s8437_s9  ;;  %v9273_v51 = vpop.permute.xlu1 %1663  ;;  %8136 = vmatpush3.bf16.msra.mxu0 %v8315_v12 }
  0xa6   : > { %2169 = vrot.lane.b32.xlu1 %v8736_v36, %s8437_s9  ;;  %v9301_v3 = vpop.permute.xlu0 %1665 }
  0xa8   : > { %1926 = vrot.lane.b32.xlu0 %v9053_v46, %s8430_s16  ;;  %v9285_v29 = vpop.permute.xlu1 %1667 }
  0xa9   : > { %13378 = vst [vmem:[#allocation32_spill] sm:$0xff] %v9285_v29 }
  0xaa   : > { %1928 = vrot.lane.b32.xlu1 %v9098_v5, %s8430_s16 }
  0xac   : > { %2202 = vrot.lane.b32.xlu0 %v9053_v46, %s8438_s24  ;;  %v1250_v46 = vrot.slane %v13380_v25, 6  ;;  %v9304_v18 = vpop.permute.xlu1 %1671 }
  0xad   : > { %13383 = vst [vmem:[#allocation33_spill] sm:$0xff] %v9304_v18  ;;  %v13410_v18 = vshrl.u32 %v8750_v26, 16 }
  0xae   : > { %2204 = vrot.lane.b32.xlu1 %v9098_v5, %s8438_s24  ;;  %v1251_v59 = vor.u32 %v1250_v46, %v1249_v14  ;;  %v13395_v14 = vshrl.u32 %v8700_v33, 16 }
  0xb0   : > { %1961 = vrot.lane.b32.xlu0 %v9205_v45, %s8431_s17  ;;  %v1252_v53 = vrot.slane %v1251_v59, 4  ;;  %v1264_v25 = vrot.slane %v13395_v14, 5  ;;  %v1269_v59 = vrot.slane %v13399_v47, 6 }
  0xb2   : > { %1963 = vrot.lane.b32.xlu1 %v7718_v35, %s8431_s17  ;;  %v1256_v31 = vsel %vm9090_vm8, %v1252_v53, %v1255_v39  ;;  %v1273_v39 = vshrl.u32 %v8721_v24, 16  ;;  %v1266_v33 = vor.u32 %v1265_v1, %v1264_v25  ;;  %v1270_v4 = vor.u32 %v1269_v59, %v1268_v56 }
  0xb3   : > { %v7719_v20 = vcombine.low %v1256_v31, %v1263_v55  ;;  %v1276_v53 = vrot.slane %v13400_v41, 6 }
  0xb4   : > { %2237 = vrot.lane.b32.xlu0 %v9205_v45, %s8439_s25  ;;  %v9316_v45 = vpop.permute.xlu0 %1669  ;;  %v9318_v40 = vpop.permute.xlu1 %1675  ;;  %v1275_v17 = vrot.slane %v1273_v39, 5  ;;  %v1267_v6 = vrot.slane %v1266_v33, 4  ;;  %v1272_v31 = vrot.slane %v1270_v4, 4 }
  0xb5   : > { %13386 = vst [vmem:[#allocation35_spill] sm:$0xff] %v9316_v45  ;;  %13387 = vst [vmem:[#allocation36_spill] sm:$0xff] %v9318_v40 }
  0xb6   : > { %2239 = vrot.lane.b32.xlu1 %v7718_v35, %s8439_s25  ;;  %v1277_v55 = vor.u32 %v1276_v53, %v1275_v17  ;;  %v8383_v53 = vld [vmem:[%s8501_s10 + $0x5c] sm:$0x3] }
  0xb8   : > { %1996 = vrot.lane.b32.xlu0 %v9221_v9, %s8432_s18  ;;  %v1278_v14 = vsel %vm9090_vm8, %v1272_v31, %v1277_v55  ;;  %v13404_v31 = vshrl.u32 %v8668_v42, 16 }
  0xba   : > { %2031 = vrot.lane.b32.xlu1 %v8736_v36, %s8433_s19  ;;  %v9330_v36 = vpop.permute.xlu0 %1673  ;;  %v1279_v55 = vrot.slane %v13404_v31, 5 }
  0xbb   : > { %13388 = vst [vmem:[#allocation37_spill] sm:$0xff] %v9330_v36  ;;  %v8386_v36 = vld [vmem:[%s8501_s10 + $0x68] sm:$0x3] }
  0xbc   : > { %1998 = vrot.lane.b32.xlu0 %v9312_v34, %s8432_s18  ;;  %v9334_v11 = vpop.permute.xlu1 %1679 }
  0xbd   : > { %13389 = vst [vmem:[#allocation38_spill] sm:$0xff] %v9334_v11 }
  0xbe   : > { %2066 = vrot.lane.b32.xlu1 %v9098_v5, %s8434_s20 }
  0xbf   : > { %v9338_v5 = vpop.permute.xlu0 %1677 }
  0xc0   : > { %2033 = vrot.lane.b32.xlu0 %v8702_v43, %s8433_s19  ;;  %13390 = vst [vmem:[#allocation39_spill] sm:$0xff] %v9338_v5 }
  0xc2   : > { %2068 = vrot.lane.b32.xlu1 %v9083_v63, %s8434_s20 }
  0xc4   : > { %1825 = vrot.lane.b32.xlu0 %v7718_v35, %s8427_s13  ;;  %v9340_v12 = vpop.permute.xlu1 %1683 }
  0xc5   : > { %13391 = vst [vmem:[#allocation40_spill] sm:$0xff] %v9340_v12 }
  0xc6   : > { %1827 = vrot.lane.b32.xlu1 %v7719_v20, %s8427_s13 }
  0xc8   : > { %2101 = vrot.lane.b32.xlu0 %v7718_v35, %s8435_s29 }
  0xc9   : > { %v9350_v28 = vpop.permute.xlu0 %1681 }
  0xca   : > { %2103 = vrot.lane.b32.xlu1 %v7719_v20, %s8435_s29  ;;  %13393 = vst [vmem:[#allocation42_spill] sm:$0xff] %v9350_v28  ;;  %v1288_v28 = vshrl.u32 %v8383_v53, 16 }
  0xcc   : > { %1860 = vrot.lane.b32.xlu0 %v9312_v34, %s8428_s14  ;;  %v9354_v27 = vpop.permute.xlu1 %1687 }
  0xcd   : > { %13394 = vst [vmem:[#allocation43_spill] sm:$0xff] %v9354_v27  ;;  %v13407_v27 = vshll.u32 %v8678_v62, 16 }
  0xce   : > { %1862 = vrot.lane.b32.xlu1 %v9346_v21, %s8428_s14 }
  0xcf   : > { %v1284_v12 = vrot.slane %v13407_v27, 6 }
  0xd0   : > { %2136 = vrot.lane.b32.xlu0 %v9312_v34, %s8436_s23  ;;  %v9360_v35 = vpop.permute.xlu1 %1739  ;;  %v1303_v34 = vshrl.u32 %v8386_v36, 16 }
  0xd1   : > { %v9364_v46 = vpop.permute.xlu0 %1685 }
  0xd2   : > { %2138 = vrot.lane.b32.xlu1 %v9346_v21, %s8436_s23  ;;  %13396 = vst [vmem:[#allocation44_spill] sm:$0xff] %v9364_v46 }
  0xd4   : > { %1895 = vrot.lane.b32.xlu0 %v8702_v43, %s8429_s15  ;;  %v9377_v57 = vpop.permute.xlu1 %1743 }
  0xd5   : > { %v9379_v32 = vpop.permute.xlu0 %1737 }
  0xd6   : > { %1897 = vrot.lane.b32.xlu1 %v8811_v58, %s8429_s15 }
  0xd8   : > { %2171 = vrot.lane.b32.xlu0 %v8702_v43, %s8437_s9  ;;  %v9387_v13 = vpop.permute.xlu1 %1747  ;;  %v1271_v43 = vsel %vm9090_vm8, %v1267_v6, %v1270_v4  ;;  %v8382_v4 = vld [vmem:[%s8501_s10 + $0x54] sm:$0xf]  ;;  %v1113_v6 = vrot.slane %v8383_v53, 5 }
  0xd9   : > { %13401 = vst [vmem:[#allocation45_spill] sm:$0xff] %v9387_v13  ;;  %v9389_v50 = vpop.permute.xlu0 %1741  ;;  %v7720_v0 = vcombine.low %v1271_v43, %v1278_v14  ;;  %v7654_v17 = vrot.slane %v8382_v4, 9  ;;  %v13406_v14 = vshrl.u32 %v8678_v62, 16  ;;  %v1299_v13 = vrot.slane %v13413_v38, 6 }
  0xda   : > { %2173 = vrot.lane.b32.xlu1 %v8811_v58, %s8437_s9 }
  0xdb   : > { %v1283_v46 = vrot.slane %v13406_v14, 5 }
  0xdc   : > { %1930 = vrot.lane.b32.xlu0 %v9083_v63, %s8430_s16 }
  0xdd   : > { %v9395_v24 = vpop.permute.xlu0 %1745  ;;  %v1285_v27 = vor.u32 %v1284_v12, %v1283_v46 }
  0xde   : > { %1932 = vrot.lane.b32.xlu1 %v9124_v10, %s8430_s16  ;;  %13402 = vst [vmem:[#allocation46_spill] sm:$0xff] %v9395_v24 }
  0xe0   : > { %v9401_v25 = vpop.permute.xlu1 %1817  ;;  %2206 = vrot.lane.b32.xlu0 %v9083_v63, %s8438_s24  ;;  %v8381_v63 = vld [vmem:[%s8501_s10 + $0x58] sm:$0xf] }
  0xe1   : > { %v9407_v1 = vpop.permute.xlu0 %1749  ;;  %v1110_v59 = vrot.slane %v8381_v63, 5  ;;  %v9438_v11 = vcombine.low %v8382_v4, %v8381_v63  ;;  %v1290_v63 = vrot.slane %v1288_v28, 5  ;;  %v13409_v4 = vshll.u32 %v8689_v22, 16 }
  0xe2   : > { %2208 = vrot.lane.b32.xlu1 %v9124_v10, %s8438_s24  ;;  %13403 = vst [vmem:[#allocation47_spill] sm:$0xff] %v9407_v1  ;;  %v1294_v1 = vrot.slane %v13410_v18, 5 }
  0xe3   : > { %v1112_v41 = vrot.slane %v1110_v59, 4  ;;  %13408 = vst [vmem:[#allocation48_spill] sm:$0xff] %v9438_v11  ;;  %v1291_v53 = vrot.slane %v13409_v4, 6 }
  0xe4   : > { %v9409_v2 = vpop.permute.xlu1 %1852  ;;  %1965 = vrot.lane.b32.xlu0 %v7719_v20, %s8431_s17 }
  0xe6   : > { %1967 = vrot.lane.b32.xlu1 %v7720_v0, %s8431_s17  ;;  %v9413_v56 = vpop.permute.xlu0 %1819 }
  0xe8   : > { %v9415_v47 = vpop.permute.xlu1 %1887  ;;  %2241 = vrot.lane.b32.xlu0 %v7719_v20, %s8439_s25  ;;  %v13405_v20 = vshll.u32 %v8668_v42, 16  ;;  %v1114_v42 = vsel %vm9002_vm5, %v1112_v41, %v1113_v6  ;;  %v1287_v41 = vrot.slane %v1285_v27, 4  ;;  %v1292_v6 = vor.u32 %v1291_v53, %v1290_v63 }
  0xea   : > { %2243 = vrot.lane.b32.xlu1 %v7720_v0, %s8439_s25  ;;  %v9420_v39 = vpop.permute.xlu0 %1854  ;;  %v1280_v43 = vrot.slane %v13405_v20, 6  ;;  %v1293_v28 = vsel %vm9090_vm8, %v1287_v41, %v1292_v6 }
  0xec   : > { %v9422_v33 = vpop.permute.xlu1 %1922  ;;  %2000 = vrot.lane.b32.xlu0 %v9346_v21, %s8432_s18  ;;  %v1281_v62 = vor.u32 %v1280_v43, %v1279_v55 }
  0xee   : > { %2035 = vrot.lane.b32.xlu1 %v8811_v58, %s8433_s19  ;;  %v9440_v5 = vpop.permute.xlu0 %1889  ;;  %v1111_v58 = vsel %vm9002_vm5, %v7654_v17, %v1110_v59  ;;  %v1282_v17 = vrot.slane %v1281_v62, 4  ;;  %v8384_v62 = vld [vmem:[%s8501_s10 + $0x60] sm:$0xf] }
  0xef   : > { %v7705_v59 = vcombine.low %v1111_v58, %v1114_v42 }
  0xf0   : > { %v9442_v40 = vpop.permute.xlu1 %1957  ;;  %2002 = vrot.lane.b32.xlu0 %v9438_v11, %s8432_s18  ;;  %v1286_v22 = vsel %vm9090_vm8, %v1282_v17, %v1285_v27  ;;  %v8385_v27 = vld [vmem:[%s8501_s10 + $0x64] sm:$0xf] }
  0xf1   : > { %v7721_v43 = vcombine.low %v1286_v22, %v1293_v28  ;;  %v9494_v63 = vcombine.low %v8384_v62, %v8385_v27  ;;  %v1117_v17 = vrot.slane %v8385_v27, 5  ;;  %v7655_v22 = vrot.slane %v8384_v62, 9 }
  0xf2   : > { %2070 = vrot.lane.b32.xlu1 %v9124_v10, %s8434_s20  ;;  %v9454_v31 = vpop.permute.xlu0 %1924  ;;  %v13411_v27 = vshll.u32 %v8750_v26, 16 }
  0xf3   : > { %v1119_v28 = vrot.slane %v1117_v17, 4  ;;  %v1118_v26 = vsel %vm9002_vm5, %v7655_v22, %v1117_v17  ;;  %v8387_v17 = vld [vmem:[%s8501_s10] sm:$0xf]  ;;  %v8388_v22 = vld [vmem:[%s8501_s10 + $0x4] sm:$0xf] }
  0xf4   : > { %v9456_v20 = vpop.permute.xlu1 %1992  ;;  %2037 = vrot.lane.b32.xlu0 %v8768_v15, %s8433_s19  ;;  %v1295_v21 = vrot.slane %v13411_v27, 6  ;;  %v1305_v27 = vrot.slane %v1303_v34, 5 }
  0xf6   : > { %1829 = vrot.lane.b32.xlu1 %v7720_v0, %s8427_s13  ;;  %v9461_v10 = vpop.permute.xlu0 %1959 }
  0xf8   : > { %v9463_v12 = vpop.permute.xlu1 %2027  ;;  %1751 = vrot.lane.b32.xlu0 %v7705_v59, %s8426_s12 }
  0xfa   : > { %2105 = vrot.lane.b32.xlu1 %v7720_v0, %s8435_s29  ;;  %v9471_v46 = vpop.permute.xlu0 %1994 }
  0xfc   : > { %v9473_v55 = vpop.permute.xlu1 %2062  ;;  %2072 = vrot.lane.b32.xlu0 %v7705_v59, %s8434_s20 }
  0xfe   : > { %1864 = vrot.lane.b32.xlu1 %v9438_v11, %s8428_s14  ;;  %v9478_v14 = vpop.permute.xlu0 %2029 }
 0x100   : > { %v9480_v0 = vpop.permute.xlu1 %2064  ;;  %1831 = vrot.lane.b32.xlu0 %v7721_v43, %s8427_s13 }
 0x102   : > { %2140 = vrot.lane.b32.xlu1 %v9438_v11, %s8436_s23  ;;  %v9485_v58 = vpop.permute.xlu0 %1821  ;;  %v1120_v11 = vrot.slane %v8386_v36, 5  ;;  %v13414_v36 = vshll.u32 %v8775_v52, 16 }
 0x104   : > { %v9487_v42 = vpop.permute.xlu1 %1823  ;;  %2107 = vrot.lane.b32.xlu0 %v7721_v43, %s8435_s29  ;;  %v1121_v18 = vsel %vm9002_vm5, %v1119_v28, %v1120_v11  ;;  %v7666_v11 = vcombine.low %v8387_v17, %v8388_v22 }
 0x105   : > { %v9539_v9 = vcombine.low %v1118_v26, %v1121_v18  ;;  %v2275_v26 = vsel %vm13300_vm9, %v9129_v61, %v9283_v16 }
 0x106   : > { %1899 = vrot.lane.b32.xlu1 %v8768_v15, %s8429_s15  ;;  %v9496_v4 = vpop.permute.xlu0 %2097 }
 0x108   : > { %v9498_v53 = vpop.permute.xlu1 %2099  ;;  %1866 = vrot.lane.b32.xlu0 %v9494_v63, %s8428_s14 }
 0x10a   : > { %2175 = vrot.lane.b32.xlu1 %v8768_v15, %s8437_s9  ;;  %v9504_v41 = vpop.permute.xlu0 %1856  ;;  %v13412_v15 = vshrl.u32 %v8759_v60, 16  ;;  %v1296_v60 = vor.u32 %v1295_v21, %v1294_v1  ;;  %v2272_v1 = vsel %vm13300_vm9, %v7666_v11, %v9269_v7 }
 0x10b   : > { %v2320_v18 = vsel %vm13302_vm10, %v2272_v1, %v9379_v32  ;;  %v8389_v32 = vld [vmem:[%s8501_s10 + $0x6c] sm:$0xf] }
 0x10c   : > { %v9506_v6 = vpop.permute.xlu1 %1858  ;;  %2142 = vrot.lane.b32.xlu0 %v9494_v63, %s8436_s23  ;;  %v1298_v45 = vrot.slane %v13412_v15, 5  ;;  %v1306_v15 = vrot.slane %v13414_v36, 6  ;;  %v1297_v21 = vrot.slane %v1296_v60, 4  ;;  %v2353_v60 = vsel %vm13301_vm11, %v2320_v18, %v9401_v25 }
 0x10e   : > { %1934 = vrot.lane.b32.xlu1 %v7705_v59, %s8430_s16  ;;  %v9520_v62 = vpop.permute.xlu0 %2132  ;;  %v1300_v38 = vor.u32 %v1299_v13, %v1298_v45  ;;  %v1307_v34 = vor.u32 %v1306_v15, %v1305_v27  ;;  %v2386_v27 = vsel %vm13303_vm12, %v2353_v60, %v9409_v2 }
 0x10f   : > { %v2419_v25 = vsel %vm13299_vm13, %v2386_v27, %v9415_v47 }
 0x110   : > { %v9522_v29 = vpop.permute.xlu1 %2134  ;;  %1901 = vrot.lane.b32.xlu0 %v8865_v44, %s8429_s15  ;;  %v1302_v45 = vrot.slane %v1300_v38, 4  ;;  %v2452_v2 = vsel %vm13298_vm14, %v2419_v25, %v9422_v33 }
 0x111   : > { %v2485_v11 = vsel %vm2483_vm15, %v2452_v2, %v9442_v40 }
 0x112   : > { %2210 = vrot.lane.b32.xlu1 %v7705_v59, %s8438_s24  ;;  %v9533_v23 = vpop.permute.xlu0 %1891  ;;  %v1301_v59 = vsel %vm9090_vm8, %v1297_v21, %v1300_v38  ;;  %v1308_v28 = vsel %vm9090_vm8, %v1302_v45, %v1307_v34  ;;  %v2518_v21 = vsel %vm2516_vm0, %v2485_v11, %v9456_v20  ;;  %v7656_v45 = vrot.slane %v8389_v32, 9 }
 0x113   : > { %v9576_v16 = vcombine.low %v1301_v59, %v1308_v28  ;;  %v2551_v40 = vsel %vm13316_vm1, %v2518_v21, %v9463_v12  ;;  %v8391_v59 = vld [vmem:[%s8501_s10 + $0x74] sm:$0x3] }
 0x114   : > { %v9535_v24 = vpop.permute.xlu1 %1893  ;;  %2177 = vrot.lane.b32.xlu0 %v8865_v44, %s8437_s9  ;;  %v1127_v28 = vrot.slane %v8391_v59, 5 }
 0x116   : > { %1969 = vrot.lane.b32.xlu1 %v7721_v43, %s8431_s17  ;;  %v9544_v52 = vpop.permute.xlu0 %2167 }
 0x118   : > { %v9546_v13 = vpop.permute.xlu1 %2169  ;;  %1936 = vrot.lane.b32.xlu0 %v9539_v9, %s8430_s16 }
 0x11a   : > { %2245 = vrot.lane.b32.xlu1 %v7721_v43, %s8439_s25  ;;  %v9562_v7 = vpop.permute.xlu0 %1926  ;;  %v2322_v43 = vsel %vm13302_vm10, %v2275_v26, %v9360_v35  ;;  %v8390_v35 = vld [vmem:[%s8501_s10 + $0x70] sm:$0xf]  ;;  %v13415_v26 = vshrl.u32 %v8731_v48, 16 }
 0x11b   : > { %v2355_v61 = vsel %vm13301_vm11, %v2322_v43, %v9413_v56  ;;  %v9580_v36 = vcombine.low %v8389_v32, %v8390_v35  ;;  %v1124_v22 = vrot.slane %v8390_v35, 5  ;;  %v1318_v32 = vshrl.u32 %v8391_v59, 16 }
 0x11c   : > { %v9568_v38 = vpop.permute.xlu1 %1928  ;;  %2212 = vrot.lane.b32.xlu0 %v9539_v9, %s8438_s24  ;;  %v2388_v15 = vsel %vm13303_vm12, %v2355_v61, %v9420_v39 }
 0x11d   : > { %v2421_v56 = vsel %vm13299_vm13, %v2388_v15, %v9440_v5  ;;  %vm13309_vm13 = vcmask 982016   ;;  %v1126_v34 = vrot.slane %v1124_v22, 4  ;;  %v1320_v11 = vrot.slane %v1318_v32, 5 }
 0x11e   : > { %2004 = vrot.lane.b32.xlu1 %v9494_v63, %s8432_s18  ;;  %v2203_v17 = vpop.permute.xlu0 %2202  ;;  %v2454_v47 = vsel %vm13298_vm14, %v2421_v56, %v9454_v31  ;;  %vm13313_vm14 = vcmask 916480   ;;  %v2584_v31 = vsel %vm2582_vm3, %v2551_v40, %v9473_v55  ;;  %v1309_v55 = vrot.slane %v13415_v26, 5  ;;  %v13421_v40 = vld [vmem:[#allocation12_spill] sm:$0xff] }
 0x11f   : > { %v2487_v33 = vsel %vm2483_vm15, %v2454_v47, %v9461_v10  ;;  %v13419_v47 = vld [vmem:[#allocation5_spill] sm:$0xff] }
 0x120   : > { %v2205_v39 = vpop.permute.xlu1 %2204  ;;  %1971 = vrot.lane.b32.xlu0 %v9576_v16, %s8431_s17  ;;  %v2520_v5 = vsel %vm2516_vm0, %v2487_v33, %v9471_v46  ;;  %v2617_v46 = vsel %vm2615_vm4, %v2584_v31, %v9496_v4  ;;  %v13417_v4 = vshrl.u32 %v8734_v54, 16 }
 0x121   : > { %v2553_v20 = vsel %vm13316_vm1, %v2520_v5, %v9478_v14  ;;  %v2650_v18 = vsel %vm13315_vm6, %v2617_v46, %v9520_v62 }
 0x122   : > { %2006 = vrot.lane.b32.xlu1 %v9580_v36, %s8432_s18  ;;  %v9612_v10 = vpop.permute.xlu0 %1961  ;;  %v2586_v12 = vsel %vm2582_vm3, %v2553_v20, %v9480_v0  ;;  %v13416_v0 = vshll.u32 %v8731_v48, 16  ;;  %v1313_v60 = vrot.slane %v13417_v4, 5  ;;  %v2683_v61 = vsel %vm13314_vm7, %v2650_v18, %v9544_v52  ;;  %v8392_v18 = vld [vmem:[%s8501_s10 + $0x78] sm:$0xf] }
 0x123   : > { %v2619_v14 = vsel %vm2615_vm4, %v2586_v12, %v9498_v53  ;;  %v13418_v53 = vshll.u32 %v8734_v54, 16  ;;  %v2716_v35 = vsel %vm13313_vm14, %v2683_v61, %v2203_v17  ;;  %v1125_v54 = vsel %vm9002_vm5, %v7656_v45, %v1124_v22 }
 0x124   : > { %v9618_v1 = vpop.permute.xlu1 %1963  ;;  %2247 = vrot.lane.b32.xlu0 %v9576_v16, %s8439_s25  ;;  %v1310_v43 = vrot.slane %v13416_v0, 6  ;;  %v2652_v27 = vsel %vm13315_vm6, %v2619_v14, %v9522_v29  ;;  %v8393_v0 = vld [vmem:[%s8501_s10 + $0x7c] sm:$0xf] }
 0x125   : > { %v1314_v62 = vrot.slane %v13418_v53, 6  ;;  %v2685_v48 = vsel %vm13314_vm7, %v2652_v27, %v9546_v13  ;;  %v1128_v13 = vsel %vm9002_vm5, %v1126_v34, %v1127_v28  ;;  %v1131_v27 = vrot.slane %v8393_v0, 5 }
 0x126   : > { %1753 = vrot.lane.b32.xlu1 %v9539_v9, %s8426_s12  ;;  %v2238_v25 = vpop.permute.xlu0 %2237  ;;  %v2718_v15 = vsel %vm13313_vm14, %v2685_v48, %v2205_v39  ;;  %v1311_v56 = vor.u32 %v1310_v43, %v1309_v55  ;;  %v13420_v39 = vshll.u32 %v13419_v47, 16  ;;  %v7707_v22 = vcombine.low %v1125_v54, %v1128_v13  ;;  %v8394_v48 = vld [vmem:[%s8501_s10 + $0x80] sm:$0x3] }
 0x127   : > { %v2749_v29 = vsel %vm13309_vm13, %v2716_v35, %v2238_v25  ;;  %v1315_v17 = vor.u32 %v1314_v62, %v1313_v60  ;;  %v9699_v43 = vcombine.low %v8392_v18, %v8393_v0  ;;  %v7657_v62 = vrot.slane %v8392_v18, 9  ;;  %v13422_v25 = vld [vmem:[#allocation9_spill] sm:$0xff]  ;;  %v13425_v54 = vld [vmem:[#allocation10_spill] sm:$0xff]  ;;  %v13429_v18 = vld [vmem:[#allocation11_spill] sm:$0xff] }
 0x128   : > { %v2240_v2 = vpop.permute.xlu1 %2239  ;;  %2039 = vrot.lane.b32.xlu0 %v8865_v44, %s8433_s19  ;;  %8137 = vmatprep.mubr.bf16.mxu0 %v2749_v29  ;;  %v1321_v21 = vrot.slane %v13420_v39, 6  ;;  %v1312_v5 = vrot.slane %v1311_v56, 4  ;;  %v1133_v32 = vrot.slane %v1131_v27, 4  ;;  %v1134_v35 = vrot.slane %v8394_v48, 5 }
 0x129   : > { %v2752_v52 = vsel %vm13309_vm13, %v2718_v15, %v2240_v2  ;;  %v13423_v15 = vshrl.u32 %v13422_v25, 16  ;;  %v13424_v2 = vshll.u32 %v13422_v25, 16  ;;  %v13426_v13 = vshrl.u32 %v13425_v54, 16 }
 0x12a   : > { %2074 = vrot.lane.b32.xlu1 %v9539_v9, %s8434_s20  ;;  %8138 = vmatmul.mubr.bf16.vlgmr.msra.gmra.mrb[0].mxu0 %v2752_v52  ;;  %v9657_v44 = vpop.permute.xlu0 %1996  ;;  %v1317_v9 = vrot.slane %v1315_v17, 4  ;;  %v1322_v31 = vor.u32 %v1321_v21, %v1320_v11  ;;  %v1316_v34 = vsel %vm9090_vm8, %v1312_v5, %v1315_v17  ;;  %v13427_v17 = vshll.u32 %v13425_v54, 16 }
 0x12b   : > { %v1324_v29 = vrot.slane %v13423_v15, 5  ;;  %v1325_v52 = vrot.slane %v13424_v2, 6  ;;  %v1328_v56 = vrot.slane %v13426_v13, 5  ;;  %v1333_v47 = vshrl.u32 %v8394_v48, 16 }
 0x12c   : > { %v9659_v33 = vpop.permute.xlu1 %2031  ;;  %2041 = vrot.lane.b32.xlu0 %v13421_v40, %s8433_s19  ;;  %v1323_v12 = vsel %vm9090_vm8, %v1317_v9, %v1322_v31  ;;  %v1329_v11 = vrot.slane %v13427_v17, 6  ;;  %v1132_v5 = vsel %vm9002_vm5, %v7657_v62, %v1131_v27  ;;  %v1135_v9 = vsel %vm9002_vm5, %v1133_v32, %v1134_v35 }
 0x12d   : > { %v7723_v28 = vcombine.low %v1316_v34, %v1323_v12  ;;  %v1326_v31 = vor.u32 %v1325_v52, %v1324_v29  ;;  %v1335_v12 = vrot.slane %v1333_v47, 5  ;;  %v13430_v0 = vshll.u32 %v13429_v18, 16  ;;  %v8395_v47 = vld [vmem:[%s8501_s10 + $0x84] sm:$0xf] }
 0x12e   : > { %1833 = vrot.lane.b32.xlu1 %v9576_v16, %s8427_s13  ;;  %v9665_v20 = vpop.permute.xlu0 %1998  ;;  %v1330_v34 = vor.u32 %v1329_v11, %v1328_v56  ;;  %v9740_v2 = vcombine.low %v1132_v5, %v1135_v9  ;;  %v2278_v27 = vsel %vm13300_vm9, %v9151_v30, %v9258_v49  ;;  %v2281_v35 = vsel %vm13300_vm9, %v9186_v37, %v9273_v51  ;;  %v8396_v5 = vld [vmem:[%s8501_s10 + $0x88] sm:$0xf] }
 0x12f   : > { %v1336_v48 = vrot.slane %v13430_v0, 6  ;;  %v2324_v29 = vsel %vm13302_vm10, %v2278_v27, %v9389_v50  ;;  %v2326_v54 = vsel %vm13302_vm10, %v2281_v35, %v9377_v57  ;;  %vm13431_vm9 = vcmask 326656  }
 0x130   : > { %v9667_v45 = vpop.permute.xlu1 %2066  ;;  %1755 = vrot.lane.b32.xlu0 %v7707_v22, %s8426_s12  ;;  %v1332_v62 = vrot.slane %v1330_v34, 4  ;;  %v2357_v30 = vsel %vm13301_vm11, %v2324_v29, %v9485_v58  ;;  %v2359_v13 = vsel %vm13301_vm11, %v2326_v54, %v9487_v42  ;;  %vm13432_vm11 = vmmov %vm13431_vm9  ;;  %vm13433_vm10 = vcmask 392192  }
 0x131   : > { %v1337_v32 = vor.u32 %v1336_v48, %v1335_v12  ;;  %v2390_v56 = vsel %vm13303_vm12, %v2357_v30, %v9504_v41  ;;  %v2392_v37 = vsel %vm13303_vm12, %v2359_v13, %v9506_v6  ;;  %vm13434_vm12 = vmmov %vm13433_vm10  ;;  %v9802_v9 = vcombine.low %v8395_v47, %v8396_v5  ;;  %v13439_v30 = vld [vmem:[#allocation7_spill] sm:$0xff] }
 0x132   : > { %2109 = vrot.lane.b32.xlu1 %v9576_v16, %s8435_s29  ;;  %v9676_v46 = vpop.permute.xlu0 %2033  ;;  %v2423_v51 = vsel %vm13431_vm9, %v2390_v56, %v9533_v23  ;;  %v2425_v58 = vsel %vm13432_vm11, %v2392_v37, %v9535_v24  ;;  %v7658_v27 = vrot.slane %v8395_v47, 9  ;;  %v13440_v13 = vshrl.u32 %v13439_v30, 16 }
 0x133   : > { %v1338_v50 = vsel %vm9090_vm8, %v1332_v62, %v1337_v32  ;;  %v2456_v42 = vsel %vm13433_vm10, %v2423_v51, %v9562_v7  ;;  %v2458_v23 = vsel %vm13434_vm12, %v2425_v58, %v9568_v38  ;;  %13435 = vst [vmem:[#allocation5_spill] sm:$0xff] %v9802_v9  ;;  %v13436_v32 = vld [vmem:[#allocation6_spill] sm:$0xff]  ;;  %v13441_v37 = vshll.u32 %v13439_v30, 16 }
 0x134   : > { %v9678_v59 = vpop.permute.xlu1 %2068  ;;  %2076 = vrot.lane.b32.xlu0 %v7707_v22, %s8434_s20  ;;  %v2489_v6 = vsel %vm2483_vm15, %v2456_v42, %v9612_v10  ;;  %v2491_v17 = vsel %vm2483_vm15, %v2458_v23, %v9618_v1  ;;  %v13437_v35 = vshrl.u32 %v13436_v32, 16  ;;  %v13438_v29 = vshll.u32 %v13436_v32, 16 }
 0x135   : > { %v2522_v11 = vsel %vm2516_vm0, %v2489_v6, %v9657_v44  ;;  %v2524_v38 = vsel %vm2516_vm0, %v2491_v17, %v9665_v20  ;;  %v1343_v56 = vrot.slane %v13440_v13, 5  ;;  %v1344_v51 = vrot.slane %v13441_v37, 6  ;;  %v13442_v17 = vld [vmem:[#allocation8_spill] sm:$0xff] }
 0x136   : > { %1868 = vrot.lane.b32.xlu1 %v9580_v36, %s8428_s14  ;;  %v9683_v26 = vpop.permute.xlu0 %1825  ;;  %v2555_v7 = vsel %vm13316_vm1, %v2522_v11, %v9659_v33  ;;  %v2557_v1 = vsel %vm13316_vm1, %v2524_v38, %v9676_v46  ;;  %v1340_v54 = vrot.slane %v13438_v29, 6  ;;  %v13443_v11 = vshll.u32 %v13442_v17, 16 }
 0x137   : > { %v2588_v10 = vsel %vm2582_vm3, %v2555_v7, %v9667_v45  ;;  %v2590_v33 = vsel %vm2582_vm3, %v2557_v1, %v9678_v59  ;;  %v1345_v6 = vor.u32 %v1344_v51, %v1343_v56  ;;  %v13449_v51 = vld [vmem:[#allocation17_spill] sm:$0xff]  ;;  %vm13453_vm9 = vcmask 64512  }
 0x138   : > { %v9685_v16 = vpop.permute.xlu1 %1827  ;;  %1835 = vrot.lane.b32.xlu0 %v7723_v28, %s8427_s13  ;;  %v1351_v7 = vrot.slane %v13443_v11, 6  ;;  %vm13455_vm10 = vcmask 130048   ;;  %vm13456_vm11 = vcmask 195584   ;;  %vm13458_vm12 = vcmask 261120  }
 0x13a   : > { %2144 = vrot.lane.b32.xlu1 %v9580_v36, %s8436_s23  ;;  %v9690_v55 = vpop.permute.xlu0 %2101 }
 0x13b   : > { %v2621_v20 = vsel %vm2615_vm4, %v2588_v10, %v9690_v55 }
 0x13c   : > { %v9692_v14 = vpop.permute.xlu1 %2103  ;;  %2111 = vrot.lane.b32.xlu0 %v7723_v28, %s8435_s29 }
 0x13d   : > { %v2623_v45 = vsel %vm2615_vm4, %v2590_v33, %v9692_v14 }
 0x13e   : > { %1903 = vrot.lane.b32.xlu1 %v13421_v40, %s8429_s15  ;;  %v9701_v4 = vpop.permute.xlu0 %1860 }
 0x140   : > { %v9703_v60 = vpop.permute.xlu1 %1862  ;;  %1870 = vrot.lane.b32.xlu0 %v9699_v43, %s8428_s14 }
 0x142   : > { %2179 = vrot.lane.b32.xlu1 %v13421_v40, %s8437_s9  ;;  %v9709_v61 = vpop.permute.xlu0 %2136  ;;  %v13428_v40 = vld [vmem:[#allocation21_spill] sm:$0xff] }
 0x143   : > { %v2654_v46 = vsel %vm13315_vm6, %v2621_v20, %v9709_v61 }
 0x144   : > { %v9711_v53 = vpop.permute.xlu1 %2138  ;;  %2146 = vrot.lane.b32.xlu0 %v9699_v43, %s8436_s23 }
 0x145   : > { %v2656_v12 = vsel %vm13315_vm6, %v2623_v45, %v9711_v53 }
 0x146   : > { %1938 = vrot.lane.b32.xlu1 %v7707_v22, %s8430_s16  ;;  %v9725_v39 = vpop.permute.xlu0 %1895 }
 0x148   : > { %v9727_v21 = vpop.permute.xlu1 %1897  ;;  %1905 = vrot.lane.b32.xlu0 %v13428_v40, %s8429_s15 }
 0x14a   : > { %2214 = vrot.lane.b32.xlu1 %v7707_v22, %s8438_s24  ;;  %v2172_v25 = vpop.permute.xlu0 %2171  ;;  %v1327_v22 = vrot.slane %v1326_v31, 4 }
 0x14b   : > { %v2687_v59 = vsel %vm13314_vm7, %v2654_v46, %v2172_v25 }
 0x14c   : > { %v2174_v15 = vpop.permute.xlu1 %2173  ;;  %2181 = vrot.lane.b32.xlu0 %v13428_v40, %s8437_s9  ;;  %v1331_v57 = vsel %vm9090_vm8, %v1327_v22, %v1330_v34  ;;  %v1138_v34 = vrot.slane %v8396_v5, 5  ;;  %v8397_v22 = vld [vmem:[%s8501_s10 + $0x8c] sm:$0x3]  ;;  %v1347_v5 = vrot.slane %v1345_v6, 4 }
 0x14d   : > { %v7724_v24 = vcombine.low %v1331_v57, %v1338_v50  ;;  %v2689_v55 = vsel %vm13314_vm7, %v2656_v12, %v2174_v15  ;;  %v1141_v62 = vrot.slane %v8397_v22, 5  ;;  %v1339_v15 = vrot.slane %v13437_v35, 5 }
 0x14e   : > { %1973 = vrot.lane.b32.xlu1 %v7723_v28, %s8431_s17  ;;  %v9751_v52 = vpop.permute.xlu0 %1930  ;;  %v1140_v25 = vrot.slane %v1138_v34, 4  ;;  %v1348_v57 = vshrl.u32 %v8397_v22, 16  ;;  %v1139_v42 = vsel %vm9002_vm5, %v7658_v27, %v1138_v34 }
 0x14f   : > { %v1341_v23 = vor.u32 %v1340_v54, %v1339_v15  ;;  %v8400_v15 = vld [vmem:[%s8501_s10 + $0x98] sm:$0x3]  ;;  %v13446_v54 = vld [vmem:[#allocation16_spill] sm:$0xff] }
 0x150   : > { %v9757_v49 = vpop.permute.xlu1 %1932  ;;  %1940 = vrot.lane.b32.xlu0 %v9740_v2, %s8430_s16  ;;  %v1148_v29 = vrot.slane %v8400_v15, 5  ;;  %v13447_v30 = vshrl.u32 %v13446_v54, 16  ;;  %v13448_v56 = vshll.u32 %v13446_v54, 16  ;;  %v13459_v54 = vld [vmem:[#allocation19_spill] sm:$0xff] }
 0x151   : > { %v1342_v47 = vrot.slane %v1341_v23, 4 }
 0x152   : > { %2249 = vrot.lane.b32.xlu1 %v7723_v28, %s8439_s25  ;;  %v2207_v41 = vpop.permute.xlu0 %2206  ;;  %v1354_v13 = vrot.slane %v13447_v30, 5  ;;  %v1355_v37 = vrot.slane %v13448_v56, 6  ;;  %v13460_v30 = vshll.u32 %v13459_v54, 16 }
 0x153   : > { %v2720_v18 = vsel %vm13313_vm14, %v2687_v59, %v2207_v41  ;;  %v1142_v41 = vsel %vm9002_vm5, %v1140_v25, %v1141_v62  ;;  %v1346_v45 = vsel %vm9090_vm8, %v1342_v47, %v1345_v6  ;;  %v1363_v6 = vshrl.u32 %v8400_v15, 16 }
 0x154   : > { %v2209_v28 = vpop.permute.xlu1 %2208  ;;  %2216 = vrot.lane.b32.xlu0 %v9740_v2, %s8438_s24  ;;  %v7709_v1 = vcombine.low %v1139_v42, %v1142_v41  ;;  %v13451_v41 = vshll.u32 %v13449_v51, 16 }
 0x155   : > { %v2722_v0 = vsel %vm13313_vm14, %v2689_v55, %v2209_v28  ;;  %v1350_v28 = vrot.slane %v1348_v57, 5  ;;  %v13450_v57 = vshrl.u32 %v13449_v51, 16  ;;  %v1365_v15 = vrot.slane %v1363_v6, 5 }
 0x156   : > { %2008 = vrot.lane.b32.xlu1 %v9699_v43, %s8432_s18  ;;  %v9798_v44 = vpop.permute.xlu0 %1965  ;;  %v1359_v23 = vrot.slane %v13451_v41, 6  ;;  %v13464_v41 = vld [vmem:[#allocation34_spill] sm:$0xff] }
 0x157   : > { %v1352_v33 = vor.u32 %v1351_v7, %v1350_v28  ;;  %v1358_v42 = vrot.slane %v13450_v57, 5  ;;  %v13452_v28 = vld [vmem:[#allocation31_spill] sm:$0xff]  ;;  %v13454_v7 = vld [vmem:[#allocation46_spill] sm:$0xff] }
 0x158   : > { %v9808_v31 = vpop.permute.xlu1 %1967  ;;  %1975 = vrot.lane.b32.xlu0 %v7724_v24, %s8431_s17  ;;  %v2284_v17 = vsel %vm13453_vm9, %v13452_v28, %v9301_v3  ;;  %v1356_v3 = vor.u32 %v1355_v37, %v1354_v13  ;;  %vm13461_vm9 = vcmask 326656   ;;  %v13466_v28 = vld [vmem:[#allocation45_spill] sm:$0xff] }
 0x159   : > { %v1353_v46 = vsel %vm9090_vm8, %v1347_v5, %v1352_v33  ;;  %v13457_v33 = vld [vmem:[#allocation28_spill] sm:$0xff] }
 0x15a   : > { %2010 = vrot.lane.b32.xlu1 %v9802_v9, %s8432_s18  ;;  %v2242_v14 = vpop.permute.xlu0 %2241  ;;  %v9873_v59 = vcombine.low %v1346_v45, %v1353_v46 }
 0x15b   : > { %v2755_v61 = vsel %vm13309_vm13, %v2720_v18, %v2242_v14 }
 0x15c   : > { %v2244_v48 = vpop.permute.xlu1 %2243  ;;  %2251 = vrot.lane.b32.xlu0 %v7724_v24, %s8439_s25  ;;  %8141 = vmatprep.mubr.bf16.mxu0 %v2755_v61  ;;  %v8399_v61 = vld [vmem:[%s8501_s10 + $0x94] sm:$0xf] }
 0x15d   : > { %v2758_v53 = vsel %vm13309_vm13, %v2722_v0, %v2244_v48  ;;  %v8398_v0 = vld [vmem:[%s8501_s10 + $0x90] sm:$0xf]  ;;  %v1145_v25 = vrot.slane %v8399_v61, 5 }
 0x15e   : > { %1757 = vrot.lane.b32.xlu1 %v9740_v2, %s8426_s12  ;;  %8142 = vmatmul.mubr.bf16.gmra.mrb[4].mxu0 %v2758_v53  ;;  %v9837_v50 = vpop.permute.xlu0 %2000  ;;  %v9893_v48 = vcombine.low %v8398_v0, %v8399_v61  ;;  %v7659_v32 = vrot.slane %v8398_v0, 9  ;;  %v1360_v61 = vor.u32 %v1359_v23, %v1358_v42 }
 0x15f   : > { %v1147_v35 = vrot.slane %v1145_v25, 4 }
 0x160   : > { %v9839_v58 = vpop.permute.xlu1 %2035  ;;  %2043 = vrot.lane.b32.xlu0 %v13428_v40, %s8433_s19  ;;  %v13444_v40 = vld [vmem:[#allocation18_spill] sm:$0xff]  ;;  %13445 = vst [vmem:[#allocation12_spill] sm:$0xff] %v9893_v48  ;;  %v1146_v45 = vsel %vm9002_vm5, %v7659_v32, %v1145_v25 }
 0x161   : > { %v1149_v46 = vsel %vm9002_vm5, %v1147_v35, %v1148_v29  ;;  %v1362_v29 = vrot.slane %v1360_v61, 4 }
 0x162   : > { %2078 = vrot.lane.b32.xlu1 %v9740_v2, %s8434_s20  ;;  %v9851_v38 = vpop.permute.xlu0 %2002 }
 0x164   : > { %v9853_v10 = vpop.permute.xlu1 %2070  ;;  %2045 = vrot.lane.b32.xlu0 %v13444_v40, %s8433_s19 }
 0x166   : > { %1837 = vrot.lane.b32.xlu1 %v7724_v24, %s8427_s13  ;;  %v9858_v2 = vpop.permute.xlu0 %2037 }
 0x168   : > { %v9860_v20 = vpop.permute.xlu1 %1829  ;;  %1759 = vrot.lane.b32.xlu0 %v7709_v1, %s8426_s12 }
 0x16a   : > { %2113 = vrot.lane.b32.xlu1 %v7724_v24, %s8435_s29  ;;  %v9868_v34 = vpop.permute.xlu0 %1751 }
 0x16c   : > { %v9870_v12 = vpop.permute.xlu1 %2105  ;;  %2080 = vrot.lane.b32.xlu0 %v7709_v1, %s8434_s20 }
 0x16e   : > { %1872 = vrot.lane.b32.xlu1 %v9802_v9, %s8428_s14  ;;  %v9877_v24 = vpop.permute.xlu0 %2072 }
 0x170   : > { %v9879_v55 = vpop.permute.xlu1 %1864  ;;  %1839 = vrot.lane.b32.xlu0 %v9873_v59, %s8427_s13 }
 0x172   : > { %2148 = vrot.lane.b32.xlu1 %v9802_v9, %s8436_s23  ;;  %v9885_v18 = vpop.permute.xlu0 %1831 }
 0x174   : > { %v2141_v14 = vpop.permute.xlu1 %2140  ;;  %2115 = vrot.lane.b32.xlu0 %v9873_v59, %s8435_s29 }
 0x176   : > { %1907 = vrot.lane.b32.xlu1 %v13444_v40, %s8429_s15  ;;  %v9895_v27 = vpop.permute.xlu0 %2107 }
 0x178   : > { %v9897_v53 = vpop.permute.xlu1 %1899  ;;  %1874 = vrot.lane.b32.xlu0 %v9893_v48, %s8428_s14 }
 0x17a   : > { %2183 = vrot.lane.b32.xlu1 %v13444_v40, %s8437_s9  ;;  %v9903_v22 = vpop.permute.xlu0 %1866  ;;  %v2328_v40 = vsel %vm13455_vm10, %v2284_v17, %v13454_v7  ;;  %vm13462_vm10 = vcmask 392192  }
 0x17b   : > { %v2361_v5 = vsel %vm13456_vm11, %v2328_v40, %v9683_v26  ;;  %v1366_v26 = vrot.slane %v13460_v30, 6  ;;  %vm13465_vm11 = vcmask 64512  }
 0x17c   : > { %v2176_v62 = vpop.permute.xlu1 %2175  ;;  %2150 = vrot.lane.b32.xlu0 %v9893_v48, %s8436_s23  ;;  %v2394_v0 = vsel %vm13458_vm12, %v2361_v5, %v9701_v4  ;;  %v9949_v4 = vcombine.low %v1146_v45, %v1149_v46  ;;  %vm13467_vm12 = vcmask 130048  }
 0x17d   : > { %v2427_v56 = vsel %vm13461_vm9, %v2394_v0, %v9725_v39  ;;  %v1357_v39 = vrot.slane %v1356_v3, 4  ;;  %v1367_v13 = vor.u32 %v1366_v26, %v1365_v15  ;;  %vm13468_vm9 = vcmask 195584   ;;  %v8401_v0 = vld [vmem:[%s8501_s10 + $0x9c] sm:$0xf] }
 0x17e   : > { %1942 = vrot.lane.b32.xlu1 %v7709_v1, %s8430_s16  ;;  %v9920_v11 = vpop.permute.xlu0 %2142  ;;  %v2460_v25 = vsel %vm13462_vm10, %v2427_v56, %v9751_v52  ;;  %vm13469_vm10 = vcmask 261120  }
 0x17f   : > { %v2493_v35 = vsel %vm2483_vm15, %v2460_v25, %v9798_v44 }
 0x180   : > { %v9924_v47 = vpop.permute.xlu1 %1934  ;;  %1909 = vrot.lane.b32.xlu0 %v13457_v33, %s8429_s15 }
 0x182   : > { %2218 = vrot.lane.b32.xlu1 %v7709_v1, %s8438_s24  ;;  %v9941_v51 = vpop.permute.xlu0 %1901  ;;  %v2526_v1 = vsel %vm2516_vm0, %v2493_v35, %v9837_v50  ;;  %v13463_v50 = vld [vmem:[#allocation32_spill] sm:$0xff] }
 0x183   : > { %v2559_v52 = vsel %vm13316_vm1, %v2526_v1, %v9839_v58  ;;  %v2287_v23 = vsel %vm13465_vm11, %v13464_v41, %v13463_v50  ;;  %v1361_v58 = vsel %vm9090_vm8, %v1357_v39, %v1360_v61  ;;  %vm13470_vm11 = vcmask 326656   ;;  %v8402_v61 = vld [vmem:[%s8501_s10 + $0xa0] sm:$0xf]  ;;  %v13473_v39 = vld [vmem:[#allocation13_spill] sm:$0xff] }
 0x184   : > { %v2211_v32 = vpop.permute.xlu1 %2210  ;;  %2185 = vrot.lane.b32.xlu0 %v13457_v33, %s8437_s9  ;;  %v2592_v44 = vsel %vm2582_vm3, %v2559_v52, %v9853_v10  ;;  %v1368_v10 = vsel %vm9090_vm8, %v1362_v29, %v1367_v13  ;;  %v1152_v30 = vrot.slane %v8402_v61, 5  ;;  %v13474_v29 = vshrl.u32 %v13473_v39, 16 }
 0x185   : > { %v2625_v42 = vsel %vm2615_vm4, %v2592_v44, %v9870_v12  ;;  %v2330_v12 = vsel %vm13467_vm12, %v2287_v23, %v13466_v28  ;;  %v7726_v45 = vcombine.low %v1361_v58, %v1368_v10  ;;  %vm13471_vm12 = vcmask 392192  }
 0x186   : > { %1977 = vrot.lane.b32.xlu1 %v9873_v59, %s8431_s17  ;;  %v2178_v37 = vpop.permute.xlu0 %2177  ;;  %v2658_v6 = vsel %vm13315_vm6, %v2625_v42, %v2141_v14  ;;  %v2363_v14 = vsel %vm13468_vm9, %v2330_v12, %v9685_v16  ;;  %v1369_v13 = vrot.slane %v13474_v29, 5  ;;  %vm13491_vm9 = vcmask 64512  }
 0x187   : > { %v2691_v17 = vsel %vm13314_vm7, %v2658_v6, %v2176_v62  ;;  %v2396_v5 = vsel %vm13469_vm10, %v2363_v14, %v9703_v60  ;;  %v9996_v60 = vcombine.low %v8401_v0, %v8402_v61  ;;  %vm13493_vm10 = vcmask 130048  }
 0x188   : > { %v9959_v57 = vpop.permute.xlu1 %1969  ;;  %1944 = vrot.lane.b32.xlu0 %v9949_v4, %s8430_s16  ;;  %v2429_v62 = vsel %vm13470_vm11, %v2396_v5, %v9727_v21  ;;  %vm13494_vm11 = vcmask 195584  }
 0x189   : > { %v2462_v16 = vsel %vm13471_vm12, %v2429_v62, %v9757_v49  ;;  %13472 = vst [vmem:[#allocation9_spill] sm:$0xff] %v9996_v60  ;;  %vm13496_vm12 = vcmask 261120  }
 0x18a   : > { %2253 = vrot.lane.b32.xlu1 %v9873_v59, %s8439_s25  ;;  %v9978_v7 = vpop.permute.xlu0 %1936  ;;  %v2724_v59 = vsel %vm13313_vm14, %v2691_v17, %v2211_v32  ;;  %v2495_v15 = vsel %vm2483_vm15, %v2462_v16, %v9808_v31  ;;  %v7660_v32 = vrot.slane %v8401_v0, 9  ;;  %v13481_v16 = vld [vmem:[#allocation25_spill] sm:$0xff] }
 0x18b   : > { %v2528_v21 = vsel %vm2516_vm0, %v2495_v15, %v9851_v38  ;;  %v1154_v38 = vrot.slane %v1152_v30, 4 }
 0x18c   : > { %v2246_v40 = vpop.permute.xlu1 %2245  ;;  %2220 = vrot.lane.b32.xlu0 %v9949_v4, %s8438_s24  ;;  %v2561_v49 = vsel %vm13316_vm1, %v2528_v21, %v9858_v2  ;;  %v8403_v2 = vld [vmem:[%s8501_s10 + $0xa4] sm:$0x3] }
 0x18d   : > { %v2761_v46 = vsel %vm13309_vm13, %v2724_v59, %v2246_v40  ;;  %v2594_v26 = vsel %vm2582_vm3, %v2561_v49, %v9877_v24  ;;  %v1155_v1 = vrot.slane %v8403_v2, 5  ;;  %v13475_v24 = vshll.u32 %v13473_v39, 16  ;;  %v13479_v40 = vld [vmem:[#allocation15_spill] sm:$0xff] }
 0x18e   : > { %2012 = vrot.lane.b32.xlu1 %v9893_v48, %s8432_s18  ;;  %8145 = vmatprep.mubr.bf16.mxu0 %v2761_v46  ;;  %v2213_v3 = vpop.permute.xlu0 %2212  ;;  %v2627_v31 = vsel %vm2615_vm4, %v2594_v26, %v9895_v27  ;;  %v13476_v27 = vld [vmem:[#allocation14_spill] sm:$0xff]  ;;  %v1378_v23 = vshrl.u32 %v8403_v2, 16  ;;  %v13480_v5 = vshll.u32 %v13479_v40, 16  ;;  %v8405_v39 = vld [vmem:[%s8501_s10 + $0xac] sm:$0xf] }
 0x18f   : > { %v2660_v35 = vsel %vm13315_vm6, %v2627_v31, %v9920_v11  ;;  %v1370_v52 = vrot.slane %v13475_v24, 6  ;;  %v13477_v42 = vshrl.u32 %v13476_v27, 16  ;;  %v13478_v11 = vshll.u32 %v13476_v27, 16  ;;  %v10346_v48 = vld [vmem:[%s8501_s10 + $0xd4] sm:$0x3] }
 0x190   : > { %v10000_v54 = vpop.permute.xlu1 %2004  ;;  %1979 = vrot.lane.b32.xlu0 %v7726_v45, %s8431_s17  ;;  %v2693_v44 = vsel %vm13314_vm7, %v2660_v35, %v2178_v37  ;;  %v1153_v37 = vsel %vm9002_vm5, %v7660_v32, %v1152_v30  ;;  %v1156_v12 = vsel %vm9002_vm5, %v1154_v38, %v1155_v1  ;;  %v1380_v59 = vrot.slane %v1378_v23, 5  ;;  %v8404_v1 = vld [vmem:[%s8501_s10 + $0xa8] sm:$0xf]  ;;  %v13483_v23 = vld [vmem:[#allocation24_spill] sm:$0xff] }
 0x191   : > { %v1373_v50 = vrot.slane %v13477_v42, 5  ;;  %v1374_v41 = vrot.slane %v13478_v11, 6  ;;  %v2726_v6 = vsel %vm13313_vm14, %v2693_v44, %v2213_v3  ;;  %v1371_v17 = vor.u32 %v1370_v52, %v1369_v13  ;;  %v8406_v11 = vld [vmem:[%s8501_s10 + $0xb0] sm:$0x3] }
 0x192   : > { %2014 = vrot.lane.b32.xlu1 %v9996_v60, %s8432_s18  ;;  %v10011_v56 = vpop.permute.xlu0 %1971  ;;  %v1381_v46 = vrot.slane %v13480_v5, 6  ;;  %v7711_v3 = vcombine.low %v1153_v37, %v1156_v12  ;;  %v10094_v29 = vcombine.low %v8404_v1, %v8405_v39  ;;  %v1159_v52 = vrot.slane %v8405_v39, 5  ;;  %v13486_v12 = vld [vmem:[#allocation26_spill] sm:$0xff] }
 0x193   : > { %v1375_v14 = vor.u32 %v1374_v41, %v1373_v50  ;;  %v1372_v0 = vrot.slane %v1371_v17, 4  ;;  %v7661_v42 = vrot.slane %v8404_v1, 9  ;;  %v1162_v41 = vrot.slane %v8406_v11, 5  ;;  %v13495_v39 = vld [vmem:[#allocation30_spill] sm:$0xff] }
 0x194   : > { %v10015_v25 = vpop.permute.xlu1 %2006  ;;  %2255 = vrot.lane.b32.xlu0 %v7726_v45, %s8439_s25  ;;  %13482 = vst [vmem:[#allocation10_spill] sm:$0xff] %v10094_v29  ;;  %v1161_v50 = vrot.slane %v1159_v52, 4  ;;  %v13487_v17 = vshrl.u32 %v13486_v12, 16  ;;  %v1393_v5 = vshrl.u32 %v8406_v11, 16 }
 0x195   : > { %v1377_v61 = vrot.slane %v1375_v14, 4  ;;  %v1376_v21 = vsel %vm9090_vm8, %v1372_v0, %v1375_v14  ;;  %v1160_v11 = vsel %vm9002_vm5, %v7661_v42, %v1159_v52 }
 0x196   : > { %1761 = vrot.lane.b32.xlu1 %v9949_v4, %s8426_s12  ;;  %v2248_v58 = vpop.permute.xlu0 %2247  ;;  %v1388_v14 = vrot.slane %v13487_v17, 5  ;;  %v1395_v17 = vrot.slane %v1393_v5, 5  ;;  %v13502_v5 = vld [vmem:[#allocation48_spill] sm:$0xff] }
 0x197   : > { %v2764_v10 = vsel %vm13309_vm13, %v2726_v6, %v2248_v58  ;;  %v13484_v6 = vshrl.u32 %v13483_v23, 16 }
 0x198   : > { %v10034_v28 = vpop.permute.xlu1 %1753  ;;  %2047 = vrot.lane.b32.xlu0 %v13457_v33, %s8433_s19  ;;  %8146 = vmatmul.mubr.bf16.gmra.mrb[8].mxu0 %v2764_v10  ;;  %v13485_v10 = vshll.u32 %v13483_v23, 16  ;;  %v1163_v23 = vsel %vm9002_vm5, %v1161_v50, %v1162_v41 }
 0x199   : > { %v1384_v58 = vrot.slane %v13484_v6, 5 }
 0x19a   : > { %2082 = vrot.lane.b32.xlu1 %v9949_v4, %s8434_s20  ;;  %v10046_v62 = vpop.permute.xlu0 %2039  ;;  %v1382_v4 = vor.u32 %v1381_v46, %v1380_v59  ;;  %v1385_v37 = vrot.slane %v13485_v10, 6  ;;  %v13488_v59 = vshll.u32 %v13486_v12, 16  ;;  %v13489_v46 = vld [vmem:[#allocation35_spill] sm:$0xff] }
 0x19c   : > { %v10048_v33 = vpop.permute.xlu1 %2074  ;;  %2049 = vrot.lane.b32.xlu0 %v13481_v16, %s8433_s19  ;;  %v1383_v49 = vsel %vm9090_vm8, %v1377_v61, %v1382_v4  ;;  %v1389_v40 = vrot.slane %v13488_v59, 6  ;;  %v13492_v4 = vld [vmem:[#allocation47_spill] sm:$0xff]  ;;  %v1386_v6 = vor.u32 %v1385_v37, %v1384_v58 }
 0x19d   : > { %v13497_v59 = vld [vmem:[#allocation27_spill] sm:$0xff] }
 0x19e   : > { %1841 = vrot.lane.b32.xlu1 %v7726_v45, %s8427_s13  ;;  %v10053_v15 = vpop.permute.xlu0 %2041  ;;  %v1390_v12 = vor.u32 %v1389_v40, %v1388_v14 }
 0x1a0   : > { %v10055_v30 = vpop.permute.xlu1 %1833  ;;  %1763 = vrot.lane.b32.xlu0 %v7711_v3, %s8426_s12  ;;  %v1392_v41 = vrot.slane %v1390_v12, 4 }
 0x1a2   : > { %2117 = vrot.lane.b32.xlu1 %v7726_v45, %s8435_s29  ;;  %v10069_v26 = vpop.permute.xlu0 %1755  ;;  %v10074_v45 = vcombine.low %v1376_v21, %v1383_v49 }
 0x1a4   : > { %v10071_v31 = vpop.permute.xlu1 %2109  ;;  %2084 = vrot.lane.b32.xlu0 %v7711_v3, %s8434_s20 }
 0x1a6   : > { %1876 = vrot.lane.b32.xlu1 %v9996_v60, %s8428_s14  ;;  %v10078_v32 = vpop.permute.xlu0 %2076 }
 0x1a8   : > { %v10080_v38 = vpop.permute.xlu1 %1868  ;;  %1843 = vrot.lane.b32.xlu0 %v10074_v45, %s8427_s13 }
 0x1aa   : > { %2152 = vrot.lane.b32.xlu1 %v9996_v60, %s8436_s23  ;;  %v10086_v35 = vpop.permute.xlu0 %1835 }
 0x1ac   : > { %v2145_v2 = vpop.permute.xlu1 %2144  ;;  %2119 = vrot.lane.b32.xlu0 %v10074_v45, %s8435_s29 }
 0x1ae   : > { %1911 = vrot.lane.b32.xlu1 %v13481_v16, %s8429_s15  ;;  %v10096_v13 = vpop.permute.xlu0 %2111 }
 0x1b0   : > { %v10098_v24 = vpop.permute.xlu1 %1903  ;;  %1878 = vrot.lane.b32.xlu0 %v10094_v29, %s8428_s14 }
 0x1b2   : > { %2187 = vrot.lane.b32.xlu1 %v13481_v16, %s8437_s9  ;;  %v10104_v44 = vpop.permute.xlu0 %1870  ;;  %v13490_v16 = vld [vmem:[#allocation41_spill] sm:$0xff] }
 0x1b3   : > { %v2290_v0 = vsel %vm13491_vm9, %v13490_v16, %v13489_v46  ;;  %v13498_v46 = vshll.u32 %v13497_v59, 16  ;;  %vm13499_vm9 = vcmask 326656  }
 0x1b4   : > { %v2180_v27 = vpop.permute.xlu1 %2179  ;;  %2154 = vrot.lane.b32.xlu0 %v10094_v29, %s8436_s23  ;;  %v2332_v21 = vsel %vm13493_vm10, %v2290_v0, %v13492_v4  ;;  %vm13500_vm10 = vcmask 392192  }
 0x1b5   : > { %v2365_v1 = vsel %vm13494_vm11, %v2332_v21, %v9860_v20  ;;  %v1396_v20 = vrot.slane %v13498_v46, 6  ;;  %vm13503_vm11 = vcmask 64512  }
 0x1b6   : > { %1946 = vrot.lane.b32.xlu1 %v7711_v3, %s8430_s16  ;;  %v10121_v61 = vpop.permute.xlu0 %2146  ;;  %v2398_v10 = vsel %vm13496_vm12, %v2365_v1, %v9879_v55  ;;  %v10150_v55 = vcombine.low %v1160_v11, %v1163_v23  ;;  %vm13504_vm12 = vcmask 130048  }
 0x1b7   : > { %v2431_v16 = vsel %vm13499_vm9, %v2398_v10, %v9897_v53  ;;  %v1387_v53 = vrot.slane %v1386_v6, 4  ;;  %v1397_v58 = vor.u32 %v1396_v20, %v1395_v17  ;;  %vm13505_vm9 = vcmask 195584   ;;  %v8407_v17 = vld [vmem:[%s8501_s10 + $0xb4] sm:$0xf] }
 0x1b8   : > { %v10125_v49 = vpop.permute.xlu1 %1938  ;;  %1913 = vrot.lane.b32.xlu0 %v13495_v39, %s8429_s15  ;;  %v2464_v52 = vsel %vm13500_vm10, %v2431_v16, %v9924_v47  ;;  %vm13506_vm10 = vcmask 261120  }
 0x1b9   : > { %v2497_v50 = vsel %vm2483_vm15, %v2464_v52, %v9959_v57 }
 0x1ba   : > { %2222 = vrot.lane.b32.xlu1 %v7711_v3, %s8438_s24  ;;  %v10142_v0 = vpop.permute.xlu0 %1905  ;;  %v2530_v3 = vsel %vm2516_vm0, %v2497_v50, %v10000_v54  ;;  %v13501_v54 = vld [vmem:[#allocation33_spill] sm:$0xff] }
 0x1bb   : > { %v2563_v47 = vsel %vm13316_vm1, %v2530_v3, %v10046_v62  ;;  %v2293_v4 = vsel %vm13503_vm11, %v13502_v5, %v13501_v54  ;;  %v1391_v62 = vsel %vm9090_vm8, %v1387_v53, %v1390_v12  ;;  %vm13507_vm11 = vcmask 326656   ;;  %v8409_v54 = vld [vmem:[%s8501_s10 + $0xbc] sm:$0x3] }
 0x1bc   : > { %v2215_v42 = vpop.permute.xlu1 %2214  ;;  %2189 = vrot.lane.b32.xlu0 %v13495_v39, %s8437_s9  ;;  %v2596_v57 = vsel %vm2582_vm3, %v2563_v47, %v10048_v33  ;;  %v1398_v33 = vsel %vm9090_vm8, %v1392_v41, %v1397_v58  ;;  %v1408_v5 = vshrl.u32 %v8409_v54, 16 }
 0x1bd   : > { %v2629_v40 = vsel %vm2615_vm4, %v2596_v57, %v10071_v31  ;;  %v2334_v31 = vsel %vm13504_vm12, %v2293_v4, %v9868_v34  ;;  %v10188_v10 = vcombine.low %v1391_v62, %v1398_v33  ;;  %vm13508_vm12 = vcmask 392192  }
 0x1be   : > { %1981 = vrot.lane.b32.xlu1 %v10074_v45, %s8431_s17  ;;  %v2182_v37 = vpop.permute.xlu0 %2181  ;;  %v2662_v21 = vsel %vm13315_vm6, %v2629_v40, %v2145_v2  ;;  %v2367_v2 = vsel %vm13505_vm9, %v2334_v31, %v9885_v18  ;;  %v1169_v33 = vrot.slane %v8409_v54, 5  ;;  %vm13528_vm9 = vcmask 64512  }
 0x1bf   : > { %v2695_v1 = vsel %vm13314_vm7, %v2662_v21, %v2180_v27  ;;  %v2400_v6 = vsel %vm13506_vm10, %v2367_v2, %v9903_v22  ;;  %v8408_v22 = vld [vmem:[%s8501_s10 + $0xb8] sm:$0xf]  ;;  %v7662_v21 = vrot.slane %v8407_v17, 9  ;;  %vm13529_vm10 = vcmask 130048  }
 0x1c0   : > { %v10160_v14 = vpop.permute.xlu1 %1973  ;;  %1948 = vrot.lane.b32.xlu0 %v10150_v55, %s8430_s16  ;;  %v2433_v27 = vsel %vm13507_vm11, %v2400_v6, %v9941_v51  ;;  %v10199_v59 = vcombine.low %v8407_v17, %v8408_v22  ;;  %v1166_v16 = vrot.slane %v8408_v22, 5  ;;  %v13516_v6 = vld [vmem:[#allocation23_spill] sm:$0xff]  ;;  %v13518_v22 = vld [vmem:[#allocation29_spill] sm:$0xff]  ;;  %vm13530_vm11 = vcmask 195584  }
 0x1c1   : > { %v2466_v18 = vsel %vm13508_vm12, %v2433_v27, %v9978_v7  ;;  %vm13531_vm12 = vcmask 261120  }
 0x1c2   : > { %2257 = vrot.lane.b32.xlu1 %v10074_v45, %s8439_s25  ;;  %v10179_v11 = vpop.permute.xlu0 %1940  ;;  %v2728_v45 = vsel %vm13313_vm14, %v2695_v1, %v2215_v42  ;;  %13509 = vst [vmem:[#allocation21_spill] sm:$0xff] %v10199_v59  ;;  %v2499_v46 = vsel %vm2483_vm15, %v2466_v18, %v10011_v56  ;;  %v1168_v62 = vrot.slane %v1166_v16, 4  ;;  %v1167_v18 = vsel %vm9002_vm5, %v7662_v21, %v1166_v16  ;;  %v10264_v16 = vld [vmem:[%s8501_s10 + $0xc0] sm:$0xf]  ;;  %v614_v21 = vld [vmem:[%s8501_s10 + $0xc8] sm:$0x3] }
 0x1c3   : > { %v2532_v51 = vsel %vm2516_vm0, %v2499_v46, %v10015_v25  ;;  %v13510_v25 = vld [vmem:[#allocation20_spill] sm:$0xff] }
 0x1c4   : > { %v2250_v23 = vpop.permute.xlu1 %2249  ;;  %2224 = vrot.lane.b32.xlu0 %v10150_v55, %s8438_s24  ;;  %v2565_v7 = vsel %vm13316_vm1, %v2532_v51, %v10053_v15  ;;  %v13511_v3 = vshrl.u32 %v13510_v25, 16  ;;  %v13512_v41 = vshll.u32 %v13510_v25, 16 }
 0x1c5   : > { %v2767_v34 = vsel %vm13309_vm13, %v2728_v45, %v2250_v23  ;;  %v2598_v52 = vsel %vm2582_vm3, %v2565_v7, %v10078_v32  ;;  %v13513_v32 = vld [vmem:[#allocation22_spill] sm:$0xff]  ;;  %v1410_v23 = vrot.slane %v1408_v5, 5 }
 0x1c6   : > { %2016 = vrot.lane.b32.xlu1 %v10094_v29, %s8432_s18  ;;  %8149 = vmatprep.mubr.bf16.mxu0 %v2767_v34  ;;  %v2217_v12 = vpop.permute.xlu0 %2216  ;;  %v2631_v42 = vsel %vm2615_vm4, %v2598_v52, %v10096_v13  ;;  %v1399_v53 = vrot.slane %v13511_v3, 5  ;;  %v1400_v15 = vrot.slane %v13512_v41, 6  ;;  %v13514_v47 = vshrl.u32 %v13513_v32, 16 }
 0x1c7   : > { %v2664_v58 = vsel %vm13315_vm6, %v2631_v42, %v10121_v61  ;;  %v13515_v40 = vshll.u32 %v13513_v32, 16  ;;  %v13517_v34 = vshll.u32 %v13516_v6, 16  ;;  %v10267_v42 = vld [vmem:[%s8501_s10 + $0xc4] sm:$0xf]  ;;  %v1415_v41 = vshrl.u32 %v10264_v16, 16 }
 0x1c8   : > { %v10203_v20 = vpop.permute.xlu1 %2008  ;;  %1983 = vrot.lane.b32.xlu0 %v10188_v10, %s8431_s17  ;;  %v1403_v57 = vrot.slane %v13514_v47, 5  ;;  %v2697_v4 = vsel %vm13314_vm7, %v2664_v58, %v2182_v37  ;;  %v1401_v45 = vor.u32 %v1400_v15, %v1399_v53  ;;  %v1418_v15 = vshll.u32 %v10264_v16, 16 }
 0x1c9   : > { %v1404_v13 = vrot.slane %v13515_v40, 6  ;;  %v2730_v61 = vsel %vm13313_vm14, %v2697_v4, %v2217_v12  ;;  %v1411_v27 = vrot.slane %v13517_v34, 6  ;;  %v1170_v12 = vsel %vm9002_vm5, %v1168_v62, %v1169_v33 }
 0x1ca   : > { %2018 = vrot.lane.b32.xlu1 %v10199_v59, %s8432_s18  ;;  %v10215_v56 = vpop.permute.xlu0 %1975  ;;  %v10257_v46 = vcombine.low %v1167_v18, %v1170_v12  ;;  %v1402_v51 = vrot.slane %v1401_v45, 4  ;;  %v1428_v58 = vshrl.u32 %v10267_v42, 16  ;;  %v1424_v32 = vshll.u32 %v10267_v42, 16  ;;  %v10306_v45 = vld [vmem:[%s8501_s10 + $0xd0] sm:$0xf] }
 0x1cb   : > { %v1405_v37 = vor.u32 %v1404_v13, %v1403_v57  ;;  %v1412_v52 = vor.u32 %v1411_v27, %v1410_v23  ;;  %v1420_v13 = vrot.slane %v1418_v15, 5  ;;  %v10314_v6 = vcombine.low %v10264_v16, %v10267_v42 }
 0x1cc   : > { %v10219_v50 = vpop.permute.xlu1 %2010  ;;  %2259 = vrot.lane.b32.xlu0 %v10188_v10, %s8439_s25  ;;  %v1426_v54 = vrot.slane %v1424_v32, 5  ;;  %v1430_v5 = vrot.slane %v1428_v58, 4  ;;  %v1452_v27 = vrot.slane %v1428_v58, 5  ;;  %v1453_v34 = vrot.slane %v1424_v32, 6 }
 0x1cd   : > { %v1407_v7 = vrot.slane %v1405_v37, 4  ;;  %v1406_v3 = vsel %vm9090_vm8, %v1402_v51, %v1405_v37  ;;  %v1457_v18 = vshrl.u32 %v614_v21, 16 }
 0x1ce   : > { %1765 = vrot.lane.b32.xlu1 %v10150_v55, %s8426_s12  ;;  %v2252_v31 = vpop.permute.xlu0 %2251  ;;  %v1454_v9 = vor.u32 %v1453_v34, %v1452_v27 }
 0x1cf   : > { %v2770_v1 = vsel %vm13309_vm13, %v2730_v61, %v2252_v31  ;;  %v1413_v53 = vsel %vm9090_vm8, %v1407_v7, %v1412_v52  ;;  %v1431_v61 = vor.u32 %v1430_v5, %v1426_v54  ;;  %v1434_v31 = vshll.u32 %v614_v21, 16 }
 0x1d0   : > { %v10239_v2 = vpop.permute.xlu1 %1757  ;;  %2051 = vrot.lane.b32.xlu0 %v13495_v39, %s8433_s19  ;;  %8150 = vmatmul.mubr.bf16.gmra.mrb[12].mxu0 %v2770_v1  ;;  %v10289_v40 = vcombine.low %v1406_v3, %v1413_v53  ;;  %v10303_v1 = vld [vmem:[%s8501_s10 + $0xcc] sm:$0xf]  ;;  %v1443_v53 = vrot.slane %v10267_v42, 5  ;;  %v1449_v5 = vrot.slane %v1418_v15, 6  ;;  %v13525_v42 = vshrl.u32 %v10306_v45, 16 }
 0x1d1   : > { %v1432_v7 = vrot.slane %v1431_v61, 4  ;;  %v1436_v52 = vrot.slane %v1434_v31, 5  ;;  %v13522_v12 = vshrl.u32 %v10303_v1, 16  ;;  %v13523_v61 = vshll.u32 %v10303_v1, 16 }
 0x1d2   : > { %2086 = vrot.lane.b32.xlu1 %v10150_v55, %s8434_s20  ;;  %v10251_v17 = vpop.permute.xlu0 %2043 }
 0x1d3   : > { %v1469_v29 = vrot.slane %v13523_v61, 5  ;;  %v1437_v32 = vsel %vm8548_vm2, %v1432_v7, %v1436_v52  ;;  %v7663_v61 = vrot.slane %v10264_v16, 9  ;;  %v1483_v52 = vshll.u32 %v10346_v48, 16  ;;  %v13527_v16 = vld [vmem:[#allocation37_spill] sm:$0xff] }
 0x1d4   : > { %v10253_v39 = vpop.permute.xlu1 %2078  ;;  %2053 = vrot.lane.b32.xlu0 %v13518_v22, %s8433_s19 }
 0x1d6   : > { %1845 = vrot.lane.b32.xlu1 %v10188_v10, %s8427_s13  ;;  %v10261_v55 = vpop.permute.xlu0 %2045 }
 0x1d8   : > { %v10269_v25 = vpop.permute.xlu1 %1837  ;;  %1767 = vrot.lane.b32.xlu0 %v10257_v46, %s8426_s12 }
 0x1da   : > { %2121 = vrot.lane.b32.xlu1 %v10188_v10, %s8435_s29  ;;  %v10283_v47 = vpop.permute.xlu0 %1759  ;;  %v1417_v10 = vrot.slane %v1415_v41, 4 }
 0x1db   : > { %13519 = vst [vmem:[#allocation11_spill] sm:$0xff] %v10283_v47 }
 0x1dc   : > { %v10285_v57 = vpop.permute.xlu1 %2113  ;;  %2088 = vrot.lane.b32.xlu0 %v10257_v46, %s8434_s20  ;;  %v1421_v33 = vor.u32 %v1420_v13, %v1417_v10  ;;  %v1448_v10 = vrot.slane %v1415_v41, 5  ;;  %v1479_v41 = vrot.slane %v13525_v42, 4 }
 0x1de   : > { %1880 = vrot.lane.b32.xlu1 %v10199_v59, %s8428_s14  ;;  %v10293_v4 = vpop.permute.xlu0 %2080  ;;  %v1422_v51 = vrot.slane %v1421_v33, 4  ;;  %v1466_v33 = vrot.slane %v13522_v12, 4  ;;  %v1450_v42 = vor.u32 %v1449_v5, %v1448_v10  ;;  %v1456_v5 = vrot.slane %v1454_v9, 4 }
 0x1e0   : > { %v10296_v62 = vpop.permute.xlu1 %1872  ;;  %1847 = vrot.lane.b32.xlu0 %v10289_v40, %s8427_s13  ;;  %v1427_v58 = vsel %vm8548_vm2, %v1422_v51, %v1426_v54  ;;  %v1470_v51 = vor.u32 %v1469_v29, %v1466_v33 }
 0x1e1   : > { %v10355_v54 = vcombine.low %v1427_v58, %v1437_v32 }
 0x1e2   : > { %2156 = vrot.lane.b32.xlu1 %v10199_v59, %s8436_s23  ;;  %v10308_v37 = vpop.permute.xlu0 %1839  ;;  %v13524_v59 = vshll.u32 %v10306_v45, 16 }
 0x1e3   : > { %13520 = vst [vmem:[#allocation6_spill] sm:$0xff] %v10308_v37  ;;  %v1445_v37 = vrot.slane %v1443_v53, 4 }
 0x1e4   : > { %v10310_v23 = vpop.permute.xlu1 %2148  ;;  %2123 = vrot.lane.b32.xlu0 %v10289_v40, %s8435_s29  ;;  %v1475_v60 = vrot.slane %v13524_v59, 5  ;;  %v1446_v59 = vrot.slane %v614_v21, 5  ;;  %v2296_v21 = vsel %vm13528_vm9, %v9494_v63, %v13527_v16  ;;  %v1471_v63 = vrot.slane %v1470_v51, 4 }
 0x1e5   : > { %v2336_v29 = vsel %vm13529_vm10, %v2296_v21, %v10034_v28  ;;  %vm13532_vm9 = vcmask 326656   ;;  %vm13533_vm10 = vcmask 392192  }
 0x1e6   : > { %1915 = vrot.lane.b32.xlu1 %v13518_v22, %s8429_s15  ;;  %v10324_v3 = vpop.permute.xlu0 %2115  ;;  %v1480_v7 = vor.u32 %v1479_v41, %v1475_v60  ;;  %v1447_v34 = vsel %vm9002_vm5, %v1445_v37, %v1446_v59  ;;  %v2369_v41 = vsel %vm13530_vm11, %v2336_v29, %v10055_v30  ;;  %vm13535_vm11 = vcmask 64512  }
 0x1e7   : > { %v2402_v37 = vsel %vm13531_vm12, %v2369_v41, %v10080_v38  ;;  %v10440_v41 = vld [vmem:[%s8501_s10 + $0xdc] sm:$0xf]  ;;  %vm13540_vm12 = vcmask 130048  }
 0x1e8   : > { %v10327_v13 = vpop.permute.xlu1 %1907  ;;  %1882 = vrot.lane.b32.xlu0 %v10314_v6, %s8428_s14  ;;  %v1481_v58 = vrot.slane %v1480_v7, 4  ;;  %v2435_v28 = vsel %vm13532_vm9, %v2402_v37, %v10098_v24  ;;  %v1476_v24 = vsel %vm8548_vm2, %v1471_v63, %v1475_v60  ;;  %vm13541_vm9 = vcmask 195584  }
 0x1e9   : > { %13521 = vst [vmem:[#allocation7_spill] sm:$0xff] %v10327_v13  ;;  %v1459_v13 = vrot.slane %v1457_v18, 5  ;;  %v1451_v18 = vrot.slane %v1450_v42, 4  ;;  %v2468_v30 = vsel %vm13533_vm10, %v2435_v28, %v10125_v49  ;;  %v1492_v42 = vrot.slane %v10306_v45, 5 }
 0x1ea   : > { %2191 = vrot.lane.b32.xlu1 %v13518_v22, %s8437_s9  ;;  %v10348_v12 = vpop.permute.xlu0 %1874  ;;  %v1460_v22 = vrot.slane %v1434_v31, 6  ;;  %v1444_v31 = vsel %vm9002_vm5, %v7663_v61, %v1443_v53  ;;  %v1485_v53 = vrot.slane %v1483_v52, 5  ;;  %v1506_v28 = vshrl.u32 %v10346_v48, 16 }
 0x1eb   : > { %v10389_v61 = vcombine.low %v1444_v31, %v1447_v34  ;;  %v1455_v59 = vsel %vm9090_vm8, %v1451_v18, %v1454_v9  ;;  %v10429_v34 = vld [vmem:[%s8501_s10 + $0xd8] sm:$0xf]  ;;  %v1494_v29 = vrot.slane %v1492_v42, 4  ;;  %vm13542_vm10 = vcmask 261120  }
 0x1ec   : > { %v10351_v47 = vpop.permute.xlu1 %2183  ;;  %2158 = vrot.lane.b32.xlu0 %v10314_v6, %s8436_s23  ;;  %v1461_v33 = vor.u32 %v1460_v22, %v1459_v13  ;;  %v1486_v49 = vsel %vm8548_vm2, %v1481_v58, %v1485_v53  ;;  %v13534_v22 = vld [vmem:[#allocation36_spill] sm:$0xff]  ;;  %v13539_v53 = vshll.u32 %v10306_v45, 16 }
 0x1ed   : > { %v10425_v31 = vcombine.low %v1476_v24, %v1486_v49  ;;  %v1495_v24 = vrot.slane %v10346_v48, 5  ;;  %v1522_v49 = vshll.u32 %v10440_v41, 16 }
 0x1ee   : > { %1950 = vrot.lane.b32.xlu1 %v10257_v46, %s8430_s16  ;;  %v10363_v10 = vpop.permute.xlu0 %2150  ;;  %v1462_v38 = vsel %vm9090_vm8, %v1456_v5, %v1461_v33  ;;  %v13537_v5 = vshll.u32 %v10303_v1, 16  ;;  %v1502_v37 = vrot.slane %v13539_v53, 6 }
 0x1ef   : > { %v10415_v7 = vcombine.low %v1455_v59, %v1462_v38 }
 0x1f0   : > { %v10371_v27 = vpop.permute.xlu1 %1942  ;;  %1917 = vrot.lane.b32.xlu0 %v10355_v54, %s8429_s15  ;;  %v1498_v33 = vrot.slane %v13537_v5, 6 }
 0x1f2   : > { %2226 = vrot.lane.b32.xlu1 %v10257_v46, %s8438_s24  ;;  %v10385_v13 = vpop.permute.xlu0 %1909  ;;  %v2501_v46 = vsel %vm2483_vm15, %v2468_v30, %v10160_v14  ;;  %v2299_v14 = vsel %vm13535_vm11, %v9580_v36, %v13534_v22  ;;  %v7664_v36 = vrot.slane %v10303_v1, 9  ;;  %v1526_v22 = vshrl.u32 %v10440_v41, 16 }
 0x1f3   : > { %v2534_v9 = vsel %vm2516_vm0, %v2501_v46, %v10203_v20  ;;  %v10423_v20 = vcombine.low %v10303_v1, %v10306_v45  ;;  %vm13543_vm11 = vcmask 326656  }
 0x1f4   : > { %v2219_v32 = vpop.permute.xlu1 %2218  ;;  %2193 = vrot.lane.b32.xlu0 %v10355_v54, %s8437_s9  ;;  %v2567_v51 = vsel %vm13316_vm1, %v2534_v9, %v10251_v17  ;;  %v10471_v9 = vld [vmem:[%s13167_s3] ss:$0 sm:$0xff]  ;;  %v1528_v53 = vrot.slane %v1526_v22, 4 }
 0x1f5   : > { %v2600_v16 = vsel %vm2582_vm3, %v2567_v51, %v10253_v39  ;;  %v13536_v39 = vshrl.u32 %v10303_v1, 16  ;;  %v2338_v1 = vsel %vm13540_vm12, %v2299_v14, %v10069_v26  ;;  %vm13544_vm12 = vcmask 392192  }
 0x1f6   : > { %1985 = vrot.lane.b32.xlu1 %v10289_v40, %s8431_s17  ;;  %v10413_v60 = vpop.permute.xlu0 %2185  ;;  %v2633_v17 = vsel %vm2615_vm4, %v2600_v16, %v10285_v57  ;;  %v13538_v57 = vshrl.u32 %v10306_v45, 16  ;;  %v2371_v38 = vsel %vm13541_vm9, %v2338_v1, %v10086_v35  ;;  %vm13310_vm9 = vcmask 60416  }
 0x1f7   : > { %v1497_v18 = vrot.slane %v13536_v39, 5  ;;  %v2666_v63 = vsel %vm13315_vm6, %v2633_v17, %v10310_v23  ;;  %v1513_v23 = vshrl.u32 %v10429_v34, 16  ;;  %v2404_v26 = vsel %vm13542_vm10, %v2371_v38, %v10104_v44 }
 0x1f8   : > { %v10419_v21 = vpop.permute.xlu1 %1977  ;;  %1952 = vrot.lane.b32.xlu0 %v10389_v61, %s8430_s16  ;;  %v1501_v58 = vrot.slane %v13538_v57, 5  ;;  %v2699_v30 = vsel %vm13314_vm7, %v2666_v63, %v10351_v47  ;;  %v2437_v14 = vsel %vm13543_vm11, %v2404_v26, %v10142_v0  ;;  %v1509_v17 = vrot.slane %v1483_v52, 6 }
 0x1f9   : > { %v2732_v45 = vsel %vm13313_vm14, %v2699_v30, %v2219_v32  ;;  %v1493_v32 = vsel %vm9002_vm5, %v7664_v36, %v1492_v42  ;;  %v1499_v51 = vor.u32 %v1498_v33, %v1497_v18  ;;  %v2470_v39 = vsel %vm13544_vm12, %v2437_v14, %v10179_v11  ;;  %v620_v30 = vld [vmem:[%s8501_s10 + $0xe0] sm:$0x3]  ;;  %s8441_s10 = smov 4  }
 0x1fa   : > { %2261 = vrot.lane.b32.xlu1 %v10289_v40, %s8439_s25  ;;  %v10455_v59 = vpop.permute.xlu0 %1944  ;;  %v1516_v40 = vshll.u32 %v10429_v34, 16  ;;  %v1503_v16 = vor.u32 %v1502_v37, %v1501_v58  ;;  %v1508_v36 = vrot.slane %v1506_v28, 5  ;;  %v1515_v63 = vrot.slane %v1513_v23, 4 }
 0x1fb   : > { %v10501_v33 = vrot.slane %v1522_v49, 5  ;;  %v1500_v1 = vrot.slane %v1499_v51, 4  ;;  %v1532_v14 = vshll.u32 %v620_v30, 16  ;;  %vm330_vm10 = vcmask 57344  }
 0x1fc   : > { %v2254_v46 = vpop.permute.xlu1 %2253  ;;  %2228 = vrot.lane.b32.xlu0 %v10389_v61, %s8438_s24  ;;  %v1518_v0 = vrot.slane %v1516_v40, 5  ;;  %v1510_v26 = vor.u32 %v1509_v17, %v1508_v36  ;;  %vm13311_vm11 = vsmask.f32 256  ;;  %vm13312_vm12 = vsmask.f32 7938 }
 0x1fd   : > { %v8139_v47 = vpop.f32.mrb[0].mxu0  ;;  %v2773_v35 = vsel %vm13309_vm13, %v2732_v45, %v2254_v46 }
 0x1fe   : > { %2020 = vrot.lane.b32.xlu1 %v10314_v6, %s8432_s18  ;;  %v2901_v44 = vpop.f32.mrb[1].mxu0  ;;  %8153 = vmatprep.mubr.bf16.mxu0 %v2773_v35  ;;  %v2221_v5 = vpop.permute.xlu0 %2220  ;;  %v2503_v6 = vsel %vm2483_vm15, %v2470_v39, %v10215_v56  ;;  %v10492_v18 = vadd.f32 %v8139_v47, %v10471_v9 }
 0x1ff   : > { %v8140_v42 = vpop.f32.mrb[2].mxu0  ;;  %v2536_v57 = vsel %vm2516_vm0, %v2503_v6, %v10219_v50  ;;  %v10506_v58 = vadd.f32 %v10471_v9, %v2901_v44  ;;  %v1496_v50 = vsel %vm9002_vm5, %v1494_v29, %v1495_v24  ;;  %v1519_v24 = vor.u32 %v1518_v0, %v1515_v63 }
 0x200   : > { %v10495_v48 = vadd.f32 %v8140_v42, %v10471_v9  ;;  %v10497_v11 = vpop.permute.xlu1 %2012  ;;  %v2904_v52 = vpop.f32.mrb[3].mxu0  ;;  %1987 = vrot.lane.b32.xlu0 %v10415_v7, %s8431_s17  ;;  %v2569_v37 = vsel %vm13316_vm1, %v2536_v57, %v10261_v55  ;;  %v1505_v55 = vrot.slane %v1503_v16, 4  ;;  %v10541_v51 = vcombine.low %v1493_v32, %v1496_v50 }
 0x201   : > { %v10511_v56 = vadd.f32 %v10471_v9, %v2904_v52  ;;  %v2602_v38 = vsel %vm2582_vm3, %v2569_v37, %v10293_v4  ;;  %v1529_v4 = vor.u32 %v1528_v53, %v10501_v33  ;;  %v1534_v63 = vrot.slane %v1532_v14, 5 }
 0x202   : > { %v3029_v28 = vpack.c.bf16 %v10495_v48, %v10492_v18  ;;  %2022 = vrot.lane.b32.xlu1 %v10423_v20, %s8432_s18  ;;  %v10526_v46 = vpop.permute.xlu0 %1979  ;;  %v2635_v47 = vsel %vm2615_vm4, %v2602_v38, %v10324_v3  ;;  %v1511_v39 = vsel %vm9090_vm8, %v1505_v55, %v1510_v26  ;;  %v1546_v0 = vrot.slane %v1513_v23, 5 }
 0x203   : > { %v3028_v45 = vpack.c.bf16 %v10511_v56, %v10506_v58  ;;  %v2668_v29 = vsel %vm13315_vm6, %v2635_v47, %v10363_v10  ;;  %v1504_v10 = vsel %vm9090_vm8, %v1500_v1, %v1503_v16  ;;  %v1530_v32 = vrot.slane %v1529_v4, 4 }
 0x204   : > { %v10530_v35 = vpop.permute.xlu1 %2014  ;;  %2263 = vrot.lane.b32.xlu0 %v10415_v7, %s8439_s25  ;;  %v2701_v44 = vsel %vm13314_vm7, %v2668_v29, %v10413_v60  ;;  %v1520_v60 = vrot.slane %v1519_v24, 4  ;;  %v1541_v16 = vrot.slane %v10440_v41, 5  ;;  %v1547_v6 = vrot.slane %v1516_v40, 6 }
 0x205   : > { %v2734_v3 = vsel %vm13313_vm14, %v2701_v44, %v2221_v5  ;;  %v10555_v5 = vcombine.low %v1504_v10, %v1511_v39  ;;  %v1551_v57 = vrot.slane %v1522_v49, 6  ;;  %v1555_v53 = vshrl.u32 %v620_v30, 16  ;;  %v345_v10 = vld [vmem:[#allocation2 + $0x18] sm:$0x1] }
 0x206   : > { %2057 = vrot.lane.b32.xlu1 %v10425_v31, %s8433_s19  ;;  %v2256_v17 = vpop.permute.xlu0 %2255  ;;  %v7738_v50 = vcombine.low %v10429_v34, %v10440_v41  ;;  %v1525_v23 = vsel %vm8548_vm2, %v1520_v60, %v10501_v33  ;;  %v1535_v40 = vsel %vm8548_vm2, %v1530_v32, %v1534_v63  ;;  %v1543_v49 = vrot.slane %v1541_v16, 4 }
 0x207   : > { %v2776_v42 = vsel %vm13309_vm13, %v2734_v3, %v2256_v17  ;;  %v1544_v1 = vrot.slane %v620_v30, 5  ;;  %v1548_v38 = vor.u32 %v1547_v6, %v1546_v0  ;;  %v1558_v55 = vrot.slane %v1532_v14, 6  ;;  %vm10611_vm13 = vmand %vm330_vm10, %vm13311_vm11  ;;  %v342_v0 = vld [vmem:[#allocation2 + $0xc] sm:$0x1] }
 0x208   : > { %v10549_v36 = vpop.permute.xlu1 %1761  ;;  %2055 = vrot.lane.b32.xlu0 %v10355_v54, %s8433_s19  ;;  %8154 = vmatmul.mubr.bf16.gmra.mrb[16].mxu0 %v2776_v42  ;;  %v1550_v54 = vrot.slane %v1526_v22, 5  ;;  %v7665_v22 = vrot.slane %v10429_v34, 9  ;;  %v1557_v41 = vrot.slane %v1555_v53, 5  ;;  %v7739_v34 = vcombine.low %v1525_v23, %v1535_v40  ;;  %v401_v42 = vld [vmem:[#allocation2 + $0x20] sm:$0x1] }
 0x209   : > { %v1545_v30 = vsel %vm9002_vm5, %v1543_v49, %v1544_v1  ;;  %v8440_v29 = vmov 0   ;;  %v1549_v24 = vrot.slane %v1548_v38, 4  ;;  %v346_v63 = vsel %vm10611_vm13, 0, %v345_v10  ;;  %v407_v49 = vld [vmem:[#allocation2 + $0x38] sm:$0x1]  ;;  %v8319_v38 = vld [vmem:[%s10067_s22 + $0x8] sm:$0xff]  }
 0x20a   : > { %2092 = vrot.lane.b32.xlu1 %v10541_v51, %s8434_s20  ;;  %v10562_v52 = vpop.permute.xlu0 %2047  ;;  %v1552_v26 = vor.u32 %v1551_v57, %v1550_v54  ;;  %v1542_v33 = vsel %vm9002_vm5, %v7665_v22, %v1541_v16  ;;  %328 = vst.msk [vmem:[#allocation2] sm:$0xf] %vm13310_vm9, %v8440_v29  ;;  %329 = vst.msk [vmem:[#allocation2 + $0x4] sm:$0xf] %vm13310_vm9, %v8440_v29  ;;  %v1559_v14 = vor.u32 %v1558_v55, %v1557_v41  ;;  %v398_v57 = vld [vmem:[#allocation2 + $0x14] sm:$0x1] }
 0x20b   : > { %331 = vst.msk [vmem:[#allocation2 + $0x8] sm:$0x1] %vm330_vm10, %v8440_v29  ;;  %335 = vst.msk [vmem:[#allocation2 + $0xd4] sm:$0x1] %vm330_vm10, %v8440_v29  ;;  %v7740_v17 = vcombine.low %v1542_v33, %v1545_v30  ;;  %v343_v54 = vsel %vm10611_vm13, 0, %v342_v0  ;;  %vm13552_vm11 = vcmask 195584  }
 0x20c   : > { %v10566_v37 = vpop.permute.xlu1 %2082  ;;  %2090 = vrot.lane.b32.xlu0 %v10389_v61, %s8434_s20  ;;  %333 = vst.msk [vmem:[#allocation2 + $0xcc] sm:$0xf] %vm13310_vm9, %v8440_v29  ;;  %334 = vst.msk [vmem:[#allocation2 + $0xd0] sm:$0xf] %vm13310_vm9, %v8440_v29  ;;  %v1554_v4 = vrot.slane %v1552_v26, 4 }
 0x20d   : > { %449 = vst.msk [vmem:[#allocation3] sm:$0xf] %vm13310_vm9, %v8440_v29  ;;  %450 = vst.msk [vmem:[#allocation3 + $0x4] sm:$0xf] %vm13310_vm9, %v8440_v29  ;;  %v348_v1 = vld [vmem:[#allocation2 + $0x24] sm:$0x1] }
 0x20e   : > { %2127 = vrot.lane.b32.xlu1 %v10555_v5, %s8435_s29  ;;  %v10580_v61 = vpop.permute.xlu0 %2049  ;;  %451 = vst.msk [vmem:[#allocation3 + $0x8] sm:$0x1] %vm330_vm10, %v8440_v29  ;;  %455 = vst.msk [vmem:[#allocation3 + $0xd4] sm:$0x1] %vm330_vm10, %v8440_v29  ;;  %v1560_v32 = vsel %vm9090_vm8, %v1554_v4, %v1559_v14  ;;  %v349_v41 = vsel %vm10611_vm13, 0, %v348_v1  ;;  %v8321_v14 = vld [vmem:[%s10067_s22 + $0x18] sm:$0xff]  }
 0x20f   : > { %453 = vst.msk [vmem:[#allocation3 + $0xcc] sm:$0xf] %vm13310_vm9, %v8440_v29  ;;  %454 = vst.msk [vmem:[#allocation3 + $0xd0] sm:$0xf] %vm13310_vm9, %v8440_v29  ;;  %v13554_v1 = vld [vmem:[#allocation7_spill] sm:$0xff] }
 0x210   : > { %v10582_v47 = vpop.permute.xlu1 %1841  ;;  %2125 = vrot.lane.b32.xlu0 %v10415_v7, %s8435_s29  ;;  %vm10618_vm9 = vmand %vm330_vm10, %vm13312_vm12  ;;  %347 = vst [vmem:[#allocation2 + $0x18] sm:$0x1] %v346_v63  ;;  %v413_v63 = vld [vmem:[#allocation2 + $0x50] sm:$0x1]  ;;  %vm13551_vm10 = vcmask 130048   ;;  %vm13574_vm12 = vcmask 261120  }
 0x211   : > { %v402_v16 = vsel %vm10618_vm9, 0, %v401_v42  ;;  %344 = vst [vmem:[#allocation2 + $0xc] sm:$0x1] %v343_v54  ;;  %v399_v19 = vsel %vm10618_vm9, 0, %v398_v57  ;;  %v339_v53 = vld [vmem:[#allocation2] sm:$0x1] }
 0x212   : > { %2162 = vrot.lane.b32.xlu1 %v7738_v50, %s8436_s23  ;;  %v10603_v7 = vpop.permute.xlu0 %1763  ;;  %403 = vst [vmem:[#allocation2 + $0x20] sm:$0x1] %v402_v16  ;;  %400 = vst [vmem:[#allocation2 + $0x14] sm:$0x1] %v399_v19  ;;  %v340_v23 = vsel %vm10611_vm13, 0, %v339_v53  ;;  %v8322_v42 = vld [vmem:[%s10067_s22 + $0x10] sm:$0xff]  }
 0x213   : > { %341 = vst [vmem:[#allocation2] sm:$0x1] %v340_v23  ;;  %350 = vst [vmem:[#allocation2 + $0x24] sm:$0x1] %v349_v41  ;;  %v395_v29 = vld [vmem:[#allocation2 + $0x8] sm:$0x1] }
 0x214   : > { %v10605_v44 = vpop.permute.xlu1 %2117  ;;  %2160 = vrot.lane.b32.xlu0 %v10423_v20, %s8436_s23  ;;  %v1553_v20 = vsel %vm9090_vm8, %v1549_v24, %v1552_v26  ;;  %v408_v26 = vsel %vm10618_vm9, 0, %v407_v49  ;;  %v8320_v24 = vld [vmem:[%s10067_s22] sm:$0xff]   ;;  %v396_v4 = vsel %vm10618_vm9, 0, %v395_v29  ;;  %vm13550_vm8 = vcmask 64512   ;;  %v354_v16 = vld [vmem:[#allocation2 + $0x3c] sm:$0x1] }
 0x215   : > { %v7741_v50 = vcombine.low %v1553_v20, %v1560_v32  ;;  %409 = vst [vmem:[#allocation2 + $0x38] sm:$0x1] %v408_v26  ;;  %397 = vst [vmem:[#allocation2 + $0x8] sm:$0x1] %v396_v4  ;;  %v13549_v20 = vld [vmem:[#allocation39_spill] sm:$0xff]  ;;  %v414_v53 = vsel %vm10618_vm9, 0, %v413_v63 }
 0x216   : > { %2197 = vrot.lane.b32.xlu1 %v7739_v34, %s8437_s9  ;;  %v10622_v60 = vpop.permute.xlu0 %2084  ;;  %v404_v34 = vld [vmem:[#allocation2 + $0x2c] sm:$0x1]  ;;  %v2302_v32 = vsel %vm13550_vm8, %v9699_v43, %v13549_v20  ;;  %vm13553_vm8 = vcmask 261120   ;;  %415 = vst [vmem:[#allocation2 + $0x50] sm:$0x1] %v414_v53  ;;  %v8325_v41 = vld [vmem:[%s10067_s22 + $0x38] sm:$0xff]  }
 0x217   : > { %v2340_v0 = vsel %vm13551_vm10, %v2302_v32, %v10239_v2  ;;  %v8323_v54 = vld [vmem:[%s10067_s22 + $0x28] sm:$0xff]   ;;  %v10699_v49 = vld [vmem:[#allocation2 + $0x4] sm:$0xf]  ;;  %vm13556_vm10 = vcmask 392192   ;;  %v8326_v20 = vld [vmem:[%s10067_s22 + $0x30] sm:$0xff]  }
 0x218   : > { %v10632_v6 = vpop.permute.xlu1 %1876  ;;  %2195 = vrot.lane.b32.xlu0 %v10425_v31, %s8437_s9  ;;  %v351_v31 = vld [vmem:[#allocation2 + $0x30] sm:$0x1]  ;;  %v2373_v57 = vsel %vm13552_vm11, %v2340_v0, %v10269_v25  ;;  %v410_v25 = vld [vmem:[#allocation2 + $0x44] sm:$0x1]  ;;  %vm13555_vm11 = vcmask 326656   ;;  %v3822_v4 = vshrl.u32 %v10699_v49, 16 }
 0x219   : > { %v352_v55 = vsel %vm10611_vm13, 0, %v351_v31  ;;  %v2406_v2 = vsel %vm13553_vm8, %v2373_v57, %v10296_v62  ;;  %v411_v62 = vsel %vm10618_vm9, 0, %v410_v25  ;;  %v13557_v32 = vld [vmem:[#allocation38_spill] sm:$0xff]  ;;  %vm13559_vm8 = vcmask 64512   ;;  %v8327_v0 = vld [vmem:[%s10067_s22 + $0x48] sm:$0xff]  }
 0x21a   : > { %2232 = vrot.lane.b32.xlu1 %v7740_v17, %s8438_s24  ;;  %v10643_v40 = vpop.permute.xlu0 %1843  ;;  %353 = vst [vmem:[#allocation2 + $0x30] sm:$0x1] %v352_v55  ;;  %v10697_v31 = vld [vmem:[#allocation2] sm:$0xf]  ;;  %412 = vst [vmem:[#allocation2 + $0x44] sm:$0x1] %v411_v62 }
 0x21b   : > { %v8324_v55 = vld [vmem:[%s10067_s22 + $0x20] sm:$0xff]   ;;  %v3812_v29 = vshll.u32 %v10697_v31, 16  ;;  %v13560_v53 = vld [vmem:[#allocation11_spill] sm:$0xff]  ;;  %v3649_v56 = vld [vmem:[#allocation2 + $0x18] sm:$0xf] }
 0x21c   : > { %v10645_v22 = vpop.permute.xlu1 %2152  ;;  %2230 = vrot.lane.b32.xlu0 %v10541_v51, %s8438_s24  ;;  %v405_v51 = vsel %vm10618_vm9, 0, %v404_v34  ;;  %v8328_v62 = vld [vmem:[%s10067_s22 + $0x40] sm:$0xff]  }
 0x21d   : > { %406 = vst [vmem:[#allocation2 + $0x2c] sm:$0x1] %v405_v51  ;;  %v3809_v51 = vshrl.u32 %v10697_v31, 16  ;;  %v3814_v57 = vrot.slane %v3812_v29, 5 }
 0x21e   : > { %2267 = vrot.lane.b32.xlu1 %v7741_v50, %s8439_s25  ;;  %v10657_v33 = vpop.permute.xlu0 %2119  ;;  %v355_v50 = vsel %vm10611_vm13, 0, %v354_v16 }
 0x21f   : > { %356 = vst [vmem:[#allocation2 + $0x3c] sm:$0x1] %v355_v50 }
 0x220   : > { %v10661_v30 = vpop.permute.xlu1 %1911  ;;  %2265 = vrot.lane.b32.xlu0 %v10555_v5, %s8439_s25  ;;  %v357_v5 = vld [vmem:[#allocation2 + $0x48] sm:$0x1] }
 0x221   : > { %v358_v43 = vsel %vm10611_vm13, 0, %v357_v5  ;;  %v13558_v5 = vld [vmem:[#allocation5_spill] sm:$0xff] }
 0x222   : > { %3158 = vrot.lane.b32.xlu1 %v8319_v38, %s8441_s10  ;;  %v10670_v17 = vpop.permute.xlu0 %1878  ;;  %359 = vst [vmem:[#allocation2 + $0x48] sm:$0x1] %v358_v43  ;;  %v2439_v38 = vsel %vm13555_vm11, %v2406_v2, %v13554_v1  ;;  %v2305_v63 = vsel %vm13559_vm8, %v13558_v5, %v13557_v32  ;;  %v3824_v43 = vrot.slane %v3822_v4, 4  ;;  %vm13561_vm11 = vcmask 130048  }
 0x223   : > { %v2472_v26 = vsel %vm13556_vm10, %v2439_v38, %v10371_v27  ;;  %v2342_v50 = vsel %vm13561_vm11, %v2305_v63, %v13560_v53  ;;  %vm13563_vm10 = vcmask 195584   ;;  %vm13564_vm8 = vcmask 261120   ;;  %v8329_v63 = vld [vmem:[%s10067_s22 + $0x50] sm:$0xff]  }
 0x224   : > { %v10672_v10 = vpop.permute.xlu1 %2187  ;;  %3156 = vrot.lane.b32.xlu0 %v8320_v24, %s8441_s10  ;;  %v3818_v24 = vshll.u32 %v10699_v49, 16  ;;  %vm13565_vm11 = vcmask 326656   ;;  %v360_v53 = vld [vmem:[#allocation2 + $0x54] sm:$0x1] }
 0x226   : > { %3162 = vrot.lane.b32.xlu1 %v8321_v14, %s8441_s10  ;;  %v10685_v19 = vpop.permute.xlu0 %2154  ;;  %v2505_v14 = vsel %vm2483_vm15, %v2472_v26, %v10419_v21  ;;  %v3811_v21 = vrot.slane %v3809_v51, 4 }
 0x227   : > { %v2538_v27 = vsel %vm2516_vm0, %v2505_v14, %v10497_v11  ;;  %v10732_v11 = vrot.slane %v3818_v24, 5  ;;  %v10758_v14 = vld [vmem:[#allocation2 + $0x8] sm:$0x1] }
 0x228   : > { %v10695_v23 = vpop.permute.xlu1 %1946  ;;  %3160 = vrot.lane.b32.xlu0 %v8322_v42, %s8441_s10  ;;  %v2571_v16 = vsel %vm13316_vm1, %v2538_v27, %v10562_v52  ;;  %v13562_v52 = vld [vmem:[#allocation6_spill] sm:$0xff] }
 0x229   : > { %v2604_v2 = vsel %vm2582_vm3, %v2571_v16, %v10566_v37  ;;  %v2375_v1 = vsel %vm13563_vm10, %v2342_v50, %v13562_v52  ;;  %v8332_v37 = vld [vmem:[%s10067_s22 + $0x58] sm:$0xff]   ;;  %v3825_v27 = vor.u32 %v3824_v43, %v10732_v11  ;;  %v363_v16 = vld [vmem:[#allocation2 + $0x60] sm:$0x1]  ;;  %vm13566_vm10 = vcmask 982016  }
 0x22a   : > { %3166 = vrot.lane.b32.xlu1 %v8323_v54, %s8441_s10  ;;  %v10711_v34 = vpop.permute.xlu0 %1913  ;;  %v2637_v38 = vsel %vm2615_vm4, %v2604_v2, %v10605_v44  ;;  %v2408_v26 = vsel %vm13564_vm8, %v2375_v1, %v10348_v12  ;;  %v3815_v12 = vor.u32 %v3814_v57, %v3811_v21  ;;  %v364_v57 = vsel %vm10611_vm13, 0, %v363_v16  ;;  %v416_v50 = vld [vmem:[#allocation2 + $0x5c] sm:$0x1] }
 0x22b   : > { %v2441_v29 = vsel %vm13565_vm11, %v2408_v26, %v10385_v13  ;;  %v3828_v52 = vshll.u32 %v10758_v14, 16  ;;  %365 = vst [vmem:[#allocation2 + $0x60] sm:$0x1] %v364_v57  ;;  %v361_v1 = vsel %vm10611_vm13, 0, %v360_v53  ;;  %vm13567_vm8 = vcmask 392192   ;;  %vm13568_vm11 = vmmov %vm13566_vm10 }
 0x22c   : > { %v2223_v42 = vpop.permute.xlu1 %2222  ;;  %3164 = vrot.lane.b32.xlu0 %v8324_v55, %s8441_s10  ;;  %362 = vst [vmem:[#allocation2 + $0x54] sm:$0x1] %v361_v1  ;;  %v4245_v57 = vrot.slane %v10758_v14, 5 }
 0x22e   : > { %3170 = vrot.lane.b32.xlu1 %v8325_v41, %s8441_s10  ;;  %v10730_v54 = vpop.permute.xlu0 %2189  ;;  %v2670_v41 = vsel %vm13315_vm6, %v2637_v38, %v10645_v22  ;;  %v417_v38 = vsel %vm10618_vm9, 0, %v416_v50 }
 0x22f   : > { %v2703_v44 = vsel %vm13314_vm7, %v2670_v41, %v10672_v10  ;;  %418 = vst [vmem:[#allocation2 + $0x5c] sm:$0x1] %v417_v38 }
 0x230   : > { %v10738_v25 = vpop.permute.xlu1 %1981  ;;  %3168 = vrot.lane.b32.xlu0 %v8326_v20, %s8441_s10  ;;  %v2736_v22 = vsel %vm13313_vm14, %v2703_v44, %v2223_v42 }
 0x231   : > { %v8143_v55 = vpop.f32.mrb[4].mxu0 }
 0x232   : > { %v2917_v51 = vpop.f32.mrb[5].mxu0  ;;  %3174 = vrot.lane.b32.xlu1 %v8327_v0, %s8441_s10  ;;  %v10756_v24 = vpop.permute.xlu0 %1948  ;;  %v10763_v20 = vadd.f32 %v8143_v55, %v10471_v9  ;;  %v419_v0 = vld [vmem:[#allocation2 + $0x68] sm:$0x1] }
 0x233   : > { %v8144_v4 = vpop.f32.mrb[6].mxu0  ;;  %v10766_v32 = vadd.f32 %v10471_v9, %v2917_v51  ;;  %v420_v43 = vsel %vm10618_vm9, 0, %v419_v0  ;;  %v8334_v55 = vld [vmem:[%s10067_s22 + $0x68] sm:$0xff]  }
 0x234   : > { %v10769_v13 = vadd.f32 %v8144_v4, %v10471_v9  ;;  %v2258_v10 = vpop.permute.xlu1 %2257  ;;  %v2920_v5 = vpop.f32.mrb[7].mxu0  ;;  %3172 = vrot.lane.b32.xlu0 %v8328_v62, %s8441_s10  ;;  %421 = vst [vmem:[#allocation2 + $0x68] sm:$0x1] %v420_v43  ;;  %v2474_v62 = vsel %vm13567_vm8, %v2441_v29, %v10455_v59  ;;  %v8330_v4 = vld [vmem:[%s10067_s22 + $0x60] sm:$0xff]   ;;  %v4242_v59 = vrot.slane %v10699_v49, 5  ;;  %vm13572_vm8 = vcmask 130048  }
 0x235   : > { %v10773_v21 = vadd.f32 %v10471_v9, %v2920_v5  ;;  %v2779_v42 = vsel %vm13566_vm10, %v2736_v22, %v2258_v10  ;;  %v2507_v51 = vsel %vm2483_vm15, %v2474_v62, %v10526_v46  ;;  %v3816_v22 = vrot.slane %v3815_v12, 4  ;;  %v8335_v46 = vld [vmem:[%s10067_s22 + $0x78] sm:$0xff]  }
 0x236   : > { %v3031_v2 = vpack.c.bf16 %v10769_v13, %v10763_v20  ;;  %8157 = vmatprep.mubr.bf16.mxu0 %v2779_v42  ;;  %3178 = vrot.lane.b32.xlu1 %v8332_v37, %s8441_s10  ;;  %v2225_v41 = vpop.permute.xlu0 %2224  ;;  %v2540_v44 = vsel %vm2516_vm0, %v2507_v51, %v10530_v35  ;;  %v3826_v10 = vrot.slane %v3825_v27, 4  ;;  %v3830_v5 = vrot.slane %v3828_v52, 5 }
 0x237   : > { %v3030_v26 = vpack.c.bf16 %v10773_v21, %v10766_v32  ;;  %v2573_v29 = vsel %vm13316_vm1, %v2540_v44, %v10580_v61  ;;  %v8331_v61 = vld [vmem:[%s10067_s22 + $0x70] sm:$0xff]   ;;  %v7799_v12 = vrot.slane %v10697_v31, 9  ;;  %v4244_v27 = vrot.slane %v4242_v59, 4 }
 0x238   : > { %v10796_v37 = vpop.permute.xlu1 %2016  ;;  %3176 = vrot.lane.b32.xlu0 %v8329_v63, %s8441_s10  ;;  %v2606_v16 = vsel %vm2582_vm3, %v2573_v29, %v10622_v60  ;;  %v3821_v60 = vsel %vm8548_vm2, %v3816_v22, %v10732_v11  ;;  %vm13571_vm10 = vcmask 64512  }
 0x239   : > { %v2639_v35 = vsel %vm2615_vm4, %v2606_v16, %v10657_v33  ;;  %v3831_v33 = vsel %vm8548_vm2, %v3826_v10, %v3830_v5  ;;  %v4243_v11 = vsel %vm9002_vm5, %v7799_v12, %v4242_v59  ;;  %v4246_v50 = vsel %vm9002_vm5, %v4244_v27, %v4245_v57  ;;  %v13570_v16 = vld [vmem:[#allocation12_spill] sm:$0xff] }
 0x23a   : > { %3182 = vrot.lane.b32.xlu1 %v8334_v55, %s8441_s10  ;;  %v10809_v0 = vpop.permute.xlu0 %1983  ;;  %v2672_v49 = vsel %vm13315_vm6, %v2639_v35, %v10685_v19  ;;  %v7849_v1 = vcombine.low %v4243_v11, %v4246_v50  ;;  %v13577_v11 = vld [vmem:[#allocation40_spill] sm:$0xff]  ;;  %v13578_v50 = vld [vmem:[#allocation9_spill] sm:$0xff] }
 0x23b   : > { %v2705_v42 = vsel %vm13314_vm7, %v2672_v49, %v10730_v54  ;;  %v7833_v54 = vcombine.low %v3821_v60, %v3831_v33  ;;  %vm13576_vm7 = vcmask 392192  }
 0x23c   : > { %v10813_v63 = vpop.permute.xlu1 %2018  ;;  %3180 = vrot.lane.b32.xlu0 %v8330_v4, %s8441_s10  ;;  %v2738_v19 = vsel %vm13313_vm14, %v2705_v42, %v2225_v41  ;;  %vm13575_vm14 = vcmask 326656  }
 0x23e   : > { %3186 = vrot.lane.b32.xlu1 %v8335_v46, %s8441_s10  ;;  %v2260_v43 = vpop.permute.xlu0 %2259  ;;  %v13569_v46 = vld [vmem:[#allocation42_spill] sm:$0xff] }
 0x23f   : > { %v2782_v31 = vsel %vm13568_vm11, %v2738_v19, %v2260_v43  ;;  %v2308_v35 = vsel %vm13571_vm10, %v13570_v16, %v13569_v46  ;;  %vm13573_vm11 = vcmask 195584  }
 0x240   : > { %v10831_v53 = vpop.permute.xlu1 %1765  ;;  %8158 = vmatmul.mubr.bf16.gmra.mrb[20].mxu0 %v2782_v31  ;;  %3184 = vrot.lane.b32.xlu0 %v8331_v61, %s8441_s10  ;;  %v2344_v61 = vsel %vm13572_vm8, %v2308_v35, %v10549_v36  ;;  %v369_v35 = vld [vmem:[#allocation2 + $0x78] sm:$0x1] }
 0x241   : > { %v2377_v27 = vsel %vm13573_vm11, %v2344_v61, %v10582_v47  ;;  %v425_v61 = vld [vmem:[#allocation2 + $0x80] sm:$0x1] }
 0x242   : > { %v2052_v14 = vpop.permute.xlu0 %2051  ;;  %v2410_v42 = vsel %vm13574_vm12, %v2377_v27, %v10632_v6  ;;  %vm13581_vm12 = vcmask 850944  }
 0x243   : > { %v2443_v60 = vsel %vm13575_vm14, %v2410_v42, %v10661_v30  ;;  %vm13579_vm14 = vmmov %vm13571_vm10 }
 0x244   : > { %v2087_v52 = vpop.permute.xlu1 %2086  ;;  %4516 = vrot.lane.b32.xlu0 %v7833_v54, %s8425_s11  ;;  %v2476_v57 = vsel %vm13576_vm7, %v2443_v60, %v10695_v23  ;;  %v2311_v23 = vsel %vm13579_vm14, %v13578_v50, %v13577_v11  ;;  %vm13580_vm7 = vmmov %vm13572_vm8  ;;  %vm13583_vm8 = vcmask 916480   ;;  %vm13585_vm14 = vcmask 982016   ;;  %v366_v60 = vld [vmem:[#allocation2 + $0x6c] sm:$0x1] }
 0x245   : > { %v2509_v36 = vsel %vm2483_vm15, %v2476_v57, %v10738_v25  ;;  %v2346_v25 = vsel %vm13580_vm7, %v2311_v23, %v10603_v7  ;;  %vm13582_vm10 = vmmov %vm13573_vm11  ;;  %vm13584_vm11 = vcmask 261120   ;;  %v370_v7 = vsel %vm10611_vm13, 0, %v369_v35 }
 0x246   : > { %v10839_v38 = vpop.permute.xlu0 %2053  ;;  %v2542_v43 = vsel %vm2516_vm0, %v2509_v36, %v10796_v37  ;;  %vm13586_vm7 = vcmask 326656   ;;  %371 = vst [vmem:[#allocation2 + $0x78] sm:$0x1] %v370_v7 }
 0x247   : > { %v2575_v47 = vsel %vm13316_vm1, %v2542_v43, %v2052_v14  ;;  %v2379_v14 = vsel %vm13582_vm10, %v2346_v25, %v10643_v40  ;;  %vm13588_vm10 = vcmask 850944  }
 0x248   : > { %v10841_v55 = vpop.permute.xlu1 %1845  ;;  %4596 = vrot.lane.b32.xlu0 %v7849_v1, %s8426_s12  ;;  %v2608_v6 = vsel %vm2582_vm3, %v2575_v47, %v2087_v52  ;;  %v2412_v27 = vsel %vm13584_vm11, %v2379_v14, %v10670_v17  ;;  %v367_v17 = vsel %vm10611_vm13, 0, %v366_v60  ;;  %vm13589_vm11 = vmmov %vm13585_vm14 }
 0x249   : > { %v2445_v40 = vsel %vm13586_vm7, %v2412_v27, %v10711_v34  ;;  %368 = vst [vmem:[#allocation2 + $0x6c] sm:$0x1] %v367_v17  ;;  %v13594_v17 = vld [vmem:[#allocation10_spill] sm:$0xff] }
 0x24a   : > { %v10844_v62 = vpop.permute.xlu0 %1767 }
 0x24c   : > { %v2122_v41 = vpop.permute.xlu1 %2121 }
 0x24d   : > { %v2641_v30 = vsel %vm2615_vm4, %v2608_v6, %v2122_v41 }
 0x24e   : > { %v10846_v51 = vpop.permute.xlu0 %2088 }
 0x250   : > { %v10848_v44 = vpop.permute.xlu1 %1880 }
 0x252   : > { %v10850_v4 = vpop.permute.xlu0 %1847 }
 0x254   : > { %v2157_v59 = vpop.permute.xlu1 %2156 }
 0x255   : > { %v2674_v1 = vsel %vm13315_vm6, %v2641_v30, %v2157_v59 }
 0x256   : > { %v10852_v29 = vpop.permute.xlu0 %2123 }
 0x258   : > { %v10854_v22 = vpop.permute.xlu1 %1915 }
 0x25a   : > { %v10856_v10 = vpop.permute.xlu0 %1882 }
 0x25c   : > { %v2192_v5 = vpop.permute.xlu1 %2191 }
 0x25d   : > { %v2707_v37 = vsel %vm13581_vm12, %v2674_v1, %v2192_v5  ;;  %v426_v5 = vsel %vm10618_vm9, 0, %v425_v61  ;;  %vm13587_vm12 = vcmask 392192  }
 0x25e   : > { %v2159_v49 = vpop.permute.xlu0 %2158  ;;  %427 = vst [vmem:[#allocation2 + $0x80] sm:$0x1] %v426_v5  ;;  %v2478_v36 = vsel %vm13587_vm12, %v2445_v40, %v10756_v24  ;;  %v13590_v40 = vld [vmem:[#allocation43_spill] sm:$0xff]  ;;  %vm13596_vm12 = vcmask 130048  }
 0x25f   : > { %v2511_v11 = vsel %vm2483_vm15, %v2478_v36, %v10809_v0 }
 0x260   : > { %v10863_v12 = vpop.permute.xlu1 %1950  ;;  %v2544_v1 = vsel %vm2516_vm0, %v2511_v11, %v10813_v63 }
 0x262   : > { %v10871_v33 = vpop.permute.xlu0 %1917 }
 0x264   : > { %v2227_v19 = vpop.permute.xlu1 %2226 }
 0x265   : > { %v2740_v52 = vsel %vm13583_vm8, %v2707_v37, %v2227_v19  ;;  %v422_v19 = vld [vmem:[#allocation2 + $0x74] sm:$0x1]  ;;  %v2577_v37 = vsel %vm13316_vm1, %v2544_v1, %v10839_v38 }
 0x266   : > { %v2194_v31 = vpop.permute.xlu0 %2193  ;;  %v423_v34 = vsel %vm10618_vm9, 0, %v422_v19  ;;  %v2610_v14 = vsel %vm2582_vm3, %v2577_v37, %v10846_v51 }
 0x267   : > { %424 = vst [vmem:[#allocation2 + $0x74] sm:$0x1] %v423_v34 }
 0x268   : > { %v10881_v54 = vpop.permute.xlu1 %1985 }
 0x26a   : > { %v10891_v46 = vpop.permute.xlu0 %1952 }
 0x26b   : > { %v8147_v16 = vpop.f32.mrb[8].mxu0 }
 0x26c   : > { %v2262_v41 = vpop.permute.xlu1 %2261  ;;  %v2933_v59 = vpop.f32.mrb[9].mxu0  ;;  %v10910_v43 = vadd.f32 %v8147_v16, %v10471_v9 }
 0x26d   : > { %v2785_v42 = vsel %vm13585_vm14, %v2740_v52, %v2262_v41  ;;  %v8148_v57 = vpop.f32.mrb[10].mxu0  ;;  %v10920_v50 = vadd.f32 %v10471_v9, %v2933_v59  ;;  %vm13592_vm14 = vcmask 64512  }
 0x26e   : > { %8161 = vmatprep.mubr.bf16.mxu0 %v2785_v42  ;;  %v10913_v47 = vadd.f32 %v8148_v57, %v10471_v9  ;;  %v2936_v6 = vpop.f32.mrb[11].mxu0  ;;  %v2229_v30 = vpop.permute.xlu0 %2228  ;;  %vm13595_vm7 = vmmov %vm13592_vm14 }
 0x26f   : > { %v10923_v24 = vadd.f32 %v10471_v9, %v2936_v6  ;;  %v2643_v9 = vsel %vm2615_vm4, %v2610_v14, %v10852_v29  ;;  %v13591_v29 = vld [vmem:[#allocation21_spill] sm:$0xff] }
 0x270   : > { %v2021_v23 = vpop.permute.xlu1 %2020  ;;  %v3033_v25 = vpack.c.bf16 %v10913_v47, %v10910_v43  ;;  %v2676_v41 = vsel %vm13315_vm6, %v2643_v9, %v2159_v49  ;;  %v2317_v57 = vsel %vm13592_vm14, %v13591_v29, %v13590_v40  ;;  %v13593_v49 = vld [vmem:[#allocation44_spill] sm:$0xff]  ;;  %vm13600_vm6 = vcmask 261120  }
 0x271   : > { %v3032_v0 = vpack.c.bf16 %v10923_v24, %v10920_v50  ;;  %v2709_v63 = vsel %vm13588_vm10, %v2676_v41, %v2194_v31  ;;  %v2314_v31 = vsel %vm13595_vm7, %v13594_v17, %v13593_v49  ;;  %v2350_v19 = vsel %vm13596_vm12, %v2317_v57, %v10844_v62  ;;  %vm13597_vm10 = vmmov %vm13596_vm12  ;;  %v3677_v50 = vld [vmem:[#allocation2 + $0x48] sm:$0xf] }
 0x272   : > { %v1988_v52 = vpop.permute.xlu0 %1987  ;;  %v2742_v35 = vsel %vm13583_vm8, %v2709_v63, %v2229_v30  ;;  %v2348_v36 = vsel %vm13597_vm10, %v2314_v31, %v10831_v53  ;;  %vm13598_vm8 = vcmask 195584   ;;  %vm13601_vm14 = vmmov %vm13600_vm6  ;;  %vm13602_vm7 = vcmask 326656  }
 0x273   : > { %v2383_v6 = vsel %vm13598_vm8, %v2350_v19, %v10850_v4  ;;  %vm13603_vm12 = vmmov %vm13602_vm7  ;;  %vm13604_vm10 = vcmask 392192  }
 0x274   : > { %v2023_v16 = vpop.permute.xlu1 %2022  ;;  %v2416_v11 = vsel %vm13600_vm6, %v2383_v6, %v10856_v10  ;;  %vm13606_vm6 = vcmask 785408  }
 0x275   : > { %v2449_v62 = vsel %vm13602_vm7, %v2416_v11, %v10871_v33 }
 0x276   : > { %v2264_v61 = vpop.permute.xlu0 %2263  ;;  %v2482_v4 = vsel %vm13604_vm10, %v2449_v62, %v10891_v46 }
 0x277   : > { %v2788_v38 = vsel %vm13589_vm11, %v2742_v35, %v2264_v61  ;;  %vm13599_vm11 = vmmov %vm13598_vm8 }
 0x278   : > { %v2058_v27 = vpop.permute.xlu1 %2057  ;;  %8162 = vmatmul.mubr.bf16.gmra.mrb[24].mxu0 %v2788_v38  ;;  %v2381_v34 = vsel %vm13599_vm11, %v2348_v36, %v10841_v55  ;;  %vm13605_vm8 = vmmov %vm13604_vm10  ;;  %v2515_v55 = vsel %vm2483_vm15, %v2482_v4, %v1988_v52  ;;  %vm3188_vm10 = vcmask 31744   ;;  %v8342_v36 = vld [vmem:[%s13168_s4] sm:$0xff]  }
 0x279   : > { %v2414_v37 = vsel %vm13601_vm14, %v2381_v34, %v10848_v44  ;;  %v2548_v44 = vsel %vm2516_vm0, %v2515_v55, %v2023_v16  ;;  %vm13607_vm11 = vmmov %vm13606_vm6  ;;  %vm13608_vm14 = vcmask 850944   ;;  %8169 = vmatprep.subr.bf16.mxu0 %v8342_v36  ;;  %8253 = vmatprep.subr.bf16.mxu1 %v8342_v36 }
 0x27a   : > { %v2056_v59 = vpop.permute.xlu0 %2055  ;;  %v2447_v53 = vsel %vm13603_vm12, %v2414_v37, %v10854_v22  ;;  %v2581_v63 = vsel %vm13316_vm1, %v2548_v44, %v2058_v27  ;;  %vm13609_vm7 = vmmov %vm13608_vm14  ;;  %vm13610_vm12 = vcmask 916480   ;;  %8170 = vmatpush3.bf16.msra.mxu0 %v8342_v36  ;;  %8258 = vmatpush3.bf16.msra.mxu1 %v8342_v36 }
 0x27b   : > { %v2480_v14 = vsel %vm13605_vm8, %v2447_v53, %v10863_v12  ;;  %vm13611_vm8 = vmmov %vm13610_vm12 }
 0x27c   : > { %v2093_v42 = vpop.permute.xlu1 %2092  ;;  %v2513_v10 = vsel %vm2483_vm15, %v2480_v14, %v10881_v54 }
 0x27d   : > { %v2546_v33 = vsel %vm2516_vm0, %v2513_v10, %v2021_v23  ;;  %v2614_v46 = vsel %vm2582_vm3, %v2581_v63, %v2093_v42 }
 0x27e   : > { %v2091_v7 = vpop.permute.xlu0 %2090  ;;  %v2579_v22 = vsel %vm13316_vm1, %v2546_v33, %v2056_v59 }
 0x27f   : > { %v2612_v35 = vsel %vm2582_vm3, %v2579_v22, %v2091_v7  ;;  %vm13612_vm3 = vcmask 982016  }
 0x280   : > { %v2128_v51 = vpop.permute.xlu1 %2127  ;;  %vm13613_vm1 = vmmov %vm13612_vm3 }
 0x281   : > { %v2647_v12 = vsel %vm2615_vm4, %v2614_v46, %v2128_v51 }
 0x282   : > { %v2126_v5 = vpop.permute.xlu0 %2125 }
 0x283   : > { %v2645_v61 = vsel %vm2615_vm4, %v2612_v35, %v2126_v5  ;;  %vm3317_vm4 = vsmask.f32 4368 }
 0x284   : > { %v2163_v60 = vpop.permute.xlu1 %2162 }
 0x285   : > { %v2680_v54 = vsel %vm13606_vm6, %v2647_v12, %v2163_v60  ;;  %vm13615_vm6 = vcmask 60416  }
 0x286   : > { %v2161_v30 = vpop.permute.xlu0 %2160 }
 0x287   : > { %v2678_v16 = vsel %vm13607_vm11, %v2645_v61, %v2161_v30 }
 0x288   : > { %v2198_v1 = vpop.permute.xlu1 %2197 }
 0x289   : > { %v2713_v23 = vsel %vm13608_vm14, %v2680_v54, %v2198_v1  ;;  %vm13618_vm14 = vsmask.f32 256  ;;  %v3642_v54 = vld [vmem:[#allocation2 + $0xc] sm:$0xf] }
 0x28a   : > { %v2196_v9 = vpop.permute.xlu0 %2195 }
 0x28b   : > { %v2711_v27 = vsel %vm13609_vm7, %v2678_v16, %v2196_v9  ;;  %vm11009_vm7 = vmor %vm13618_vm14, %vm3317_vm4 }
 0x28c   : > { %v2233_v41 = vpop.permute.xlu1 %2232 }
 0x28d   : > { %v2746_v59 = vsel %vm13610_vm12, %v2713_v23, %v2233_v41  ;;  %vm13621_vm12 = vmmov %vm13615_vm6 }
 0x28e   : > { %v2231_v52 = vpop.permute.xlu0 %2230 }
 0x28f   : > { %v2744_v42 = vsel %vm13611_vm8, %v2711_v27, %v2231_v52  ;;  %vm13622_vm8 = vmmov %vm13615_vm6 }
 0x290   : > { %v2268_v38 = vpop.permute.xlu1 %2267 }
 0x291   : > { %v2794_v51 = vsel %vm13612_vm3, %v2746_v59, %v2268_v38  ;;  %v3646_v38 = vld [vmem:[#allocation2 + $0x14] sm:$0x1]  ;;  %vm13623_vm3 = vmmov %vm13615_vm6 }
 0x292   : > { %v2266_v7 = vpop.permute.xlu0 %2265  ;;  %vm13624_vm4 = vmmov %vm13623_vm3 }
 0x293   : > { %v2791_v40 = vsel %vm13613_vm1, %v2744_v42, %v2266_v7  ;;  %vm13614_vm1 = vsmask.f32 7938 }
 0x294   : > { %v3159_v5 = vpop.permute.xlu1 %3158  ;;  %8165 = vmatprep.mubr.bf16.mxu0 %v2791_v40  ;;  %vm11003_vm11 = vmand %vm13615_vm6, %vm13614_vm1 }
 0x295   : > { %v3194_v60 = vsel %vm3188_vm10, %v3029_v28, %v3159_v5  ;;  %8166 = vmatmul.mubr.bf16.gmra.mrb[28].mxu0 %v2794_v51  ;;  %v3663_v5 = vld [vmem:[#allocation2 + $0x30] sm:$0xf]  ;;  %vm13625_vm1 = vmmov %vm13623_vm3 }
 0x296   : > { %v7769_v29 = vcombine.low %v3194_v60, %v3194_v60  ;;  %v7770_v57 = vcombine.high %v3194_v60, %v3194_v60  ;;  %v3157_v49 = vpop.permute.xlu0 %3156  ;;  %vm13626_vm6 = vmmov %vm13625_vm1 }
 0x297   : > { %v3191_v18 = vsel %vm3188_vm10, %v3028_v45, %v3157_v49  ;;  %v3653_v45 = vld [vmem:[#allocation2 + $0x20] sm:$0x1]  ;;  %vm13627_vm14 = vmmov %vm13625_vm1 }
 0x298   : > { %v3337_v17 = vshrl.u32 %v7769_v29, 16  ;;  %v3345_v31 = vshrl.u32 %v7770_v57, 16  ;;  %v3163_v19 = vpop.permute.xlu1 %3162  ;;  %v3340_v6 = vshll.u32 %v7769_v29, 16  ;;  %v3348_v30 = vshll.u32 %v7770_v57, 16 }
 0x299   : > { %v3200_v48 = vsel %vm3188_vm10, %v3031_v2, %v3163_v19  ;;  %v7767_v1 = vcombine.low %v3191_v18, %v3191_v18  ;;  %v7768_v37 = vcombine.high %v3191_v18, %v3191_v18 }
 0x29a   : > { %v3339_v34 = vrot.slane %v3337_v17, 7  ;;  %v3347_v11 = vrot.slane %v3345_v31, 7  ;;  %v7773_v20 = vcombine.low %v3200_v48, %v3200_v48  ;;  %v7774_v13 = vcombine.high %v3200_v48, %v3200_v48  ;;  %v3161_v44 = vpop.permute.xlu0 %3160 }
 0x29b   : > { %v3320_v14 = vshrl.u32 %v7767_v1, 16  ;;  %v3323_v55 = vshll.u32 %v7767_v1, 16  ;;  %v3328_v9 = vshrl.u32 %v7768_v37, 16  ;;  %v3331_v10 = vshll.u32 %v7768_v37, 16 }
 0x29c   : > { %v3342_v2 = vor.u32 %v3340_v6, %v3339_v34  ;;  %v3343_v62 = vrot.slane %v3339_v34, 4  ;;  %v3350_v53 = vor.u32 %v3348_v30, %v3347_v11  ;;  %v3352_v4 = vrot.slane %v3347_v11, 4  ;;  %v3167_v41 = vpop.permute.xlu1 %3166 }
 0x29d   : > { %v3371_v46 = vshrl.u32 %v7773_v20, 16  ;;  %v3322_v35 = vrot.slane %v3320_v14, 7  ;;  %v3330_v12 = vrot.slane %v3328_v9, 7  ;;  %v3374_v52 = vshll.u32 %v7773_v20, 16 }
 0x29e   : > { %v3351_v33 = vsel %vm11009_vm7, %v3343_v62, %v3350_v53  ;;  %v3650_v63 = vsel %vm11003_vm11, %v3342_v2, %v3649_v56  ;;  %v3654_v22 = vsel %vm10611_vm13, %v3352_v4, %v3653_v45  ;;  %v3379_v61 = vshrl.u32 %v7774_v13, 16  ;;  %v3165_v36 = vpop.permute.xlu0 %3164 }
 0x29f   : > { %3651 = vst [vmem:[#allocation2 + $0x18] sm:$0xf] %v3650_v63  ;;  %3652 = vst.msk [vmem:[#allocation2 + $0x1c] sm:$0xf] %vm13621_vm12, %v3351_v33  ;;  %v3373_v16 = vrot.slane %v3371_v46, 7  ;;  %v3382_v23 = vshll.u32 %v7774_v13, 16  ;;  %v3197_v27 = vsel %vm3188_vm10, %v3030_v26, %v3161_v44  ;;  %v3206_v59 = vsel %vm3188_vm10, %v3033_v25, %v3167_v41 }
 0x2a0   : > { %3655 = vst [vmem:[#allocation2 + $0x20] sm:$0x1] %v3654_v22  ;;  %v3325_v42 = vor.u32 %v3323_v55, %v3322_v35  ;;  %v3326_v7 = vrot.slane %v3322_v35, 4  ;;  %v3333_v51 = vor.u32 %v3331_v10, %v3330_v12  ;;  %v3335_v40 = vrot.slane %v3330_v12, 4  ;;  %v3667_v26 = vld [vmem:[#allocation2 + $0x38] sm:$0x1]  ;;  %vm13628_vm12 = vmmov %vm13625_vm1 }
 0x2a1   : > { %v3376_v60 = vor.u32 %v3374_v52, %v3373_v16  ;;  %v3377_v29 = vrot.slane %v3373_v16, 4  ;;  %v3381_v57 = vrot.slane %v3379_v61, 7  ;;  %v7771_v49 = vcombine.low %v3197_v27, %v3197_v27  ;;  %v3656_v13 = vld [vmem:[#allocation2 + $0x24] sm:$0xf]  ;;  %v3660_v55 = vld [vmem:[#allocation2 + $0x2c] sm:$0x1] }
 0x2a2   : > { %v3334_v17 = vsel %vm11009_vm7, %v3326_v7, %v3333_v51  ;;  %v3643_v32 = vsel %vm11003_vm11, %v3325_v42, %v3642_v54  ;;  %v3647_v21 = vsel %vm10611_vm13, %v3335_v40, %v3646_v38  ;;  %v7772_v43 = vcombine.high %v3197_v27, %v3197_v27  ;;  %v8343_v33 = vld [vmem:[%s13168_s4 + $0x8] sm:$0xff]   ;;  %v11054_v52 = vld [vmem:[%s13167_s3] ss:$0 sm:$0xff]  ;;  %v3681_v16 = vld [vmem:[#allocation2 + $0x50] sm:$0x1] }
 0x2a3   : > { %3644 = vst [vmem:[#allocation2 + $0xc] sm:$0xf] %v3643_v32  ;;  %3645 = vst.msk [vmem:[#allocation2 + $0x10] sm:$0xf] %vm13622_vm8, %v3334_v17  ;;  %v3384_v47 = vor.u32 %v3382_v23, %v3381_v57  ;;  %v3386_v25 = vrot.slane %v3381_v57, 4  ;;  %v3664_v31 = vsel %vm11003_vm11, %v3376_v60, %v3663_v5  ;;  %v3354_v19 = vshrl.u32 %v7771_v49, 16  ;;  %8171 = vmatprep.subr.bf16.mxu0 %v8343_v33 }
 0x2a4   : > { %3648 = vst [vmem:[#allocation2 + $0x14] sm:$0x1] %v3647_v21  ;;  %v8151_v6 = vpop.f32.mrb[12].mxu0  ;;  %3665 = vst [vmem:[#allocation2 + $0x30] sm:$0xf] %v3664_v31  ;;  %v3357_v30 = vshll.u32 %v7771_v49, 16  ;;  %v7777_v34 = vcombine.low %v3206_v59, %v3206_v59  ;;  %v7778_v45 = vcombine.high %v3206_v59, %v3206_v59  ;;  %v3203_v4 = vsel %vm3188_vm10, %v3032_v0, %v3165_v36  ;;  %v3171_v31 = vpop.permute.xlu1 %3170 }
 0x2a5   : > { %v3362_v18 = vshrl.u32 %v7772_v43, 16  ;;  %v3365_v48 = vshll.u32 %v7772_v43, 16  ;;  %v2949_v11 = vpop.f32.mrb[13].mxu0  ;;  %v3385_v1 = vsel %vm11009_vm7, %v3377_v29, %v3384_v47  ;;  %v3668_v37 = vsel %vm10611_vm13, %v3386_v25, %v3667_v26  ;;  %8254 = vmatprep.subr.bf16.mxu1 %v8343_v33  ;;  %8172 = vmatpush3.bf16.msra.mxu0 %v8343_v33  ;;  %v3670_v43 = vld [vmem:[#allocation2 + $0x3c] sm:$0xf]  ;;  %vm13629_vm8 = vmmov %vm13625_vm1 }
 0x2a6   : > { %v3356_v56 = vrot.slane %v3354_v19, 7  ;;  %v8152_v20 = vpop.f32.mrb[14].mxu0  ;;  %3666 = vst.msk [vmem:[#allocation2 + $0x34] sm:$0xf] %vm13623_vm3, %v3385_v1  ;;  %3669 = vst [vmem:[#allocation2 + $0x38] sm:$0x1] %v3668_v37  ;;  %v7775_v35 = vcombine.low %v3203_v4, %v3203_v4  ;;  %v7776_v0 = vcombine.high %v3203_v4, %v3203_v4  ;;  %v2958_v61 = vadd.f32 %v11054_v52, %v8151_v6 }
 0x2a7   : > { %v3364_v2 = vrot.slane %v3362_v18, 7  ;;  %v3405_v62 = vshrl.u32 %v7777_v34, 16  ;;  %v3408_v53 = vshll.u32 %v7777_v34, 16  ;;  %v2952_v14 = vpop.f32.mrb[15].mxu0  ;;  %v3413_v44 = vshrl.u32 %v7778_v45, 16  ;;  %8259 = vmatpush3.bf16.msra.mxu1 %v8343_v33  ;;  %vm13630_vm3 = vmmov %vm13625_vm1 }
 0x2a8   : > { %v3359_v9 = vor.u32 %v3357_v30, %v3356_v56  ;;  %v3360_v10 = vrot.slane %v3356_v56, 4  ;;  %v3416_v41 = vshll.u32 %v7778_v45, 16  ;;  %v3388_v51 = vshrl.u32 %v7775_v35, 16  ;;  %v3674_v6 = vld [vmem:[#allocation2 + $0x44] sm:$0x1]  ;;  %v3169_v56 = vpop.permute.xlu0 %3168 }
 0x2a9   : > { %v3367_v63 = vor.u32 %v3365_v48, %v3364_v2  ;;  %v3369_v22 = vrot.slane %v3364_v2, 4  ;;  %v3407_v46 = vrot.slane %v3405_v62, 7  ;;  %v3415_v24 = vrot.slane %v3413_v44, 7 }
 0x2aa   : > { %v3657_v12 = vsel %vm11003_vm11, %v3359_v9, %v3656_v13  ;;  %v11061_v59 = vld [vmem:[#allocation2 + $0xc] sm:$0xf]  ;;  %v3391_v40 = vshll.u32 %v7775_v35, 16  ;;  %v11064_v5 = vld [vmem:[#allocation2 + $0x10] sm:$0xf]  ;;  %v3396_v29 = vshrl.u32 %v7776_v0, 16  ;;  %v2950_v49 = vadd.f32 %v11054_v52, %v2949_v11 }
 0x2ab   : > { %v3368_v54 = vsel %vm11009_vm7, %v3360_v10, %v3367_v63  ;;  %3658 = vst [vmem:[#allocation2 + $0x24] sm:$0xf] %v3657_v12  ;;  %v3661_v38 = vsel %vm10611_vm13, %v3369_v22, %v3660_v55  ;;  %v3410_v23 = vor.u32 %v3408_v53, %v3407_v46  ;;  %v3411_v27 = vrot.slane %v3407_v46, 4  ;;  %v11095_v10 = vld [vmem:[#allocation2 + $0x14] sm:$0x1] }
 0x2ac   : > { %3659 = vst.msk [vmem:[#allocation2 + $0x28] sm:$0xf] %vm13624_vm4, %v3368_v54  ;;  %3662 = vst [vmem:[#allocation2 + $0x2c] sm:$0x1] %v3661_v38  ;;  %v3418_v42 = vor.u32 %v3416_v41, %v3415_v24  ;;  %v3420_v7 = vrot.slane %v3415_v24, 4  ;;  %v3399_v57 = vshll.u32 %v7776_v0, 16  ;;  %v2961_v26 = vadd.f32 %v11054_v52, %v8152_v20 }
 0x2ad   : > { %v3678_v60 = vsel %vm11003_vm11, %v3410_v23, %v3677_v50  ;;  %v3390_v21 = vrot.slane %v3388_v51, 7  ;;  %v3398_v47 = vrot.slane %v3396_v29, 7  ;;  %v2953_v25 = vadd.f32 %v11054_v52, %v2952_v14  ;;  %v8346_v63 = vld [vmem:[%s13168_s4 + $0x10] sm:$0xff]  }
 0x2ae   : > { %v3419_v17 = vsel %vm11009_vm7, %v3411_v27, %v3418_v42  ;;  %3679 = vst [vmem:[#allocation2 + $0x48] sm:$0xf] %v3678_v60  ;;  %v3682_v32 = vsel %vm10611_vm13, %v3420_v7, %v3681_v16  ;;  %v3846_v19 = vshrl.u32 %v11064_v5, 16  ;;  %v11079_v36 = vcombine.low %v11061_v59, %v11064_v5  ;;  %8173 = vmatprep.subr.bf16.mxu0 %v8346_v63  ;;  %v3695_v27 = vld [vmem:[#allocation2 + $0x68] sm:$0x1] }
 0x2af   : > { %3680 = vst.msk [vmem:[#allocation2 + $0x4c] sm:$0xf] %vm13625_vm1, %v3419_v17  ;;  %3683 = vst [vmem:[#allocation2 + $0x50] sm:$0x1] %v3682_v32  ;;  %v3393_v30 = vor.u32 %v3391_v40, %v3390_v21  ;;  %v3394_v18 = vrot.slane %v3390_v21, 4  ;;  %v3035_v48 = vpack.c.bf16 %v2961_v26, %v2958_v61  ;;  %v3833_v34 = vshrl.u32 %v11061_v59, 16  ;;  %8174 = vmatpush3.bf16.msra.mxu0 %v8346_v63 }
 0x2b0   : > { %v3401_v11 = vor.u32 %v3399_v57, %v3398_v47  ;;  %v3403_v1 = vrot.slane %v3398_v47, 4  ;;  %v3034_v37 = vpack.c.bf16 %v2953_v25, %v2950_v49  ;;  %4631 = vrot.lane.b32.xlu0 %v11079_v36, %s8427_s13  ;;  %v3836_v45 = vshll.u32 %v11061_v59, 16  ;;  %v3691_v61 = vld [vmem:[#allocation2 + $0x60] sm:$0xf]  ;;  %8255 = vmatprep.subr.bf16.mxu1 %v8346_v63 }
 0x2b1   : > { %v3671_v20 = vsel %vm11003_vm11, %v3393_v30, %v3670_v43  ;;  %v3212_v13 = vsel %vm3188_vm10, %v3035_v48, %v3171_v31  ;;  %v3835_v2 = vrot.slane %v3833_v34, 4  ;;  %v3842_v62 = vshll.u32 %v11064_v5, 16  ;;  %8260 = vmatpush3.bf16.msra.mxu1 %v8346_v63  ;;  %v3684_v31 = vld [vmem:[#allocation2 + $0x54] sm:$0xf] }
 0x2b2   : > { %v3402_v53 = vsel %vm11009_vm7, %v3394_v18, %v3401_v11  ;;  %3672 = vst [vmem:[#allocation2 + $0x3c] sm:$0xf] %v3671_v20  ;;  %v3675_v4 = vsel %vm10611_vm13, %v3403_v1, %v3674_v6  ;;  %v7781_v14 = vcombine.low %v3212_v13, %v3212_v13  ;;  %v7782_v55 = vcombine.high %v3212_v13, %v3212_v13  ;;  %v11108_v11 = vld [vmem:[#allocation2 + $0x18] sm:$0xf]  ;;  %v11116_v20 = vld [vmem:[#allocation2 + $0x1c] sm:$0xf] }
 0x2b3   : > { %3673 = vst.msk [vmem:[#allocation2 + $0x40] sm:$0xf] %vm13626_vm6, %v3402_v53  ;;  %3676 = vst [vmem:[#allocation2 + $0x44] sm:$0x1] %v3675_v4  ;;  %v3209_v9 = vsel %vm3188_vm10, %v3034_v37, %v3169_v56  ;;  %v3838_v44 = vrot.slane %v3836_v45, 5  ;;  %v3844_v41 = vrot.slane %v3842_v62, 5 }
 0x2b4   : > { %v3848_v33 = vrot.slane %v3846_v19, 4  ;;  %v3439_v22 = vshrl.u32 %v7781_v14, 16  ;;  %v3442_v46 = vshll.u32 %v7781_v14, 16  ;;  %v3447_v35 = vshrl.u32 %v7782_v55, 16  ;;  %v3688_v19 = vld [vmem:[#allocation2 + $0x5c] sm:$0x1]  ;;  %vm13631_vm6 = vmmov %vm13625_vm1 }
 0x2b5   : > { %v7779_v12 = vcombine.low %v3209_v9, %v3209_v9  ;;  %v7780_v50 = vcombine.high %v3209_v9, %v3209_v9  ;;  %v3839_v24 = vor.u32 %v3838_v44, %v3835_v2  ;;  %v3450_v16 = vshll.u32 %v7782_v55, 16  ;;  %v3762_v55 = vld [vmem:[#allocation2 + $0x20] sm:$0x1] }
 0x2b6   : > { %v3849_v0 = vor.u32 %v3848_v33, %v3844_v41  ;;  %v3441_v54 = vrot.slane %v3439_v22, 7  ;;  %v3449_v38 = vrot.slane %v3447_v35, 7  ;;  %v3852_v23 = vshll.u32 %v11095_v10, 16 }
 0x2b7   : > { %v3422_v42 = vshrl.u32 %v7779_v12, 16  ;;  %v3425_v7 = vshll.u32 %v7779_v12, 16  ;;  %v3430_v51 = vshrl.u32 %v7780_v50, 16  ;;  %v3433_v40 = vshll.u32 %v7780_v50, 16 }
 0x2b8   : > { %v3444_v60 = vor.u32 %v3442_v46, %v3441_v54  ;;  %v3445_v29 = vrot.slane %v3441_v54, 4  ;;  %v3452_v57 = vor.u32 %v3450_v16, %v3449_v38  ;;  %v3454_v49 = vrot.slane %v3449_v38, 4  ;;  %v3763_v46 = vld [vmem:[#allocation2 + $0x24] sm:$0xf] }
 0x2b9   : > { %v3424_v17 = vrot.slane %v3422_v42, 7  ;;  %v3432_v32 = vrot.slane %v3430_v51, 7  ;;  %v3840_v21 = vrot.slane %v3839_v24, 4  ;;  %v3850_v26 = vrot.slane %v3849_v0, 4  ;;  %v3764_v0 = vld [vmem:[#allocation2 + $0x28] sm:$0xf] }
 0x2ba   : > { %v3453_v43 = vsel %vm11009_vm7, %v3445_v29, %v3452_v57  ;;  %v3692_v47 = vsel %vm11003_vm11, %v3444_v60, %v3691_v61  ;;  %v3696_v25 = vsel %vm10611_vm13, %v3454_v49, %v3695_v27  ;;  %v3854_v6 = vrot.slane %v3852_v23, 5 }
 0x2bb   : > { %3693 = vst [vmem:[#allocation2 + $0x60] sm:$0xf] %v3692_v47  ;;  %3694 = vst.msk [vmem:[#allocation2 + $0x64] sm:$0xf] %vm13627_vm14, %v3453_v43  ;;  %v3427_v30 = vor.u32 %v3425_v7, %v3424_v17  ;;  %v3428_v18 = vrot.slane %v3424_v17, 4  ;;  %v3435_v48 = vor.u32 %v3433_v40, %v3432_v32  ;;  %v3437_v34 = vrot.slane %v3432_v32, 4 }
 0x2bc   : > { %3697 = vst [vmem:[#allocation2 + $0x68] sm:$0x1] %v3696_v25  ;;  %v3845_v1 = vsel %vm8548_vm2, %v3840_v21, %v3844_v41  ;;  %v3855_v37 = vsel %vm8548_vm2, %v3850_v26, %v3854_v6  ;;  %v7800_v56 = vrot.slane %v11061_v59, 9  ;;  %v4249_v45 = vrot.slane %v11064_v5, 5  ;;  %v8347_v41 = vld [vmem:[%s13168_s4 + $0x18] sm:$0xff]  }
 0x2bd   : > { %v3436_v13 = vsel %vm11009_vm7, %v3428_v18, %v3435_v48  ;;  %v3685_v2 = vsel %vm11003_vm11, %v3427_v30, %v3684_v31  ;;  %v3689_v62 = vsel %vm10611_vm13, %v3437_v34, %v3688_v19  ;;  %v7834_v53 = vcombine.low %v3845_v1, %v3855_v37  ;;  %8175 = vmatprep.subr.bf16.mxu0 %v8347_v41  ;;  %v3765_v19 = vld [vmem:[#allocation2 + $0x2c] sm:$0x1] }
 0x2be   : > { %3686 = vst [vmem:[#allocation2 + $0x54] sm:$0xf] %v3685_v2  ;;  %3687 = vst.msk [vmem:[#allocation2 + $0x58] sm:$0xf] %vm13628_vm12, %v3436_v13  ;;  %v4251_v4 = vrot.slane %v4249_v45, 4  ;;  %v4252_v59 = vrot.slane %v11095_v10, 5  ;;  %v4250_v10 = vsel %vm9002_vm5, %v7800_v56, %v4249_v45  ;;  %8256 = vmatprep.subr.bf16.mxu1 %v8347_v41  ;;  %8176 = vmatpush3.bf16.msra.mxu0 %v8347_v41 }
 0x2bf   : > { %3690 = vst [vmem:[#allocation2 + $0x5c] sm:$0x1] %v3689_v62  ;;  %v3857_v5 = vshrl.u32 %v11108_v11, 16  ;;  %v3860_v14 = vshll.u32 %v11108_v11, 16  ;;  %4666 = vrot.lane.b32.xlu0 %v7834_v53, %s8428_s14  ;;  %4518 = vrot.lane.b32.xlu1 %v7834_v53, %s8425_s11  ;;  %v3870_v9 = vshrl.u32 %v11116_v20, 16  ;;  %v3866_v44 = vshll.u32 %v11116_v20, 16 }
 0x2c0   : > { %v4253_v33 = vsel %vm9002_vm5, %v4251_v4, %v4252_v59  ;;  %v3876_v24 = vshll.u32 %v3762_v55, 16  ;;  %v4256_v54 = vrot.slane %v11116_v20, 5  ;;  %8261 = vmatpush3.bf16.msra.mxu1 %v8347_v41  ;;  %v3881_v16 = vshrl.u32 %v3763_v46, 16  ;;  %v3766_v45 = vld [vmem:[#allocation2 + $0x30] sm:$0xf] }
 0x2c1   : > { %v3859_v63 = vrot.slane %v3857_v5, 4  ;;  %v3862_v22 = vrot.slane %v3860_v14, 5  ;;  %v7850_v35 = vcombine.low %v4250_v10, %v4253_v33  ;;  %v3868_v12 = vrot.slane %v3866_v44, 5  ;;  %v3767_v62 = vld [vmem:[#allocation2 + $0x34] sm:$0xf] }
 0x2c2   : > { %v3872_v50 = vrot.slane %v3870_v9, 4  ;;  %v3884_v23 = vshll.u32 %v3763_v46, 16  ;;  %v11144_v27 = vcombine.low %v11108_v11, %v11116_v20  ;;  %v3894_v7 = vshrl.u32 %v3764_v0, 16 }
 0x2c3   : > { %v3863_v61 = vor.u32 %v3862_v22, %v3859_v63  ;;  %4701 = vrot.lane.b32.xlu0 %v7850_v35, %s8429_s15  ;;  %4598 = vrot.lane.b32.xlu1 %v7850_v35, %s8426_s12  ;;  %v3878_v40 = vrot.slane %v3876_v24, 5  ;;  %v4258_v60 = vrot.slane %v4256_v54, 4  ;;  %v4263_v29 = vrot.slane %v3764_v0, 5 }
 0x2c4   : > { %v3873_v38 = vor.u32 %v3872_v50, %v3868_v12  ;;  %v3883_v49 = vrot.slane %v3881_v16, 4  ;;  %v3886_v17 = vrot.slane %v3884_v23, 5  ;;  %v3890_v32 = vshll.u32 %v3764_v0, 16 }
 0x2c5   : > { %v3864_v42 = vrot.slane %v3863_v61, 4  ;;  %v7801_v26 = vrot.slane %v11108_v11, 9  ;;  %v4259_v43 = vrot.slane %v3762_v55, 5  ;;  %v3896_v25 = vrot.slane %v3894_v7, 4  ;;  %v11180_v61 = vld [vmem:[#allocation2 + $0x40] sm:$0xf] }
 0x2c6   : > { %v3874_v51 = vrot.slane %v3873_v38, 4  ;;  %v3892_v47 = vrot.slane %v3890_v32, 5  ;;  %v4265_v30 = vrot.slane %v4263_v29, 4  ;;  %v3887_v18 = vor.u32 %v3886_v17, %v3883_v49 }
 0x2c7   : > { %v3869_v57 = vsel %vm8548_vm2, %v3864_v42, %v3868_v12  ;;  %4736 = vrot.lane.b32.xlu0 %v11144_v27, %s8430_s16  ;;  %4633 = vrot.lane.b32.xlu1 %v11144_v27, %s8427_s13  ;;  %v4260_v6 = vsel %vm9002_vm5, %v4258_v60, %v4259_v43  ;;  %v4257_v34 = vsel %vm9002_vm5, %v7801_v26, %v4256_v54  ;;  %v7802_v1 = vrot.slane %v3763_v46, 9  ;;  %v3768_v12 = vld [vmem:[#allocation2 + $0x38] sm:$0x1] }
 0x2c8   : > { %v3879_v21 = vsel %vm8548_vm2, %v3874_v51, %v3878_v40  ;;  %v3897_v48 = vor.u32 %v3896_v25, %v3892_v47  ;;  %v4266_v11 = vrot.slane %v3765_v19, 5  ;;  %v3900_v37 = vshll.u32 %v3765_v19, 16 }
 0x2c9   : > { %v7835_v31 = vcombine.low %v3869_v57, %v3879_v21  ;;  %v7851_v56 = vcombine.low %v4257_v34, %v4260_v6  ;;  %v3888_v13 = vrot.slane %v3887_v18, 4  ;;  %v4264_v53 = vsel %vm9002_vm5, %v7802_v1, %v4263_v29  ;;  %v3173_v18 = vpop.permute.xlu0 %3172 }
 0x2ca   : > { %v4267_v20 = vsel %vm9002_vm5, %v4265_v30, %v4266_v11  ;;  %v3898_v2 = vrot.slane %v3897_v48, 4  ;;  %v3902_v4 = vrot.slane %v3900_v37, 5  ;;  %v3905_v59 = vshrl.u32 %v3766_v45, 16 }
 0x2cb   : > { %4771 = vrot.lane.b32.xlu0 %v7835_v31, %s8431_s17  ;;  %4668 = vrot.lane.b32.xlu1 %v7835_v31, %s8428_s14  ;;  %v3908_v5 = vshll.u32 %v3766_v45, 16  ;;  %v11167_v14 = vcombine.low %v3763_v46, %v3764_v0  ;;  %v7852_v55 = vcombine.low %v4264_v53, %v4267_v20  ;;  %v3893_v9 = vsel %vm8548_vm2, %v3888_v13, %v3892_v47  ;;  %v11178_v0 = vld [vmem:[#allocation2 + $0x3c] sm:$0xf] }
 0x2cc   : > { %v3903_v44 = vsel %vm8548_vm2, %v3898_v2, %v3902_v4  ;;  %v3918_v41 = vshrl.u32 %v3767_v62, 16  ;;  %v3914_v10 = vshll.u32 %v3767_v62, 16  ;;  %v3907_v33 = vrot.slane %v3905_v59, 4 }
 0x2cd   : > { %v3910_v63 = vrot.slane %v3908_v5, 5  ;;  %v7836_v22 = vcombine.low %v3893_v9, %v3903_v44  ;;  %v3924_v38 = vshll.u32 %v3768_v12, 16  ;;  %v7803_v42 = vrot.slane %v3766_v45, 9 }
 0x2ce   : > { %v3916_v35 = vrot.slane %v3914_v10, 5  ;;  %v3920_v46 = vrot.slane %v3918_v41, 4  ;;  %v4270_v7 = vrot.slane %v3767_v62, 5  ;;  %v11185_v51 = vcombine.low %v3766_v45, %v3767_v62 }
 0x2cf   : > { %4806 = vrot.lane.b32.xlu0 %v7851_v56, %s8432_s18  ;;  %4703 = vrot.lane.b32.xlu1 %v7851_v56, %s8429_s15  ;;  %v3911_v50 = vor.u32 %v3910_v63, %v3907_v33  ;;  %v3942_v60 = vshrl.u32 %v11180_v61, 16  ;;  %v3929_v29 = vshrl.u32 %v11178_v0, 16  ;;  %v3932_v57 = vshll.u32 %v11178_v0, 16 }
 0x2d0   : > { %v3921_v24 = vor.u32 %v3920_v46, %v3916_v35  ;;  %v3938_v26 = vshll.u32 %v11180_v61, 16  ;;  %v3926_v25 = vrot.slane %v3924_v38, 5  ;;  %v4273_v19 = vrot.slane %v3768_v12, 5 }
 0x2d1   : > { %v3912_v23 = vrot.slane %v3911_v50, 4  ;;  %v11201_v48 = vsel %vm9002_vm5, %v7803_v42, %v4270_v7  ;;  %v4272_v34 = vrot.slane %v4270_v7, 4  ;;  %v4277_v11 = vrot.slane %v11180_v61, 5  ;;  %v3709_v50 = vld [vmem:[#allocation2 + $0x80] sm:$0x1] }
 0x2d2   : > { %v3922_v21 = vrot.slane %v3921_v24, 4  ;;  %v11204_v37 = vrot.slane %v3929_v29, 4  ;;  %v11211_v13 = vrot.slane %v3938_v26, 5  ;;  %v11213_v2 = vrot.slane %v3942_v60, 4  ;;  %v3771_v60 = vld [vmem:[#allocation2 + $0x44] sm:$0x1] }
 0x2d3   : > { %4738 = vrot.lane.b32.xlu1 %v11167_v14, %s8430_s16  ;;  %4808 = vrot.lane.b32.xlu0 %v7852_v55, %s8432_s18  ;;  %v3917_v30 = vsel %vm8548_vm2, %v3912_v23, %v3916_v35  ;;  %v4274_v9 = vsel %vm9002_vm5, %v4272_v34, %v4273_v19  ;;  %v7804_v44 = vrot.slane %v11178_v0, 9  ;;  %v4279_v63 = vrot.slane %v4277_v11, 4  ;;  %v428_v19 = vld [vmem:[#allocation2 + $0x8c] sm:$0x1] }
 0x2d4   : > { %v3927_v45 = vsel %vm8548_vm2, %v3922_v21, %v3926_v25  ;;  %v3945_v12 = vor.u32 %v11213_v2, %v11211_v13  ;;  %v3702_v21 = vld [vmem:[#allocation2 + $0x74] sm:$0x1]  ;;  %v4280_v34 = vrot.slane %v3771_v60, 5  ;;  %v3948_v2 = vshll.u32 %v3771_v60, 16  ;;  %v11304_v60 = vld [vmem:[#allocation2 + $0x58] sm:$0xf] }
 0x2d5   : > { %v11221_v41 = vcombine.low %v3917_v30, %v3927_v45  ;;  %vm5185_vm4 = vcmask 1043456   ;;  %vm13632_vm14 = vcmask 64512   ;;  %vm13633_vm12 = vcmask 130048  }
 0x2d7   : > { %4600 = vrot.lane.b32.xlu0 %v7851_v56, %s8426_s12  ;;  %4773 = vrot.lane.b32.xlu1 %v7836_v22, %s8431_s17  ;;  %v11206_v56 = vrot.slane %v3932_v57, 5 }
 0x2d9   : > { %v3935_v46 = vor.u32 %v11206_v56, %v11204_v37  ;;  %v431_v37 = vld [vmem:[#allocation2 + $0x98] sm:$0x1] }
 0x2db   : > { %4635 = vrot.lane.b32.xlu0 %v11167_v14, %s8427_s13  ;;  %4520 = vrot.lane.b32.xlu1 %v7835_v31, %s8425_s11  ;;  %v8155_v54 = vpop.f32.mrb[16].mxu0  ;;  %v3175_v31 = vpop.permute.xlu1 %3174 }
 0x2dc   : > { %v2965_v16 = vpop.f32.mrb[17].mxu0  ;;  %v2974_v49 = vadd.f32 %v11054_v52, %v8155_v54 }
 0x2dd   : > { %v8156_v40 = vpop.f32.mrb[18].mxu0  ;;  %v2966_v43 = vadd.f32 %v11054_v52, %v2965_v16 }
 0x2de   : > { %v2977_v17 = vadd.f32 %v11054_v52, %v8156_v40  ;;  %v2968_v32 = vpop.f32.mrb[19].mxu0 }
 0x2df   : > { %4670 = vrot.lane.b32.xlu0 %v7836_v22, %s8428_s14  ;;  %4522 = vrot.lane.b32.xlu1 %v7836_v22, %s8425_s11  ;;  %v2969_v47 = vadd.f32 %v11054_v52, %v2968_v32  ;;  %v3705_v22 = vld [vmem:[#allocation2 + $0x78] sm:$0xf]  ;;  %v3698_v32 = vld [vmem:[#allocation2 + $0x6c] sm:$0xf] }
 0x2e0   : > { %v3037_v6 = vpack.c.bf16 %v2977_v17, %v2974_v49 }
 0x2e1   : > { %v3036_v1 = vpack.c.bf16 %v2969_v47, %v2966_v43 }
 0x2e2   : > { %v3218_v20 = vsel %vm3188_vm10, %v3037_v6, %v3175_v31  ;;  %v372_v31 = vld [vmem:[#allocation2 + $0x84] sm:$0x1] }
 0x2e3   : > { %4705 = vrot.lane.b32.xlu0 %v7852_v55, %s8429_s15  ;;  %4602 = vrot.lane.b32.xlu1 %v7852_v55, %s8426_s12  ;;  %v7785_v62 = vcombine.low %v3218_v20, %v3218_v20  ;;  %v7786_v53 = vcombine.high %v3218_v20, %v3218_v20  ;;  %v3215_v4 = vsel %vm3188_vm10, %v3036_v1, %v3173_v18  ;;  %v375_v1 = vld [vmem:[#allocation2 + $0x90] sm:$0x1] }
 0x2e4   : > { %v7783_v59 = vcombine.low %v3215_v4, %v3215_v4  ;;  %v7784_v5 = vcombine.high %v3215_v4, %v3215_v4  ;;  %v373_v4 = vsel %vm10611_vm13, 0, %v372_v31 }
 0x2e5   : > { %v3473_v10 = vshrl.u32 %v7785_v62, 16  ;;  %v3481_v33 = vshrl.u32 %v7786_v53, 16  ;;  %v3476_v54 = vshll.u32 %v7785_v62, 16  ;;  %v3484_v16 = vshll.u32 %v7786_v53, 16  ;;  %374 = vst [vmem:[#allocation2 + $0x84] sm:$0x1] %v373_v4 }
 0x2e6   : > { %v3456_v55 = vshrl.u32 %v7783_v59, 16  ;;  %v3464_v35 = vshrl.u32 %v7784_v5, 16  ;;  %v3459_v42 = vshll.u32 %v7783_v59, 16  ;;  %v3467_v40 = vshll.u32 %v7784_v5, 16 }
 0x2e7   : > { %4740 = vrot.lane.b32.xlu0 %v11185_v51, %s8430_s16  ;;  %4637 = vrot.lane.b32.xlu1 %v11185_v51, %s8427_s13  ;;  %v3475_v24 = vrot.slane %v3473_v10, 7  ;;  %v3483_v38 = vrot.slane %v3481_v33, 7  ;;  %v7853_v62 = vcombine.low %v11201_v48, %v4274_v9  ;;  %v4281_v53 = vsel %vm9002_vm5, %v4279_v63, %v4280_v34  ;;  %v11270_v63 = vld [vmem:[#allocation2 + $0x48] sm:$0xf]  ;;  %v384_v34 = vld [vmem:[#allocation2 + $0xb4] sm:$0x1] }
 0x2e8   : > { %v3458_v23 = vrot.slane %v3456_v55, 7  ;;  %v3466_v7 = vrot.slane %v3464_v35, 7  ;;  %v429_v59 = vsel %vm10618_vm9, 0, %v428_v19  ;;  %v3936_v5 = vrot.slane %v3935_v46, 4  ;;  %v11276_v46 = vld [vmem:[#allocation2 + $0x4c] sm:$0xf] }
 0x2e9   : > { %v3478_v29 = vor.u32 %v3476_v54, %v3475_v24  ;;  %v3479_v57 = vrot.slane %v3475_v24, 4  ;;  %v3486_v49 = vor.u32 %v3484_v16, %v3483_v38  ;;  %v3488_v17 = vrot.slane %v3483_v38, 4  ;;  %430 = vst [vmem:[#allocation2 + $0x8c] sm:$0x1] %v429_v59  ;;  %v387_v19 = vld [vmem:[#allocation2 + $0xc0] sm:$0x1] }
 0x2ea   : > { %v3461_v26 = vor.u32 %v3459_v42, %v3458_v23  ;;  %v3462_v43 = vrot.slane %v3458_v23, 4  ;;  %v3469_v47 = vor.u32 %v3467_v40, %v3466_v7  ;;  %v3471_v25 = vrot.slane %v3466_v7, 4  ;;  %v8349_v23 = vld [vmem:[%s13168_s4 + $0x20] ss:$0 sps:$4 sm:$0xff]   ;;  %v11301_v42 = vld [vmem:[#allocation2 + $0x50] sm:$0x1] }
 0x2eb   : > { %4775 = vrot.lane.b32.xlu0 %v11221_v41, %s8431_s17  ;;  %4672 = vrot.lane.b32.xlu1 %v11221_v41, %s8428_s14  ;;  %v3487_v6 = vsel %vm11009_vm7, %v3479_v57, %v3486_v49  ;;  %v3706_v30 = vsel %vm11003_vm11, %v3478_v29, %v3705_v22  ;;  %v3710_v18 = vsel %vm10611_vm13, %v3488_v17, %v3709_v50  ;;  %v3946_v10 = vrot.slane %v3945_v12, 4  ;;  %v381_v57 = vld [vmem:[#allocation2 + $0xa8] sm:$0x1] }
 0x2ec   : > { %3707 = vst [vmem:[#allocation2 + $0x78] sm:$0xf] %v3706_v30  ;;  %3708 = vst.msk [vmem:[#allocation2 + $0x7c] sm:$0xf] %vm13629_vm8, %v3487_v6  ;;  %v3470_v56 = vsel %vm11009_vm7, %v3462_v43, %v3469_v47  ;;  %v3699_v45 = vsel %vm11003_vm11, %v3461_v26, %v3698_v32  ;;  %v3703_v20 = vsel %vm10611_vm13, %v3471_v25, %v3702_v21  ;;  %v376_v33 = vsel %vm10611_vm13, 0, %v375_v1 }
 0x2ed   : > { %3711 = vst [vmem:[#allocation2 + $0x80] sm:$0x1] %v3710_v18  ;;  %3700 = vst [vmem:[#allocation2 + $0x6c] sm:$0xf] %v3699_v45  ;;  %v432_v22 = vsel %vm10618_vm9, 0, %v431_v37  ;;  %v4278_v48 = vsel %vm9002_vm5, %v7804_v44, %v4277_v11  ;;  %v3950_v9 = vrot.slane %v3948_v2, 5  ;;  %v11274_v55 = vcombine.low %v11178_v0, %v11180_v61  ;;  %8263 = vmatprep.subr.msk.bf16.mxu0 %vm5185_vm4, %v8349_v23 }
 0x2ee   : > { %3701 = vst.msk [vmem:[#allocation2 + $0x70] sm:$0xf] %vm13630_vm3, %v3470_v56  ;;  %3704 = vst [vmem:[#allocation2 + $0x74] sm:$0x1] %v3703_v20  ;;  %v7854_v35 = vcombine.low %v4278_v48, %v4281_v53  ;;  %v3941_v12 = vsel %vm8548_vm2, %v3936_v5, %v11211_v13  ;;  %v3953_v11 = vshrl.u32 %v11270_v63, 16  ;;  %v3956_v0 = vshll.u32 %v11270_v63, 16  ;;  %8264 = vmatprep.subr.msk.bf16.mxu1 %vm5185_vm4, %v8349_v23 }
 0x2ef   : > { %4810 = vrot.lane.b32.xlu0 %v7853_v62, %s8432_s18  ;;  %4707 = vrot.lane.b32.xlu1 %v7853_v62, %s8429_s15  ;;  %377 = vst [vmem:[#allocation2 + $0x90] sm:$0x1] %v376_v33  ;;  %433 = vst [vmem:[#allocation2 + $0x98] sm:$0x1] %v432_v22  ;;  %v3951_v50 = vsel %vm8548_vm2, %v3946_v10, %v3950_v9  ;;  %v3966_v61 = vshrl.u32 %v11276_v46, 16  ;;  %v3962_v44 = vshll.u32 %v11276_v46, 16 }
 0x2f0   : > { %v7838_v24 = vcombine.low %v3941_v12, %v3951_v50  ;;  %v3955_v13 = vrot.slane %v3953_v11, 4  ;;  %v3958_v54 = vrot.slane %v3956_v0, 5  ;;  %v5187_v29 = vsel %vm5185_vm4, %v8349_v23, 0  ;;  %v437_v32 = vld [vmem:[#allocation2 + $0xb0] sm:$0x1] }
 0x2f1   : > { %v11292_v38 = vrot.slane %v3962_v44, 5  ;;  %v3968_v16 = vrot.slane %v3966_v61, 4  ;;  %v3972_v49 = vshll.u32 %v11301_v42, 16  ;;  %v4284_v17 = vrot.slane %v11276_v46, 5  ;;  %8178 = vmatpush3.bf16.msra.mxu0 %v5187_v29  ;;  %8262 = vmatpush3.bf16.msra.mxu1 %v5187_v29  ;;  %v378_v43 = vld [vmem:[#allocation2 + $0x9c] sm:$0x1] }
 0x2f2   : > { %v3959_v7 = vor.u32 %v3958_v54, %v3955_v13  ;;  %v3990_v26 = vshrl.u32 %v11304_v60, 16  ;;  %v434_v47 = vld [vmem:[#allocation2 + $0xa4] sm:$0x1]  ;;  %v382_v31 = vsel %vm10611_vm13, 0, %v381_v57  ;;  %v443_v6 = vld [vmem:[#allocation2 + $0xc8] sm:$0x1]  ;;  %v11335_v4 = vcombine.low %v11270_v63, %v11276_v46 }
 0x2f3   : > { %4742 = vrot.lane.b32.xlu1 %v11274_v55, %s8430_s16  ;;  %4812 = vrot.lane.b32.xlu0 %v7854_v35, %s8432_s18  ;;  %v3969_v40 = vor.u32 %v3968_v16, %v11292_v38  ;;  %383 = vst [vmem:[#allocation2 + $0xa8] sm:$0x1] %v382_v31  ;;  %v440_v1 = vld [vmem:[#allocation2 + $0xbc] sm:$0x1]  ;;  %v3986_v37 = vshll.u32 %v11304_v60, 16  ;;  %v438_v56 = vsel %vm10618_vm9, 0, %v437_v32  ;;  %v3177_v32 = vpop.permute.xlu0 %3176 }
 0x2f4   : > { %v3960_v21 = vrot.slane %v3959_v7, 4  ;;  %v379_v45 = vsel %vm10611_vm13, 0, %v378_v43  ;;  %v435_v20 = vsel %vm10618_vm9, 0, %v434_v47  ;;  %v3974_v2 = vrot.slane %v3972_v49, 5  ;;  %439 = vst [vmem:[#allocation2 + $0xb0] sm:$0x1] %v438_v56 }
 0x2f5   : > { %v3970_v25 = vrot.slane %v3969_v40, 4  ;;  %380 = vst [vmem:[#allocation2 + $0x9c] sm:$0x1] %v379_v45  ;;  %436 = vst [vmem:[#allocation2 + $0xa4] sm:$0x1] %v435_v20  ;;  %v444_v53 = vsel %vm10618_vm9, 0, %v443_v6 }
 0x2f6   : > { %445 = vst [vmem:[#allocation2 + $0xc8] sm:$0x1] %v444_v53  ;;  %v385_v59 = vsel %vm10611_vm13, 0, %v384_v34  ;;  %v441_v5 = vsel %vm10618_vm9, 0, %v440_v1  ;;  %v3965_v10 = vsel %vm8548_vm2, %v3960_v21, %v11292_v38  ;;  %v4286_v22 = vrot.slane %v4284_v17, 4 }
 0x2f7   : > { %4604 = vrot.lane.b32.xlu0 %v7853_v62, %s8426_s12  ;;  %4777 = vrot.lane.b32.xlu1 %v7838_v24, %s8431_s17  ;;  %v388_v62 = vsel %vm10611_vm13, 0, %v387_v19  ;;  %v3975_v33 = vsel %vm8548_vm2, %v3970_v25, %v3974_v2  ;;  %v4291_v48 = vrot.slane %v11304_v60, 5  ;;  %386 = vst [vmem:[#allocation2 + $0xb4] sm:$0x1] %v385_v59  ;;  %442 = vst [vmem:[#allocation2 + $0xbc] sm:$0x1] %v441_v5 }
 0x2f8   : > { %389 = vst [vmem:[#allocation2 + $0xc0] sm:$0x1] %v388_v62  ;;  %v3988_v46 = vrot.slane %v3986_v37, 5  ;;  %v3992_v12 = vrot.slane %v3990_v26, 4  ;;  %v7805_v50 = vrot.slane %v11270_v63, 9  ;;  %v4287_v11 = vrot.slane %v11301_v42, 5  ;;  %v11388_v37 = vpop.permute.xlu0 %3180 }
 0x2f9   : > { %v7839_v0 = vcombine.low %v3965_v10, %v3975_v33  ;;  %v3777_v61 = vld [vmem:[#allocation2 + $0x5c] sm:$0x1]  ;;  %v11360_v7 = vld [vmem:[#allocation2 + $0x60] sm:$0xf]  ;;  %v11364_v49 = vld [vmem:[#allocation2 + $0x64] sm:$0xf]  ;;  %v3179_v10 = vpop.permute.xlu1 %3178 }
 0x2fa   : > { %v4288_v44 = vsel %vm9002_vm5, %v4286_v22, %v4287_v11  ;;  %v3993_v54 = vor.u32 %v3992_v12, %v3988_v46  ;;  %v4285_v38 = vsel %vm9002_vm5, %v7805_v50, %v4284_v17  ;;  %v4294_v63 = vrot.slane %v3777_v61, 5  ;;  %v11398_v33 = vld [vmem:[#allocation2 + $0x68] sm:$0x1] }
 0x2fb   : > { %4639 = vrot.lane.b32.xlu0 %v11274_v55, %s8427_s13  ;;  %4524 = vrot.lane.b32.xlu1 %v11221_v41, %s8425_s11  ;;  %v11311_v41 = vld [vmem:[#allocation2 + $0x54] sm:$0xf]  ;;  %v3996_v23 = vshll.u32 %v3777_v61, 16  ;;  %v7855_v42 = vcombine.low %v4285_v38, %v4288_v44  ;;  %v4001_v26 = vshrl.u32 %v11360_v7, 16  ;;  %v4004_v43 = vshll.u32 %v11360_v7, 16 }
 0x2fc   : > { %v3977_v30 = vshrl.u32 %v11311_v41, 16  ;;  %v3980_v18 = vshll.u32 %v11311_v41, 16  ;;  %v7806_v16 = vrot.slane %v11311_v41, 9  ;;  %v3994_v57 = vrot.slane %v3993_v54, 4  ;;  %v11409_v61 = vld [vmem:[#allocation2 + $0x6c] sm:$0xf] }
 0x2fd   : > { %v3998_v21 = vrot.slane %v3996_v23, 5  ;;  %v11374_v47 = vcombine.low %v11311_v41, %v11304_v60  ;;  %v4014_v31 = vshrl.u32 %v11364_v49, 16  ;;  %v4010_v19 = vshll.u32 %v11364_v49, 16 }
 0x2fe   : > { %v3979_v9 = vrot.slane %v3977_v30, 4  ;;  %v4292_v17 = vsel %vm9002_vm5, %v7806_v16, %v4291_v48  ;;  %v4006_v34 = vrot.slane %v4004_v43, 5  ;;  %v11406_v50 = vcombine.low %v11360_v7, %v11364_v49 }
 0x2ff   : > { %4674 = vrot.lane.b32.xlu0 %v7838_v24, %s8428_s14  ;;  %4526 = vrot.lane.b32.xlu1 %v7838_v24, %s8425_s11  ;;  %v4293_v24 = vrot.slane %v4291_v48, 4  ;;  %v3999_v30 = vsel %vm8548_vm2, %v3994_v57, %v3998_v21  ;;  %v11390_v45 = vrot.slane %v4010_v19, 5  ;;  %v4016_v20 = vrot.slane %v4014_v31, 4 }
 0x300   : > { %v4020_v11 = vshll.u32 %v11398_v33, 16  ;;  %v4298_v54 = vrot.slane %v11364_v49, 5  ;;  %v4025_v57 = vshrl.u32 %v11409_v61, 16  ;;  %v4028_v21 = vshll.u32 %v11409_v61, 16 }
 0x301   : > { %v4295_v40 = vsel %vm9002_vm5, %v4293_v24, %v4294_v63  ;;  %vm13634_vm8 = vcmask 195584   ;;  %vm13635_vm3 = vcmask 261120  }
 0x302   : > { %v11376_v25 = vcombine.low %v4292_v17, %v4295_v40 }
 0x303   : > { %4709 = vrot.lane.b32.xlu0 %v7854_v35, %s8429_s15  ;;  %4606 = vrot.lane.b32.xlu1 %v7854_v35, %s8426_s12  ;;  %v3982_v35 = vrot.slane %v3980_v18, 5  ;;  %v4003_v18 = vrot.slane %v4001_v26, 4  ;;  %v3719_v26 = vld [vmem:[#allocation2 + $0x90] sm:$0xf] }
 0x305   : > { %v3983_v13 = vor.u32 %v3982_v35, %v3979_v9  ;;  %v4007_v48 = vor.u32 %v4006_v34, %v4003_v18  ;;  %v4017_v35 = vor.u32 %v4016_v20, %v11390_v45  ;;  %v3723_v34 = vld [vmem:[#allocation2 + $0x98] sm:$0x1]  ;;  %v3712_v20 = vld [vmem:[#allocation2 + $0x84] sm:$0xf] }
 0x307   : > { %4744 = vrot.lane.b32.xlu0 %v11335_v4, %s8430_s16  ;;  %4641 = vrot.lane.b32.xlu1 %v11335_v4, %s8427_s13  ;;  %v3984_v29 = vrot.slane %v3983_v13, 4  ;;  %v11418_v63 = vrot.slane %v4007_v48, 4 }
 0x309   : > { %v3989_v6 = vsel %vm8548_vm2, %v3984_v29, %v3988_v46  ;;  %v11401_v46 = vld [vmem:[#allocation2 + $0x70] sm:$0xf]  ;;  %v4018_v29 = vrot.slane %v4017_v35, 4 }
 0x30a   : > { %v7840_v1 = vcombine.low %v3989_v6, %v3999_v30  ;;  %v4038_v23 = vshrl.u32 %v11401_v46, 16 }
 0x30b   : > { %4779 = vrot.lane.b32.xlu0 %v7839_v0, %s8431_s17  ;;  %4676 = vrot.lane.b32.xlu1 %v7839_v0, %s8428_s14 }
 0x30f   : > { %4814 = vrot.lane.b32.xlu0 %v7855_v42, %s8432_s18  ;;  %4711 = vrot.lane.b32.xlu1 %v7855_v42, %s8429_s15 }
 0x313   : > { %4746 = vrot.lane.b32.xlu1 %v11374_v47, %s8430_s16  ;;  %4816 = vrot.lane.b32.xlu0 %v11376_v25, %s8432_s18  ;;  %v8159_v60 = vpop.f32.mrb[20].mxu0 }
 0x314   : > { %v2981_v41 = vpop.f32.mrb[21].mxu0  ;;  %v2990_v2 = vadd.f32 %v11054_v52, %v8159_v60 }
 0x315   : > { %v8160_v56 = vpop.f32.mrb[22].mxu0  ;;  %v2982_v59 = vadd.f32 %v11054_v52, %v2981_v41 }
 0x316   : > { %v2993_v62 = vadd.f32 %v11054_v52, %v8160_v56  ;;  %v2984_v53 = vpop.f32.mrb[23].mxu0 }
 0x317   : > { %4608 = vrot.lane.b32.xlu0 %v7855_v42, %s8426_s12  ;;  %4781 = vrot.lane.b32.xlu1 %v7840_v1, %s8431_s17  ;;  %v2985_v5 = vadd.f32 %v11054_v52, %v2984_v53  ;;  %v11414_v52 = vpop.permute.xlu0 %3184 }
 0x318   : > { %v3039_v22 = vpack.c.bf16 %v2993_v62, %v2990_v2  ;;  %v3716_v2 = vld [vmem:[#allocation2 + $0x8c] sm:$0x1] }
 0x319   : > { %v3038_v9 = vpack.c.bf16 %v2985_v5, %v2982_v59 }
 0x31a   : > { %v3224_v12 = vsel %vm3188_vm10, %v3039_v22, %v3179_v10 }
 0x31b   : > { %4643 = vrot.lane.b32.xlu0 %v11374_v47, %s8427_s13  ;;  %4528 = vrot.lane.b32.xlu1 %v7839_v0, %s8425_s11  ;;  %v3221_v44 = vsel %vm3188_vm10, %v3038_v9, %v3177_v32  ;;  %v7789_v24 = vcombine.low %v3224_v12, %v3224_v12  ;;  %v7790_v13 = vcombine.high %v3224_v12, %v3224_v12  ;;  %v4034_v32 = vshll.u32 %v11401_v46, 16  ;;  %v11426_v56 = vpop.permute.xlu0 %4516 }
 0x31c   : > { %v7787_v38 = vcombine.low %v3221_v44, %v3221_v44  ;;  %v7788_v16 = vcombine.high %v3221_v44, %v3221_v44 }
 0x31d   : > { %v3507_v42 = vshrl.u32 %v7789_v24, 16  ;;  %v3515_v40 = vshrl.u32 %v7790_v13, 16  ;;  %v3510_v31 = vshll.u32 %v7789_v24, 16  ;;  %v3518_v6 = vshll.u32 %v7790_v13, 16 }
 0x31e   : > { %v3490_v0 = vshrl.u32 %v7787_v38, 16  ;;  %v3498_v17 = vshrl.u32 %v7788_v16, 16  ;;  %v3493_v60 = vshll.u32 %v7787_v38, 16  ;;  %v3501_v18 = vshll.u32 %v7788_v16, 16  ;;  %v11446_v38 = vpop.permute.xlu1 %3182 }
 0x31f   : > { %4678 = vrot.lane.b32.xlu0 %v7840_v1, %s8428_s14  ;;  %4530 = vrot.lane.b32.xlu1 %v7840_v1, %s8425_s11  ;;  %v3509_v43 = vrot.slane %v3507_v42, 7  ;;  %v3517_v19 = vrot.slane %v3515_v40, 7  ;;  %v4013_v16 = vsel %vm8548_vm2, %v11418_v63, %v11390_v45  ;;  %v4300_v42 = vrot.slane %v4298_v54, 4 }
 0x320   : > { %v3492_v30 = vrot.slane %v3490_v0, 7  ;;  %v3500_v41 = vrot.slane %v3498_v17, 7  ;;  %v4305_v40 = vrot.slane %v11401_v46, 5  ;;  %v4027_v0 = vrot.slane %v4025_v57, 4 }
 0x321   : > { %v3512_v62 = vor.u32 %v3510_v31, %v3509_v43  ;;  %v3513_v53 = vrot.slane %v3509_v43, 4  ;;  %v3520_v59 = vor.u32 %v3518_v6, %v3517_v19  ;;  %v3522_v5 = vrot.slane %v3517_v19, 4  ;;  %v4597_v31 = vpop.permute.xlu0 %4596  ;;  %v3783_v6 = vld [vmem:[#allocation2 + $0x74] sm:$0x1] }
 0x322   : > { %v3495_v10 = vor.u32 %v3493_v60, %v3492_v30  ;;  %v3496_v1 = vrot.slane %v3492_v30, 4  ;;  %v3503_v22 = vor.u32 %v3501_v18, %v3500_v41  ;;  %v3505_v48 = vrot.slane %v3500_v41, 4 }
 0x323   : > { %4713 = vrot.lane.b32.xlu0 %v11376_v25, %s8429_s15  ;;  %4610 = vrot.lane.b32.xlu1 %v11376_v25, %s8426_s12  ;;  %v3521_v9 = vsel %vm11009_vm7, %v3513_v53, %v3520_v59  ;;  %v3720_v35 = vsel %vm11003_vm11, %v3512_v62, %v3719_v26  ;;  %v3724_v12 = vsel %vm10611_vm13, %v3522_v5, %v3723_v34  ;;  %v4022_v25 = vrot.slane %v4020_v11, 5 }
 0x324   : > { %v3504_v44 = vsel %vm11009_vm7, %v3496_v1, %v3503_v22  ;;  %v3713_v24 = vsel %vm11003_vm11, %v3495_v10, %v3712_v20  ;;  %v3717_v13 = vsel %vm10611_vm13, %v3505_v48, %v3716_v2  ;;  %3721 = vst [vmem:[#allocation2 + $0x90] sm:$0xf] %v3720_v35  ;;  %3722 = vst.msk [vmem:[#allocation2 + $0x94] sm:$0xf] %vm13625_vm1, %v3521_v9  ;;  %v4030_v17 = vrot.slane %v4028_v21, 5 }
 0x325   : > { %3725 = vst [vmem:[#allocation2 + $0x98] sm:$0x1] %v3724_v12  ;;  %3714 = vst [vmem:[#allocation2 + $0x84] sm:$0xf] %v3713_v24  ;;  %v4023_v11 = vsel %vm8548_vm2, %v4018_v29, %v4022_v25  ;;  %v4036_v26 = vrot.slane %v4034_v32, 5  ;;  %v4040_v43 = vrot.slane %v4038_v23, 4  ;;  %v11467_v23 = vpop.permute.xlu1 %3186  ;;  %v4632_v41 = vpop.permute.xlu0 %4631  ;;  %v11484_v59 = vcombine.low %v11409_v61, %v11401_v46 }
 0x326   : > { %3715 = vst.msk [vmem:[#allocation2 + $0x88] sm:$0xf] %vm13631_vm6, %v3504_v44  ;;  %3718 = vst [vmem:[#allocation2 + $0x8c] sm:$0x1] %v3717_v13  ;;  %v7807_v45 = vrot.slane %v11360_v7, 9  ;;  %v4301_v63 = vrot.slane %v11398_v33, 5  ;;  %v7841_v19 = vcombine.low %v4013_v16, %v4023_v11  ;;  %v4031_v21 = vor.u32 %v4030_v17, %v4027_v0 }
 0x327   : > { %4748 = vrot.lane.b32.xlu0 %v11406_v50, %s8430_s16  ;;  %4645 = vrot.lane.b32.xlu1 %v11406_v50, %s8427_s13  ;;  %v4307_v29 = vrot.slane %v4305_v40, 4  ;;  %v4041_v32 = vor.u32 %v4040_v43, %v4036_v26  ;;  %v7808_v33 = vrot.slane %v11409_v61, 9  ;;  %v4308_v30 = vrot.slane %v3783_v6, 5  ;;  %v11486_v10 = vld [vmem:[#allocation2 + $0x78] sm:$0xf] }
 0x328   : > { %v4302_v57 = vsel %vm9002_vm5, %v4300_v42, %v4301_v63  ;;  %v4299_v7 = vsel %vm9002_vm5, %v7807_v45, %v4298_v54  ;;  %v4044_v60 = vshll.u32 %v3783_v6, 16  ;;  %v4032_v20 = vrot.slane %v4031_v21, 4  ;;  %v11492_v48 = vld [vmem:[#allocation2 + $0x7c] sm:$0xf]  ;;  %v8411_v9 = vld [vmem:[#allocation2] sm:$0xf] }
 0x329   : > { %v7857_v18 = vcombine.low %v4299_v7, %v4302_v57  ;;  %v4309_v34 = vsel %vm9002_vm5, %v4307_v29, %v4308_v30  ;;  %v4042_v2 = vrot.slane %v4041_v32, 4  ;;  %v4306_v49 = vsel %vm9002_vm5, %v7808_v33, %v4305_v40  ;;  %v8412_v35 = vld [vmem:[#allocation2 + $0x4] sm:$0xf]  ;;  %v390_v42 = vld [vmem:[#allocation2 + $0xcc] sm:$0x1] }
 0x32a   : > { %v4046_v62 = vrot.slane %v4044_v60, 5  ;;  %v7858_v5 = vcombine.low %v4306_v49, %v4309_v34  ;;  %v4037_v1 = vsel %vm8548_vm2, %v4032_v20, %v4036_v26  ;;  %v7817_v12 = vcombine.low %v8411_v9, %v8412_v35  ;;  %v446_v57 = vld [vmem:[#allocation2 + $0xd4] sm:$0x1]  ;;  %v3786_v29 = vld [vmem:[#allocation2 + $0x80] sm:$0x1] }
 0x32b   : > { %4783 = vrot.lane.b32.xlu0 %v7841_v19, %s8431_s17  ;;  %4680 = vrot.lane.b32.xlu1 %v7841_v19, %s8428_s14  ;;  %v4049_v46 = vshrl.u32 %v11486_v10, 16  ;;  %v4052_v61 = vshll.u32 %v11486_v10, 16  ;;  %v4062_v25 = vshrl.u32 %v11492_v48, 16  ;;  %v4058_v16 = vshll.u32 %v11492_v48, 16 }
 0x32c   : > { %v4047_v22 = vsel %vm8548_vm2, %v4042_v2, %v4046_v62  ;;  %v4840_v40 = vsel %vm13632_vm14, %v7817_v12, %v11426_v56  ;;  %v391_v17 = vsel %vm10611_vm13, 0, %v390_v42  ;;  %v447_v56 = vsel %vm10618_vm9, 0, %v446_v57 }
 0x32d   : > { %v7842_v13 = vcombine.low %v4037_v1, %v4047_v22  ;;  %v4051_v0 = vrot.slane %v4049_v46, 4  ;;  %v4054_v11 = vrot.slane %v4052_v61, 5  ;;  %v4060_v45 = vrot.slane %v4058_v16, 5  ;;  %392 = vst [vmem:[#allocation2 + $0xcc] sm:$0x1] %v391_v17 }
 0x32e   : > { %v4064_v63 = vrot.slane %v4062_v25, 4  ;;  %v4887_v6 = vsel %vm13633_vm12, %v4840_v40, %v4597_v31  ;;  %448 = vst [vmem:[#allocation2 + $0xd4] sm:$0x1] %v447_v56  ;;  %v11515_v31 = vld [vmem:[#allocation2 + $0x84] sm:$0xf]  ;;  %vm13636_vm1 = vcmask 326656  }
 0x32f   : > { %4818 = vrot.lane.b32.xlu0 %v7857_v18, %s8432_s18  ;;  %4715 = vrot.lane.b32.xlu1 %v7857_v18, %s8429_s15  ;;  %v4055_v21 = vor.u32 %v4054_v11, %v4051_v0  ;;  %v4919_v32 = vsel %vm13634_vm8, %v4887_v6, %v4632_v41  ;;  %v11520_v34 = vld [vmem:[#allocation2 + $0x88] sm:$0xf]  ;;  %vm13637_vm6 = vcmask 392192   ;;  %v4312_v41 = vrot.slane %v11492_v48, 5 }
 0x330   : > { %v4065_v30 = vor.u32 %v4064_v63, %v4060_v45  ;;  %v4073_v22 = vshrl.u32 %v11515_v31, 16  ;;  %v4086_v35 = vshrl.u32 %v11520_v34, 16  ;;  %v4076_v12 = vshll.u32 %v11515_v31, 16 }
 0x331   : > { %v11480_v54 = vpop.permute.xlu1 %4518  ;;  %v4667_v53 = vpop.permute.xlu0 %4666  ;;  %v4056_v2 = vrot.slane %v4055_v21, 4  ;;  %v4082_v46 = vshll.u32 %v11520_v34, 16  ;;  %vm13638_vm12 = vcmask 588800   ;;  %v4314_v16 = vrot.slane %v4312_v41, 4 }
 0x332   : > { %v4951_v60 = vsel %vm13635_vm3, %v4919_v32, %v4667_v53  ;;  %v4066_v1 = vrot.slane %v4065_v30, 4  ;;  %vm13639_vm8 = vcmask 130048   ;;  %v4319_v11 = vrot.slane %v11520_v34, 5 }
 0x333   : > { %4750 = vrot.lane.b32.xlu1 %v11484_v59, %s8430_s16  ;;  %4820 = vrot.lane.b32.xlu0 %v7858_v5, %s8432_s18  ;;  %v4061_v25 = vsel %vm8548_vm2, %v4056_v2, %v4060_v45  ;;  %vm13640_vm3 = vcmask 195584   ;;  %v4078_v17 = vrot.slane %v4076_v12, 5  ;;  %v7809_v6 = vrot.slane %v11486_v10, 9 }
 0x334   : > { %v4321_v30 = vrot.slane %v4319_v11, 4 }
 0x335   : > { %v4599_v44 = vpop.permute.xlu1 %4598  ;;  %v4702_v24 = vpop.permute.xlu0 %4701 }
 0x337   : > { %4612 = vrot.lane.b32.xlu0 %v7857_v18, %s8426_s12  ;;  %4785 = vrot.lane.b32.xlu1 %v7842_v13, %s8431_s17  ;;  %v4983_v18 = vsel %vm13636_vm1, %v4951_v60, %v4702_v24  ;;  %v4843_v24 = vsel %vm13632_vm14, %v11079_v36, %v11480_v54  ;;  %v4075_v36 = vrot.slane %v4073_v22, 4  ;;  %vm13641_vm1 = vcmask 261120  }
 0x338   : > { %v4889_v42 = vsel %vm13639_vm8, %v4843_v24, %v4599_v44  ;;  %v4315_v44 = vrot.slane %v3786_v29, 5  ;;  %vm13643_vm14 = vcmask 392192   ;;  %v11576_v24 = vld [vmem:[#allocation2 + $0x94] sm:$0xf]  ;;  %vm13644_vm8 = vcmask 64512  }
 0x339   : > { %v4634_v26 = vpop.permute.xlu1 %4633  ;;  %v4737_v43 = vpop.permute.xlu0 %4736  ;;  %v4079_v60 = vor.u32 %v4078_v17, %v4075_v36 }
 0x33a   : > { %v5015_v20 = vsel %vm13637_vm6, %v4983_v18, %v4737_v43  ;;  %v4921_v54 = vsel %vm13640_vm3, %v4889_v42, %v4634_v26  ;;  %v11547_v43 = vrot.slane %v4082_v46, 5  ;;  %vm13642_vm6 = vcmask 326656  }
 0x33b   : > { %4647 = vrot.lane.b32.xlu0 %v11484_v59, %s8427_s13  ;;  %4532 = vrot.lane.b32.xlu1 %v7841_v19, %s8425_s11  ;;  %v4068_v19 = vshll.u32 %v3786_v29, 16  ;;  %v4316_v32 = vsel %vm9002_vm5, %v4314_v16, %v4315_v44  ;;  %v4080_v12 = vrot.slane %v4079_v60, 4  ;;  %v11599_v44 = vcombine.low %v11515_v31, %v11520_v34 }
 0x33c   : > { %vm13645_vm3 = vcmask 130048  }
 0x33d   : > { %v4669_v7 = vpop.permute.xlu1 %4668  ;;  %v4772_v33 = vpop.permute.xlu0 %4771  ;;  %v4070_v61 = vrot.slane %v4068_v19, 5  ;;  %v4313_v19 = vsel %vm9002_vm5, %v7809_v6, %v4312_v41  ;;  %v11583_v41 = vld [vmem:[%s13167_s3] ss:$0 sm:$0xff] }
 0x33e   : > { %v5047_v49 = vsel %vm2483_vm15, %v5015_v20, %v4772_v33  ;;  %v4953_v63 = vsel %vm13641_vm1, %v4921_v54, %v4669_v7  ;;  %v3789_v7 = vld [vmem:[#allocation2 + $0x8c] sm:$0x1]  ;;  %v7810_v20 = vrot.slane %v11515_v31, 9  ;;  %vm13646_vm1 = vcmask 195584  }
 0x33f   : > { %4682 = vrot.lane.b32.xlu0 %v7842_v13, %s8428_s14  ;;  %4534 = vrot.lane.b32.xlu1 %v7842_v13, %s8425_s11  ;;  %v11538_v13 = vcombine.low %v11486_v10, %v11492_v48  ;;  %v4088_v48 = vrot.slane %v4086_v35, 4  ;;  %v4322_v2 = vrot.slane %v3789_v7, 5 }
 0x341   : > { %v4704_v62 = vpop.permute.xlu1 %4703  ;;  %v4807_v53 = vpop.permute.xlu0 %4806  ;;  %v4089_v29 = vor.u32 %v4088_v48, %v11547_v43  ;;  %v4323_v35 = vsel %vm9002_vm5, %v4321_v30, %v4322_v2 }
 0x342   : > { %v5079_v9 = vsel %vm2516_vm0, %v5047_v49, %v4807_v53  ;;  %v4985_v45 = vsel %vm13642_vm6, %v4953_v63, %v4704_v62  ;;  %v4092_v62 = vshll.u32 %v3789_v7, 16  ;;  %v11572_v53 = vld [vmem:[#allocation2 + $0x90] sm:$0xf]  ;;  %vm13647_vm6 = vcmask 261120  }
 0x343   : > { %4717 = vrot.lane.b32.xlu0 %v7858_v5, %s8429_s15  ;;  %4614 = vrot.lane.b32.xlu1 %v7858_v5, %s8426_s12  ;;  %v4071_v5 = vsel %vm8548_vm2, %v4066_v1, %v4070_v61  ;;  %v4090_v46 = vrot.slane %v4089_v29, 4 }
 0x344   : > { %8179 = vmatprep.mubr.msk.bf16.mxu0 %vm13638_vm12, %v5079_v9  ;;  %v11557_v21 = vcombine.low %v4061_v25, %v4071_v5  ;;  %v7859_v9 = vcombine.low %v4313_v19, %v4316_v32  ;;  %v4320_v5 = vsel %vm9002_vm5, %v7810_v20, %v4319_v11  ;;  %v4094_v54 = vrot.slane %v4092_v62, 5 }
 0x345   : > { %v4739_v40 = vpop.permute.xlu1 %4738  ;;  %v4809_v0 = vpop.permute.xlu0 %4808 }
 0x346   : > { %v5017_v57 = vsel %vm13643_vm14, %v4985_v45, %v4739_v40  ;;  %v4097_v40 = vshrl.u32 %v11572_v53, 16  ;;  %v11601_v45 = vcombine.low %v4320_v5, %v4323_v35  ;;  %v4095_v32 = vsel %vm8548_vm2, %v4090_v46, %v4094_v54  ;;  %v3726_v5 = vld [vmem:[#allocation2 + $0x9c] sm:$0xf] }
 0x347   : > { %4752 = vrot.lane.b32.xlu0 %v11538_v13, %s8430_s16  ;;  %4649 = vrot.lane.b32.xlu1 %v11538_v13, %s8427_s13  ;;  %vm13648_vm14 = vcmask 60416  }
 0x348   : > { %v11617_v34 = vrot.slane %v4097_v40, 4 }
 0x349   : > { %v4774_v26 = vpop.permute.xlu1 %4773  ;;  %v4601_v56 = vpop.permute.xlu0 %4600 }
 0x34a   : > { %v5049_v33 = vsel %vm2483_vm15, %v5017_v57, %v4774_v26  ;;  %v4110_v57 = vshrl.u32 %v11576_v24, 16  ;;  %v4085_v26 = vsel %vm8548_vm2, %v4080_v12, %v11547_v43 }
 0x34b   : > { %v5081_v18 = vsel %vm2516_vm0, %v5049_v33, %v4809_v0  ;;  %4787 = vrot.lane.b32.xlu0 %v11557_v21, %s8431_s17  ;;  %4684 = vrot.lane.b32.xlu1 %v11557_v21, %s8428_s14  ;;  %v8163_v10 = vpop.f32.mrb[24].mxu0  ;;  %v4100_v0 = vshll.u32 %v11572_v53, 16  ;;  %v4106_v33 = vshll.u32 %v11576_v24, 16  ;;  %v7844_v19 = vcombine.low %v4085_v26, %v4095_v32  ;;  %v3792_v26 = vld [vmem:[#allocation2 + $0x98] sm:$0x1] }
 0x34c   : > { %8180 = vmatmul.mubr.msk.bf16.vlgmr.msra.gmra.mrb[32].mxu0 %vm13638_vm12, %v5081_v18  ;;  %v2997_v49 = vpop.f32.mrb[25].mxu0  ;;  %v3006_v25 = vadd.f32 %v11583_v41, %v8163_v10  ;;  %vm13649_vm12 = vcmask 326656  }
 0x34d   : > { %v4521_v1 = vpop.permute.xlu1 %4520  ;;  %v4636_v22 = vpop.permute.xlu0 %4635  ;;  %v2998_v36 = vadd.f32 %v11583_v41, %v2997_v49  ;;  %v4112_v49 = vrot.slane %v4110_v57, 4  ;;  %v11631_v12 = vrot.slane %v4106_v33, 5 }
 0x34e   : > { %v8164_v61 = vpop.f32.mrb[26].mxu0  ;;  %v4846_v11 = vsel %vm13644_vm8, %v11144_v27, %v4521_v1  ;;  %v11619_v27 = vrot.slane %v4100_v0, 5  ;;  %v3733_v1 = vld [vmem:[#allocation2 + $0xa8] sm:$0xf]  ;;  %vm13650_vm8 = vmmov %vm13648_vm14 }
 0x34f   : > { %4822 = vrot.lane.b32.xlu0 %v7859_v9, %s8432_s18  ;;  %4719 = vrot.lane.b32.xlu1 %v7859_v9, %s8429_s15  ;;  %v3009_v16 = vadd.f32 %v11583_v41, %v8164_v61  ;;  %v3000_v42 = vpop.f32.mrb[27].mxu0  ;;  %v4891_v29 = vsel %vm13645_vm3, %v4846_v11, %v4601_v56  ;;  %vm13651_vm3 = vcmask 392192  }
 0x350   : > { %v3001_v17 = vadd.f32 %v11583_v41, %v3000_v42  ;;  %v4923_v56 = vsel %vm13646_vm1, %v4891_v29, %v4636_v22  ;;  %vm13652_vm1 = vcmask 64512  }
 0x351   : > { %v11593_v48 = vpop.permute.xlu1 %4522  ;;  %v11595_v63 = vpop.permute.xlu0 %4670  ;;  %v3041_v6 = vpack.c.bf16 %v3009_v16, %v3006_v25  ;;  %v3737_v25 = vld [vmem:[#allocation2 + $0xb0] sm:$0x1] }
 0x352   : > { %v3040_v7 = vpack.c.bf16 %v3001_v17, %v2998_v36 }
 0x353   : > { %4754 = vrot.lane.b32.xlu1 %v11599_v44, %s8430_s16  ;;  %4824 = vrot.lane.b32.xlu0 %v11601_v45, %s8432_s18  ;;  %v3230_v31 = vsel %vm3188_vm10, %v3041_v6, %v11446_v38 }
 0x354   : > { %v7793_v43 = vcombine.low %v3230_v31, %v3230_v31  ;;  %v7794_v30 = vcombine.high %v3230_v31, %v3230_v31  ;;  %v3227_v60 = vsel %vm3188_vm10, %v3040_v7, %v11388_v37  ;;  %v4103_v37 = vor.u32 %v11619_v27, %v11617_v34  ;;  %v3730_v34 = vld [vmem:[#allocation2 + $0xa4] sm:$0x1] }
 0x355   : > { %v11625_v18 = vpop.permute.xlu1 %4602  ;;  %v4706_v10 = vpop.permute.xlu0 %4705  ;;  %v7791_v20 = vcombine.low %v3227_v60, %v3227_v60  ;;  %v7792_v2 = vcombine.high %v3227_v60, %v3227_v60 }
 0x356   : > { %v3541_v38 = vshrl.u32 %v7793_v43, 16  ;;  %v3549_v62 = vshrl.u32 %v7794_v30, 16  ;;  %v3544_v61 = vshll.u32 %v7793_v43, 16  ;;  %v3552_v40 = vshll.u32 %v7794_v30, 16 }
 0x357   : > { %4616 = vrot.lane.b32.xlu0 %v7859_v9, %s8426_s12  ;;  %4789 = vrot.lane.b32.xlu1 %v7844_v19, %s8431_s17  ;;  %v3524_v35 = vshrl.u32 %v7791_v20, 16  ;;  %v3532_v16 = vshrl.u32 %v7792_v2, 16  ;;  %v3527_v9 = vshll.u32 %v7791_v20, 16  ;;  %v3535_v11 = vshll.u32 %v7792_v2, 16 }
 0x358   : > { %v3543_v46 = vrot.slane %v3541_v38, 7  ;;  %v3551_v42 = vrot.slane %v3549_v62, 7  ;;  %v4113_v30 = vor.u32 %v4112_v49, %v11631_v12  ;;  %v4955_v62 = vsel %vm13647_vm6, %v4923_v56, %v11595_v63 }
 0x359   : > { %v3526_v0 = vrot.slane %v3524_v35, 7  ;;  %v4638_v36 = vpop.permute.xlu1 %4637  ;;  %v4741_v54 = vpop.permute.xlu0 %4740  ;;  %v3534_v57 = vrot.slane %v3532_v16, 7  ;;  %v4326_v35 = vrot.slane %v11576_v24, 5  ;;  %v4104_v56 = vrot.slane %v4103_v37, 4 }
 0x35a   : > { %v3546_v17 = vor.u32 %v3544_v61, %v3543_v46  ;;  %v3547_v6 = vrot.slane %v3543_v46, 4  ;;  %v3554_v32 = vor.u32 %v3552_v40, %v3551_v42  ;;  %v3556_v7 = vrot.slane %v3551_v42, 4 }
 0x35b   : > { %v3529_v31 = vor.u32 %v3527_v9, %v3526_v0  ;;  %v3530_v22 = vrot.slane %v3526_v0, 4  ;;  %4651 = vrot.lane.b32.xlu0 %v11599_v44, %s8427_s13  ;;  %4536 = vrot.lane.b32.xlu1 %v11557_v21, %s8425_s11  ;;  %v3537_v33 = vor.u32 %v3535_v11, %v3534_v57  ;;  %v3539_v43 = vrot.slane %v3534_v57, 4 }
 0x35c   : > { %v3734_v27 = vsel %vm11003_vm11, %v3546_v17, %v3733_v1  ;;  %v3555_v60 = vsel %vm11009_vm7, %v3547_v6, %v3554_v32  ;;  %v3738_v29 = vsel %vm10611_vm13, %v3556_v7, %v3737_v25  ;;  %v4116_v21 = vshll.u32 %v3792_v26, 16 }
 0x35d   : > { %3735 = vst [vmem:[#allocation2 + $0xa8] sm:$0xf] %v3734_v27  ;;  %v3727_v20 = vsel %vm11003_vm11, %v3529_v31, %v3726_v5  ;;  %v4673_v2 = vpop.permute.xlu1 %4672  ;;  %v4776_v38 = vpop.permute.xlu0 %4775  ;;  %3736 = vst.msk [vmem:[#allocation2 + $0xac] sm:$0xf] %vm13648_vm14, %v3555_v60  ;;  %v3538_v49 = vsel %vm11009_vm7, %v3530_v22, %v3537_v33  ;;  %v3731_v1 = vsel %vm10611_vm13, %v3539_v43, %v3730_v34  ;;  %v4114_v61 = vrot.slane %v4113_v30, 4 }
 0x35e   : > { %3739 = vst [vmem:[#allocation2 + $0xb0] sm:$0x1] %v3738_v29  ;;  %3728 = vst [vmem:[#allocation2 + $0x9c] sm:$0xf] %v3727_v20  ;;  %v4987_v46 = vsel %vm13649_vm12, %v4955_v62, %v4706_v10  ;;  %v7811_v40 = vrot.slane %v11572_v53, 9  ;;  %v4118_v10 = vrot.slane %v4116_v21, 5  ;;  %v4849_v5 = vsel %vm13652_vm1, %v11167_v14, %v11593_v48 }
 0x35f   : > { %3729 = vst.msk [vmem:[#allocation2 + $0xa0] sm:$0xf] %vm13650_vm8, %v3538_v49  ;;  %3732 = vst [vmem:[#allocation2 + $0xa4] sm:$0x1] %v3731_v1  ;;  %4686 = vrot.lane.b32.xlu0 %v7844_v19, %s8428_s14  ;;  %4538 = vrot.lane.b32.xlu1 %v7844_v19, %s8425_s11  ;;  %v5019_v63 = vsel %vm13651_vm3, %v4987_v46, %v4741_v54  ;;  %v4328_v9 = vrot.slane %v4326_v35, 4  ;;  %vm13653_vm6 = vcmask 130048   ;;  %v4109_v37 = vsel %vm8548_vm2, %v4104_v56, %v11631_v12 }
 0x360   : > { %v5051_v25 = vsel %vm2483_vm15, %v5019_v63, %v4776_v38  ;;  %v4893_v19 = vsel %vm13653_vm6, %v4849_v5, %v11625_v18  ;;  %vm13654_vm14 = vcmask 588800   ;;  %v4119_v54 = vsel %vm8548_vm2, %v4114_v61, %v4118_v10 }
 0x361   : > { %v4708_v16 = vpop.permute.xlu1 %4707  ;;  %v4811_v42 = vpop.permute.xlu0 %4810  ;;  %v4329_v17 = vrot.slane %v3792_v26, 5  ;;  %vm13655_vm12 = vcmask 195584   ;;  %v4327_v18 = vsel %vm9002_vm5, %v7811_v40, %v4326_v35  ;;  %vm13656_vm8 = vcmask 261120   ;;  %vm13659_vm6 = vmmov %vm13654_vm14 }
 0x362   : > { %v5083_v0 = vsel %vm2516_vm0, %v5051_v25, %v4811_v42  ;;  %v4925_v14 = vsel %vm13655_vm12, %v4893_v19, %v4638_v36  ;;  %vm13657_vm3 = vcmask 326656   ;;  %vm13658_vm1 = vcmask 392192  }
 0x363   : > { %4721 = vrot.lane.b32.xlu0 %v11601_v45, %s8429_s15  ;;  %4618 = vrot.lane.b32.xlu1 %v11601_v45, %s8426_s12  ;;  %v11681_v45 = vcombine.low %v11572_v53, %v11576_v24  ;;  %v4957_v11 = vsel %vm13656_vm8, %v4925_v14, %v4673_v2  ;;  %v4330_v12 = vsel %vm9002_vm5, %v4328_v9, %v4329_v17  ;;  %vm13661_vm12 = vcmask 130048  }
 0x364   : > { %8183 = vmatprep.mubr.msk.bf16.mxu0 %vm13654_vm14, %v5083_v0  ;;  %v4989_v36 = vsel %vm13657_vm3, %v4957_v11, %v4708_v16  ;;  %v11693_v53 = vcombine.low %v4109_v37, %v4119_v54  ;;  %v11697_v63 = vld [vmem:[#allocation2 + $0xa8] sm:$0xf]  ;;  %v11704_v61 = vcombine.low %v4327_v18, %v4330_v12  ;;  %v11711_v5 = vld [vmem:[#allocation2 + $0xac] sm:$0xf]  ;;  %vm13660_vm14 = vcmask 64512  }
 0x365   : > { %v4743_v48 = vpop.permute.xlu1 %4742  ;;  %v4813_v6 = vpop.permute.xlu0 %4812  ;;  %v3793_v57 = vld [vmem:[#allocation2 + $0x9c] sm:$0xf]  ;;  %v4145_v14 = vshrl.u32 %v11697_v63, 16  ;;  %vm13663_vm8 = vcmask 195584  }
 0x366   : > { %v3794_v32 = vld [vmem:[#allocation2 + $0xa0] sm:$0xf]  ;;  %v4121_v7 = vshrl.u32 %v3793_v57, 16  ;;  %v4124_v26 = vshll.u32 %v3793_v57, 16  ;;  %v3795_v31 = vld [vmem:[#allocation2 + $0xa4] sm:$0x1]  ;;  %v5021_v34 = vsel %vm13658_vm1, %v4989_v36, %v4743_v48 }
 0x367   : > { %4756 = vrot.lane.b32.xlu0 %v11681_v45, %s8430_s16  ;;  %4653 = vrot.lane.b32.xlu1 %v11681_v45, %s8427_s13  ;;  %v4134_v24 = vshrl.u32 %v3794_v32, 16  ;;  %v4333_v22 = vrot.slane %v3794_v32, 5  ;;  %v4130_v30 = vshll.u32 %v3794_v32, 16  ;;  %v7812_v20 = vrot.slane %v3793_v57, 9 }
 0x368   : > { %v8167_v27 = vpop.f32.mrb[28].mxu0  ;;  %v4123_v33 = vrot.slane %v4121_v7, 4  ;;  %v4126_v43 = vrot.slane %v4124_v26, 5  ;;  %v4336_v38 = vrot.slane %v3795_v31, 5  ;;  %v4140_v46 = vshll.u32 %v3795_v31, 16 }
 0x369   : > { %v4778_v60 = vpop.permute.xlu1 %4777  ;;  %v4605_v29 = vpop.permute.xlu0 %4604  ;;  %v4335_v2 = vrot.slane %v4333_v22, 4  ;;  %v4136_v21 = vrot.slane %v4134_v24, 4  ;;  %v4132_v35 = vrot.slane %v4130_v30, 5  ;;  %v3022_v25 = vadd.f32 %v11583_v41, %v8167_v27 }
 0x36a   : > { %v5053_v62 = vsel %vm2483_vm15, %v5021_v34, %v4778_v60  ;;  %v3013_v49 = vpop.f32.mrb[29].mxu0  ;;  %v4127_v1 = vor.u32 %v4126_v43, %v4123_v33  ;;  %v4148_v48 = vshll.u32 %v11697_v63, 16  ;;  %v4334_v18 = vsel %vm9002_vm5, %v7812_v20, %v4333_v22 }
 0x36b   : > { %4791 = vrot.lane.b32.xlu0 %v11693_v53, %s8431_s17  ;;  %4688 = vrot.lane.b32.xlu1 %v11693_v53, %s8428_s14  ;;  %v5085_v56 = vsel %vm2516_vm0, %v5053_v62, %v4813_v6  ;;  %v8168_v16 = vpop.f32.mrb[30].mxu0  ;;  %v4337_v0 = vsel %vm9002_vm5, %v4335_v2, %v4336_v38  ;;  %v4137_v9 = vor.u32 %v4136_v21, %v4132_v35  ;;  %v4142_v12 = vrot.slane %v4140_v46, 5 }
 0x36c   : > { %8184 = vmatmul.mubr.msk.bf16.gmra.mrb[36].mxu0 %vm13659_vm6, %v5085_v56  ;;  %v3025_v42 = vadd.f32 %v11583_v41, %v8168_v16  ;;  %v3016_v40 = vpop.f32.mrb[31].mxu0  ;;  %v4128_v10 = vrot.slane %v4127_v1, 4  ;;  %v3014_v54 = vadd.f32 %v11583_v41, %v3013_v49  ;;  %v11725_v7 = vcombine.low %v3793_v57, %v3794_v32  ;;  %v3747_v16 = vld [vmem:[#allocation2 + $0xc0] sm:$0xf] }
 0x36d   : > { %v4525_v19 = vpop.permute.xlu1 %4524  ;;  %v11713_v37 = vpop.permute.xlu0 %4639  ;;  %v3017_v17 = vadd.f32 %v11583_v41, %v3016_v40  ;;  %v4138_v11 = vrot.slane %v4137_v9, 4  ;;  %v11727_v41 = vcombine.low %v4334_v18, %v4337_v0  ;;  %v4158_v31 = vshrl.u32 %v11711_v5, 16  ;;  %v3751_v40 = vld [vmem:[#allocation2 + $0xc8] sm:$0x1]  ;;  %v3744_v18 = vld [vmem:[#allocation2 + $0xbc] sm:$0x1] }
 0x36e   : > { %v3043_v6 = vpack.c.bf16 %v3025_v42, %v3022_v25  ;;  %v4852_v36 = vsel %vm13660_vm14, %v11185_v51, %v4525_v19  ;;  %v4133_v22 = vsel %vm8548_vm2, %v4128_v10, %v4132_v35  ;;  %v11744_v60 = vrot.slane %v4145_v14, 4 }
 0x36f   : > { %4723 = vrot.lane.b32.xlu1 %v11704_v61, %s8429_s15  ;;  %4826 = vrot.lane.b32.xlu0 %v11704_v61, %s8432_s18  ;;  %v3042_v26 = vpack.c.bf16 %v3017_v17, %v3014_v54  ;;  %v4143_v34 = vsel %vm8548_vm2, %v4138_v11, %v4142_v12  ;;  %v4895_v20 = vsel %vm13661_vm12, %v4852_v36, %v4605_v29  ;;  %v4160_v1 = vrot.slane %v4158_v31, 4 }
 0x370   : > { %v3236_v24 = vsel %vm3188_vm10, %v3043_v6, %v11467_v23  ;;  %v11746_v23 = vrot.slane %v4148_v48, 5  ;;  %v7846_v21 = vcombine.low %v4133_v22, %v4143_v34  ;;  %v3740_v6 = vld [vmem:[#allocation2 + $0xb4] sm:$0xf]  ;;  %vm13665_vm1 = vcmask 261120  }
 0x371   : > { %v11738_v27 = vpop.permute.xlu1 %4526  ;;  %v11740_v57 = vpop.permute.xlu0 %4674  ;;  %v7797_v32 = vcombine.low %v3236_v24, %v3236_v24  ;;  %v7798_v33 = vcombine.high %v3236_v24, %v3236_v24  ;;  %v3233_v43 = vsel %vm3188_vm10, %v3042_v26, %v11414_v52  ;;  %v4154_v52 = vshll.u32 %v11711_v5, 16 }
 0x372   : > { %v7795_v30 = vcombine.low %v3233_v43, %v3233_v43  ;;  %v7796_v51 = vcombine.high %v3233_v43, %v3233_v43  ;;  %vm13662_vm10 = vcmask 60416   ;;  %vm13666_vm6 = vcmask 326656  }
 0x373   : > { %4758 = vrot.lane.b32.xlu1 %v11725_v7, %s8430_s16  ;;  %v3575_v2 = vshrl.u32 %v7797_v32, 16  ;;  %v3583_v38 = vshrl.u32 %v7798_v33, 16  ;;  %4828 = vrot.lane.b32.xlu0 %v11727_v41, %s8432_s18  ;;  %v3578_v46 = vshll.u32 %v7797_v32, 16  ;;  %v3586_v25 = vshll.u32 %v7798_v33, 16  ;;  %vm13664_vm3 = vmmov %vm13662_vm10 }
 0x374   : > { %v3558_v62 = vshrl.u32 %v7795_v30, 16  ;;  %v3566_v49 = vshrl.u32 %v7796_v51, 16  ;;  %v3561_v10 = vshll.u32 %v7795_v30, 16  ;;  %v3569_v19 = vshll.u32 %v7796_v51, 16 }
 0x375   : > { %v3577_v35 = vrot.slane %v3575_v2, 7  ;;  %v3585_v56 = vrot.slane %v3583_v38, 7  ;;  %v11754_v29 = vpop.permute.xlu1 %4606  ;;  %v4710_v42 = vpop.permute.xlu0 %4709  ;;  %v11765_v33 = vrot.slane %v4154_v52, 5  ;;  %v4927_v51 = vsel %vm13663_vm8, %v4895_v20, %v11713_v37  ;;  %v3798_v2 = vld [vmem:[#allocation2 + $0xb0] sm:$0x1] }
 0x376   : > { %v3560_v0 = vrot.slane %v3558_v62, 7  ;;  %v3568_v9 = vrot.slane %v3566_v49, 7  ;;  %v4151_v49 = vor.u32 %v11746_v23, %v11744_v60  ;;  %v4959_v37 = vsel %vm13665_vm1, %v4927_v51, %v11740_v57 }
 0x377   : > { %v3580_v54 = vor.u32 %v3578_v46, %v3577_v35  ;;  %v3581_v17 = vrot.slane %v3577_v35, 4  ;;  %v3588_v14 = vor.u32 %v3586_v25, %v3585_v56  ;;  %v3590_v48 = vrot.slane %v3585_v56, 4  ;;  %4793 = vrot.lane.b32.xlu1 %v7846_v21, %s8431_s17  ;;  %4620 = vrot.lane.b32.xlu0 %v11704_v61, %s8426_s12 }
 0x378   : > { %v3563_v11 = vor.u32 %v3561_v10, %v3560_v0  ;;  %v3564_v12 = vrot.slane %v3560_v0, 4  ;;  %v3571_v26 = vor.u32 %v3569_v19, %v3568_v9  ;;  %v3573_v31 = vrot.slane %v3568_v9, 4 }
 0x379   : > { %v3589_v36 = vsel %vm11009_vm7, %v3581_v17, %v3588_v14  ;;  %v3748_v24 = vsel %vm11003_vm11, %v3580_v54, %v3747_v16  ;;  %v3752_v22 = vsel %vm10611_vm13, %v3590_v48, %v3751_v40  ;;  %v4642_v34 = vpop.permute.xlu1 %4641  ;;  %v4745_v32 = vpop.permute.xlu0 %4744  ;;  %v4161_v52 = vor.u32 %v4160_v1, %v11765_v33 }
 0x37a   : > { %3749 = vst [vmem:[#allocation2 + $0xc0] sm:$0xf] %v3748_v24  ;;  %3750 = vst.msk [vmem:[#allocation2 + $0xc4] sm:$0xf] %vm13662_vm10, %v3589_v36  ;;  %v3572_v61 = vsel %vm11009_vm7, %v3564_v12, %v3571_v26  ;;  %v3741_v43 = vsel %vm11003_vm11, %v3563_v11, %v3740_v6  ;;  %v3745_v30 = vsel %vm10611_vm13, %v3573_v31, %v3744_v18  ;;  %vm13667_vm14 = vcmask 392192  }
 0x37b   : > { %3753 = vst [vmem:[#allocation2 + $0xc8] sm:$0x1] %v3752_v22  ;;  %3742 = vst [vmem:[#allocation2 + $0xb4] sm:$0xf] %v3741_v43  ;;  %4540 = vrot.lane.b32.xlu1 %v11693_v53, %s8425_s11  ;;  %4655 = vrot.lane.b32.xlu0 %v11725_v7, %s8427_s13  ;;  %v4991_v20 = vsel %vm13666_vm6, %v4959_v37, %v4710_v42  ;;  %v4164_v53 = vshll.u32 %v3798_v2, 16  ;;  %v4152_v16 = vrot.slane %v4151_v49, 4 }
 0x37c   : > { %3743 = vst.msk [vmem:[#allocation2 + $0xb8] sm:$0xf] %vm13664_vm3, %v3572_v61  ;;  %3746 = vst [vmem:[#allocation2 + $0xbc] sm:$0x1] %v3745_v30  ;;  %v5023_v35 = vsel %vm13667_vm14, %v4991_v20, %v4745_v32  ;;  %v4162_v60 = vrot.slane %v4161_v52, 4  ;;  %v4340_v23 = vrot.slane %v11711_v5, 5 }
 0x37d   : > { %v4677_v38 = vpop.permute.xlu1 %4676  ;;  %v4780_v62 = vpop.permute.xlu0 %4779  ;;  %vm13668_vm12 = vcmask 64512   ;;  %vm13669_vm10 = vcmask 588800   ;;  %vm13670_vm8 = vcmask 130048   ;;  %vm13671_vm3 = vcmask 195584  }
 0x37e   : > { %v5055_v46 = vsel %vm2483_vm15, %v5023_v35, %v4780_v62  ;;  %v4855_v57 = vsel %vm13668_vm12, %v11274_v55, %v11738_v27  ;;  %v11805_v55 = vcombine.low %v11697_v63, %v11711_v5  ;;  %v4157_v48 = vsel %vm8548_vm2, %v4152_v16, %v11765_v33  ;;  %vm13672_vm12 = vmmov %vm13669_vm10 }
 0x37f   : > { %4542 = vrot.lane.b32.xlu1 %v7846_v21, %s8425_s11  ;;  %4690 = vrot.lane.b32.xlu0 %v7846_v21, %s8428_s14  ;;  %v4166_v21 = vrot.slane %v4164_v53, 5  ;;  %v4897_v19 = vsel %vm13670_vm8, %v4855_v57, %v11754_v29  ;;  %v4342_v29 = vrot.slane %v4340_v23, 4  ;;  %v7813_v36 = vrot.slane %v11697_v63, 9 }
 0x380   : > { %v4929_v54 = vsel %vm13671_vm3, %v4897_v19, %v4642_v34  ;;  %v4343_v24 = vrot.slane %v3798_v2, 5 }
 0x381   : > { %v4712_v56 = vpop.permute.xlu1 %4711  ;;  %v4815_v25 = vpop.permute.xlu0 %4814  ;;  %v4167_v6 = vsel %vm8548_vm2, %v4162_v60, %v4166_v21  ;;  %v4961_v5 = vsel %vm13665_vm1, %v4929_v54, %v4677_v38  ;;  %v4341_v63 = vsel %vm9002_vm5, %v7813_v36, %v4340_v23  ;;  %v11848_v19 = vld [vmem:[#allocation2 + $0xc4] sm:$0xf]  ;;  %v11866_v36 = vld [vmem:[#allocation2 + $0xd0] sm:$0xf] }
 0x382   : > { %v5087_v1 = vsel %vm2516_vm0, %v5055_v46, %v4815_v25  ;;  %v3799_v42 = vld [vmem:[#allocation2 + $0xb4] sm:$0xf]  ;;  %v4993_v31 = vsel %vm13666_vm6, %v4961_v5, %v4712_v56  ;;  %v7847_v33 = vcombine.low %v4157_v48, %v4167_v6  ;;  %v4344_v30 = vsel %vm9002_vm5, %v4342_v29, %v4343_v24 }
 0x383   : > { %v3800_v40 = vld [vmem:[#allocation2 + $0xb8] sm:$0xf]  ;;  %8187 = vmatprep.mubr.msk.bf16.mxu0 %vm13669_vm10, %v5087_v1  ;;  %4622 = vrot.lane.b32.xlu1 %v11727_v41, %s8426_s12  ;;  %v4169_v10 = vshrl.u32 %v3799_v42, 16  ;;  %v4172_v9 = vshll.u32 %v3799_v42, 16  ;;  %v3801_v61 = vld [vmem:[#allocation2 + $0xbc] sm:$0x1]  ;;  %v7863_v20 = vcombine.low %v4341_v63, %v4344_v30 }
 0x384   : > { %v4182_v0 = vshrl.u32 %v3800_v40, 16  ;;  %4725 = vrot.lane.b32.xlu0 %v11727_v41, %s8429_s15  ;;  %v4178_v27 = vshll.u32 %v3800_v40, 16  ;;  %v4347_v26 = vrot.slane %v3800_v40, 5  ;;  %v4188_v2 = vshll.u32 %v3801_v61, 16 }
 0x385   : > { %v4747_v17 = vpop.permute.xlu1 %4746  ;;  %v4817_v14 = vpop.permute.xlu0 %4816  ;;  %v4171_v18 = vrot.slane %v4169_v10, 4  ;;  %v4174_v11 = vrot.slane %v4172_v9, 5  ;;  %v7814_v53 = vrot.slane %v3799_v42, 9  ;;  %v4350_v35 = vrot.slane %v3801_v61, 5  ;;  %v11846_v9 = vld [vmem:[#allocation2 + $0xc0] sm:$0xf] }
 0x386   : > { %v4180_v41 = vrot.slane %v4178_v27, 5  ;;  %v4184_v12 = vrot.slane %v4182_v0, 4  ;;  %v5025_v22 = vsel %vm13667_vm14, %v4993_v31, %v4747_v17  ;;  %v4349_v49 = vrot.slane %v4347_v26, 4  ;;  %v462_v31 = vld [vmem:[#allocation3 + $0x18] sm:$0x1] }
 0x387   : > { %4657 = vrot.lane.b32.xlu1 %v11805_v55, %s8427_s13  ;;  %v4175_v51 = vor.u32 %v4174_v11, %v4171_v18  ;;  %v4190_v16 = vrot.slane %v4188_v2, 5  ;;  %v11836_v23 = vcombine.low %v3799_v42, %v3800_v40  ;;  %v4348_v1 = vsel %vm9002_vm5, %v7814_v53, %v4347_v26  ;;  %v11870_v61 = vld [vmem:[#allocation2 + $0xcc] sm:$0xf] }
 0x388   : > { %4760 = vrot.lane.b32.xlu0 %v11805_v55, %s8430_s16  ;;  %v4185_v38 = vor.u32 %v4184_v12, %v4180_v41  ;;  %v4351_v25 = vsel %vm9002_vm5, %v4349_v49, %v4350_v35  ;;  %vm13673_vm10 = vcmask 64512   ;;  %v4353_v17 = vshrl.u32 %v11846_v9, 16 }
 0x389   : > { %v4782_v34 = vpop.permute.xlu1 %4781  ;;  %v4609_v32 = vpop.permute.xlu0 %4608  ;;  %v4176_v46 = vrot.slane %v4175_v51, 4  ;;  %v7864_v21 = vcombine.low %v4348_v1, %v4351_v25  ;;  %v4366_v48 = vshrl.u32 %v11848_v19, 16  ;;  %v4362_v6 = vshll.u32 %v11848_v19, 16 }
 0x38a   : > { %v5057_v43 = vsel %vm2483_vm15, %v5025_v22, %v4782_v34  ;;  %v4186_v56 = vrot.slane %v4185_v38, 4  ;;  %v463_v24 = vsel %vm10611_vm13, 0, %v462_v31  ;;  %v4400_v38 = vshrl.u32 %v11866_v36, 16 }
 0x38b   : > { %v5089_v62 = vsel %vm2516_vm0, %v5057_v43, %v4817_v14  ;;  %4692 = vrot.lane.b32.xlu1 %v7847_v33, %s8428_s14  ;;  %v4181_v0 = vsel %vm8548_vm2, %v4176_v46, %v4180_v41  ;;  %v4356_v14 = vshll.u32 %v11846_v9, 16  ;;  %v11860_v12 = vrot.slane %v4362_v6, 5  ;;  %464 = vst [vmem:[#allocation3 + $0x18] sm:$0x1] %v463_v24 }
 0x38c   : > { %8188 = vmatmul.mubr.msk.bf16.gmra.mrb[40].mxu0 %vm13672_vm12, %v5089_v62  ;;  %4795 = vrot.lane.b32.xlu0 %v7847_v33, %s8431_s17  ;;  %v4191_v10 = vsel %vm8548_vm2, %v4186_v56, %v4190_v16  ;;  %v4368_v5 = vrot.slane %v4366_v48, 4  ;;  %v4396_v62 = vshll.u32 %v11866_v36, 16  ;;  %v4387_v2 = vshrl.u32 %v11870_v61, 16 }
 0x38d   : > { %v4529_v52 = vpop.permute.xlu1 %4528  ;;  %v4644_v37 = vpop.permute.xlu0 %4643  ;;  %v7848_v54 = vcombine.low %v4181_v0, %v4191_v10  ;;  %v4358_v41 = vrot.slane %v4356_v14, 5  ;;  %v4381_v25 = vrot.slane %v11848_v19, 5  ;;  %v11893_v10 = vld [vmem:[#allocation2 + $0xd4] sm:$0x1]  ;;  %v7865_v48 = vcombine.low %v11846_v9, %v11848_v19 }
 0x38e   : > { %v4858_v42 = vsel %vm13673_vm10, %v11335_v4, %v4529_v52  ;;  %v4355_v4 = vrot.slane %v4353_v17, 4  ;;  %v4390_v52 = vshll.u32 %v11870_v61, 16  ;;  %v11887_v16 = vrot.slane %v4396_v62, 5 }
 0x38f   : > { %4727 = vrot.lane.b32.xlu1 %v7863_v20, %s8429_s15  ;;  %v4899_v29 = vsel %vm13670_vm8, %v4858_v42, %v4609_v32  ;;  %v3804_v32 = vld [vmem:[#allocation2 + $0xc8] sm:$0x1]  ;;  %v4389_v42 = vrot.slane %v4387_v2, 4  ;;  %v516_v2 = vld [vmem:[#allocation3 + $0x20] sm:$0x1] }
 0x390   : > { %4830 = vrot.lane.b32.xlu0 %v7863_v20, %s8432_s18  ;;  %v4931_v26 = vsel %vm13671_vm3, %v4899_v29, %v4644_v37  ;;  %v4359_v30 = vor.u32 %v4358_v41, %v4355_v4  ;;  %v4372_v63 = vshll.u32 %v3804_v32, 16  ;;  %v4384_v4 = vrot.slane %v3804_v32, 5 }
 0x391   : > { %v11834_v60 = vpop.permute.xlu1 %4530  ;;  %v4679_v57 = vpop.permute.xlu0 %4678 }
 0x392   : > { %v4963_v43 = vsel %vm13665_vm1, %v4931_v26, %v4679_v57  ;;  %v4360_v46 = vrot.slane %v4359_v30, 4  ;;  %v4402_v57 = vrot.slane %v4400_v38, 4  ;;  %v4861_v1 = vsel %vm13673_vm10, %v11374_v47, %v11834_v60 }
 0x393   : > { %4762 = vrot.lane.b32.xlu1 %v11836_v23, %s8430_s16  ;;  %v4374_v0 = vrot.slane %v4372_v63, 5 }
 0x394   : > { %4832 = vrot.lane.b32.xlu0 %v7864_v21, %s8432_s18  ;;  %v4365_v47 = vsel %vm8548_vm2, %v4360_v46, %v11860_v12 }
 0x395   : > { %v4611_v40 = vpop.permute.xlu1 %4610  ;;  %v4714_v27 = vpop.permute.xlu0 %4713 }
 0x396   : > { %v4995_v51 = vsel %vm13666_vm6, %v4963_v43, %v4714_v27  ;;  %v4392_v27 = vrot.slane %v4390_v52, 5  ;;  %v4415_v43 = vrot.slane %v11866_v36, 5  ;;  %v7868_v52 = vcombine.low %v11870_v61, %v11866_v36 }
 0x397   : > { %4797 = vrot.lane.b32.xlu1 %v7848_v54, %s8431_s17 }
 0x398   : > { %4624 = vrot.lane.b32.xlu0 %v7863_v20, %s8426_s12  ;;  %v4393_v41 = vor.u32 %v4392_v27, %v4389_v42  ;;  %v5912_v27 = vld [vmem:[#allocation3 + $0x4] sm:$0xf] }
 0x399   : > { %v4646_v18 = vpop.permute.xlu1 %4645  ;;  %v4749_v11 = vpop.permute.xlu0 %4748 }
 0x39a   : > { %v5027_v49 = vsel %vm13667_vm14, %v4995_v51, %v4749_v11  ;;  %v4406_v11 = vshll.u32 %v11893_v10, 16  ;;  %v4394_v32 = vrot.slane %v4393_v41, 4 }
 0x39b   : > { %4544 = vrot.lane.b32.xlu1 %v7847_v33, %s8425_s11  ;;  %v4369_v33 = vor.u32 %v4368_v5, %v11860_v12 }
 0x39c   : > { %4659 = vrot.lane.b32.xlu0 %v11836_v23, %s8427_s13  ;;  %v4399_v46 = vsel %vm8548_vm2, %v4394_v32, %v11887_v16 }
 0x39d   : > { %v4681_v22 = vpop.permute.xlu1 %4680  ;;  %v4784_v34 = vpop.permute.xlu0 %4783  ;;  %v4370_v56 = vrot.slane %v4369_v33, 4  ;;  %v4408_v33 = vrot.slane %v4406_v11, 5 }
 0x39e   : > { %v5059_v37 = vsel %vm2483_vm15, %v5027_v49, %v4784_v34  ;;  %v459_v49 = vld [vmem:[#allocation3 + $0xc] sm:$0x1] }
 0x39f   : > { %4546 = vrot.lane.b32.xlu1 %v7848_v54, %s8425_s11  ;;  %v4375_v60 = vsel %vm8548_vm2, %v4370_v56, %v4374_v0  ;;  %v460_v63 = vsel %vm10611_vm13, 0, %v459_v49 }
 0x3a0   : > { %4694 = vrot.lane.b32.xlu0 %v7848_v54, %s8428_s14  ;;  %v4901_v54 = vsel %vm13670_vm8, %v4861_v1, %v4611_v40  ;;  %v4403_v40 = vor.u32 %v4402_v57, %v11887_v16  ;;  %v7866_v31 = vcombine.low %v4365_v47, %v4375_v60  ;;  %461 = vst [vmem:[#allocation3 + $0xc] sm:$0x1] %v460_v63  ;;  %v510_v57 = vld [vmem:[#allocation3 + $0x8] sm:$0x1] }
 0x3a1   : > { %v4716_v20 = vpop.permute.xlu1 %4715  ;;  %v4819_v53 = vpop.permute.xlu0 %4818  ;;  %v4933_v6 = vsel %vm13671_vm3, %v4901_v54, %v4646_v18  ;;  %v7815_v18 = vrot.slane %v11846_v9, 9  ;;  %v511_v16 = vsel %vm10618_vm9, 0, %v510_v57  ;;  %v5975_v54 = vshll.u32 %v5912_v27, 16 }
 0x3a2   : > { %v5091_v35 = vsel %vm2516_vm0, %v5059_v37, %v4819_v53  ;;  %v4965_v29 = vsel %vm13665_vm1, %v4933_v6, %v4681_v22  ;;  %v4404_v30 = vrot.slane %v4403_v40, 4  ;;  %v7816_v37 = vrot.slane %v11870_v61, 9  ;;  %v456_v61 = vld [vmem:[#allocation3] sm:$0x1]  ;;  %512 = vst [vmem:[#allocation3 + $0x8] sm:$0x1] %v511_v16 }
 0x3a3   : > { %8191 = vmatprep.mubr.msk.bf16.mxu1 %vm13672_vm12, %v5091_v35  ;;  %4626 = vrot.lane.b32.xlu1 %v7864_v21, %s8426_s12  ;;  %v4997_v19 = vsel %vm13666_vm6, %v4965_v29, %v4716_v20  ;;  %v4382_v9 = vsel %vm9002_vm5, %v7815_v18, %v4381_v25  ;;  %v4417_v20 = vrot.slane %v4415_v43, 4  ;;  %v517_v53 = vsel %vm10618_vm9, 0, %v516_v2  ;;  %v513_v35 = vld [vmem:[#allocation3 + $0x14] sm:$0x1] }
 0x3a4   : > { %4729 = vrot.lane.b32.xlu0 %v7864_v21, %s8429_s15  ;;  %v4383_v21 = vrot.slane %v4381_v25, 4  ;;  %v4409_v56 = vsel %vm8548_vm2, %v4404_v30, %v4408_v33  ;;  %v4418_v25 = vrot.slane %v11893_v10, 5  ;;  %518 = vst [vmem:[#allocation3 + $0x20] sm:$0x1] %v517_v53  ;;  %v514_v36 = vsel %vm10618_vm9, 0, %v513_v35 }
 0x3a5   : > { %v4751_v17 = vpop.permute.xlu1 %4750  ;;  %v4821_v14 = vpop.permute.xlu0 %4820  ;;  %515 = vst [vmem:[#allocation3 + $0x14] sm:$0x1] %v514_v36  ;;  %v457_v42 = vsel %vm10611_vm13, 0, %v456_v61  ;;  %v5979_v10 = vshrl.u32 %v5912_v27, 16  ;;  %v5977_v47 = vrot.slane %v5975_v54, 5 }
 0x3a6   : > { %v5029_v12 = vsel %vm13667_vm14, %v4997_v19, %v4751_v17  ;;  %v4385_v22 = vsel %vm9002_vm5, %v4383_v21, %v4384_v4  ;;  %458 = vst [vmem:[#allocation3] sm:$0x1] %v457_v42  ;;  %v7869_v17 = vcombine.low %v4399_v46, %v4409_v56  ;;  %v4419_v6 = vsel %vm9002_vm5, %v4417_v20, %v4418_v25 }
 0x3a7   : > { %4661 = vrot.lane.b32.xlu1 %v7865_v48, %s8427_s13  ;;  %v7867_v62 = vcombine.low %v4382_v9, %v4385_v22  ;;  %v5981_v60 = vrot.slane %v5979_v10, 4  ;;  %v468_v22 = vld [vmem:[#allocation3 + $0x30] sm:$0x1] }
 0x3a8   : > { %4764 = vrot.lane.b32.xlu0 %v7865_v48, %s8430_s16 }
 0x3a9   : > { %v4786_v5 = vpop.permute.xlu1 %4785  ;;  %v4613_v26 = vpop.permute.xlu0 %4612  ;;  %v5982_v19 = vor.u32 %v5981_v60, %v5977_v47 }
 0x3aa   : > { %v5061_v24 = vsel %vm2483_vm15, %v5029_v12, %v4786_v5  ;;  %v5913_v12 = vld [vmem:[#allocation3 + $0x8] sm:$0x1] }
 0x3ab   : > { %v5093_v34 = vsel %vm2516_vm0, %v5061_v24, %v4821_v14  ;;  %4696 = vrot.lane.b32.xlu1 %v7866_v31, %s8428_s14  ;;  %v4416_v14 = vsel %vm9002_vm5, %v7816_v37, %v4415_v43  ;;  %v6399_v24 = vrot.slane %v5912_v27, 5  ;;  %v5983_v32 = vrot.slane %v5982_v19, 4  ;;  %v522_v19 = vld [vmem:[#allocation3 + $0x38] sm:$0x1] }
 0x3ac   : > { %8192 = vmatmul.mubr.msk.bf16.vlgmr.msra.gmra.mrb[0].mxu1 %vm13672_vm12, %v5093_v34  ;;  %4799 = vrot.lane.b32.xlu0 %v7866_v31, %s8431_s17  ;;  %v7870_v11 = vcombine.low %v4416_v14, %v4419_v6  ;;  %v5985_v34 = vshll.u32 %v5913_v12, 16  ;;  %v6402_v2 = vrot.slane %v5913_v12, 5 }
 0x3ad   : > { %v4533_v51 = vpop.permute.xlu1 %4532  ;;  %v4648_v38 = vpop.permute.xlu0 %4647  ;;  %v5911_v41 = vld [vmem:[#allocation3] sm:$0xf]  ;;  %v6401_v63 = vrot.slane %v6399_v24, 4 }
 0x3ae   : > { %v4864_v48 = vsel %vm13673_vm10, %v11406_v50, %v4533_v51  ;;  %v5966_v50 = vshrl.u32 %v5911_v41, 16  ;;  %v5969_v31 = vshll.u32 %v5911_v41, 16  ;;  %v7925_v49 = vrot.slane %v5911_v41, 9 }
 0x3af   : > { %4731 = vrot.lane.b32.xlu1 %v7867_v62, %s8429_s15  ;;  %v4903_v40 = vsel %vm13670_vm8, %v4864_v48, %v4613_v26  ;;  %v469_v26 = vsel %vm10611_vm13, 0, %v468_v22  ;;  %v6403_v57 = vsel %vm9002_vm5, %v6401_v63, %v6402_v2 }
 0x3b0   : > { %4834 = vrot.lane.b32.xlu0 %v7867_v62, %s8432_s18  ;;  %v4935_v5 = vsel %vm13671_vm3, %v4903_v40, %v4648_v38  ;;  %v5968_v43 = vrot.slane %v5966_v50, 4  ;;  %v5971_v9 = vrot.slane %v5969_v31, 5  ;;  %470 = vst [vmem:[#allocation3 + $0x30] sm:$0x1] %v469_v26  ;;  %v5987_v62 = vrot.slane %v5985_v34, 5 }
 0x3b1   : > { %v4535_v1 = vpop.permute.xlu1 %4534  ;;  %v4683_v0 = vpop.permute.xlu0 %4682  ;;  %v6400_v61 = vsel %vm9002_vm5, %v7925_v49, %v6399_v24  ;;  %v465_v40 = vld [vmem:[#allocation3 + $0x24] sm:$0x1] }
 0x3b2   : > { %v4967_v30 = vsel %vm13665_vm1, %v4935_v5, %v4683_v0  ;;  %v5972_v38 = vor.u32 %v5971_v9, %v5968_v43  ;;  %v5988_v53 = vsel %vm8548_vm2, %v5983_v32, %v5987_v62  ;;  %v4867_v42 = vsel %vm13673_vm10, %v11484_v59, %v4535_v1 }
 0x3b3   : > { %4766 = vrot.lane.b32.xlu1 %v7868_v52, %s8430_s16  ;;  %v7975_v10 = vcombine.low %v6400_v61, %v6403_v57 }
 0x3b4   : > { %v5973_v20 = vrot.slane %v5972_v38, 4 }
 0x3b5   : > { %v4615_v21 = vpop.permute.xlu1 %4614  ;;  %v4718_v29 = vpop.permute.xlu0 %4717 }
 0x3b6   : > { %v4999_v52 = vsel %vm13666_vm6, %v4967_v30, %v4718_v29  ;;  %v5978_v36 = vsel %vm8548_vm2, %v5973_v20, %v5977_v47  ;;  %v4905_v16 = vsel %vm13670_vm8, %v4867_v42, %v4615_v21 }
 0x3b7   : > { %4801 = vrot.lane.b32.xlu1 %v7869_v17, %s8431_s17  ;;  %v7959_v0 = vcombine.low %v5978_v36, %v5988_v53 }
 0x3b9   : > { %v4650_v18 = vpop.permute.xlu1 %4649  ;;  %v4753_v4 = vpop.permute.xlu0 %4752  ;;  %6673 = vrot.lane.b32.xlu0 %v7959_v0, %s8425_s11 }
 0x3ba   : > { %v5031_v37 = vsel %vm13667_vm14, %v4999_v52, %v4753_v4  ;;  %v4937_v17 = vsel %vm13671_vm3, %v4905_v16, %v4650_v18  ;;  %v523_v18 = vsel %vm10618_vm9, 0, %v522_v19  ;;  %v519_v4 = vld [vmem:[#allocation3 + $0x2c] sm:$0x1]  ;;  %v471_v16 = vld [vmem:[#allocation3 + $0x3c] sm:$0x1] }
 0x3bb   : > { %4836 = vrot.lane.b32.xlu1 %v7870_v11, %s8432_s18  ;;  %v466_v11 = vsel %vm10611_vm13, 0, %v465_v40  ;;  %524 = vst [vmem:[#allocation3 + $0x38] sm:$0x1] %v523_v18  ;;  %v520_v41 = vsel %vm10618_vm9, 0, %v519_v4 }
 0x3bc   : > { %467 = vst [vmem:[#allocation3 + $0x24] sm:$0x1] %v466_v11  ;;  %521 = vst [vmem:[#allocation3 + $0x2c] sm:$0x1] %v520_v41  ;;  %v480_v41 = vld [vmem:[#allocation3 + $0x60] sm:$0x1] }
 0x3bd   : > { %v4685_v33 = vpop.permute.xlu1 %4684  ;;  %v4788_v51 = vpop.permute.xlu0 %4787  ;;  %6753 = vrot.lane.b32.xlu0 %v7975_v10, %s8426_s12 }
 0x3be   : > { %v5063_v35 = vsel %vm2483_vm15, %v5031_v37, %v4788_v51  ;;  %v4969_v14 = vsel %vm13665_vm1, %v4937_v17, %v4685_v33  ;;  %v474_v51 = vld [vmem:[#allocation3 + $0x48] sm:$0x1]  ;;  %v525_v17 = vld [vmem:[#allocation3 + $0x44] sm:$0x1] }
 0x3c1   : > { %v4720_v46 = vpop.permute.xlu1 %4719  ;;  %v4823_v56 = vpop.permute.xlu0 %4822 }
 0x3c2   : > { %v5095_v25 = vsel %vm2516_vm0, %v5063_v35, %v4823_v56  ;;  %v5001_v48 = vsel %vm13666_vm6, %v4969_v14, %v4720_v46  ;;  %v526_v14 = vsel %vm10618_vm9, 0, %v525_v17 }
 0x3c3   : > { %8195 = vmatprep.mubr.msk.bf16.mxu1 %vm13672_vm12, %v5095_v25  ;;  %527 = vst [vmem:[#allocation3 + $0x44] sm:$0x1] %v526_v14 }
 0x3c5   : > { %v4755_v27 = vpop.permute.xlu1 %4754  ;;  %v4825_v54 = vpop.permute.xlu0 %4824 }
 0x3c6   : > { %v5033_v6 = vsel %vm13667_vm14, %v5001_v48, %v4755_v27  ;;  %v472_v27 = vsel %vm10611_vm13, 0, %v471_v16 }
 0x3c7   : > { %473 = vst [vmem:[#allocation3 + $0x3c] sm:$0x1] %v472_v27 }
 0x3c9   : > { %v4790_v47 = vpop.permute.xlu1 %4789  ;;  %v4617_v60 = vpop.permute.xlu0 %4616 }
 0x3ca   : > { %v5065_v59 = vsel %vm2483_vm15, %v5033_v6, %v4790_v47 }
 0x3cb   : > { %v5097_v1 = vsel %vm2516_vm0, %v5065_v59, %v4825_v54  ;;  %v528_v54 = vld [vmem:[#allocation3 + $0x50] sm:$0x1] }
 0x3cc   : > { %8196 = vmatmul.mubr.msk.bf16.gmra.mrb[4].mxu1 %vm13672_vm12, %v5097_v1  ;;  %v529_v10 = vsel %vm10618_vm9, 0, %v528_v54 }
 0x3cd   : > { %v4537_v21 = vpop.permute.xlu1 %4536  ;;  %v4652_v29 = vpop.permute.xlu0 %4651  ;;  %530 = vst [vmem:[#allocation3 + $0x50] sm:$0x1] %v529_v10 }
 0x3ce   : > { %v4870_v50 = vsel %vm13673_vm10, %v11538_v13, %v4537_v21  ;;  %v475_v13 = vsel %vm10611_vm13, 0, %v474_v51 }
 0x3cf   : > { %v4907_v22 = vsel %vm13670_vm8, %v4870_v50, %v4617_v60  ;;  %476 = vst [vmem:[#allocation3 + $0x48] sm:$0x1] %v475_v13 }
 0x3d0   : > { %v4939_v43 = vsel %vm13671_vm3, %v4907_v22, %v4652_v29 }
 0x3d1   : > { %v4539_v12 = vpop.permute.xlu1 %4538  ;;  %v4687_v5 = vpop.permute.xlu0 %4686 }
 0x3d2   : > { %v4971_v30 = vsel %vm13665_vm1, %v4939_v43, %v4687_v5  ;;  %v4873_v52 = vsel %vm13673_vm10, %v11599_v44, %v4539_v12 }
 0x3d5   : > { %v4619_v31 = vpop.permute.xlu1 %4618  ;;  %v4722_v24 = vpop.permute.xlu0 %4721 }
 0x3d6   : > { %v5003_v33 = vsel %vm13666_vm6, %v4971_v30, %v4722_v24  ;;  %v4909_v37 = vsel %vm13670_vm8, %v4873_v52, %v4619_v31  ;;  %v534_v52 = vld [vmem:[#allocation3 + $0x68] sm:$0x1] }
 0x3d9   : > { %v4654_v34 = vpop.permute.xlu1 %4653  ;;  %v4757_v26 = vpop.permute.xlu0 %4756 }
 0x3da   : > { %v5035_v62 = vsel %vm13667_vm14, %v5003_v33, %v4757_v26  ;;  %v4941_v35 = vsel %vm13671_vm3, %v4909_v37, %v4654_v34  ;;  %v535_v37 = vsel %vm10618_vm9, 0, %v534_v52  ;;  %v5799_v52 = vld [vmem:[#allocation3 + $0xc] sm:$0xf] }
 0x3db   : > { %536 = vst [vmem:[#allocation3 + $0x68] sm:$0x1] %v535_v37 }
 0x3dd   : > { %v4689_v9 = vpop.permute.xlu1 %4688  ;;  %v4792_v32 = vpop.permute.xlu0 %4791 }
 0x3de   : > { %v5067_v38 = vsel %vm2483_vm15, %v5035_v62, %v4792_v32  ;;  %v4973_v46 = vsel %vm13665_vm1, %v4941_v35, %v4689_v9 }
 0x3e1   : > { %v4724_v49 = vpop.permute.xlu1 %4723  ;;  %v4827_v63 = vpop.permute.xlu0 %4826 }
 0x3e2   : > { %v5099_v2 = vsel %vm2516_vm0, %v5067_v38, %v4827_v63  ;;  %v5005_v56 = vsel %vm13666_vm6, %v4973_v46, %v4724_v49  ;;  %v477_v49 = vld [vmem:[#allocation3 + $0x54] sm:$0x1] }
 0x3e3   : > { %8199 = vmatprep.mubr.msk.bf16.mxu1 %vm13672_vm12, %v5099_v2  ;;  %v478_v2 = vsel %vm10611_vm13, 0, %v477_v49 }
 0x3e4   : > { %479 = vst [vmem:[#allocation3 + $0x54] sm:$0x1] %v478_v2 }
 0x3e5   : > { %v4759_v20 = vpop.permute.xlu1 %4758  ;;  %v4829_v53 = vpop.permute.xlu0 %4828 }
 0x3e6   : > { %v5037_v25 = vsel %vm13667_vm14, %v5005_v56, %v4759_v20  ;;  %v531_v20 = vld [vmem:[#allocation3 + $0x5c] sm:$0x1] }
 0x3e9   : > { %v4794_v36 = vpop.permute.xlu1 %4793  ;;  %v4621_v61 = vpop.permute.xlu0 %4620 }
 0x3ea   : > { %v5069_v57 = vsel %vm2483_vm15, %v5037_v25, %v4794_v36 }
 0x3eb   : > { %v5101_v0 = vsel %vm2516_vm0, %v5069_v57, %v4829_v53  ;;  %v532_v53 = vsel %vm10618_vm9, 0, %v531_v20 }
 0x3ec   : > { %8200 = vmatmul.mubr.msk.bf16.gmra.mrb[8].mxu1 %vm13672_vm12, %v5101_v0  ;;  %vm13674_vm12 = vmmov %vm13673_vm10  ;;  %533 = vst [vmem:[#allocation3 + $0x5c] sm:$0x1] %v532_v53 }
 0x3ed   : > { %v4541_v44 = vpop.permute.xlu1 %4540  ;;  %v4656_v42 = vpop.permute.xlu0 %4655 }
 0x3ee   : > { %v4876_v60 = vsel %vm13673_vm10, %v11681_v45, %v4541_v44  ;;  %v481_v45 = vsel %vm10611_vm13, 0, %v480_v41  ;;  %vm13675_vm10 = vcmask 588800  }
 0x3ef   : > { %v4911_v1 = vsel %vm13670_vm8, %v4876_v60, %v4621_v61  ;;  %482 = vst [vmem:[#allocation3 + $0x60] sm:$0x1] %v481_v45 }
 0x3f0   : > { %v4943_v40 = vsel %vm13671_vm3, %v4911_v1, %v4656_v42  ;;  %v12051_v42 = vld [vmem:[%s13169_s5] ss:$0 sm:$0xff] }
 0x3f1   : > { %v4543_v48 = vpop.permute.xlu1 %4542  ;;  %v4691_v6 = vpop.permute.xlu0 %4690 }
 0x3f2   : > { %v4975_v18 = vsel %vm13665_vm1, %v4943_v40, %v4691_v6  ;;  %v4879_v22 = vsel %vm13674_vm12, %v11725_v7, %v4543_v48  ;;  %vm13676_vm12 = vmmov %vm13675_vm10  ;;  %v486_v48 = vld [vmem:[#allocation3 + $0x78] sm:$0x1] }
 0x3f3   : > { %v487_v1 = vsel %vm10611_vm13, 0, %v486_v48 }
 0x3f4   : > { %488 = vst [vmem:[#allocation3 + $0x78] sm:$0x1] %v487_v1 }
 0x3f5   : > { %v4623_v47 = vpop.permute.xlu1 %4622 }
 0x3f6   : > { %v4726_v59 = vpop.permute.xlu0 %4725  ;;  %v4913_v34 = vsel %vm13670_vm8, %v4879_v22, %v4623_v47 }
 0x3f7   : > { %v5007_v4 = vsel %vm13666_vm6, %v4975_v18, %v4726_v59 }
 0x3f9   : > { %v4658_v21 = vpop.permute.xlu1 %4657 }
 0x3fa   : > { %v4761_v29 = vpop.permute.xlu0 %4760  ;;  %v4945_v43 = vsel %vm13671_vm3, %v4913_v34, %v4658_v21 }
 0x3fb   : > { %v5039_v12 = vsel %vm13667_vm14, %v5007_v4, %v4761_v29 }
 0x3fd   : > { %v4693_v11 = vpop.permute.xlu1 %4692 }
 0x3fe   : > { %v4796_v19 = vpop.permute.xlu0 %4795  ;;  %v4977_v32 = vsel %vm13665_vm1, %v4945_v43, %v4693_v11 }
 0x3ff   : > { %v5071_v50 = vsel %vm2483_vm15, %v5039_v12, %v4796_v19 }
 0x401   : > { %v4728_v5 = vpop.permute.xlu1 %4727 }
 0x402   : > { %v4831_v31 = vpop.permute.xlu0 %4830  ;;  %v5009_v30 = vsel %vm13666_vm6, %v4977_v32, %v4728_v5 }
 0x403   : > { %v5103_v24 = vsel %vm2516_vm0, %v5071_v50, %v4831_v31 }
 0x404   : > { %8203 = vmatprep.mubr.msk.bf16.mxu1 %vm13675_vm10, %v5103_v24  ;;  %vm13677_vm10 = vcmask 64512  }
 0x405   : > { %v4763_v26 = vpop.permute.xlu1 %4762 }
 0x406   : > { %v4833_v9 = vpop.permute.xlu0 %4832  ;;  %v5041_v33 = vsel %vm13667_vm14, %v5009_v30, %v4763_v26 }
 0x409   : > { %v4798_v51 = vpop.permute.xlu1 %4797 }
 0x40a   : > { %v5073_v62 = vsel %vm2483_vm15, %v5041_v33, %v4798_v51  ;;  %v4625_v13 = vpop.permute.xlu0 %4624 }
 0x40b   : > { %v5105_v7 = vsel %vm2516_vm0, %v5073_v62, %v4833_v9 }
 0x40c   : > { %8204 = vmatmul.mubr.msk.bf16.gmra.mrb[12].mxu1 %vm13676_vm12, %v5105_v7 }
 0x40d   : > { %v4545_v38 = vpop.permute.xlu1 %4544 }
 0x40e   : > { %v4660_v63 = vpop.permute.xlu0 %4659  ;;  %v4882_v25 = vsel %vm13677_vm10, %v11805_v55, %v4545_v38 }
 0x40f   : > { %v4915_v61 = vsel %vm13670_vm8, %v4882_v25, %v4625_v13  ;;  %v5806_v13 = vld [vmem:[#allocation3 + $0x18] sm:$0xf] }
 0x410   : > { %v4947_v44 = vsel %vm13671_vm3, %v4915_v61, %v4660_v63 }
 0x411   : > { %v4547_v35 = vpop.permute.xlu1 %4546 }
 0x412   : > { %v4695_v46 = vpop.permute.xlu0 %4694  ;;  %v4885_v45 = vsel %vm13677_vm10, %v11836_v23, %v4547_v35  ;;  %vm13679_vm10 = vcmask 588800  }
 0x413   : > { %v4979_v54 = vsel %vm13665_vm1, %v4947_v44, %v4695_v46  ;;  %v5803_v44 = vld [vmem:[#allocation3 + $0x14] sm:$0x1] }
 0x415   : > { %v4627_v56 = vpop.permute.xlu1 %4626 }
 0x416   : > { %v4730_v36 = vpop.permute.xlu0 %4729  ;;  %v4917_v22 = vsel %vm13670_vm8, %v4885_v45, %v4627_v56  ;;  %v5810_v56 = vld [vmem:[#allocation3 + $0x20] sm:$0x1] }
 0x417   : > { %v5011_v17 = vsel %vm13666_vm6, %v4979_v54, %v4730_v36 }
 0x419   : > { %v4662_v57 = vpop.permute.xlu1 %4661 }
 0x41a   : > { %v4765_v0 = vpop.permute.xlu0 %4764  ;;  %v4949_v43 = vsel %vm13671_vm3, %v4917_v22, %v4662_v57 }
 0x41b   : > { %v5043_v6 = vsel %vm13667_vm14, %v5011_v17, %v4765_v0 }
 0x41d   : > { %v4697_v16 = vpop.permute.xlu1 %4696 }
 0x41e   : > { %v4800_v27 = vpop.permute.xlu0 %4799  ;;  %v4981_v51 = vsel %vm13665_vm1, %v4949_v43, %v4697_v16 }
 0x41f   : > { %v8181_v10 = vpop.f32.mrb[32].mxu0  ;;  %v5075_v40 = vsel %vm2483_vm15, %v5043_v6, %v4800_v27 }
 0x420   : > { %v5232_v55 = vadd.f32 %v8181_v10, %v12051_v42  ;;  %v5223_v14 = vpop.f32.mrb[33].mxu0 }
 0x421   : > { %v5224_v47 = vadd.f32 %v12051_v42, %v5223_v14  ;;  %v8182_v60 = vpop.f32.mrb[34].mxu0  ;;  %v4732_v59 = vpop.permute.xlu1 %4731  ;;  %v483_v14 = vld [vmem:[#allocation3 + $0x6c] sm:$0x1] }
 0x422   : > { %v5352_v21 = vmax.f32 %v5232_v55, 0.0  ;;  %v5235_v29 = vadd.f32 %v8182_v60, %v12051_v42  ;;  %v5226_v11 = vpop.f32.mrb[35].mxu0  ;;  %v4835_v19 = vpop.permute.xlu0 %4834  ;;  %v5013_v49 = vsel %vm13666_vm6, %v4981_v51, %v4732_v59  ;;  %v484_v60 = vsel %vm10611_vm13, 0, %v483_v14  ;;  %v540_v59 = vld [vmem:[#allocation3 + $0x80] sm:$0x1] }
 0x423   : > { %v5350_v18 = vmax.f32 %v5224_v47, 0.0  ;;  %v5227_v4 = vadd.f32 %v12051_v42, %v5226_v11  ;;  %v5107_v41 = vsel %vm2516_vm0, %v5075_v40, %v4835_v19  ;;  %485 = vst [vmem:[#allocation3 + $0x6c] sm:$0x1] %v484_v60  ;;  %v537_v40 = vld [vmem:[#allocation3 + $0x74] sm:$0x1] }
 0x424   : > { %v8025_v12 = vpack.c.bf16 %v5352_v21, %v5352_v21  ;;  %v5353_v5 = vmax.f32 %v5235_v29, 0.0  ;;  %8207 = vmatprep.mubr.msk.bf16.mxu1 %vm13676_vm12, %v5107_v41  ;;  %vm13678_vm12 = vcmask 60416   ;;  %v541_v29 = vsel %vm10618_vm9, 0, %v540_v59 }
 0x425   : > { %v8023_v50 = vpack.c.bf16 %v5350_v18, %v5350_v18  ;;  %v5351_v31 = vmax.f32 %v5227_v4, 0.0  ;;  %v4767_v24 = vpop.permute.xlu1 %4766  ;;  %vm13680_vm8 = vmmov %vm13678_vm12  ;;  %542 = vst [vmem:[#allocation3 + $0x80] sm:$0x1] %v541_v29  ;;  %v538_v11 = vsel %vm10618_vm9, 0, %v537_v40  ;;  %v492_v40 = vld [vmem:[#allocation3 + $0x90] sm:$0x1] }
 0x426   : > { %v5496_v34 = vshrl.u32 %v8025_v12, 16  ;;  %v8026_v26 = vpack.c.bf16 %v5353_v5, %v5353_v5  ;;  %v5499_v33 = vshll.u32 %v8025_v12, 16  ;;  %v5045_v53 = vsel %vm13667_vm14, %v5013_v49, %v4767_v24  ;;  %539 = vst [vmem:[#allocation3 + $0x74] sm:$0x1] %v538_v11  ;;  %vm13681_vm3 = vmmov %vm13680_vm8 }
 0x427   : > { %v5479_v9 = vshrl.u32 %v8023_v50, 16  ;;  %v8024_v32 = vpack.c.bf16 %v5351_v31, %v5351_v31  ;;  %v5482_v38 = vshll.u32 %v8023_v50, 16  ;;  %vm13682_vm1 = vmmov %vm13681_vm3 }
 0x428   : > { %v5498_v30 = vrot.slane %v5496_v34, 7  ;;  %v5504_v62 = vshrl.u32 %v8026_v26, 16  ;;  %v5507_v20 = vshll.u32 %v8026_v26, 16  ;;  %vm13684_vm6 = vmmov %vm13682_vm1 }
 0x429   : > { %v5481_v7 = vrot.slane %v5479_v9, 7  ;;  %v5487_v23 = vshrl.u32 %v8024_v32, 16  ;;  %v4802_v63 = vpop.permute.xlu1 %4801  ;;  %v5490_v36 = vshll.u32 %v8024_v32, 16  ;;  %vm13685_vm14 = vmmov %vm13682_vm1 }
 0x42a   : > { %v5501_v2 = vor.u32 %v5499_v33, %v5498_v30  ;;  %v5506_v37 = vrot.slane %v5504_v62, 7  ;;  %v5502_v35 = vrot.slane %v5498_v30, 4  ;;  %v5077_v16 = vsel %vm2483_vm15, %v5045_v53, %v4802_v63 }
 0x42b   : > { %v5484_v46 = vor.u32 %v5482_v38, %v5481_v7  ;;  %v5489_v25 = vrot.slane %v5487_v23, 7  ;;  %v5485_v27 = vrot.slane %v5481_v7, 4 }
 0x42c   : > { %v5807_v61 = vsel %vm11003_vm11, %v5501_v2, %v5806_v13  ;;  %v5509_v57 = vor.u32 %v5507_v20, %v5506_v37  ;;  %v5511_v0 = vrot.slane %v5506_v37, 4 }
 0x42d   : > { %5808 = vst [vmem:[#allocation3 + $0x18] sm:$0xf] %v5807_v61  ;;  %v5800_v54 = vsel %vm11003_vm11, %v5484_v46, %v5799_v52  ;;  %v5492_v10 = vor.u32 %v5490_v36, %v5489_v25  ;;  %v5494_v17 = vrot.slane %v5489_v25, 4  ;;  %v4837_v55 = vpop.permute.xlu1 %4836 }
 0x42e   : > { %5801 = vst [vmem:[#allocation3 + $0xc] sm:$0xf] %v5800_v54  ;;  %v5510_v48 = vsel %vm11009_vm7, %v5502_v35, %v5509_v57  ;;  %v5811_v6 = vsel %vm10611_vm13, %v5511_v0, %v5810_v56  ;;  %v5109_v47 = vsel %vm2516_vm0, %v5077_v16, %v4837_v55 }
 0x42f   : > { %5809 = vst.msk [vmem:[#allocation3 + $0x1c] sm:$0xf] %vm13678_vm12, %v5510_v48  ;;  %5812 = vst [vmem:[#allocation3 + $0x20] sm:$0x1] %v5811_v6  ;;  %v5493_v1 = vsel %vm11009_vm7, %v5485_v27, %v5492_v10  ;;  %v5804_v21 = vsel %vm10611_vm13, %v5494_v17, %v5803_v44  ;;  %8208 = vmatmul.mubr.msk.bf16.gmra.mrb[16].mxu1 %vm13679_vm10, %v5109_v47 }
 0x430   : > { %5802 = vst.msk [vmem:[#allocation3 + $0x10] sm:$0xf] %vm13680_vm8, %v5493_v1  ;;  %5805 = vst [vmem:[#allocation3 + $0x14] sm:$0x1] %v5804_v21 }
 0x431   : > { %vm13686_vm12 = vmmov %vm13682_vm1 }
 0x432   : > { %vm13687_vm10 = vmmov %vm13682_vm1 }
 0x433   : > { %vm13688_vm8 = vmmov %vm13682_vm1 }
 0x434   : > { %v12095_v41 = vld [vmem:[#allocation3 + $0x18] sm:$0xf] }
 0x435   : > { %v5914_v19 = vld [vmem:[#allocation3 + $0xc] sm:$0xf]  ;;  %v6014_v26 = vshrl.u32 %v12095_v41, 16  ;;  %v6017_v43 = vshll.u32 %v12095_v41, 16  ;;  %v7927_v61 = vrot.slane %v12095_v41, 9 }
 0x436   : > { %v5990_v18 = vshrl.u32 %v5914_v19, 16  ;;  %v5993_v4 = vshll.u32 %v5914_v19, 16  ;;  %v12097_v5 = vld [vmem:[#allocation3 + $0x1c] sm:$0xf]  ;;  %v7926_v56 = vrot.slane %v5914_v19, 9 }
 0x437   : > { %v5915_v12 = vld [vmem:[#allocation3 + $0x10] sm:$0xf]  ;;  %v5916_v31 = vld [vmem:[#allocation3 + $0x14] sm:$0x1]  ;;  %v6027_v62 = vshrl.u32 %v12097_v5, 16  ;;  %v6023_v13 = vshll.u32 %v12097_v5, 16 }
 0x438   : > { %v6003_v45 = vshrl.u32 %v5915_v12, 16  ;;  %v12099_v50 = vcombine.low %v5914_v19, %v5915_v12  ;;  %v5992_v24 = vrot.slane %v5990_v18, 4  ;;  %v5995_v22 = vrot.slane %v5993_v4, 5  ;;  %v12110_v36 = vld [vmem:[#allocation3 + $0x20] sm:$0x1] }
 0x439   : > { %v5999_v34 = vshll.u32 %v5915_v12, 16  ;;  %v6406_v30 = vrot.slane %v5915_v12, 5  ;;  %v6009_v51 = vshll.u32 %v5916_v31, 16  ;;  %v6016_v23 = vrot.slane %v6014_v26, 4 }
 0x43a   : > { %6788 = vrot.lane.b32.xlu0 %v12099_v50, %s8427_s13  ;;  %v5996_v9 = vor.u32 %v5995_v22, %v5992_v24  ;;  %v6005_v32 = vrot.slane %v6003_v45, 4  ;;  %v6019_v49 = vrot.slane %v6017_v43, 5  ;;  %v12107_v20 = vrot.slane %v6023_v13, 5 }
 0x43b   : > { %v6001_v33 = vrot.slane %v5999_v34, 5  ;;  %v6408_v63 = vrot.slane %v6406_v30, 4  ;;  %v6011_v37 = vrot.slane %v6009_v51, 5  ;;  %v6029_v53 = vrot.slane %v6027_v62, 4  ;;  %v5820_v51 = vld [vmem:[#allocation3 + $0x30] sm:$0xf] }
 0x43c   : > { %v5997_v7 = vrot.slane %v5996_v9, 4  ;;  %v6409_v25 = vrot.slane %v5916_v31, 5  ;;  %v6020_v27 = vor.u32 %v6019_v49, %v6016_v23  ;;  %v6033_v60 = vshll.u32 %v12110_v36, 16  ;;  %v5813_v49 = vld [vmem:[#allocation3 + $0x24] sm:$0xf] }
 0x43d   : > { %v6006_v38 = vor.u32 %v6005_v32, %v6001_v33  ;;  %v6030_v47 = vor.u32 %v6029_v53, %v12107_v20  ;;  %v6407_v21 = vsel %vm9002_vm5, %v7926_v56, %v6406_v30  ;;  %v6413_v29 = vrot.slane %v12097_v5, 5  ;;  %v5824_v53 = vld [vmem:[#allocation3 + $0x38] sm:$0x1] }
 0x43e   : > { %v6002_v44 = vsel %vm8548_vm2, %v5997_v7, %v6001_v33  ;;  %v6410_v14 = vsel %vm9002_vm5, %v6408_v63, %v6409_v25  ;;  %v6021_v18 = vrot.slane %v6020_v27, 4  ;;  %v493_v4 = vsel %vm10611_vm13, 0, %v492_v40  ;;  %v543_v40 = vld [vmem:[#allocation3 + $0x8c] sm:$0x1] }
 0x43f   : > { %v8185_v2 = vpop.f32.mrb[36].mxu0  ;;  %v6007_v52 = vrot.slane %v6006_v38, 4  ;;  %v7976_v31 = vcombine.low %v6407_v21, %v6410_v14  ;;  %v12133_v24 = vcombine.low %v12095_v41, %v12097_v5  ;;  %494 = vst [vmem:[#allocation3 + $0x90] sm:$0x1] %v493_v4  ;;  %v6031_v26 = vrot.slane %v6030_v47, 4 }
 0x440   : > { %v5248_v35 = vadd.f32 %v8185_v2, %v12051_v42  ;;  %v5239_v46 = vpop.f32.mrb[37].mxu0  ;;  %v6035_v43 = vrot.slane %v6033_v60, 5  ;;  %v6415_v33 = vrot.slane %v6413_v29, 4  ;;  %v6026_v38 = vsel %vm8548_vm2, %v6021_v18, %v12107_v20  ;;  %v5817_v20 = vld [vmem:[#allocation3 + $0x2c] sm:$0x1]  ;;  %v8367_v18 = vld [vmem:[%s13170_s6 + $0x8] sm:$0xff]  }
 0x441   : > { %v5240_v57 = vadd.f32 %v12051_v42, %v5239_v46  ;;  %v8186_v0 = vpop.f32.mrb[38].mxu0  ;;  %v6012_v16 = vsel %vm8548_vm2, %v6007_v52, %v6011_v37  ;;  %v6416_v52 = vrot.slane %v12110_v36, 5  ;;  %v546_v47 = vld [vmem:[#allocation3 + $0x98] sm:$0x1] }
 0x442   : > { %v5356_v54 = vmax.f32 %v5248_v35, 0.0  ;;  %v5251_v10 = vadd.f32 %v8186_v0, %v12051_v42  ;;  %v5242_v17 = vpop.f32.mrb[39].mxu0  ;;  %v7960_v55 = vcombine.low %v6002_v44, %v6012_v16  ;;  %v6036_v56 = vsel %vm8548_vm2, %v6031_v26, %v6035_v43 }
 0x443   : > { %v5354_v48 = vmax.f32 %v5240_v57, 0.0  ;;  %v5243_v6 = vadd.f32 %v12051_v42, %v5242_v17  ;;  %v12157_v14 = vcombine.low %v6026_v38, %v6036_v56  ;;  %v547_v21 = vsel %vm10618_vm9, 0, %v546_v47 }
 0x444   : > { %v8029_v59 = vpack.c.bf16 %v5356_v54, %v5356_v54  ;;  %v5357_v1 = vmax.f32 %v5251_v10, 0.0  ;;  %6675 = vrot.lane.b32.xlu1 %v7960_v55, %s8425_s11  ;;  %6823 = vrot.lane.b32.xlu0 %v7960_v55, %s8428_s14  ;;  %v489_v10 = vld [vmem:[#allocation3 + $0x84] sm:$0x1]  ;;  %548 = vst [vmem:[#allocation3 + $0x98] sm:$0x1] %v547_v21 }
 0x445   : > { %v8027_v11 = vpack.c.bf16 %v5354_v48, %v5354_v48  ;;  %v5355_v19 = vmax.f32 %v5243_v6, 0.0  ;;  %v490_v48 = vsel %vm10611_vm13, 0, %v489_v10  ;;  %v8366_v6 = vld [vmem:[%s13170_s6] sm:$0xff]  }
 0x446   : > { %v5530_v12 = vshrl.u32 %v8029_v59, 16  ;;  %v8030_v45 = vpack.c.bf16 %v5357_v1, %v5357_v1  ;;  %v5533_v32 = vshll.u32 %v8029_v59, 16  ;;  %v6417_v1 = vsel %vm9002_vm5, %v6415_v33, %v6416_v52  ;;  %491 = vst [vmem:[#allocation3 + $0x84] sm:$0x1] %v490_v48  ;;  %8211 = vmatprep.subr.bf16.mxu1 %v8366_v6 }
 0x447   : > { %v5513_v22 = vshrl.u32 %v8027_v11, 16  ;;  %v8028_v34 = vpack.c.bf16 %v5355_v19, %v5355_v19  ;;  %v5516_v13 = vshll.u32 %v8027_v11, 16  ;;  %v544_v11 = vsel %vm10618_vm9, 0, %v543_v40  ;;  %8212 = vmatpush3.bf16.msra.mxu1 %v8366_v6  ;;  %v498_v40 = vld [vmem:[#allocation3 + $0xa8] sm:$0x1] }
 0x448   : > { %v5532_v9 = vrot.slane %v5530_v12, 7  ;;  %v5538_v30 = vshrl.u32 %v8030_v45, 16  ;;  %6755 = vrot.lane.b32.xlu1 %v7976_v31, %s8426_s12  ;;  %6858 = vrot.lane.b32.xlu0 %v7976_v31, %s8429_s15  ;;  %v5541_v2 = vshll.u32 %v8030_v45, 16  ;;  %v6414_v19 = vsel %vm9002_vm5, %v7927_v61, %v6413_v29  ;;  %545 = vst [vmem:[#allocation3 + $0x8c] sm:$0x1] %v544_v11  ;;  %v8368_v12 = vld [vmem:[%s13170_s6 + $0x10] sm:$0xff]  }
 0x449   : > { %v5515_v62 = vrot.slane %v5513_v22, 7  ;;  %v5521_v7 = vshrl.u32 %v8028_v34, 16  ;;  %v5524_v46 = vshll.u32 %v8028_v34, 16  ;;  %v7977_v4 = vcombine.low %v6414_v19, %v6417_v1  ;;  %8213 = vmatprep.subr.bf16.mxu1 %v8367_v18  ;;  %v8369_v31 = vld [vmem:[%s13170_s6 + $0x18] sm:$0xff]  }
 0x44a   : > { %v5535_v23 = vor.u32 %v5533_v32, %v5532_v9  ;;  %v5540_v63 = vrot.slane %v5538_v30, 7  ;;  %v5536_v25 = vrot.slane %v5532_v9, 4 }
 0x44b   : > { %v5518_v37 = vor.u32 %v5516_v13, %v5515_v62  ;;  %v5523_v35 = vrot.slane %v5521_v7, 7  ;;  %v5519_v36 = vrot.slane %v5515_v62, 4  ;;  %8214 = vmatpush3.bf16.msra.mxu1 %v8367_v18 }
 0x44c   : > { %v5821_v57 = vsel %vm11003_vm11, %v5535_v23, %v5820_v51  ;;  %v5543_v0 = vor.u32 %v5541_v2, %v5540_v63  ;;  %v5545_v44 = vrot.slane %v5540_v63, 4  ;;  %6790 = vrot.lane.b32.xlu1 %v12133_v24, %s8427_s13  ;;  %6893 = vrot.lane.b32.xlu0 %v12133_v24, %s8430_s16  ;;  %v8371_v23 = vld [vmem:[%s13170_s6 + $0x20] ss:$0 sps:$4 sm:$0xff]  }
 0x44d   : > { %5822 = vst [vmem:[#allocation3 + $0x30] sm:$0xf] %v5821_v57  ;;  %v5814_v16 = vsel %vm11003_vm11, %v5518_v37, %v5813_v49  ;;  %v5526_v27 = vor.u32 %v5524_v46, %v5523_v35  ;;  %v5528_v54 = vrot.slane %v5523_v35, 4  ;;  %8215 = vmatprep.subr.bf16.mxu1 %v8368_v12 }
 0x44e   : > { %5815 = vst [vmem:[#allocation3 + $0x24] sm:$0xf] %v5814_v16  ;;  %v5544_v17 = vsel %vm11009_vm7, %v5536_v25, %v5543_v0  ;;  %v5825_v55 = vsel %vm10611_vm13, %v5545_v44, %v5824_v53  ;;  %v7343_v0 = vsel %vm5185_vm4, %v8371_v23, 0 }
 0x44f   : > { %5823 = vst.msk [vmem:[#allocation3 + $0x34] sm:$0xf] %vm13681_vm3, %v5544_v17  ;;  %5826 = vst [vmem:[#allocation3 + $0x38] sm:$0x1] %v5825_v55  ;;  %v5527_v60 = vsel %vm11009_vm7, %v5519_v36, %v5526_v27  ;;  %v5818_v59 = vsel %vm10611_vm13, %v5528_v54, %v5817_v20  ;;  %8216 = vmatpush3.bf16.msra.mxu1 %v8368_v12  ;;  %v499_v12 = vsel %vm10611_vm13, 0, %v498_v40  ;;  %vm13689_vm3 = vcmask 64512  }
 0x450   : > { %5816 = vst.msk [vmem:[#allocation3 + $0x28] sm:$0xf] %vm13682_vm1, %v5527_v60  ;;  %5819 = vst [vmem:[#allocation3 + $0x2c] sm:$0x1] %v5818_v59  ;;  %6825 = vrot.lane.b32.xlu1 %v12157_v14, %s8428_s14  ;;  %6928 = vrot.lane.b32.xlu0 %v12157_v14, %s8431_s17  ;;  %v549_v40 = vld [vmem:[#allocation3 + $0xa4] sm:$0x1] }
 0x451   : > { %8217 = vmatprep.subr.bf16.mxu1 %v8369_v31  ;;  %500 = vst [vmem:[#allocation3 + $0xa8] sm:$0x1] %v499_v12 }
 0x453   : > { %8218 = vmatpush3.bf16.msra.mxu1 %v8369_v31 }
 0x454   : > { %6860 = vrot.lane.b32.xlu1 %v7977_v4, %s8429_s15  ;;  %6963 = vrot.lane.b32.xlu0 %v7977_v4, %s8432_s18  ;;  %v12208_v2 = vld [vmem:[#allocation3 + $0x30] sm:$0xf] }
 0x455   : > { %v5920_v41 = vld [vmem:[#allocation3 + $0x24] sm:$0xf]  ;;  %v6062_v57 = vshrl.u32 %v12208_v2, 16  ;;  %8265 = vmatprep.subr.msk.bf16.mxu1 %vm5185_vm4, %v8371_v23  ;;  %v6065_v36 = vshll.u32 %v12208_v2, 16  ;;  %v5827_v23 = vld [vmem:[#allocation3 + $0x3c] sm:$0xf]  ;;  %vm13683_vm4 = vmmov %vm13682_vm1 }
 0x456   : > { %v6038_v5 = vshrl.u32 %v5920_v41, 16  ;;  %v6041_v61 = vshll.u32 %v5920_v41, 16  ;;  %v7928_v30 = vrot.slane %v5920_v41, 9  ;;  %v12212_v35 = vld [vmem:[#allocation3 + $0x34] sm:$0xf]  ;;  %vm13690_vm1 = vcmask 130048  }
 0x457   : > { %v5921_v29 = vld [vmem:[#allocation3 + $0x28] sm:$0xf]  ;;  %v5922_v45 = vld [vmem:[#allocation3 + $0x2c] sm:$0x1]  ;;  %v6075_v17 = vshrl.u32 %v12212_v35, 16  ;;  %v6071_v60 = vshll.u32 %v12212_v35, 16  ;;  %8220 = vmatpush3.bf16.msra.mxu1 %v7343_v0  ;;  %v12279_v12 = vcombine.low %v12208_v2, %v12212_v35 }
 0x458   : > { %v6051_v22 = vshrl.u32 %v5921_v29, 16  ;;  %v12197_v34 = vcombine.low %v5920_v41, %v5921_v29  ;;  %v6420_v26 = vrot.slane %v5921_v29, 5  ;;  %v6040_v43 = vrot.slane %v6038_v5, 4 }
 0x459   : > { %v6043_v9 = vrot.slane %v6041_v61, 5  ;;  %v6047_v32 = vshll.u32 %v5921_v29, 16  ;;  %v6423_v51 = vrot.slane %v5922_v45, 5  ;;  %v6057_v38 = vshll.u32 %v5922_v45, 16  ;;  %v12238_v45 = vld [vmem:[#allocation3 + $0x38] sm:$0x1] }
 0x45a   : > { %6895 = vrot.lane.b32.xlu1 %v12197_v34, %s8430_s16  ;;  %v6422_v33 = vrot.slane %v6420_v26, 4  ;;  %v6053_v62 = vrot.slane %v6051_v22, 4  ;;  %v6421_v49 = vsel %vm9002_vm5, %v7928_v30, %v6420_v26  ;;  %v12231_v21 = vrot.slane %v6062_v57, 4 }
 0x45b   : > { %v6044_v13 = vor.u32 %v6043_v9, %v6040_v43  ;;  %v6049_v7 = vrot.slane %v6047_v32, 5  ;;  %v6059_v25 = vrot.slane %v6057_v38, 5  ;;  %v12234_v18 = vrot.slane %v6065_v36, 5  ;;  %v5831_v36 = vld [vmem:[#allocation3 + $0x44] sm:$0x1] }
 0x45c   : > { %v6424_v63 = vsel %vm9002_vm5, %v6422_v33, %v6423_v51  ;;  %v6077_v31 = vrot.slane %v6075_v17, 4  ;;  %v5834_v33 = vld [vmem:[#allocation3 + $0x48] sm:$0xf]  ;;  %v495_v17 = vld [vmem:[#allocation3 + $0x9c] sm:$0x1] }
 0x45d   : > { %v12210_v52 = vcombine.low %v6421_v49, %v6424_v63  ;;  %v6045_v37 = vrot.slane %v6044_v13, 4  ;;  %v6054_v53 = vor.u32 %v6053_v62, %v6049_v7  ;;  %v6068_v30 = vor.u32 %v12234_v18, %v12231_v21 }
 0x45e   : > { %v550_v18 = vsel %vm10618_vm9, 0, %v549_v40 }
 0x45f   : > { %6965 = vrot.lane.b32.xlu0 %v12210_v52, %s8432_s18  ;;  %v8189_v46 = vpop.f32.mrb[40].mxu0  ;;  %v6055_v56 = vrot.slane %v6054_v53, 4  ;;  %v6050_v54 = vsel %vm8548_vm2, %v6045_v37, %v6049_v7  ;;  %v6081_v7 = vshll.u32 %v12238_v45, 16  ;;  %551 = vst [vmem:[#allocation3 + $0xa4] sm:$0x1] %v550_v18 }
 0x460   : > { %v5264_v44 = vadd.f32 %v8189_v46, %v12051_v42  ;;  %v5255_v20 = vpop.f32.mrb[41].mxu0  ;;  %v5838_v46 = vld [vmem:[#allocation3 + $0x50] sm:$0x1] }
 0x461   : > { %v5256_v16 = vadd.f32 %v12051_v42, %v5255_v20  ;;  %v8190_v27 = vpop.f32.mrb[42].mxu0  ;;  %v6060_v10 = vsel %vm8548_vm2, %v6055_v56, %v6059_v25 }
 0x462   : > { %v5360_v55 = vmax.f32 %v5264_v44, 0.0  ;;  %v5267_v48 = vadd.f32 %v8190_v27, %v12051_v42  ;;  %v5258_v6 = vpop.f32.mrb[43].mxu0  ;;  %v7962_v47 = vcombine.low %v6050_v54, %v6060_v10 }
 0x463   : > { %v5358_v59 = vmax.f32 %v5256_v16, 0.0  ;;  %v5259_v1 = vadd.f32 %v12051_v42, %v5258_v6  ;;  %6757 = vrot.lane.b32.xlu0 %v7977_v4, %s8426_s12  ;;  %v12240_v4 = vrot.slane %v6071_v60, 5  ;;  %v496_v60 = vsel %vm10611_vm13, 0, %v495_v17 }
 0x464   : > { %v8033_v11 = vpack.c.bf16 %v5360_v55, %v5360_v55  ;;  %v5361_v19 = vmax.f32 %v5267_v48, 0.0  ;;  %6930 = vrot.lane.b32.xlu1 %v7962_v47, %s8431_s17  ;;  %497 = vst [vmem:[#allocation3 + $0x9c] sm:$0x1] %v496_v60 }
 0x465   : > { %v8031_v41 = vpack.c.bf16 %v5358_v59, %v5358_v59  ;;  %v5359_v5 = vmax.f32 %v5259_v1, 0.0  ;;  %v6078_v37 = vor.u32 %v6077_v31, %v12240_v4  ;;  %v7929_v31 = vrot.slane %v12208_v2, 9 }
 0x466   : > { %v5564_v61 = vshrl.u32 %v8033_v11, 16  ;;  %v8034_v29 = vpack.c.bf16 %v5361_v19, %v5361_v19  ;;  %v5567_v9 = vshll.u32 %v8033_v11, 16  ;;  %v6069_v11 = vrot.slane %v6068_v30, 4 }
 0x467   : > { %v5547_v22 = vshrl.u32 %v8031_v41, 16  ;;  %v8032_v26 = vpack.c.bf16 %v5359_v5, %v5359_v5  ;;  %6792 = vrot.lane.b32.xlu0 %v12197_v34, %s8427_s13  ;;  %v5550_v62 = vshll.u32 %v8031_v41, 16  ;;  %v6079_v6 = vrot.slane %v6078_v37, 4 }
 0x468   : > { %v5566_v43 = vrot.slane %v5564_v61, 7  ;;  %v5572_v32 = vshrl.u32 %v8034_v29, 16  ;;  %6677 = vrot.lane.b32.xlu1 %v12157_v14, %s8425_s11  ;;  %v5575_v63 = vshll.u32 %v8034_v29, 16  ;;  %v6427_v14 = vrot.slane %v12212_v35, 5 }
 0x469   : > { %v5549_v51 = vrot.slane %v5547_v22, 7  ;;  %v5555_v13 = vshrl.u32 %v8032_v26, 16  ;;  %v5558_v25 = vshll.u32 %v8032_v26, 16  ;;  %v6083_v19 = vrot.slane %v6081_v7, 5 }
 0x46a   : > { %v5569_v38 = vor.u32 %v5567_v9, %v5566_v43  ;;  %v5574_v49 = vrot.slane %v5572_v32, 7  ;;  %v5570_v57 = vrot.slane %v5566_v43, 4  ;;  %v6429_v5 = vrot.slane %v6427_v14, 4 }
 0x46b   : > { %v5552_v53 = vor.u32 %v5550_v62, %v5549_v51  ;;  %v5557_v56 = vrot.slane %v5555_v13, 7  ;;  %6827 = vrot.lane.b32.xlu0 %v7962_v47, %s8428_s14  ;;  %v5553_v16 = vrot.slane %v5549_v51, 4  ;;  %v6084_v41 = vsel %vm8548_vm2, %v6079_v6, %v6083_v19 }
 0x46c   : > { %v5835_v0 = vsel %vm11003_vm11, %v5569_v38, %v5834_v33  ;;  %v5577_v44 = vor.u32 %v5575_v63, %v5574_v49  ;;  %v5579_v20 = vrot.slane %v5574_v49, 4  ;;  %6679 = vrot.lane.b32.xlu1 %v7962_v47, %s8425_s11  ;;  %v552_v47 = vld [vmem:[#allocation3 + $0xb0] sm:$0x1]  ;;  %v6430_v61 = vrot.slane %v12238_v45, 5 }
 0x46d   : > { %5836 = vst [vmem:[#allocation3 + $0x48] sm:$0xf] %v5835_v0  ;;  %v5828_v27 = vsel %vm11003_vm11, %v5552_v53, %v5827_v23  ;;  %v5560_v54 = vor.u32 %v5558_v25, %v5557_v56  ;;  %v5562_v10 = vrot.slane %v5557_v56, 4  ;;  %v553_v21 = vsel %vm10618_vm9, 0, %v552_v47 }
 0x46e   : > { %5829 = vst [vmem:[#allocation3 + $0x3c] sm:$0xf] %v5828_v27  ;;  %v5578_v55 = vsel %vm11009_vm7, %v5570_v57, %v5577_v44  ;;  %v5839_v48 = vsel %vm10611_vm13, %v5579_v20, %v5838_v46  ;;  %554 = vst [vmem:[#allocation3 + $0xb0] sm:$0x1] %v553_v21  ;;  %v6431_v22 = vsel %vm9002_vm5, %v6429_v5, %v6430_v61 }
 0x46f   : > { %5837 = vst.msk [vmem:[#allocation3 + $0x4c] sm:$0xf] %vm13683_vm4, %v5578_v55  ;;  %5840 = vst [vmem:[#allocation3 + $0x50] sm:$0x1] %v5839_v48  ;;  %v5561_v59 = vsel %vm11009_vm7, %v5553_v16, %v5560_v54  ;;  %v5832_v1 = vsel %vm10611_vm13, %v5562_v10, %v5831_v36  ;;  %6862 = vrot.lane.b32.xlu0 %v12210_v52, %s8429_s15  ;;  %v6428_v45 = vsel %vm9002_vm5, %v7929_v31, %v6427_v14  ;;  %vm13691_vm4 = vcmask 195584  }
 0x470   : > { %5830 = vst.msk [vmem:[#allocation3 + $0x40] sm:$0xf] %vm13684_vm6, %v5561_v59  ;;  %5833 = vst [vmem:[#allocation3 + $0x44] sm:$0x1] %v5832_v1  ;;  %6759 = vrot.lane.b32.xlu1 %v12210_v52, %s8426_s12  ;;  %v6074_v52 = vsel %vm8548_vm2, %v6069_v11, %v12240_v4  ;;  %v7979_v33 = vcombine.low %v6428_v45, %v6431_v22  ;;  %vm13692_vm6 = vcmask 261120  }
 0x471   : > { %v12291_v29 = vcombine.low %v6074_v52, %v6084_v41 }
 0x473   : > { %6897 = vrot.lane.b32.xlu0 %v12279_v12, %s8430_s16 }
 0x474   : > { %6794 = vrot.lane.b32.xlu1 %v12279_v12, %s8427_s13  ;;  %v12310_v57 = vld [vmem:[#allocation3 + $0x48] sm:$0xf] }
 0x475   : > { %v5926_v35 = vld [vmem:[#allocation3 + $0x3c] sm:$0xf]  ;;  %v6110_v10 = vshrl.u32 %v12310_v57, 16  ;;  %v6113_v17 = vshll.u32 %v12310_v57, 16 }
 0x476   : > { %v6086_v26 = vshrl.u32 %v5926_v35, 16  ;;  %v6089_v43 = vshll.u32 %v5926_v35, 16  ;;  %v7930_v13 = vrot.slane %v5926_v35, 9  ;;  %v12314_v44 = vld [vmem:[#allocation3 + $0x4c] sm:$0xf] }
 0x477   : > { %6932 = vrot.lane.b32.xlu0 %v12291_v29, %s8431_s17  ;;  %v5927_v9 = vld [vmem:[#allocation3 + $0x40] sm:$0xf]  ;;  %v5928_v32 = vld [vmem:[#allocation3 + $0x44] sm:$0x1]  ;;  %v6123_v47 = vshrl.u32 %v12314_v44, 16  ;;  %v6119_v11 = vshll.u32 %v12314_v44, 16 }
 0x478   : > { %6829 = vrot.lane.b32.xlu1 %v12291_v29, %s8428_s14  ;;  %v6099_v4 = vshrl.u32 %v5927_v9, 16  ;;  %v6434_v30 = vrot.slane %v5927_v9, 5  ;;  %v6088_v2 = vrot.slane %v6086_v26, 4  ;;  %v6091_v51 = vrot.slane %v6089_v43, 5 }
 0x479   : > { %v6095_v62 = vshll.u32 %v5927_v9, 16  ;;  %v6437_v38 = vrot.slane %v5928_v32, 5  ;;  %v6105_v37 = vshll.u32 %v5928_v32, 16  ;;  %v12312_v0 = vcombine.low %v5926_v35, %v5927_v9 }
 0x47a   : > { %v6436_v7 = vrot.slane %v6434_v30, 4  ;;  %v6101_v23 = vrot.slane %v6099_v4, 4  ;;  %v6092_v49 = vor.u32 %v6091_v51, %v6088_v2  ;;  %v6435_v53 = vsel %vm9002_vm5, %v7930_v13, %v6434_v30  ;;  %v12340_v2 = vld [vmem:[#allocation3 + $0x50] sm:$0x1] }
 0x47b   : > { %6967 = vrot.lane.b32.xlu0 %v7979_v33, %s8432_s18  ;;  %v6097_v63 = vrot.slane %v6095_v62, 5  ;;  %v6107_v16 = vrot.slane %v6105_v37, 5  ;;  %v6112_v35 = vrot.slane %v6110_v10, 4  ;;  %v6115_v31 = vrot.slane %v6113_v17, 5  ;;  %v5848_v62 = vld [vmem:[#allocation3 + $0x60] sm:$0xf] }
 0x47c   : > { %6864 = vrot.lane.b32.xlu1 %v7979_v33, %s8429_s15  ;;  %v6438_v46 = vsel %vm9002_vm5, %v6436_v7, %v6437_v38  ;;  %v6093_v25 = vrot.slane %v6092_v49, 4  ;;  %v12334_v43 = vrot.slane %v6119_v11, 5  ;;  %v6125_v9 = vrot.slane %v6123_v47, 4  ;;  %v5845_v17 = vld [vmem:[#allocation3 + $0x5c] sm:$0x1] }
 0x47d   : > { %v12308_v56 = vcombine.low %v6435_v53, %v6438_v46  ;;  %v6102_v14 = vor.u32 %v6101_v23, %v6097_v63  ;;  %v6116_v23 = vor.u32 %v6115_v31, %v6112_v35 }
 0x47e   : > { %v6098_v6 = vsel %vm8548_vm2, %v6093_v25, %v6097_v63  ;;  %v5841_v63 = vld [vmem:[#allocation3 + $0x54] sm:$0xf]  ;;  %v6126_v46 = vor.u32 %v6125_v9, %v12334_v43  ;;  %v6444_v9 = vrot.slane %v12340_v2, 5 }
 0x47f   : > { %6969 = vrot.lane.b32.xlu0 %v12308_v56, %s8432_s18  ;;  %v8193_v20 = vpop.f32.mrb[0].mxu1  ;;  %v6103_v36 = vrot.slane %v6102_v14, 4  ;;  %v5852_v14 = vld [vmem:[#allocation3 + $0x68] sm:$0x1] }
 0x480   : > { %6899 = vrot.lane.b32.xlu1 %v12312_v0, %s8430_s16  ;;  %v5280_v27 = vadd.f32 %v8193_v20, %v12051_v42  ;;  %v5271_v54 = vpop.f32.mrb[1].mxu1 }
 0x481   : > { %v5272_v55 = vadd.f32 %v12051_v42, %v5271_v54  ;;  %v8194_v48 = vpop.f32.mrb[2].mxu1  ;;  %v6108_v60 = vsel %vm8548_vm2, %v6103_v36, %v6107_v16  ;;  %v6129_v36 = vshll.u32 %v12340_v2, 16 }
 0x482   : > { %v5364_v59 = vmax.f32 %v5280_v27, 0.0  ;;  %v5283_v1 = vadd.f32 %v8194_v48, %v12051_v42  ;;  %v5274_v21 = vpop.f32.mrb[3].mxu1  ;;  %v7964_v40 = vcombine.low %v6098_v6, %v6108_v60 }
 0x483   : > { %v5362_v19 = vmax.f32 %v5272_v55, 0.0  ;;  %v5275_v18 = vadd.f32 %v12051_v42, %v5274_v21  ;;  %6761 = vrot.lane.b32.xlu0 %v7979_v33, %s8426_s12  ;;  %v504_v42 = vld [vmem:[#allocation3 + $0xc0] sm:$0x1]  ;;  %v6441_v21 = vrot.slane %v12314_v44, 5 }
 0x484   : > { %v8037_v41 = vpack.c.bf16 %v5364_v59, %v5364_v59  ;;  %v5365_v5 = vmax.f32 %v5283_v1, 0.0  ;;  %6934 = vrot.lane.b32.xlu1 %v7964_v40, %s8431_s17  ;;  %v505_v51 = vsel %vm10611_vm13, 0, %v504_v42  ;;  %v6127_v1 = vrot.slane %v6126_v46, 4 }
 0x485   : > { %v8035_v52 = vpack.c.bf16 %v5362_v19, %v5362_v19  ;;  %v5363_v61 = vmax.f32 %v5275_v18, 0.0  ;;  %506 = vst [vmem:[#allocation3 + $0xc0] sm:$0x1] %v505_v51  ;;  %v6117_v19 = vrot.slane %v6116_v23, 4  ;;  %v6131_v18 = vrot.slane %v6129_v36, 5 }
 0x486   : > { %v5598_v22 = vshrl.u32 %v8037_v41, 16  ;;  %v8038_v26 = vpack.c.bf16 %v5365_v5, %v5365_v5  ;;  %v5601_v30 = vshll.u32 %v8037_v41, 16  ;;  %v501_v41 = vld [vmem:[#allocation3 + $0xb4] sm:$0x1]  ;;  %v12369_v5 = vcombine.low %v12310_v57, %v12314_v44 }
 0x487   : > { %v5581_v32 = vshrl.u32 %v8035_v52, 16  ;;  %v8036_v45 = vpack.c.bf16 %v5363_v61, %v5363_v61  ;;  %6796 = vrot.lane.b32.xlu0 %v12312_v0, %s8427_s13  ;;  %v5584_v7 = vshll.u32 %v8035_v52, 16  ;;  %v502_v52 = vsel %vm10611_vm13, 0, %v501_v41  ;;  %v558_v61 = vld [vmem:[#allocation3 + $0xc8] sm:$0x1] }
 0x488   : > { %v5600_v4 = vrot.slane %v5598_v22, 7  ;;  %v5606_v33 = vshrl.u32 %v8038_v26, 16  ;;  %6681 = vrot.lane.b32.xlu1 %v12291_v29, %s8425_s11  ;;  %v5609_v53 = vshll.u32 %v8038_v26, 16  ;;  %v6132_v35 = vsel %vm8548_vm2, %v6127_v1, %v6131_v18  ;;  %503 = vst [vmem:[#allocation3 + $0xb4] sm:$0x1] %v502_v52 }
 0x489   : > { %v5583_v13 = vrot.slane %v5581_v32, 7  ;;  %v5589_v38 = vshrl.u32 %v8036_v45, 16  ;;  %v5592_v20 = vshll.u32 %v8036_v45, 16  ;;  %v6443_v31 = vrot.slane %v6441_v21, 4 }
 0x48a   : > { %v5603_v49 = vor.u32 %v5601_v30, %v5600_v4  ;;  %v5608_v37 = vrot.slane %v5606_v33, 7  ;;  %v5604_v16 = vrot.slane %v5600_v4, 4  ;;  %v559_v22 = vsel %vm10618_vm9, 0, %v558_v61 }
 0x48b   : > { %v5586_v25 = vor.u32 %v5584_v7, %v5583_v13  ;;  %v5591_v29 = vrot.slane %v5589_v38, 7  ;;  %6831 = vrot.lane.b32.xlu0 %v7964_v40, %s8428_s14  ;;  %v5587_v55 = vrot.slane %v5583_v13, 4  ;;  %560 = vst [vmem:[#allocation3 + $0xc8] sm:$0x1] %v559_v22  ;;  %v6122_v26 = vsel %vm8548_vm2, %v6117_v19, %v12334_v43 }
 0x48c   : > { %v5849_v27 = vsel %vm11003_vm11, %v5603_v49, %v5848_v62  ;;  %v5611_v54 = vor.u32 %v5609_v53, %v5608_v37  ;;  %v5613_v10 = vrot.slane %v5608_v37, 4  ;;  %6683 = vrot.lane.b32.xlu1 %v7964_v40, %s8425_s11  ;;  %v12387_v32 = vcombine.low %v6122_v26, %v6132_v35 }
 0x48d   : > { %5850 = vst [vmem:[#allocation3 + $0x60] sm:$0xf] %v5849_v27  ;;  %v5842_v48 = vsel %vm11003_vm11, %v5586_v25, %v5841_v63  ;;  %v5594_v6 = vor.u32 %v5592_v20, %v5591_v29  ;;  %v5596_v60 = vrot.slane %v5591_v29, 4  ;;  %v7931_v42 = vrot.slane %v12310_v57, 9 }
 0x48e   : > { %5843 = vst [vmem:[#allocation3 + $0x54] sm:$0xf] %v5842_v48  ;;  %v5612_v47 = vsel %vm11009_vm7, %v5604_v16, %v5611_v54  ;;  %v5853_v59 = vsel %vm10611_vm13, %v5613_v10, %v5852_v14  ;;  %v6445_v4 = vsel %vm9002_vm5, %v6443_v31, %v6444_v9 }
 0x48f   : > { %5851 = vst.msk [vmem:[#allocation3 + $0x64] sm:$0xf] %vm13685_vm14, %v5612_v47  ;;  %5854 = vst [vmem:[#allocation3 + $0x68] sm:$0x1] %v5853_v59  ;;  %v5595_v40 = vsel %vm11009_vm7, %v5587_v55, %v5594_v6  ;;  %v5846_v11 = vsel %vm10611_vm13, %v5596_v60, %v5845_v17  ;;  %6866 = vrot.lane.b32.xlu0 %v12308_v56, %s8429_s15  ;;  %v6442_v43 = vsel %vm9002_vm5, %v7931_v42, %v6441_v21  ;;  %v12419_v60 = vld [vmem:[%s13169_s5] ss:$0 sm:$0xff] }
 0x490   : > { %5844 = vst.msk [vmem:[#allocation3 + $0x58] sm:$0xf] %vm13686_vm12, %v5595_v40  ;;  %5847 = vst [vmem:[#allocation3 + $0x5c] sm:$0x1] %v5846_v11  ;;  %6763 = vrot.lane.b32.xlu1 %v12308_v56, %s8426_s12  ;;  %v555_v56 = vld [vmem:[#allocation3 + $0xbc] sm:$0x1]  ;;  %v7981_v7 = vcombine.low %v6442_v43, %v6445_v4 }
 0x491   : > { %v556_v44 = vsel %vm10618_vm9, 0, %v555_v56  ;;  %vm13693_vm14 = vcmask 326656   ;;  %vm13694_vm12 = vcmask 392192  }
 0x492   : > { %557 = vst [vmem:[#allocation3 + $0xbc] sm:$0x1] %v556_v44 }
 0x493   : > { %6901 = vrot.lane.b32.xlu0 %v12369_v5, %s8430_s16 }
 0x494   : > { %6798 = vrot.lane.b32.xlu1 %v12369_v5, %s8427_s13  ;;  %v12406_v54 = vld [vmem:[#allocation3 + $0x60] sm:$0xf] }
 0x495   : > { %v5932_v45 = vld [vmem:[#allocation3 + $0x54] sm:$0xf]  ;;  %v6158_v1 = vshrl.u32 %v12406_v54, 16  ;;  %v6161_v21 = vshll.u32 %v12406_v54, 16 }
 0x496   : > { %v6134_v30 = vshrl.u32 %v5932_v45, 16  ;;  %v6137_v33 = vshll.u32 %v5932_v45, 16  ;;  %v7932_v49 = vrot.slane %v5932_v45, 9  ;;  %v12410_v17 = vld [vmem:[#allocation3 + $0x64] sm:$0xf] }
 0x497   : > { %6936 = vrot.lane.b32.xlu0 %v12387_v32, %s8431_s17  ;;  %v5933_v51 = vld [vmem:[#allocation3 + $0x58] sm:$0xf]  ;;  %v5934_v62 = vld [vmem:[#allocation3 + $0x5c] sm:$0x1]  ;;  %v6171_v41 = vshrl.u32 %v12410_v17, 16  ;;  %v6167_v22 = vshll.u32 %v12410_v17, 16 }
 0x498   : > { %6833 = vrot.lane.b32.xlu1 %v12387_v32, %s8428_s14  ;;  %v6147_v2 = vshrl.u32 %v5933_v51, 16  ;;  %v6448_v13 = vrot.slane %v5933_v51, 5  ;;  %v6136_v57 = vrot.slane %v6134_v30, 4  ;;  %v6139_v38 = vrot.slane %v6137_v33, 5 }
 0x499   : > { %v6143_v23 = vshll.u32 %v5933_v51, 16  ;;  %v6451_v37 = vrot.slane %v5934_v62, 5  ;;  %v6153_v14 = vshll.u32 %v5934_v62, 16  ;;  %v12408_v10 = vcombine.low %v5932_v45, %v5933_v51  ;;  %v12435_v62 = vpop.permute.xlu0 %6673 }
 0x49a   : > { %v6450_v63 = vrot.slane %v6448_v13, 4  ;;  %v6149_v53 = vrot.slane %v6147_v2, 4  ;;  %v6140_v46 = vor.u32 %v6139_v38, %v6136_v57  ;;  %v6449_v29 = vsel %vm9002_vm5, %v7932_v49, %v6448_v13  ;;  %v5937_v49 = vld [vmem:[#allocation3 + $0x68] sm:$0x1] }
 0x49b   : > { %6971 = vrot.lane.b32.xlu0 %v7981_v7, %s8432_s18  ;;  %v6145_v25 = vrot.slane %v6143_v23, 5  ;;  %v6155_v6 = vrot.slane %v6153_v14, 5  ;;  %v6160_v4 = vrot.slane %v6158_v1, 4  ;;  %v6163_v30 = vrot.slane %v6161_v21, 5 }
 0x49c   : > { %6868 = vrot.lane.b32.xlu1 %v7981_v7, %s8429_s15  ;;  %v6452_v20 = vsel %vm9002_vm5, %v6450_v63, %v6451_v37  ;;  %v6141_v16 = vrot.slane %v6140_v46, 4  ;;  %v6169_v43 = vrot.slane %v6167_v22, 5  ;;  %v6173_v2 = vrot.slane %v6171_v41, 4  ;;  %v5862_v63 = vld [vmem:[#allocation3 + $0x78] sm:$0xf] }
 0x49d   : > { %v12404_v36 = vcombine.low %v6449_v29, %v6452_v20  ;;  %v6150_v27 = vor.u32 %v6149_v53, %v6145_v25  ;;  %v5855_v29 = vld [vmem:[#allocation3 + $0x6c] sm:$0xf] }
 0x49e   : > { %v6146_v19 = vsel %vm8548_vm2, %v6141_v16, %v6145_v25  ;;  %v6164_v25 = vor.u32 %v6163_v30, %v6160_v4 }
 0x49f   : > { %6973 = vrot.lane.b32.xlu0 %v12404_v36, %s8432_s18  ;;  %v8197_v55 = vpop.f32.mrb[4].mxu1  ;;  %v6151_v48 = vrot.slane %v6150_v27, 4  ;;  %v6174_v27 = vor.u32 %v6173_v2, %v6169_v43 }
 0x4a0   : > { %6903 = vrot.lane.b32.xlu1 %v12408_v10, %s8430_s16  ;;  %v5296_v47 = vadd.f32 %v12419_v60, %v8197_v55  ;;  %v5287_v59 = vpop.f32.mrb[5].mxu1 }
 0x4a1   : > { %v5288_v40 = vadd.f32 %v12419_v60, %v5287_v59  ;;  %v8198_v11 = vpop.f32.mrb[6].mxu1  ;;  %v6156_v18 = vsel %vm8548_vm2, %v6151_v48, %v6155_v6  ;;  %v5866_v48 = vld [vmem:[#allocation3 + $0x80] sm:$0x1]  ;;  %v6177_v59 = vshll.u32 %v5937_v49, 16 }
 0x4a2   : > { %v5368_v52 = vmax.f32 %v5296_v47, 0.0  ;;  %v5299_v61 = vadd.f32 %v12419_v60, %v8198_v11  ;;  %v5290_v35 = vpop.f32.mrb[7].mxu1  ;;  %v7966_v31 = vcombine.low %v6146_v19, %v6156_v18  ;;  %v5859_v11 = vld [vmem:[#allocation3 + $0x74] sm:$0x1]  ;;  %v12444_v19 = vpop.permute.xlu0 %6753 }
 0x4a3   : > { %v5366_v56 = vmax.f32 %v5288_v40, 0.0  ;;  %v5291_v44 = vadd.f32 %v12419_v60, %v5290_v35  ;;  %6765 = vrot.lane.b32.xlu0 %v7981_v7, %s8426_s12 }
 0x4a4   : > { %v8041_v26 = vpack.c.bf16 %v5368_v52, %v5368_v52  ;;  %v5369_v9 = vmax.f32 %v5299_v61, 0.0  ;;  %6938 = vrot.lane.b32.xlu1 %v7966_v31, %s8431_s17 }
 0x4a5   : > { %v8039_v45 = vpack.c.bf16 %v5366_v56, %v5366_v56  ;;  %v5367_v42 = vmax.f32 %v5291_v44, 0.0  ;;  %v6175_v56 = vrot.slane %v6174_v27, 4  ;;  %v6455_v44 = vrot.slane %v12410_v17, 5 }
 0x4a6   : > { %v5632_v33 = vshrl.u32 %v8041_v26, 16  ;;  %v8042_v51 = vpack.c.bf16 %v5369_v9, %v5369_v9  ;;  %v5635_v38 = vshll.u32 %v8041_v26, 16  ;;  %v6165_v9 = vrot.slane %v6164_v25, 4 }
 0x4a7   : > { %v5615_v13 = vshrl.u32 %v8039_v45, 16  ;;  %v8040_v57 = vpack.c.bf16 %v5367_v42, %v5367_v42  ;;  %6800 = vrot.lane.b32.xlu0 %v12408_v10, %s8427_s13  ;;  %v5618_v53 = vshll.u32 %v8039_v45, 16  ;;  %v6179_v45 = vrot.slane %v6177_v59, 5 }
 0x4a8   : > { %v5634_v7 = vrot.slane %v5632_v33, 7  ;;  %v5640_v23 = vshrl.u32 %v8042_v51, 16  ;;  %6685 = vrot.lane.b32.xlu1 %v12387_v32, %s8425_s11  ;;  %v5643_v16 = vshll.u32 %v8042_v51, 16  ;;  %v12466_v42 = vcombine.low %v12406_v54, %v12410_v17 }
 0x4a9   : > { %v5617_v37 = vrot.slane %v5615_v13, 7  ;;  %v5623_v46 = vshrl.u32 %v8040_v57, 16  ;;  %v5626_v47 = vshll.u32 %v8040_v57, 16  ;;  %v6180_v30 = vsel %vm8548_vm2, %v6175_v56, %v6179_v45 }
 0x4aa   : > { %v5637_v14 = vor.u32 %v5635_v38, %v5634_v7  ;;  %v5642_v20 = vrot.slane %v5640_v23, 7  ;;  %v5638_v1 = vrot.slane %v5634_v7, 4  ;;  %v6457_v33 = vrot.slane %v6455_v44, 4 }
 0x4ab   : > { %v5620_v55 = vor.u32 %v5618_v53, %v5617_v37  ;;  %v5625_v6 = vrot.slane %v5623_v46, 7  ;;  %6835 = vrot.lane.b32.xlu0 %v7966_v31, %s8428_s14  ;;  %v5621_v18 = vrot.slane %v5617_v37, 4  ;;  %v6458_v51 = vrot.slane %v5937_v49, 5  ;;  %v8415_v37 = vld [vmem:[#allocation3 + $0x4] sm:$0xf] }
 0x4ac   : > { %v5863_v32 = vsel %vm11003_vm11, %v5637_v14, %v5862_v63  ;;  %v5645_v21 = vor.u32 %v5643_v16, %v5642_v20  ;;  %v5647_v40 = vrot.slane %v5642_v20, 4  ;;  %6687 = vrot.lane.b32.xlu1 %v7966_v31, %s8425_s11  ;;  %v12468_v4 = vpop.permute.xlu0 %6788  ;;  %v7933_v7 = vrot.slane %v12406_v54, 9  ;;  %v8416_v53 = vld [vmem:[#allocation3] sm:$0xf] }
 0x4ad   : > { %5864 = vst [vmem:[#allocation3 + $0x78] sm:$0xf] %v5863_v32  ;;  %v5856_v41 = vsel %vm11003_vm11, %v5620_v55, %v5855_v29  ;;  %v5628_v52 = vor.u32 %v5626_v47, %v5625_v6  ;;  %v5630_v61 = vrot.slane %v5625_v6, 4  ;;  %v6459_v38 = vsel %vm9002_vm5, %v6457_v33, %v6458_v51 }
 0x4ae   : > { %5857 = vst [vmem:[#allocation3 + $0x6c] sm:$0xf] %v5856_v41  ;;  %v5646_v35 = vsel %vm11009_vm7, %v5638_v1, %v5645_v21  ;;  %v5867_v22 = vsel %vm10611_vm13, %v5647_v40, %v5866_v48  ;;  %v7943_v46 = vcombine.low %v8416_v53, %v8415_v37  ;;  %v6456_v25 = vsel %vm9002_vm5, %v7933_v7, %v6455_v44 }
 0x4af   : > { %5865 = vst.msk [vmem:[#allocation3 + $0x7c] sm:$0xf] %vm13687_vm10, %v5646_v35  ;;  %5868 = vst [vmem:[#allocation3 + $0x80] sm:$0x1] %v5867_v22  ;;  %v5629_v31 = vsel %vm11009_vm7, %v5621_v18, %v5628_v52  ;;  %v5860_v26 = vsel %vm10611_vm13, %v5630_v61, %v5859_v11  ;;  %6870 = vrot.lane.b32.xlu0 %v12404_v36, %s8429_s15  ;;  %v7983_v29 = vcombine.low %v6456_v25, %v6459_v38  ;;  %vm13695_vm10 = vcmask 588800  }
 0x4b0   : > { %5858 = vst.msk [vmem:[#allocation3 + $0x70] sm:$0xf] %vm13688_vm8, %v5629_v31  ;;  %5861 = vst [vmem:[#allocation3 + $0x74] sm:$0x1] %v5860_v26  ;;  %6767 = vrot.lane.b32.xlu1 %v12404_v36, %s8426_s12  ;;  %v6170_v36 = vsel %vm8548_vm2, %v6165_v9, %v6169_v43  ;;  %v6997_v1 = vsel %vm13689_vm3, %v7943_v46, %v12435_v62 }
 0x4b1   : > { %v12478_v2 = vcombine.low %v6170_v36, %v6180_v30  ;;  %v7044_v56 = vsel %vm13690_vm1, %v6997_v1, %v12444_v19 }
 0x4b2   : > { %v7076_v37 = vsel %vm13691_vm4, %v7044_v56, %v12468_v4 }
 0x4b3   : > { %6905 = vrot.lane.b32.xlu0 %v12466_v42, %s8430_s16 }
 0x4b4   : > { %6802 = vrot.lane.b32.xlu1 %v12466_v42, %s8427_s13  ;;  %v12503_v52 = vld [vmem:[#allocation3 + $0x78] sm:$0xf] }
 0x4b5   : > { %v5938_v17 = vld [vmem:[#allocation3 + $0x6c] sm:$0xf]  ;;  %v6206_v30 = vshrl.u32 %v12503_v52, 16  ;;  %v6209_v33 = vshll.u32 %v12503_v52, 16 }
 0x4b6   : > { %v12480_v13 = vpop.permute.xlu1 %6675  ;;  %v12482_v57 = vpop.permute.xlu0 %6823  ;;  %v6182_v23 = vshrl.u32 %v5938_v17, 16  ;;  %v6185_v63 = vshll.u32 %v5938_v17, 16  ;;  %v7934_v48 = vrot.slane %v5938_v17, 9  ;;  %v12507_v22 = vld [vmem:[#allocation3 + $0x7c] sm:$0xf] }
 0x4b7   : > { %6940 = vrot.lane.b32.xlu0 %v12478_v2, %s8431_s17  ;;  %v5939_v43 = vld [vmem:[#allocation3 + $0x70] sm:$0xf]  ;;  %v5940_v49 = vld [vmem:[#allocation3 + $0x74] sm:$0x1]  ;;  %v6219_v19 = vshrl.u32 %v12507_v22, 16 }
 0x4b8   : > { %6837 = vrot.lane.b32.xlu1 %v12478_v2, %s8428_s14  ;;  %v6195_v54 = vshrl.u32 %v5939_v43, 16  ;;  %v6462_v14 = vrot.slane %v5939_v43, 5  ;;  %v6184_v20 = vrot.slane %v6182_v23, 4  ;;  %v6187_v16 = vrot.slane %v6185_v63, 5 }
 0x4b9   : > { %v6191_v27 = vshll.u32 %v5939_v43, 16  ;;  %v6465_v47 = vrot.slane %v5940_v49, 5  ;;  %v6201_v40 = vshll.u32 %v5940_v49, 16  ;;  %v12511_v31 = vcombine.low %v5938_v17, %v5939_v43 }
 0x4ba   : > { %v6859_v55 = vpop.permute.xlu0 %6858  ;;  %v6464_v6 = vrot.slane %v6462_v14, 4  ;;  %v6197_v59 = vrot.slane %v6195_v54, 4  ;;  %v6188_v32 = vor.u32 %v6187_v16, %v6184_v20  ;;  %v12496_v11 = vpop.permute.xlu1 %6755  ;;  %v6463_v18 = vsel %vm9002_vm5, %v7934_v48, %v6462_v14 }
 0x4bb   : > { %6975 = vrot.lane.b32.xlu0 %v7983_v29, %s8432_s18  ;;  %v6193_v21 = vrot.slane %v6191_v27, 5  ;;  %v6203_v9 = vrot.slane %v6201_v40, 5  ;;  %v6215_v63 = vshll.u32 %v12507_v22, 16  ;;  %v7108_v54 = vsel %vm13692_vm6, %v7076_v37, %v12482_v57 }
 0x4bc   : > { %6872 = vrot.lane.b32.xlu1 %v7983_v29, %s8429_s15  ;;  %v6466_v41 = vsel %vm9002_vm5, %v6464_v6, %v6465_v47  ;;  %v6189_v62 = vrot.slane %v6188_v32, 4  ;;  %v12535_v16 = vrot.slane %v6206_v30, 4  ;;  %v12537_v27 = vrot.slane %v6209_v33, 5  ;;  %v5876_v33 = vld [vmem:[#allocation3 + $0x90] sm:$0xf] }
 0x4bd   : > { %v12505_v61 = vcombine.low %v6463_v18, %v6466_v41  ;;  %v6198_v35 = vor.u32 %v6197_v59, %v6193_v21  ;;  %v7140_v4 = vsel %vm13693_vm14, %v7108_v54, %v6859_v55  ;;  %v12542_v59 = vld [vmem:[#allocation3 + $0x80] sm:$0x1]  ;;  %v6221_v32 = vrot.slane %v6219_v19, 4 }
 0x4be   : > { %v6894_v44 = vpop.permute.xlu0 %6893  ;;  %v6194_v17 = vsel %vm8548_vm2, %v6189_v62, %v6193_v21  ;;  %v12529_v53 = vpop.permute.xlu1 %6790  ;;  %v6212_v56 = vor.u32 %v12537_v27, %v12535_v16  ;;  %v561_v16 = vld [vmem:[#allocation3 + $0xd4] sm:$0x1] }
 0x4bf   : > { %6977 = vrot.lane.b32.xlu0 %v12505_v61, %s8432_s18  ;;  %v6199_v26 = vrot.slane %v6198_v35, 4  ;;  %v8201_v45 = vpop.f32.mrb[8].mxu1  ;;  %v7172_v57 = vsel %vm13694_vm12, %v7140_v4, %v6894_v44  ;;  %v6225_v44 = vshll.u32 %v12542_v59, 16 }
 0x4c0   : > { %6907 = vrot.lane.b32.xlu1 %v12511_v31, %s8430_s16  ;;  %v5312_v36 = vadd.f32 %v12419_v60, %v8201_v45  ;;  %v5303_v51 = vpop.f32.mrb[9].mxu1 }
 0x4c1   : > { %v6204_v7 = vsel %vm8548_vm2, %v6199_v26, %v6203_v9  ;;  %v5304_v38 = vadd.f32 %v12419_v60, %v5303_v51  ;;  %v8202_v23 = vpop.f32.mrb[10].mxu1  ;;  %v507_v26 = vld [vmem:[#allocation3 + $0xcc] sm:$0x1] }
 0x4c2   : > { %v6929_v46 = vpop.permute.xlu0 %6928  ;;  %v7968_v43 = vcombine.low %v6194_v17, %v6204_v7  ;;  %v5372_v49 = vmax.f32 %v5312_v36, 0.0  ;;  %v5315_v25 = vadd.f32 %v12419_v60, %v8202_v23  ;;  %v5306_v20 = vpop.f32.mrb[11].mxu1  ;;  %v5869_v7 = vld [vmem:[#allocation3 + $0x84] sm:$0xf]  ;;  %v508_v23 = vsel %vm10611_vm13, 0, %v507_v26 }
 0x4c3   : > { %6769 = vrot.lane.b32.xlu0 %v7983_v29, %s8426_s12  ;;  %v5370_v14 = vmax.f32 %v5304_v38, 0.0  ;;  %v5307_v47 = vadd.f32 %v12419_v60, %v5306_v20  ;;  %v12545_v29 = vrot.slane %v6215_v63, 5  ;;  %v7204_v21 = vsel %vm2483_vm15, %v7172_v57, %v6929_v46  ;;  %v12554_v9 = vpop.permute.xlu1 %6825  ;;  %509 = vst [vmem:[#allocation3 + $0xcc] sm:$0x1] %v508_v23 }
 0x4c4   : > { %6942 = vrot.lane.b32.xlu1 %v7968_v43, %s8431_s17  ;;  %v8045_v48 = vpack.c.bf16 %v5372_v49, %v5372_v49  ;;  %v5373_v6 = vmax.f32 %v5315_v25, 0.0  ;;  %v5880_v49 = vld [vmem:[#allocation3 + $0x98] sm:$0x1]  ;;  %v6227_v26 = vrot.slane %v6225_v44, 5 }
 0x4c5   : > { %v8043_v1 = vpack.c.bf16 %v5370_v14, %v5370_v14  ;;  %v5371_v55 = vmax.f32 %v5307_v47, 0.0  ;;  %v6222_v38 = vor.u32 %v6221_v32, %v12545_v29 }
 0x4c6   : > { %v5666_v40 = vshrl.u32 %v8045_v48, 16  ;;  %v8046_v18 = vpack.c.bf16 %v5373_v6, %v5373_v6  ;;  %v6964_v41 = vpop.permute.xlu0 %6963  ;;  %v5669_v30 = vshll.u32 %v8045_v48, 16 }
 0x4c7   : > { %v5649_v62 = vshrl.u32 %v8043_v1, 16  ;;  %v7236_v35 = vsel %vm2516_vm0, %v7204_v21, %v6964_v41  ;;  %6804 = vrot.lane.b32.xlu0 %v12511_v31, %s8427_s13  ;;  %v8044_v51 = vpack.c.bf16 %v5371_v55, %v5371_v55  ;;  %v5652_v17 = vshll.u32 %v8043_v1, 16  ;;  %v5873_v1 = vld [vmem:[#allocation3 + $0x8c] sm:$0x1] }
 0x4c8   : > { %v5668_v45 = vrot.slane %v5666_v40, 7  ;;  %v5674_v36 = vshrl.u32 %v8046_v18, 16  ;;  %6689 = vrot.lane.b32.xlu1 %v12478_v2, %s8425_s11  ;;  %8221 = vmatprep.mubr.msk.bf16.mxu1 %vm13695_vm10, %v7236_v35  ;;  %v5677_v46 = vshll.u32 %v8046_v18, 16  ;;  %v6469_v2 = vrot.slane %v12507_v22, 5  ;;  %v6861_v40 = vpop.permute.xlu1 %6860 }
 0x4c9   : > { %v5651_v19 = vrot.slane %v5649_v62, 7  ;;  %v5657_v25 = vshrl.u32 %v8044_v51, 16  ;;  %v5660_v20 = vshll.u32 %v8044_v51, 16  ;;  %v6223_v32 = vrot.slane %v6222_v38, 4 }
 0x4ca   : > { %v5671_v63 = vor.u32 %v5669_v30, %v5668_v45  ;;  %v5676_v37 = vrot.slane %v5674_v36, 7  ;;  %v5672_v54 = vrot.slane %v5668_v45, 4  ;;  %v562_v21 = vsel %vm10618_vm9, 0, %v561_v16  ;;  %vm13696_vm9 = vmmov %vm13689_vm3 }
 0x4cb   : > { %v5654_v14 = vor.u32 %v5652_v17, %v5651_v19  ;;  %6839 = vrot.lane.b32.xlu0 %v7968_v43, %s8428_s14  ;;  %v5659_v6 = vrot.slane %v5657_v25, 7  ;;  %v5655_v47 = vrot.slane %v5651_v19, 4  ;;  %563 = vst [vmem:[#allocation3 + $0xd4] sm:$0x1] %v562_v21  ;;  %v6213_v35 = vrot.slane %v6212_v56, 4  ;;  %vm13697_vm3 = vmmov %vm13688_vm8 }
 0x4cc   : > { %v5877_v27 = vsel %vm11003_vm11, %v5671_v63, %v5876_v33  ;;  %v5679_v4 = vor.u32 %v5677_v46, %v5676_v37  ;;  %v5681_v48 = vrot.slane %v5676_v37, 4  ;;  %6691 = vrot.lane.b32.xlu1 %v7968_v43, %s8425_s11  ;;  %v7000_v45 = vsel %vm13696_vm9, %v12099_v50, %v12480_v13  ;;  %v6896_v51 = vpop.permute.xlu1 %6895 }
 0x4cd   : > { %5878 = vst [vmem:[#allocation3 + $0x90] sm:$0xf] %v5877_v27  ;;  %v5870_v57 = vsel %vm11003_vm11, %v5654_v14, %v5869_v7  ;;  %v5662_v55 = vor.u32 %v5660_v20, %v5659_v6  ;;  %v5664_v43 = vrot.slane %v5659_v6, 4  ;;  %v12590_v33 = vcombine.low %v12503_v52, %v12507_v22 }
 0x4ce   : > { %5871 = vst [vmem:[#allocation3 + $0x84] sm:$0xf] %v5870_v57  ;;  %v5680_v18 = vsel %vm11009_vm7, %v5672_v54, %v5679_v4  ;;  %v5881_v41 = vsel %vm10611_vm13, %v5681_v48, %v5880_v49  ;;  %v7046_v36 = vsel %vm13690_vm1, %v7000_v45, %v12496_v11  ;;  %v6471_v56 = vrot.slane %v6469_v2, 4 }
 0x4cf   : > { %5879 = vst.msk [vmem:[#allocation3 + $0x94] sm:$0xf] %vm13688_vm8, %v5680_v18  ;;  %5882 = vst [vmem:[#allocation3 + $0x98] sm:$0x1] %v5881_v41  ;;  %6874 = vrot.lane.b32.xlu0 %v12505_v61, %s8429_s15  ;;  %v5663_v39 = vsel %vm11009_vm7, %v5655_v47, %v5662_v55  ;;  %v5874_v62 = vsel %vm10611_vm13, %v5664_v43, %v5873_v1  ;;  %v7078_v44 = vsel %vm13691_vm4, %v7046_v36, %v12529_v53 }
 0x4d0   : > { %6771 = vrot.lane.b32.xlu1 %v12505_v61, %s8426_s12  ;;  %5872 = vst.msk [vmem:[#allocation3 + $0x88] sm:$0xf] %vm13697_vm3, %v5663_v39  ;;  %5875 = vst [vmem:[#allocation3 + $0x8c] sm:$0x1] %v5874_v62  ;;  %v6228_v61 = vsel %vm8548_vm2, %v6223_v32, %v6227_v26  ;;  %v7110_v50 = vsel %vm13692_vm6, %v7078_v44, %v12554_v9  ;;  %v6218_v13 = vsel %vm8548_vm2, %v6213_v35, %v12545_v29 }
 0x4d1   : > { %v6966_v30 = vpop.permute.xlu0 %6965  ;;  %v6472_v11 = vrot.slane %v12542_v59, 5  ;;  %v7142_v22 = vsel %vm13693_vm14, %v7110_v50, %v6861_v40  ;;  %v12609_v17 = vcombine.low %v6218_v13, %v6228_v61  ;;  %v7935_v53 = vrot.slane %v12503_v52, 9  ;;  %vm13698_vm8 = vmmov %vm13696_vm9 }
 0x4d2   : > { %v7174_v38 = vsel %vm13694_vm12, %v7142_v22, %v6896_v51  ;;  %vm13699_vm9 = vmmov %vm13690_vm1 }
 0x4d3   : > { %6909 = vrot.lane.b32.xlu0 %v12590_v33, %s8430_s16  ;;  %v6473_v23 = vsel %vm9002_vm5, %v6471_v56, %v6472_v11  ;;  %v6470_v52 = vsel %vm9002_vm5, %v7935_v53, %v6469_v2  ;;  %vm13700_vm3 = vmmov %vm13691_vm4 }
 0x4d4   : > { %6806 = vrot.lane.b32.xlu1 %v12590_v33, %s8427_s13  ;;  %v7985_v20 = vcombine.low %v6470_v52, %v6473_v23  ;;  %v12624_v47 = vld [vmem:[#allocation3 + $0x90] sm:$0xf]  ;;  %vm13701_vm1 = vmmov %vm13692_vm6 }
 0x4d5   : > { %v6758_v19 = vpop.permute.xlu0 %6757  ;;  %v5944_v7 = vld [vmem:[#allocation3 + $0x84] sm:$0xf]  ;;  %v6254_v35 = vshrl.u32 %v12624_v47, 16  ;;  %v6257_v26 = vshll.u32 %v12624_v47, 16  ;;  %vm13702_vm4 = vmmov %vm13693_vm14  ;;  %vm13704_vm14 = vcmask 60416  }
 0x4d6   : > { %v6931_v9 = vpop.permute.xlu1 %6930  ;;  %v6230_v63 = vshrl.u32 %v5944_v7, 16  ;;  %v6233_v37 = vshll.u32 %v5944_v7, 16  ;;  %v7936_v57 = vrot.slane %v5944_v7, 9  ;;  %v12632_v55 = vld [vmem:[#allocation3 + $0x94] sm:$0xf]  ;;  %vm13703_vm6 = vmmov %vm13694_vm12 }
 0x4d7   : > { %v7206_v29 = vsel %vm2483_vm15, %v7174_v38, %v6931_v9  ;;  %6944 = vrot.lane.b32.xlu0 %v12609_v17, %s8431_s17  ;;  %v5945_v46 = vld [vmem:[#allocation3 + $0x88] sm:$0xf]  ;;  %v5946_v49 = vld [vmem:[#allocation3 + $0x8c] sm:$0x1]  ;;  %v6267_v56 = vshrl.u32 %v12632_v55, 16  ;;  %v6263_v22 = vshll.u32 %v12632_v55, 16  ;;  %vm13705_vm12 = vmmov %vm13695_vm10 }
 0x4d8   : > { %v7238_v59 = vsel %vm2516_vm0, %v7206_v29, %v6966_v30  ;;  %6841 = vrot.lane.b32.xlu1 %v12609_v17, %s8428_s14  ;;  %v6232_v25 = vrot.slane %v6230_v63, 4  ;;  %v6235_v54 = vrot.slane %v6233_v37, 5  ;;  %v6243_v16 = vshrl.u32 %v5945_v46, 16 }
 0x4d9   : > { %8222 = vmatmul.mubr.msk.bf16.vlgmr.msra.gmra.mrb[20].mxu1 %vm13695_vm10, %v7238_v59  ;;  %v6793_v14 = vpop.permute.xlu0 %6792  ;;  %v6476_v27 = vrot.slane %v5945_v46, 5  ;;  %v6239_v6 = vshll.u32 %v5945_v46, 16  ;;  %v6479_v2 = vrot.slane %v5946_v49, 5  ;;  %v12630_v40 = vcombine.low %v5944_v7, %v5945_v46  ;;  %vm13706_vm10 = vmmov %vm13704_vm14 }
 0x4da   : > { %v6678_v4 = vpop.permute.xlu1 %6677  ;;  %v6236_v48 = vor.u32 %v6235_v54, %v6232_v25  ;;  %v6245_v32 = vrot.slane %v6243_v16, 4  ;;  %v6249_v41 = vshll.u32 %v5946_v49, 16  ;;  %v12653_v38 = vrot.slane %v6254_v35, 4 }
 0x4db   : > { %6979 = vrot.lane.b32.xlu0 %v7985_v20, %s8432_s18  ;;  %v6478_v1 = vrot.slane %v6476_v27, 4  ;;  %v7003_v21 = vsel %vm13698_vm8, %v12133_v24, %v6678_v4  ;;  %v6241_v18 = vrot.slane %v6239_v6, 5  ;;  %v6477_v39 = vsel %vm9002_vm5, %v7936_v57, %v6476_v27  ;;  %v12667_v4 = vld [vmem:[#allocation3 + $0x98] sm:$0x1] }
 0x4dc   : > { %6876 = vrot.lane.b32.xlu1 %v7985_v20, %s8429_s15  ;;  %v6237_v30 = vrot.slane %v6236_v48, 4  ;;  %v7048_v51 = vsel %vm13699_vm9, %v7003_v21, %v6758_v19  ;;  %v6251_v11 = vrot.slane %v6249_v41, 5  ;;  %v12655_v9 = vrot.slane %v6257_v26, 5 }
 0x4dd   : > { %v6828_v43 = vpop.permute.xlu0 %6827  ;;  %v6480_v62 = vsel %vm9002_vm5, %v6478_v1, %v6479_v2  ;;  %v6246_v36 = vor.u32 %v6245_v32, %v6241_v18  ;;  %v7080_v46 = vsel %vm13700_vm3, %v7048_v51, %v6793_v14  ;;  %v12669_v48 = vrot.slane %v6263_v22, 5  ;;  %v5883_v22 = vld [vmem:[#allocation3 + $0x9c] sm:$0xf] }
 0x4de   : > { %v12640_v24 = vpop.permute.xlu1 %6679  ;;  %v12642_v45 = vcombine.low %v6477_v39, %v6480_v62  ;;  %v6242_v59 = vsel %vm8548_vm2, %v6237_v30, %v6241_v18  ;;  %v6269_v6 = vrot.slane %v6267_v56, 4  ;;  %v7112_v14 = vsel %vm13701_vm1, %v7080_v46, %v6828_v43 }
 0x4df   : > { %v8205_v61 = vpop.f32.mrb[12].mxu1  ;;  %v6247_v13 = vrot.slane %v6246_v36, 4  ;;  %v6260_v41 = vor.u32 %v12655_v9, %v12653_v38  ;;  %v6273_v62 = vshll.u32 %v12667_v4, 16  ;;  %v6483_v35 = vrot.slane %v12632_v55, 5 }
 0x4e0   : > { %6911 = vrot.lane.b32.xlu1 %v12630_v40, %s8430_s16  ;;  %6981 = vrot.lane.b32.xlu0 %v12642_v45, %s8432_s18  ;;  %v5328_v44 = vadd.f32 %v12419_v60, %v8205_v61  ;;  %v5319_v50 = vpop.f32.mrb[13].mxu1  ;;  %v6270_v43 = vor.u32 %v6269_v6, %v12669_v48  ;;  %v5890_v61 = vld [vmem:[#allocation3 + $0xa8] sm:$0xf] }
 0x4e1   : > { %v6863_v53 = vpop.permute.xlu0 %6862  ;;  %v5320_v7 = vadd.f32 %v12419_v60, %v5319_v50  ;;  %v8206_v19 = vpop.f32.mrb[14].mxu1  ;;  %v6252_v52 = vsel %vm8548_vm2, %v6247_v13, %v6251_v11 }
 0x4e2   : > { %v12657_v23 = vpop.permute.xlu1 %6759  ;;  %v5376_v63 = vmax.f32 %v5328_v44, 0.0  ;;  %v5331_v37 = vadd.f32 %v12419_v60, %v8206_v19  ;;  %v5322_v29 = vpop.f32.mrb[15].mxu1  ;;  %v7970_v54 = vcombine.low %v6242_v59, %v6252_v52  ;;  %v7144_v51 = vsel %vm13702_vm4, %v7112_v14, %v6863_v53 }
 0x4e3   : > { %v5374_v49 = vmax.f32 %v5320_v7, 0.0  ;;  %v5323_v25 = vadd.f32 %v12419_v60, %v5322_v29  ;;  %v5894_v29 = vld [vmem:[#allocation3 + $0xb0] sm:$0x1] }
 0x4e4   : > { %v8049_v16 = vpack.c.bf16 %v5376_v63, %v5376_v63  ;;  %v5377_v27 = vmax.f32 %v5331_v37, 0.0  ;;  %6773 = vrot.lane.b32.xlu0 %v7985_v20, %s8426_s12  ;;  %6946 = vrot.lane.b32.xlu1 %v7970_v54, %s8431_s17 }
 0x4e5   : > { %v8047_v57 = vpack.c.bf16 %v5374_v49, %v5374_v49  ;;  %v6898_v1 = vpop.permute.xlu0 %6897  ;;  %v5375_v2 = vmax.f32 %v5323_v25, 0.0  ;;  %v5887_v25 = vld [vmem:[#allocation3 + $0xa4] sm:$0x1] }
 0x4e6   : > { %v5700_v32 = vshrl.u32 %v8049_v16, 16  ;;  %v12673_v21 = vpop.permute.xlu1 %6794  ;;  %v8050_v18 = vpack.c.bf16 %v5377_v27, %v5377_v27  ;;  %v5703_v30 = vshll.u32 %v8049_v16, 16  ;;  %v7176_v38 = vsel %vm13703_vm6, %v7144_v51, %v6898_v1 }
 0x4e7   : > { %v5683_v20 = vshrl.u32 %v8047_v57, 16  ;;  %v8048_v39 = vpack.c.bf16 %v5375_v2, %v5375_v2  ;;  %v5686_v44 = vshll.u32 %v8047_v57, 16 }
 0x4e8   : > { %v5702_v26 = vrot.slane %v5700_v32, 7  ;;  %v5708_v36 = vshrl.u32 %v8050_v18, 16  ;;  %6808 = vrot.lane.b32.xlu0 %v12630_v40, %s8427_s13  ;;  %6693 = vrot.lane.b32.xlu1 %v12609_v17, %s8425_s11  ;;  %v5711_v19 = vshll.u32 %v8050_v18, 16 }
 0x4e9   : > { %v5685_v56 = vrot.slane %v5683_v20, 7  ;;  %v5691_v50 = vshrl.u32 %v8048_v39, 16  ;;  %v6933_v13 = vpop.permute.xlu0 %6932  ;;  %v5694_v53 = vshll.u32 %v8048_v39, 16  ;;  %v6271_v20 = vrot.slane %v6270_v43, 4 }
 0x4ea   : > { %v5705_v11 = vor.u32 %v5703_v30, %v5702_v26  ;;  %v5710_v7 = vrot.slane %v5708_v36, 7  ;;  %v6830_v9 = vpop.permute.xlu1 %6829  ;;  %v5706_v63 = vrot.slane %v5702_v26, 4  ;;  %v7208_v17 = vsel %vm2483_vm15, %v7176_v38, %v6933_v13 }
 0x4eb   : > { %v5688_v37 = vor.u32 %v5686_v44, %v5685_v56  ;;  %v5693_v59 = vrot.slane %v5691_v50, 7  ;;  %v5689_v16 = vrot.slane %v5685_v56, 4  ;;  %v6261_v26 = vrot.slane %v6260_v41, 4 }
 0x4ec   : > { %v5891_v52 = vsel %vm11003_vm11, %v5705_v11, %v5890_v61  ;;  %v5713_v46 = vor.u32 %v5711_v19, %v5710_v7  ;;  %v5715_v49 = vrot.slane %v5710_v7, 4  ;;  %6843 = vrot.lane.b32.xlu0 %v7970_v54, %s8428_s14  ;;  %6695 = vrot.lane.b32.xlu1 %v7970_v54, %s8425_s11  ;;  %v6275_v30 = vrot.slane %v6273_v62, 5 }
 0x4ed   : > { %5892 = vst [vmem:[#allocation3 + $0xa8] sm:$0xf] %v5891_v52  ;;  %v5884_v27 = vsel %vm11003_vm11, %v5688_v37, %v5883_v22  ;;  %v5696_v6 = vor.u32 %v5694_v53, %v5693_v59  ;;  %v5698_v57 = vrot.slane %v5693_v59, 4  ;;  %v6968_v1 = vpop.permute.xlu0 %6967  ;;  %v7006_v36 = vsel %vm13698_vm8, %v12197_v34, %v12640_v24 }
 0x4ee   : > { %5885 = vst [vmem:[#allocation3 + $0x9c] sm:$0xf] %v5884_v27  ;;  %v5714_v2 = vsel %vm11009_vm7, %v5706_v63, %v5713_v46  ;;  %v5895_v14 = vsel %vm10611_vm13, %v5715_v49, %v5894_v29  ;;  %v6865_v32 = vpop.permute.xlu1 %6864  ;;  %v7240_v18 = vsel %vm2516_vm0, %v7208_v17, %v6968_v1  ;;  %v7050_v51 = vsel %vm13699_vm9, %v7006_v36, %v12657_v23 }
 0x4ef   : > { %5893 = vst.msk [vmem:[#allocation3 + $0xac] sm:$0xf] %vm13704_vm14, %v5714_v2  ;;  %5896 = vst [vmem:[#allocation3 + $0xb0] sm:$0x1] %v5895_v14  ;;  %v5697_v39 = vsel %vm11009_vm7, %v5689_v16, %v5696_v6  ;;  %v5888_v54 = vsel %vm10611_vm13, %v5698_v57, %v5887_v25  ;;  %8225 = vmatprep.mubr.msk.bf16.mxu1 %vm13705_vm12, %v7240_v18  ;;  %v12716_v56 = vcombine.low %v12624_v47, %v12632_v55 }
 0x4f0   : > { %5886 = vst.msk [vmem:[#allocation3 + $0xa0] sm:$0xf] %vm13706_vm10, %v5697_v39  ;;  %5889 = vst [vmem:[#allocation3 + $0xa4] sm:$0x1] %v5888_v54  ;;  %6878 = vrot.lane.b32.xlu0 %v12642_v45, %s8429_s15  ;;  %6775 = vrot.lane.b32.xlu1 %v12642_v45, %s8426_s12  ;;  %v6276_v41 = vsel %vm8548_vm2, %v6271_v20, %v6275_v30  ;;  %v6485_v62 = vrot.slane %v6483_v35, 4  ;;  %v7082_v34 = vsel %vm13700_vm3, %v7050_v51, %v12673_v21 }
 0x4f1   : > { %v6970_v43 = vpop.permute.xlu0 %6969  ;;  %v7114_v24 = vsel %vm13701_vm1, %v7082_v34, %v6830_v9  ;;  %v6266_v45 = vsel %vm8548_vm2, %v6261_v26, %v12669_v48  ;;  %v6486_v23 = vrot.slane %v12667_v4, 5  ;;  %v7937_v21 = vrot.slane %v12624_v47, 9  ;;  %vm13707_vm14 = vmmov %vm13705_vm12 }
 0x4f2   : > { %v6900_v61 = vpop.permute.xlu1 %6899  ;;  %v7146_v44 = vsel %vm13702_vm4, %v7114_v24, %v6865_v32  ;;  %v12734_v13 = vcombine.low %v6266_v45, %v6276_v41  ;;  %vm13708_vm12 = vmmov %vm13698_vm8 }
 0x4f3   : > { %v7178_v22 = vsel %vm13703_vm6, %v7146_v44, %v6900_v61  ;;  %v6487_v19 = vsel %vm9002_vm5, %v6485_v62, %v6486_v23  ;;  %v6484_v47 = vsel %vm9002_vm5, %v7937_v21, %v6483_v35  ;;  %vm13709_vm10 = vmmov %vm13699_vm9 }
 0x4f4   : > { %6913 = vrot.lane.b32.xlu0 %v12716_v56, %s8430_s16  ;;  %6810 = vrot.lane.b32.xlu1 %v12716_v56, %s8427_s13  ;;  %v7987_v52 = vcombine.low %v6484_v47, %v6487_v19  ;;  %v12761_v26 = vld [vmem:[#allocation3 + $0xa8] sm:$0xf]  ;;  %vm13710_vm8 = vmmov %vm13700_vm3 }
 0x4f5   : > { %v6762_v50 = vpop.permute.xlu0 %6761  ;;  %v5950_v11 = vld [vmem:[#allocation3 + $0x9c] sm:$0xf]  ;;  %v6302_v34 = vshrl.u32 %v12761_v26, 16  ;;  %v6305_v24 = vshll.u32 %v12761_v26, 16  ;;  %vm13711_vm9 = vmmov %vm13701_vm1 }
 0x4f6   : > { %v6935_v7 = vpop.permute.xlu1 %6934  ;;  %v6278_v48 = vshrl.u32 %v5950_v11, 16  ;;  %v6281_v38 = vshll.u32 %v5950_v11, 16  ;;  %v7938_v16 = vrot.slane %v5950_v11, 9  ;;  %v12751_v2 = vld [vmem:[#allocation3 + $0xac] sm:$0xf]  ;;  %vm13712_vm3 = vmmov %vm13708_vm12 }
 0x4f7   : > { %v7210_v4 = vsel %vm2483_vm15, %v7178_v22, %v6935_v7  ;;  %v5951_v9 = vld [vmem:[#allocation3 + $0xa0] sm:$0xf]  ;;  %v5952_v63 = vld [vmem:[#allocation3 + $0xa4] sm:$0x1]  ;;  %v6311_v62 = vshll.u32 %v12751_v2, 16  ;;  %vm13713_vm1 = vmmov %vm13702_vm4 }
 0x4f8   : > { %v7242_v37 = vsel %vm2516_vm0, %v7210_v4, %v6970_v43  ;;  %6948 = vrot.lane.b32.xlu0 %v12734_v13, %s8431_s17  ;;  %v6291_v29 = vshrl.u32 %v5951_v9, 16  ;;  %v6490_v59 = vrot.slane %v5951_v9, 5  ;;  %6845 = vrot.lane.b32.xlu1 %v12734_v13, %s8428_s14  ;;  %v6280_v46 = vrot.slane %v6278_v48, 4  ;;  %vm13714_vm4 = vmmov %vm13703_vm6 }
 0x4f9   : > { %8226 = vmatmul.mubr.msk.bf16.gmra.mrb[24].mxu1 %vm13707_vm14, %v7242_v37  ;;  %v6797_v53 = vpop.permute.xlu0 %6796  ;;  %v6283_v49 = vrot.slane %v6281_v38, 5  ;;  %v6287_v25 = vshll.u32 %v5951_v9, 16  ;;  %v6493_v6 = vrot.slane %v5952_v63, 5  ;;  %v6297_v35 = vshll.u32 %v5952_v63, 16  ;;  %vm13715_vm6 = vmmov %vm13707_vm14 }
 0x4fa   : > { %v6682_v17 = vpop.permute.xlu1 %6681  ;;  %v6492_v27 = vrot.slane %v6490_v59, 4  ;;  %v6293_v55 = vrot.slane %v6291_v29, 4  ;;  %v6491_v14 = vsel %vm9002_vm5, %v7938_v16, %v6490_v59  ;;  %v12763_v36 = vcombine.low %v5950_v11, %v5951_v9 }
 0x4fb   : > { %v6284_v57 = vor.u32 %v6283_v49, %v6280_v46  ;;  %v6289_v1 = vrot.slane %v6287_v25, 5  ;;  %v6315_v43 = vshrl.u32 %v12751_v2, 16  ;;  %v7009_v51 = vsel %vm13708_vm12, %v12279_v12, %v6682_v17  ;;  %vm13718_vm12 = vmmov %vm13710_vm8 }
 0x4fc   : > { %6983 = vrot.lane.b32.xlu0 %v7987_v52, %s8432_s18  ;;  %v6494_v32 = vsel %vm9002_vm5, %v6492_v27, %v6493_v6  ;;  %6880 = vrot.lane.b32.xlu1 %v7987_v52, %s8429_s15  ;;  %v6299_v41 = vrot.slane %v6297_v35, 5  ;;  %v7052_v44 = vsel %vm13709_vm10, %v7009_v51, %v6762_v50  ;;  %v12783_v48 = vrot.slane %v6311_v62, 5 }
 0x4fd   : > { %v6832_v18 = vpop.permute.xlu0 %6831  ;;  %v12759_v20 = vcombine.low %v6491_v14, %v6494_v32  ;;  %v6285_v39 = vrot.slane %v6284_v57, 4  ;;  %v6294_v54 = vor.u32 %v6293_v55, %v6289_v1  ;;  %v6317_v38 = vrot.slane %v6315_v43, 4 }
 0x4fe   : > { %v6684_v30 = vpop.permute.xlu1 %6683  ;;  %v12787_v63 = vrot.slane %v6302_v34, 4  ;;  %v12789_v37 = vrot.slane %v6305_v24, 5  ;;  %v7084_v50 = vsel %vm13710_vm8, %v7052_v44, %v6797_v53  ;;  %vm13717_vm14 = vcmask 60416   ;;  %vm13722_vm8 = vmmov %vm13714_vm4 }
 0x4ff   : > { %v6295_v61 = vrot.slane %v6294_v54, 4  ;;  %v6290_v23 = vsel %vm8548_vm2, %v6285_v39, %v6289_v1  ;;  %v6318_v6 = vor.u32 %v6317_v38, %v12783_v48  ;;  %v7116_v53 = vsel %vm13711_vm9, %v7084_v50, %v6832_v18 }
 0x500   : > { %6985 = vrot.lane.b32.xlu0 %v12759_v20, %s8432_s18  ;;  %6915 = vrot.lane.b32.xlu1 %v12763_v36, %s8430_s16  ;;  %v6308_v1 = vor.u32 %v12789_v37, %v12787_v63  ;;  %v7012_v35 = vsel %vm13712_vm3, %v12312_v0, %v6684_v30  ;;  %v5904_v30 = vld [vmem:[#allocation3 + $0xc0] sm:$0xf] }
 0x501   : > { %v6867_v45 = vpop.permute.xlu0 %6866  ;;  %v6300_v12 = vsel %vm8548_vm2, %v6295_v61, %v6299_v41  ;;  %v6497_v61 = vrot.slane %v12751_v2, 5  ;;  %v6319_v24 = vrot.slane %v6318_v6, 4 }
 0x502   : > { %v12780_v21 = vpop.permute.xlu1 %6763  ;;  %v8209_v11 = vpop.f32.mrb[16].mxu1  ;;  %v7972_v22 = vcombine.low %v6290_v23, %v6300_v12  ;;  %v7148_v18 = vsel %vm13713_vm1, %v7116_v53, %v6867_v45 }
 0x503   : > { %v5344_v7 = vadd.f32 %v12419_v60, %v8209_v11  ;;  %v5335_v19 = vpop.f32.mrb[17].mxu1  ;;  %v5897_v11 = vld [vmem:[#allocation3 + $0xb4] sm:$0xf]  ;;  %v6499_v58 = vrot.slane %v6497_v61, 4 }
 0x504   : > { %v5336_v4 = vadd.f32 %v12419_v60, %v5335_v19  ;;  %6777 = vrot.lane.b32.xlu0 %v7987_v52, %s8426_s12  ;;  %v8210_v9 = vpop.f32.mrb[18].mxu1  ;;  %6950 = vrot.lane.b32.xlu1 %v7972_v22, %s8431_s17  ;;  %v12797_v52 = vld [vmem:[#allocation3 + $0xb0] sm:$0x1] }
 0x505   : > { %v6902_v47 = vpop.permute.xlu0 %6901  ;;  %v5380_v29 = vmax.f32 %v5344_v7, 0.0  ;;  %v5347_v59 = vadd.f32 %v12419_v60, %v8210_v9  ;;  %v5338_v46 = vpop.f32.mrb[19].mxu1  ;;  %v6321_v39 = vshll.u32 %v12797_v52, 16  ;;  %v5908_v9 = vld [vmem:[#allocation3 + $0xc8] sm:$0x1] }
 0x506   : > { %v12794_v49 = vpop.permute.xlu1 %6798  ;;  %v5378_v25 = vmax.f32 %v5336_v4, 0.0  ;;  %v5339_v17 = vadd.f32 %v12419_v60, %v5338_v46  ;;  %v7180_v0 = vsel %vm13714_vm4, %v7148_v18, %v6902_v47  ;;  %vm13725_vm4 = vmmov %vm13718_vm12 }
 0x507   : > { %v8053_v16 = vpack.c.bf16 %v5380_v29, %v5380_v29  ;;  %v5381_v27 = vmax.f32 %v5347_v59, 0.0 }
 0x508   : > { %v8051_v55 = vpack.c.bf16 %v5378_v25, %v5378_v25  ;;  %v5379_v57 = vmax.f32 %v5339_v17, 0.0  ;;  %6812 = vrot.lane.b32.xlu0 %v12763_v36, %s8427_s13  ;;  %6697 = vrot.lane.b32.xlu1 %v12734_v13, %s8425_s11  ;;  %v5901_v17 = vld [vmem:[#allocation3 + $0xbc] sm:$0x1] }
 0x509   : > { %v5734_v60 = vshrl.u32 %v8053_v16, 16  ;;  %v8054_v14 = vpack.c.bf16 %v5381_v27, %v5381_v27  ;;  %v6937_v32 = vpop.permute.xlu0 %6936  ;;  %v5737_v62 = vshll.u32 %v8053_v16, 16 }
 0x50a   : > { %v5717_v54 = vshrl.u32 %v8051_v55, 16  ;;  %v6834_v43 = vpop.permute.xlu1 %6833  ;;  %v8052_v51 = vpack.c.bf16 %v5379_v57, %v5379_v57  ;;  %v5720_v12 = vshll.u32 %v8051_v55, 16  ;;  %v7212_v19 = vsel %vm2483_vm15, %v7180_v0, %v6937_v32 }
 0x50b   : > { %v5736_v41 = vrot.slane %v5734_v60, 7  ;;  %v5742_v34 = vshrl.u32 %v8054_v14, 16  ;;  %v5745_v7 = vshll.u32 %v8054_v14, 16  ;;  %v6309_v60 = vrot.slane %v6308_v1, 4 }
 0x50c   : > { %v5719_v23 = vrot.slane %v5717_v54, 7  ;;  %v5725_v44 = vshrl.u32 %v8052_v51, 16  ;;  %6847 = vrot.lane.b32.xlu0 %v7972_v22, %s8428_s14  ;;  %6699 = vrot.lane.b32.xlu1 %v7972_v22, %s8425_s11  ;;  %v5728_v37 = vshll.u32 %v8052_v51, 16  ;;  %v6323_v14 = vrot.slane %v6321_v39, 5 }
 0x50d   : > { %v5739_v13 = vor.u32 %v5737_v62, %v5736_v41  ;;  %v5744_v45 = vrot.slane %v5742_v34, 7  ;;  %v6972_v38 = vpop.permute.xlu0 %6971  ;;  %v5740_v29 = vrot.slane %v5736_v41, 4  ;;  %v12839_v51 = vcombine.low %v12761_v26, %v12751_v2 }
 0x50e   : > { %v5722_v4 = vor.u32 %v5720_v12, %v5719_v23  ;;  %v5727_v63 = vrot.slane %v5725_v44, 7  ;;  %v6869_v50 = vpop.permute.xlu1 %6868  ;;  %v7244_v47 = vsel %vm2516_vm0, %v7212_v19, %v6972_v38  ;;  %v5723_v16 = vrot.slane %v5719_v23, 4 }
 0x50f   : > { %v5905_v59 = vsel %vm11003_vm11, %v5739_v13, %v5904_v30  ;;  %v5747_v46 = vor.u32 %v5745_v7, %v5744_v45  ;;  %v5749_v25 = vrot.slane %v5744_v45, 4  ;;  %8229 = vmatprep.mubr.msk.bf16.mxu1 %vm13715_vm6, %v7244_v47  ;;  %v6500_v39 = vrot.slane %v12797_v52, 5 }
 0x510   : > { %5906 = vst [vmem:[#allocation3 + $0xc0] sm:$0xf] %v5905_v59  ;;  %v5898_v22 = vsel %vm11003_vm11, %v5722_v4, %v5897_v11  ;;  %v5730_v27 = vor.u32 %v5728_v37, %v5727_v63  ;;  %v5732_v6 = vrot.slane %v5727_v63, 4  ;;  %6882 = vrot.lane.b32.xlu0 %v12759_v20, %s8429_s15  ;;  %6779 = vrot.lane.b32.xlu1 %v12759_v20, %s8426_s12  ;;  %vm13716_vm11 = vmmov %vm13709_vm10 }
 0x511   : > { %5899 = vst [vmem:[#allocation3 + $0xb4] sm:$0xf] %v5898_v22  ;;  %v5748_v53 = vsel %vm11009_vm7, %v5740_v29, %v5747_v46  ;;  %v5909_v55 = vsel %vm10611_vm13, %v5749_v25, %v5908_v9  ;;  %v6974_v57 = vpop.permute.xlu0 %6973  ;;  %v7054_v28 = vsel %vm13716_vm11, %v7012_v35, %v12780_v21  ;;  %vm13719_vm10 = vmmov %vm13717_vm14  ;;  %v6324_v21 = vsel %vm8548_vm2, %v6319_v24, %v6323_v14 }
 0x512   : > { %5907 = vst.msk [vmem:[#allocation3 + $0xc4] sm:$0xf] %vm13717_vm14, %v5748_v53  ;;  %5910 = vst [vmem:[#allocation3 + $0xc8] sm:$0x1] %v5909_v55  ;;  %v5731_v32 = vsel %vm11009_vm7, %v5723_v16, %v5730_v27  ;;  %v5902_v18 = vsel %vm10611_vm13, %v5732_v6, %v5901_v17  ;;  %v6904_v54 = vpop.permute.xlu1 %6903  ;;  %v7086_v20 = vsel %vm13718_vm12, %v7054_v28, %v12794_v49  ;;  %v7939_v24 = vrot.slane %v12761_v26, 9 }
 0x513   : > { %5900 = vst.msk [vmem:[#allocation3 + $0xb8] sm:$0xf] %vm13719_vm10, %v5731_v32  ;;  %5903 = vst [vmem:[#allocation3 + $0xbc] sm:$0x1] %v5902_v18  ;;  %v6314_v49 = vsel %vm8548_vm2, %v6309_v60, %v12783_v48  ;;  %v6501_v0 = vsel %vm9002_vm5, %v6499_v58, %v6500_v39 }
 0x514   : > { %vm13720_vm7 = vmmov %vm13711_vm9  ;;  %6917 = vrot.lane.b32.xlu0 %v12839_v51, %s8430_s16  ;;  %6814 = vrot.lane.b32.xlu1 %v12839_v51, %s8427_s13  ;;  %v12859_v34 = vcombine.low %v6314_v49, %v6324_v21  ;;  %v6498_v26 = vsel %vm9002_vm5, %v7939_v24, %v6497_v61 }
 0x515   : > { %v7118_v3 = vsel %vm13720_vm7, %v7086_v20, %v6834_v43  ;;  %vm13721_vm13 = vmmov %vm13713_vm1  ;;  %v6766_v35 = vpop.permute.xlu0 %6765  ;;  %v7989_v13 = vcombine.low %v6498_v26, %v6501_v0 }
 0x516   : > { %v7150_v1 = vsel %vm13721_vm13, %v7118_v3, %v6869_v50  ;;  %v6939_v62 = vpop.permute.xlu1 %6938  ;;  %vm13723_vm9 = vmmov %vm13715_vm6 }
 0x517   : > { %v7182_v41 = vsel %vm13722_vm8, %v7150_v1, %v6904_v54  ;;  %vm13724_vm1 = vmmov %vm13716_vm11  ;;  %v12894_v18 = vld [vmem:[#allocation3 + $0xc0] sm:$0xf] }
 0x518   : > { %v7214_v43 = vsel %vm2483_vm15, %v7182_v41, %v6939_v62  ;;  %6952 = vrot.lane.b32.xlu0 %v12859_v34, %s8431_s17  ;;  %v5956_v48 = vld [vmem:[#allocation3 + $0xb4] sm:$0xf]  ;;  %6849 = vrot.lane.b32.xlu1 %v12859_v34, %s8428_s14  ;;  %v6513_v39 = vshll.u32 %v12894_v18, 16  ;;  %vm13726_vm6 = vmmov %vm13720_vm7 }
 0x519   : > { %v7246_v30 = vsel %vm2516_vm0, %v7214_v43, %v6974_v57  ;;  %v6801_v52 = vpop.permute.xlu0 %6800  ;;  %v6326_v23 = vshrl.u32 %v5956_v48, 16  ;;  %v6329_v12 = vshll.u32 %v5956_v48, 16  ;;  %v7940_v63 = vrot.slane %v5956_v48, 9  ;;  %v12891_v60 = vld [vmem:[#allocation3 + $0xc4] sm:$0xf]  ;;  %vm13727_vm11 = vmmov %vm13721_vm13 }
 0x51a   : > { %8230 = vmatmul.mubr.msk.bf16.gmra.mrb[28].mxu1 %vm13723_vm9, %v7246_v30  ;;  %v6686_v44 = vpop.permute.xlu1 %6685  ;;  %v5957_v11 = vld [vmem:[#allocation3 + $0xb8] sm:$0xf]  ;;  %v5958_v45 = vld [vmem:[#allocation3 + $0xbc] sm:$0x1]  ;;  %v6523_v21 = vshrl.u32 %v12891_v60, 16  ;;  %v6519_v58 = vshll.u32 %v12891_v60, 16  ;;  %vm13728_vm14 = vmmov %vm13722_vm8 }
 0x51b   : > { %v6339_v7 = vshrl.u32 %v5957_v11, 16  ;;  %v6504_v19 = vrot.slane %v5957_v11, 5  ;;  %v6328_v38 = vrot.slane %v6326_v23, 4  ;;  %v6331_v4 = vrot.slane %v6329_v12, 5  ;;  %v5961_v23 = vld [vmem:[#allocation3 + $0xc8] sm:$0x1]  ;;  %vm13729_vm12 = vmmov %vm13723_vm9 }
 0x51c   : > { %6987 = vrot.lane.b32.xlu0 %v7989_v13, %s8432_s18  ;;  %6884 = vrot.lane.b32.xlu1 %v7989_v13, %s8429_s15  ;;  %v6507_v37 = vrot.slane %v5958_v45, 5  ;;  %v6335_v50 = vshll.u32 %v5957_v11, 16  ;;  %v12877_v47 = vcombine.low %v5956_v48, %v5957_v11  ;;  %v6345_v16 = vshll.u32 %v5958_v45, 16  ;;  %v12914_v12 = vld [vmem:[#allocation3 + $0xd0] sm:$0xf]  ;;  %vm13730_vm10 = vmmov %vm13712_vm3 }
 0x51d   : > { %v6836_v9 = vpop.permute.xlu0 %6835  ;;  %v6506_v2 = vrot.slane %v6504_v19, 4  ;;  %v6332_v29 = vor.u32 %v6331_v4, %v6328_v38  ;;  %v6341_v59 = vrot.slane %v6339_v7, 4  ;;  %v6505_v46 = vsel %vm9002_vm5, %v7940_v63, %v6504_v19  ;;  %v12917_v45 = vld [vmem:[#allocation3 + $0xcc] sm:$0xf]  ;;  %vm13731_vm7 = vmmov %vm13724_vm1 }
 0x51e   : > { %v6688_v61 = vpop.permute.xlu1 %6687  ;;  %v6337_v17 = vrot.slane %v6335_v50, 5  ;;  %v7015_v27 = vsel %vm13712_vm3, %v12369_v5, %v6686_v44  ;;  %v6347_v28 = vrot.slane %v6345_v16, 5  ;;  %v6521_v62 = vrot.slane %v6519_v58, 5  ;;  %vm13732_vm13 = vmmov %vm13725_vm4 }
 0x51f   : > { %v6508_v25 = vsel %vm9002_vm5, %v6506_v2, %v6507_v37  ;;  %v6333_v53 = vrot.slane %v6332_v29, 4  ;;  %v7056_v32 = vsel %vm13724_vm1, %v7015_v27, %v6766_v35  ;;  %v6510_v35 = vshrl.u32 %v12894_v18, 16  ;;  %vm13733_vm8 = vmmov %vm13726_vm6 }
 0x520   : > { %v12883_v22 = vcombine.low %v6505_v46, %v6508_v25  ;;  %6919 = vrot.lane.b32.xlu1 %v12877_v47, %s8430_s16  ;;  %v6342_v55 = vor.u32 %v6341_v59, %v6337_v17  ;;  %v7088_v49 = vsel %vm13725_vm4, %v7056_v32, %v6801_v52  ;;  %v6525_v43 = vrot.slane %v6523_v21, 4  ;;  %vm13734_vm9 = vmmov %vm13727_vm11  ;;  %v5964_v21 = vld [vmem:[#allocation3 + $0xd4] sm:$0x1] }
 0x521   : > { %v6871_v6 = vpop.permute.xlu0 %6870  ;;  %v6338_v5 = vsel %vm8548_vm2, %v6333_v53, %v6337_v17  ;;  %v7120_v24 = vsel %vm13726_vm6, %v7088_v49, %v6836_v9  ;;  %v6512_v48 = vrot.slane %v6510_v35, 4  ;;  %v6515_v26 = vrot.slane %v6513_v39, 5  ;;  %vm13735_vm3 = vmmov %vm13728_vm14 }
 0x522   : > { %v6768_v57 = vpop.permute.xlu1 %6767  ;;  %6989 = vrot.lane.b32.xlu0 %v12883_v22, %s8432_s18  ;;  %v6343_v14 = vrot.slane %v6342_v55, 4  ;;  %v7152_v30 = vsel %vm13727_vm11, %v7120_v24, %v6871_v6  ;;  %v6526_v11 = vor.u32 %v6525_v43, %v6521_v62  ;;  %v6529_v4 = vshll.u32 %v5961_v23, 16  ;;  %vm13736_vm1 = vmmov %vm13729_vm12 }
 0x523   : > { %v6516_v38 = vor.u32 %v6515_v26, %v6512_v48  ;;  %v6544_v9 = vshrl.u32 %v12917_v45, 16  ;;  %v6553_v63 = vshll.u32 %v12914_v12, 16  ;;  %v7018_v2 = vsel %vm13730_vm10, %v12408_v10, %v6688_v61  ;;  %vm13737_vm4 = vmmov %vm13730_vm10 }
 0x524   : > { %v6348_v20 = vsel %vm8548_vm2, %v6343_v14, %v6347_v28  ;;  %v6527_v50 = vrot.slane %v6526_v11, 4  ;;  %v6538_v29 = vrot.slane %v12891_v60, 5  ;;  %v6547_v59 = vshll.u32 %v12917_v45, 16  ;;  %vm13738_vm6 = vmmov %vm13731_vm7 }
 0x525   : > { %v6906_v54 = vpop.permute.xlu0 %6905  ;;  %v7974_v1 = vcombine.low %v6338_v5, %v6348_v20  ;;  %v7058_v46 = vsel %vm13731_vm7, %v7018_v2, %v6768_v57  ;;  %v6517_v16 = vrot.slane %v6516_v38, 4  ;;  %v6531_v27 = vrot.slane %v6529_v4, 5  ;;  %vm13739_vm11 = vmmov %vm13732_vm13 }
 0x526   : > { %v6803_v3 = vpop.permute.xlu1 %6802  ;;  %6781 = vrot.lane.b32.xlu0 %v7989_v13, %s8426_s12  ;;  %v7184_v52 = vsel %vm13728_vm14, %v7152_v30, %v6906_v54  ;;  %v7991_v10 = vcombine.low %v12894_v18, %v12891_v60  ;;  %v6546_v61 = vrot.slane %v6544_v9, 4  ;;  %v6555_v55 = vrot.slane %v6553_v63, 5  ;;  %vm13741_vm14 = vmmov %vm13734_vm9 }
 0x527   : > { %6954 = vrot.lane.b32.xlu1 %v7974_v1, %s8431_s17  ;;  %v7090_v17 = vsel %vm13732_vm13, %v7058_v46, %v6803_v3  ;;  %v6532_v28 = vsel %vm8548_vm2, %v6527_v50, %v6531_v27  ;;  %v6540_v32 = vrot.slane %v6538_v29, 4  ;;  %v6549_v54 = vrot.slane %v6547_v59, 5  ;;  %vm13744_vm10 = vmmov %vm13737_vm4 }
 0x528   : > { %v6522_v60 = vsel %vm8548_vm2, %v6517_v16, %v6521_v62  ;;  %v6541_v58 = vrot.slane %v5961_v23, 5  ;;  %v7941_v39 = vrot.slane %v12894_v18, 9  ;;  %v6563_v24 = vshll.u32 %v5964_v21, 16  ;;  %vm13745_vm7 = vmmov %vm13738_vm6 }
 0x529   : > { %v6941_v41 = vpop.permute.xlu0 %6940  ;;  %v6550_v43 = vor.u32 %v6549_v54, %v6546_v61  ;;  %v6572_v48 = vrot.slane %v12914_v12, 5  ;;  %v7942_v11 = vrot.slane %v12917_v45, 9  ;;  %v6575_v9 = vrot.slane %v5964_v21, 5  ;;  %vm13746_vm13 = vmmov %vm13739_vm11 }
 0x52a   : > { %v6838_v0 = vpop.permute.xlu1 %6837  ;;  %6816 = vrot.lane.b32.xlu0 %v12877_v47, %s8427_s13  ;;  %v7216_v44 = vsel %vm2483_vm15, %v7184_v52, %v6941_v41  ;;  %v6542_v41 = vsel %vm9002_vm5, %v6540_v32, %v6541_v58  ;;  %v6539_v62 = vsel %vm9002_vm5, %v7941_v39, %v6538_v29  ;;  %v6565_v18 = vrot.slane %v6563_v24, 5 }
 0x52b   : > { %6701 = vrot.lane.b32.xlu1 %v12859_v34, %s8425_s11  ;;  %v6557_v34 = vshrl.u32 %v12914_v12, 16  ;;  %v7122_v53 = vsel %vm13733_vm8, %v7090_v17, %v6838_v0  ;;  %v7993_v30 = vcombine.low %v6539_v62, %v6542_v41  ;;  %v6551_v52 = vrot.slane %v6550_v43, 4 }
 0x52d   : > { %v6976_v13 = vpop.permute.xlu0 %6975  ;;  %v6559_v6 = vrot.slane %v6557_v34, 4  ;;  %v6556_v4 = vsel %vm8548_vm2, %v6551_v52, %v6555_v55 }
 0x52e   : > { %v6873_v7 = vpop.permute.xlu1 %6872  ;;  %v7248_v19 = vsel %vm2516_vm0, %v7216_v44, %v6976_v13  ;;  %6851 = vrot.lane.b32.xlu0 %v7974_v1, %s8428_s14  ;;  %v7994_v13 = vcombine.low %v12917_v45, %v12914_v12  ;;  %v6573_v45 = vsel %vm9002_vm5, %v7942_v11, %v6572_v48 }
 0x52f   : > { %8233 = vmatprep.mubr.msk.bf16.mxu1 %vm13729_vm12, %v7248_v19  ;;  %6703 = vrot.lane.b32.xlu1 %v7974_v1, %s8425_s11  ;;  %v7154_v57 = vsel %vm13734_vm9, %v7122_v53, %v6873_v7  ;;  %v7992_v1 = vcombine.low %v6522_v60, %v6532_v28  ;;  %v6560_v49 = vor.u32 %v6559_v6, %v6555_v55  ;;  %v6574_v7 = vrot.slane %v6572_v48, 4  ;;  %vm13742_vm12 = vmmov %vm13735_vm3 }
 0x531   : > { %v6978_v37 = vpop.permute.xlu0 %6977  ;;  %v6561_v23 = vrot.slane %v6560_v49, 4 }
 0x532   : > { %v6908_v25 = vpop.permute.xlu1 %6907  ;;  %6886 = vrot.lane.b32.xlu0 %v12883_v22, %s8429_s15 }
 0x533   : > { %6783 = vrot.lane.b32.xlu1 %v12883_v22, %s8426_s12  ;;  %v7186_v5 = vsel %vm13735_vm3, %v7154_v57, %v6908_v25  ;;  %v6566_v34 = vsel %vm8548_vm2, %v6561_v23, %v6565_v18  ;;  %vm13740_vm2 = vmmov %vm13733_vm8 }
 0x534   : > { %v7995_v12 = vcombine.low %v6556_v4, %v6566_v34  ;;  %vm13747_vm8 = vmmov %vm13740_vm2 }
 0x535   : > { %v6770_v14 = vpop.permute.xlu0 %6769 }
 0x536   : > { %v6943_v20 = vpop.permute.xlu1 %6942  ;;  %6921 = vrot.lane.b32.xlu0 %v7991_v10, %s8430_s16 }
 0x537   : > { %v7218_v22 = vsel %vm2483_vm15, %v7186_v5, %v6943_v20  ;;  %6818 = vrot.lane.b32.xlu1 %v7991_v10, %s8427_s13  ;;  %s8022_s13 = sshll.u32 %s13804_s28, 8 }
 0x538   : > { %v7250_v3 = vsel %vm2516_vm0, %v7218_v22, %v6978_v37 }
 0x539   : > { %8234 = vmatmul.mubr.msk.bf16.gmra.mrb[32].mxu1 %vm13736_vm1, %v7250_v3  ;;  %v6805_v35 = vpop.permute.xlu0 %6804 }
 0x53a   : > { %v6690_v0 = vpop.permute.xlu1 %6689  ;;  %6956 = vrot.lane.b32.xlu0 %v7992_v1, %s8431_s17 }
 0x53b   : > { %6853 = vrot.lane.b32.xlu1 %v7992_v1, %s8428_s14  ;;  %v7021_v19 = vsel %vm13737_vm4, %v12466_v42, %v6690_v0  ;;  %v6576_v42 = vsel %vm9002_vm5, %v6574_v7, %v6575_v9  ;;  %vm13743_vm5 = vmmov %vm13736_vm1 }
 0x53c   : > { %v7060_v2 = vsel %vm13738_vm6, %v7021_v19, %v6770_v14  ;;  %v7996_v15 = vcombine.low %v6573_v45, %v6576_v42 }
 0x53d   : > { %v6840_v26 = vpop.permute.xlu0 %6839  ;;  %v7092_v29 = vsel %vm13739_vm11, %v7060_v2, %v6805_v35 }
 0x53e   : > { %v6692_v44 = vpop.permute.xlu1 %6691  ;;  %6991 = vrot.lane.b32.xlu0 %v7993_v30, %s8432_s18  ;;  %v7124_v46 = vsel %vm13740_vm2, %v7092_v29, %v6840_v26 }
 0x53f   : > { %6888 = vrot.lane.b32.xlu1 %v7993_v30, %s8429_s15  ;;  %v7024_v10 = vsel %vm13744_vm10, %v12511_v31, %v6692_v44  ;;  %vm13751_vm10 = vmmov %vm13737_vm4 }
 0x541   : > { %v6875_v38 = vpop.permute.xlu0 %6874 }
 0x542   : > { %v6772_v63 = vpop.permute.xlu1 %6771  ;;  %v7156_v17 = vsel %vm13741_vm14, %v7124_v46, %v6875_v38  ;;  %vm13748_vm14 = vmmov %vm13734_vm9 }
 0x543   : > { %6923 = vrot.lane.b32.xlu1 %v7994_v13, %s8430_s16  ;;  %v7062_v55 = vsel %vm13745_vm7, %v7024_v10, %v6772_v63  ;;  %vm13752_vm7 = vmmov %vm13738_vm6  ;;  %s13050_s16 = scalar_lea.vmem %s13172_s8, %s8022_s13 }
 0x545   : > { %v6910_v37 = vpop.permute.xlu0 %6909 }
 0x546   : > { %v6807_v50 = vpop.permute.xlu1 %6806  ;;  %v7188_v16 = vsel %vm13742_vm12, %v7156_v17, %v6910_v37  ;;  %vm13749_vm12 = vmmov %vm13735_vm3 }
 0x547   : > { %6958 = vrot.lane.b32.xlu1 %v7995_v12, %s8431_s17  ;;  %v7094_v14 = vsel %vm13746_vm13, %v7062_v55, %v6807_v50  ;;  %vm13753_vm13 = vmmov %vm13739_vm11 }
 0x549   : > { %v6945_v59 = vpop.permute.xlu0 %6944 }
 0x54a   : > { %v6842_v25 = vpop.permute.xlu1 %6841  ;;  %v7220_v27 = vsel %vm2483_vm15, %v7188_v16, %v6945_v59 }
 0x54b   : > { %6993 = vrot.lane.b32.xlu1 %v7996_v15, %s8432_s18  ;;  %v7126_v28 = vsel %vm13747_vm8, %v7094_v14, %v6842_v25  ;;  %vm13754_vm8 = vmmov %vm13740_vm2 }
 0x54d   : > { %v6980_v8 = vpop.permute.xlu0 %6979 }
 0x54e   : > { %v6877_v6 = vpop.permute.xlu1 %6876  ;;  %v7252_v53 = vsel %vm2516_vm0, %v7220_v27, %v6980_v8 }
 0x54f   : > { %8237 = vmatprep.mubr.msk.bf16.mxu1 %vm13743_vm5, %v7252_v53  ;;  %v7158_v32 = vsel %vm13734_vm9, %v7126_v28, %v6877_v6  ;;  %vm13750_vm5 = vmmov %vm13736_vm1 }
 0x552   : > { %v6982_v61 = vpop.permute.xlu0 %6981  ;;  %v6912_v57 = vpop.permute.xlu1 %6911 }
 0x553   : > { %v7190_v5 = vsel %vm13735_vm3, %v7158_v32, %v6912_v57 }
 0x556   : > { %v6774_v54 = vpop.permute.xlu0 %6773  ;;  %v6947_v20 = vpop.permute.xlu1 %6946 }
 0x557   : > { %v7222_v21 = vsel %vm2483_vm15, %v7190_v5, %v6947_v20 }
 0x558   : > { %v7254_v22 = vsel %vm2516_vm0, %v7222_v21, %v6982_v61 }
 0x559   : > { %8238 = vmatmul.mubr.msk.bf16.gmra.mrb[36].mxu1 %vm13736_vm1, %v7254_v22 }
 0x55a   : > { %v6809_v31 = vpop.permute.xlu0 %6808  ;;  %v6694_v60 = vpop.permute.xlu1 %6693 }
 0x55b   : > { %v7027_v1 = vsel %vm13737_vm4, %v12590_v33, %v6694_v60 }
 0x55c   : > { %v7064_v39 = vsel %vm13738_vm6, %v7027_v1, %v6774_v54 }
 0x55d   : > { %v7096_v24 = vsel %vm13739_vm11, %v7064_v39, %v6809_v31 }
 0x55e   : > { %v6844_v58 = vpop.permute.xlu0 %6843  ;;  %v6696_v3 = vpop.permute.xlu1 %6695 }
 0x55f   : > { %v7128_v62 = vsel %vm13740_vm2, %v7096_v24, %v6844_v58  ;;  %v7030_v44 = vsel %vm13751_vm10, %v12630_v40, %v6696_v3  ;;  %vm13758_vm10 = vmmov %vm13737_vm4 }
 0x562   : > { %v6879_v49 = vpop.permute.xlu0 %6878  ;;  %v6776_v35 = vpop.permute.xlu1 %6775 }
 0x563   : > { %v7160_v48 = vsel %vm13748_vm14, %v7128_v62, %v6879_v49  ;;  %v7066_v11 = vsel %vm13752_vm7, %v7030_v44, %v6776_v35  ;;  %vm13755_vm14 = vmmov %vm13734_vm9  ;;  %v13041_v62 = vld [vmem:[%s13171_s7] ss:$0 sm:$0xff] }
 0x564   : > { %vm13759_vm7 = vmmov %vm13738_vm6 }
 0x566   : > { %v6914_v41 = vpop.permute.xlu0 %6913  ;;  %v6811_v43 = vpop.permute.xlu1 %6810 }
 0x567   : > { %v7192_v26 = vsel %vm13749_vm12, %v7160_v48, %v6914_v41  ;;  %v7098_v19 = vsel %vm13753_vm13, %v7066_v11, %v6811_v43  ;;  %vm13756_vm12 = vmmov %vm13735_vm3 }
 0x568   : > { %vm13760_vm13 = vmmov %vm13739_vm11 }
 0x56a   : > { %v6949_v0 = vpop.permute.xlu0 %6948  ;;  %v6846_v30 = vpop.permute.xlu1 %6845 }
 0x56b   : > { %v7224_v52 = vsel %vm2483_vm15, %v7192_v26, %v6949_v0  ;;  %v7130_v38 = vsel %vm13754_vm8, %v7098_v19, %v6846_v30  ;;  %vm13761_vm8 = vmmov %vm13740_vm2 }
 0x56e   : > { %v6984_v23 = vpop.permute.xlu0 %6983  ;;  %v6881_v33 = vpop.permute.xlu1 %6880 }
 0x56f   : > { %v7256_v18 = vsel %vm2516_vm0, %v7224_v52, %v6984_v23  ;;  %v7162_v4 = vsel %vm13734_vm9, %v7130_v38, %v6881_v33 }
 0x570   : > { %8241 = vmatprep.mubr.msk.bf16.mxu1 %vm13750_vm5, %v7256_v18  ;;  %vm13757_vm5 = vmmov %vm13736_vm1 }
 0x572   : > { %v6986_v13 = vpop.permute.xlu0 %6985  ;;  %v6916_v7 = vpop.permute.xlu1 %6915 }
 0x573   : > { %v7194_v9 = vsel %vm13735_vm3, %v7162_v4, %v6916_v7 }
 0x576   : > { %v6778_v34 = vpop.permute.xlu0 %6777  ;;  %v6951_v63 = vpop.permute.xlu1 %6950 }
 0x577   : > { %v7226_v2 = vsel %vm2483_vm15, %v7194_v9, %v6951_v63 }
 0x578   : > { %v7258_v12 = vsel %vm2516_vm0, %v7226_v2, %v6986_v13 }
 0x579   : > { %8242 = vmatmul.mubr.msk.bf16.gmra.mrb[40].mxu1 %vm13736_vm1, %v7258_v12 }
 0x57a   : > { %v6813_v40 = vpop.permute.xlu0 %6812  ;;  %v6698_v37 = vpop.permute.xlu1 %6697 }
 0x57b   : > { %v7033_v50 = vsel %vm13737_vm4, %v12716_v56, %v6698_v37 }
 0x57c   : > { %v7068_v59 = vsel %vm13738_vm6, %v7033_v50, %v6778_v34 }
 0x57d   : > { %v7100_v17 = vsel %vm13739_vm11, %v7068_v59, %v6813_v40 }
 0x57e   : > { %v6848_v45 = vpop.permute.xlu0 %6847  ;;  %v6700_v42 = vpop.permute.xlu1 %6699 }
 0x57f   : > { %v7132_v27 = vsel %vm13740_vm2, %v7100_v17, %v6848_v45  ;;  %v7036_v14 = vsel %vm13758_vm10, %v12763_v36, %v6700_v42  ;;  %vm13765_vm10 = vmmov %vm13737_vm4 }
 0x582   : > { %v6883_v29 = vpop.permute.xlu0 %6882  ;;  %v6780_v15 = vpop.permute.xlu1 %6779 }
 0x583   : > { %v7164_v6 = vsel %vm13755_vm14, %v7132_v27, %v6883_v29  ;;  %v7070_v28 = vsel %vm13759_vm7, %v7036_v14, %v6780_v15  ;;  %vm13762_vm14 = vmmov %vm13734_vm9 }
 0x584   : > { %vm13766_vm7 = vmmov %vm13736_vm1 }
 0x586   : > { %v6918_v46 = vpop.permute.xlu0 %6917  ;;  %v6815_v25 = vpop.permute.xlu1 %6814 }
 0x587   : > { %v7196_v53 = vsel %vm13756_vm12, %v7164_v6, %v6918_v46  ;;  %v7102_v54 = vsel %vm13760_vm13, %v7070_v28, %v6815_v25  ;;  %vm13763_vm12 = vmmov %vm13735_vm3 }
 0x588   : > { %vm13767_vm13 = vmmov %vm13737_vm4 }
 0x58a   : > { %v6953_v16 = vpop.permute.xlu0 %6952  ;;  %v6850_v8 = vpop.permute.xlu1 %6849 }
 0x58b   : > { %v7228_v10 = vsel %vm2483_vm15, %v7196_v53, %v6953_v16  ;;  %v7134_v5 = vsel %vm13761_vm8, %v7102_v54, %v6850_v8  ;;  %vm13768_vm8 = vmmov %vm13737_vm4 }
 0x58e   : > { %v6988_v61 = vpop.permute.xlu0 %6987  ;;  %v6885_v55 = vpop.permute.xlu1 %6884 }
 0x58f   : > { %v7260_v56 = vsel %vm2516_vm0, %v7228_v10, %v6988_v61  ;;  %v7166_v21 = vsel %vm13734_vm9, %v7134_v5, %v6885_v55  ;;  %vm13769_vm9 = vmmov %vm13737_vm4 }
 0x590   : > { %8245 = vmatprep.mubr.msk.bf16.mxu1 %vm13757_vm5, %v7260_v56  ;;  %vm13764_vm5 = vmmov %vm13737_vm4 }
 0x592   : > { %v6920_v32 = vpop.permute.xlu1 %6919 }
 0x593   : > { %v7198_v22 = vsel %vm13735_vm3, %v7166_v21, %v6920_v32  ;;  %vm13770_vm3 = vmmov %vm13738_vm6 }
 0x594   : > { %v6990_v57 = vpop.permute.xlu0 %6989 }
 0x598   : > { %v6782_v20 = vpop.permute.xlu0 %6781 }
 0x599   : > { %v6955_v31 = vpop.permute.xlu1 %6954 }
 0x59a   : > { %v7230_v60 = vsel %vm2483_vm15, %v7198_v22, %v6955_v31 }
 0x59b   : > { %v7262_v58 = vsel %vm2516_vm0, %v7230_v60, %v6990_v57 }
 0x59c   : > { %v6817_v3 = vpop.permute.xlu0 %6816  ;;  %8246 = vmatmul.mubr.msk.bf16.gmra.mrb[44].mxu1 %vm13736_vm1, %v7262_v58  ;;  %vm13771_vm1 = vmmov %vm13739_vm11 }
 0x59d   : > { %v6702_v36 = vpop.permute.xlu1 %6701 }
 0x59e   : > { %v7039_v35 = vsel %vm13737_vm4, %v12839_v51, %v6702_v36  ;;  %vm13772_vm4 = vmmov %vm13740_vm2 }
 0x59f   : > { %v7072_v43 = vsel %vm13738_vm6, %v7039_v35, %v6782_v20  ;;  %vm13773_vm6 = vmmov %vm13762_vm14 }
 0x5a0   : > { %v6852_v1 = vpop.permute.xlu0 %6851  ;;  %v7104_v0 = vsel %vm13739_vm11, %v7072_v43, %v6817_v3  ;;  %vm13774_vm11 = vmmov %vm13763_vm12 }
 0x5a1   : > { %v6704_v49 = vpop.permute.xlu1 %6703  ;;  %v7136_v52 = vsel %vm13740_vm2, %v7104_v0, %v6852_v1  ;;  %vm13775_vm2 = vmmov %vm13766_vm7 }
 0x5a2   : > { %v7042_v42 = vsel %vm13769_vm9, %v12877_v47, %v6704_v49 }
 0x5a4   : > { %v6887_v39 = vpop.permute.xlu0 %6886 }
 0x5a5   : > { %v6784_v41 = vpop.permute.xlu1 %6783  ;;  %v7168_v33 = vsel %vm13762_vm14, %v7136_v52, %v6887_v39 }
 0x5a6   : > { %v7074_v50 = vsel %vm13770_vm3, %v7042_v42, %v6784_v41 }
 0x5a8   : > { %v6922_v24 = vpop.permute.xlu0 %6921 }
 0x5a9   : > { %v6819_v30 = vpop.permute.xlu1 %6818  ;;  %v7200_v7 = vsel %vm13763_vm12, %v7168_v33, %v6922_v24 }
 0x5aa   : > { %v7106_v29 = vsel %vm13771_vm1, %v7074_v50, %v6819_v30 }
 0x5ac   : > { %v8223_v48 = vpop.f32.mrb[20].mxu1  ;;  %v6957_v26 = vpop.permute.xlu0 %6956 }
 0x5ad   : > { %v7388_v51 = vadd.f32 %v8223_v48, %v13041_v62  ;;  %v7379_v23 = vpop.f32.mrb[21].mxu1  ;;  %v6854_v13 = vpop.permute.xlu1 %6853  ;;  %v7232_v9 = vsel %vm2483_vm15, %v7200_v7, %v6957_v26 }
 0x5ae   : > { %v7380_v18 = vadd.f32 %v13041_v62, %v7379_v23  ;;  %v8224_v44 = vpop.f32.mrb[22].mxu1  ;;  %v7138_v59 = vsel %vm13772_vm4, %v7106_v29, %v6854_v13 }
 0x5af   : > { %v7508_v11 = vmax.f32 %v7388_v51, 0.0  ;;  %v7391_v19 = vadd.f32 %v8224_v44, %v13041_v62  ;;  %v7382_v38 = vpop.f32.mrb[23].mxu1 }
 0x5b0   : > { %v7506_v4 = vmax.f32 %v7380_v18, 0.0  ;;  %v7383_v34 = vadd.f32 %v13041_v62, %v7382_v38  ;;  %v6992_v63 = vpop.permute.xlu0 %6991 }
 0x5b1   : > { %7540 = vst.msk [vmem:[%s13050_s16 + $0x10] sm:$0xff] %vm13764_vm5, %v7508_v11  ;;  %v7509_v2 = vmax.f32 %v7391_v19, 0.0  ;;  %v7264_v12 = vsel %vm2516_vm0, %v7232_v9, %v6992_v63  ;;  %v6889_v37 = vpop.permute.xlu1 %6888 }
 0x5b2   : > { %7538 = vst.msk [vmem:[%s13050_s16] sm:$0xff] %vm13765_vm10, %v7506_v4  ;;  %v7507_v40 = vmax.f32 %v7383_v34, 0.0  ;;  %8249 = vmatprep.mubr.msk.bf16.mxu1 %vm13766_vm7, %v7264_v12  ;;  %v7170_v46 = vsel %vm13773_vm6, %v7138_v59, %v6889_v37 }
 0x5b3   : > { %7541 = vst.msk [vmem:[%s13050_s16 + $0x18] sm:$0xff] %vm13767_vm13, %v7509_v2 }
 0x5b4   : > { %7539 = vst.msk [vmem:[%s13050_s16 + $0x8] sm:$0xff] %vm13768_vm8, %v7507_v40 }
 0x5b5   : > { %v6924_v45 = vpop.permute.xlu1 %6923 }
 0x5b6   : > { %v7202_v25 = vsel %vm13774_vm11, %v7170_v46, %v6924_v45 }
 0x5b9   : > { %v6959_v15 = vpop.permute.xlu1 %6958 }
 0x5ba   : > { %v7234_v17 = vsel %vm2483_vm15, %v7202_v25, %v6959_v15  ;;  %vm13776_vm15 = vmmov %vm13764_vm5 }
 0x5bd   : > { %v6994_v16 = vpop.permute.xlu1 %6993 }
 0x5be   : > { %v7266_v27 = vsel %vm2516_vm0, %v7234_v17, %v6994_v16  ;;  %vm13777_vm0 = vmmov %vm13764_vm5 }
 0x5bf   : > { %8250 = vmatmul.mubr.msk.bf16.gmra.mrb[48].mxu1 %vm13775_vm2, %v7266_v27  ;;  %vm13778_vm14 = vmmov %vm13777_vm0 }
 0x5c0   : > { %vm13779_vm12 = vmmov %vm13777_vm0 }
 0x5c1   : > { %vm13780_vm5 = vmmov %vm13777_vm0 }
 0x5c2   : > { %vm13781_vm10 = vmmov %vm13777_vm0 }
 0x5c3   : > { %vm13782_vm7 = vmmov %vm13777_vm0 }
 0x5c4   : > { %vm13783_vm13 = vmmov %vm13777_vm0 }
 0x5c5   : > { %vm13784_vm8 = vmmov %vm13777_vm0 }
 0x5c6   : > { %vm13785_vm9 = vmmov %vm13777_vm0 }
 0x5c7   : > { %vm13786_vm3 = vmmov %vm13777_vm0 }
 0x5c8   : > { %vm13787_vm1 = vmmov %vm13777_vm0 }
 0x5c9   : > { %vm13788_vm4 = vmmov %vm13777_vm0 }
 0x5ca   : > { %vm13789_vm6 = vmmov %vm13777_vm0 }
 0x5cb   : > { %vm13790_vm11 = vmmov %vm13777_vm0 }
 0x5cc   : > { %v8227_v47 = vpop.f32.mrb[24].mxu1  ;;  %vm13791_vm2 = vmmov %vm13777_vm0 }
 0x5cd   : > { %v7404_v8 = vadd.f32 %v8227_v47, %v13041_v62  ;;  %v7395_v6 = vpop.f32.mrb[25].mxu1 }
 0x5ce   : > { %v7396_v53 = vadd.f32 %v13041_v62, %v7395_v6  ;;  %v8228_v10 = vpop.f32.mrb[26].mxu1 }
 0x5cf   : > { %v7512_v61 = vmax.f32 %v7404_v8, 0.0  ;;  %v7407_v56 = vadd.f32 %v8228_v10, %v13041_v62  ;;  %v7398_v55 = vpop.f32.mrb[27].mxu1 }
 0x5d0   : > { %v7510_v57 = vmax.f32 %v7396_v53, 0.0  ;;  %v7399_v14 = vadd.f32 %v13041_v62, %v7398_v55 }
 0x5d1   : > { %7544 = vst.msk [vmem:[%s13050_s16 + $0x30] sm:$0xff] %vm13776_vm15, %v7512_v61  ;;  %v7513_v28 = vmax.f32 %v7407_v56, 0.0  ;;  %vm13792_vm15 = vmmov %vm13777_vm0 }
 0x5d2   : > { %7542 = vst.msk [vmem:[%s13050_s16 + $0x20] sm:$0xff] %vm13777_vm0, %v7510_v57  ;;  %v7511_v32 = vmax.f32 %v7399_v14, 0.0 }
 0x5d3   : > { %7545 = vst.msk [vmem:[%s13050_s16 + $0x38] sm:$0xff] %vm13778_vm14, %v7513_v28  ;;  %vm13793_vm14 = vmmov %vm13777_vm0 }
 0x5d4   : > { %7543 = vst.msk [vmem:[%s13050_s16 + $0x28] sm:$0xff] %vm13779_vm12, %v7511_v32  ;;  %vm13794_vm12 = vmmov %vm13777_vm0 }
 0x5ed   : > { %v8231_v54 = vpop.f32.mrb[28].mxu1 }
 0x5ee   : > { %v7420_v5 = vadd.f32 %v8231_v54, %v13041_v62  ;;  %v7411_v20 = vpop.f32.mrb[29].mxu1 }
 0x5ef   : > { %v7412_v21 = vadd.f32 %v13041_v62, %v7411_v20  ;;  %v8232_v22 = vpop.f32.mrb[30].mxu1 }
 0x5f0   : > { %v7516_v31 = vmax.f32 %v7420_v5, 0.0  ;;  %v7423_v60 = vadd.f32 %v8232_v22, %v13041_v62  ;;  %v7414_v58 = vpop.f32.mrb[31].mxu1 }
 0x5f1   : > { %v7514_v3 = vmax.f32 %v7412_v21, 0.0  ;;  %v7415_v36 = vadd.f32 %v13041_v62, %v7414_v58 }
 0x5f2   : > { %7548 = vst.msk [vmem:[%s13050_s16 + $0x50] sm:$0xff] %vm13780_vm5, %v7516_v31  ;;  %v7517_v1 = vmax.f32 %v7423_v60, 0.0  ;;  %vm13795_vm5 = vmmov %vm13777_vm0 }
 0x5f3   : > { %7546 = vst.msk [vmem:[%s13050_s16 + $0x40] sm:$0xff] %vm13781_vm10, %v7514_v3  ;;  %v7515_v49 = vmax.f32 %v7415_v36, 0.0  ;;  %vm13796_vm10 = vmmov %vm13777_vm0 }
 0x5f4   : > { %7549 = vst.msk [vmem:[%s13050_s16 + $0x58] sm:$0xff] %vm13782_vm7, %v7517_v1  ;;  %vm13797_vm7 = vmmov %vm13777_vm0 }
 0x5f5   : > { %7547 = vst.msk [vmem:[%s13050_s16 + $0x48] sm:$0xff] %vm13783_vm13, %v7515_v49  ;;  %vm13798_vm13 = vmmov %vm13777_vm0 }
 0x60c   : > { %v8235_v35 = vpop.f32.mrb[32].mxu1 }
 0x60d   : > { %v7436_v39 = vadd.f32 %v8235_v35, %v13041_v62  ;;  %v7427_v41 = vpop.f32.mrb[33].mxu1 }
 0x60e   : > { %v7428_v43 = vadd.f32 %v13041_v62, %v7427_v41  ;;  %v8236_v24 = vpop.f32.mrb[34].mxu1 }
 0x60f   : > { %v7520_v0 = vmax.f32 %v7436_v39, 0.0  ;;  %v7439_v30 = vadd.f32 %v8236_v24, %v13041_v62  ;;  %v7430_v48 = vpop.f32.mrb[35].mxu1 }
 0x610   : > { %v7518_v26 = vmax.f32 %v7428_v43, 0.0  ;;  %v7431_v52 = vadd.f32 %v13041_v62, %v7430_v48 }
 0x611   : > { %7552 = vst.msk [vmem:[%s13050_s16 + $0x70] sm:$0xff] %vm13784_vm8, %v7520_v0  ;;  %v7521_v51 = vmax.f32 %v7439_v30, 0.0  ;;  %vm13799_vm8 = vmmov %vm13777_vm0 }
 0x612   : > { %7550 = vst.msk [vmem:[%s13050_s16 + $0x60] sm:$0xff] %vm13785_vm9, %v7518_v26  ;;  %v7519_v23 = vmax.f32 %v7431_v52, 0.0  ;;  %vm13800_vm9 = vmmov %vm13777_vm0 }
 0x613   : > { %7553 = vst.msk [vmem:[%s13050_s16 + $0x78] sm:$0xff] %vm13786_vm3, %v7521_v51  ;;  %vm13801_vm3 = vmmov %vm13777_vm0 }
 0x614   : > { %7551 = vst.msk [vmem:[%s13050_s16 + $0x68] sm:$0xff] %vm13787_vm1, %v7519_v23  ;;  %vm13802_vm1 = vmmov %vm13777_vm0 }
 0x62c   : > { %v8239_v33 = vpop.f32.mrb[36].mxu1 }
 0x62d   : > { %v7452_v18 = vadd.f32 %v8239_v33, %v13041_v62  ;;  %v7443_v44 = vpop.f32.mrb[37].mxu1 }
 0x62e   : > { %v7444_v13 = vadd.f32 %v13041_v62, %v7443_v44  ;;  %v8240_v11 = vpop.f32.mrb[38].mxu1 }
 0x62f   : > { %v7524_v7 = vmax.f32 %v7452_v18, 0.0  ;;  %v7455_v19 = vadd.f32 %v8240_v11, %v13041_v62  ;;  %v7446_v38 = vpop.f32.mrb[39].mxu1 }
 0x630   : > { %v7522_v4 = vmax.f32 %v7444_v13, 0.0  ;;  %v7447_v34 = vadd.f32 %v13041_v62, %v7446_v38 }
 0x631   : > { %7556 = vst.msk [vmem:[%s13050_s16 + $0x90] sm:$0xff] %vm13788_vm4, %v7524_v7  ;;  %v7525_v9 = vmax.f32 %v7455_v19, 0.0 }
 0x632   : > { %7554 = vst.msk [vmem:[%s13050_s16 + $0x80] sm:$0xff] %vm13789_vm6, %v7522_v4  ;;  %v7523_v63 = vmax.f32 %v7447_v34, 0.0 }
 0x633   : > { %7557 = vst.msk [vmem:[%s13050_s16 + $0x98] sm:$0xff] %vm13790_vm11, %v7525_v9 }
 0x634   : > { %7555 = vst.msk [vmem:[%s13050_s16 + $0x88] sm:$0xff] %vm13791_vm2, %v7523_v63 }
 0x64c   : > { %v8243_v2 = vpop.f32.mrb[40].mxu1 }
 0x64d   : > { %v7468_v12 = vadd.f32 %v8243_v2, %v13041_v62  ;;  %v7459_v40 = vpop.f32.mrb[41].mxu1 }
 0x64e   : > { %v7460_v37 = vadd.f32 %v13041_v62, %v7459_v40  ;;  %v8244_v45 = vpop.f32.mrb[42].mxu1 }
 0x64f   : > { %v7528_v42 = vmax.f32 %v7468_v12, 0.0  ;;  %v7471_v50 = vadd.f32 %v8244_v45, %v13041_v62  ;;  %v7462_v29 = vpop.f32.mrb[43].mxu1 }
 0x650   : > { %v7526_v15 = vmax.f32 %v7460_v37, 0.0  ;;  %v7463_v59 = vadd.f32 %v13041_v62, %v7462_v29 }
 0x651   : > { %7560 = vst.msk [vmem:[%s13050_s16 + $0xb0] sm:$0xff] %vm13792_vm15, %v7528_v42  ;;  %v7529_v46 = vmax.f32 %v7471_v50, 0.0 }
 0x652   : > { %7558 = vst.msk [vmem:[%s13050_s16 + $0xa0] sm:$0xff] %vm13777_vm0, %v7526_v15  ;;  %v7527_v25 = vmax.f32 %v7463_v59, 0.0 }
 0x653   : > { %7561 = vst.msk [vmem:[%s13050_s16 + $0xb8] sm:$0xff] %vm13793_vm14, %v7529_v46 }
 0x654   : > { %7559 = vst.msk [vmem:[%s13050_s16 + $0xa8] sm:$0xff] %vm13794_vm12, %v7527_v25 }
 0x66f   : > { %v8247_v17 = vpop.f32.mrb[44].mxu1 }
 0x670   : > { %v7484_v16 = vadd.f32 %v8247_v17, %v13041_v62  ;;  %v7475_v27 = vpop.f32.mrb[45].mxu1 }
 0x671   : > { %v7476_v47 = vadd.f32 %v13041_v62, %v7475_v27  ;;  %v8248_v8 = vpop.f32.mrb[46].mxu1 }
 0x672   : > { %v7532_v6 = vmax.f32 %v7484_v16, 0.0  ;;  %v7487_v53 = vadd.f32 %v8248_v8, %v13041_v62  ;;  %v7478_v10 = vpop.f32.mrb[47].mxu1 }
 0x673   : > { %v7530_v61 = vmax.f32 %v7476_v47, 0.0  ;;  %v7479_v56 = vadd.f32 %v13041_v62, %v7478_v10 }
 0x674   : > { %7564 = vst.msk [vmem:[%s13050_s16 + $0xd0] sm:$0xff] %vm13795_vm5, %v7532_v6  ;;  %v7533_v55 = vmax.f32 %v7487_v53, 0.0 }
 0x675   : > { %7562 = vst.msk [vmem:[%s13050_s16 + $0xc0] sm:$0xff] %vm13796_vm10, %v7530_v61  ;;  %v7531_v57 = vmax.f32 %v7479_v56, 0.0 }
 0x676   : > { %7565 = vst.msk [vmem:[%s13050_s16 + $0xd8] sm:$0xff] %vm13797_vm7, %v7533_v55 }
 0x677   : > { %7563 = vst.msk [vmem:[%s13050_s16 + $0xc8] sm:$0xff] %vm13798_vm13, %v7531_v57 }
 0x692   : > { %v8251_v14 = vpop.f32.mrb[48].mxu1 }
 0x693   : > { %v7500_v28 = vadd.f32 %v8251_v14, %v13041_v62  ;;  %v7491_v32 = vpop.f32.mrb[49].mxu1 }
 0x694   : > { %v7492_v54 = vadd.f32 %v13041_v62, %v7491_v32  ;;  %v8252_v5 = vpop.f32.mrb[50].mxu1 }
 0x695   : > { %v7536_v20 = vmax.f32 %v7500_v28, 0.0  ;;  %v7503_v21 = vadd.f32 %v8252_v5, %v13041_v62  ;;  %v7494_v22 = vpop.f32.mrb[51].mxu1 }
 0x696   : > { %v7534_v31 = vmax.f32 %v7492_v54, 0.0  ;;  %v7495_v60 = vadd.f32 %v13041_v62, %v7494_v22 }
 0x697   : > { %7568 = vst.msk [vmem:[%s13050_s16 + $0xf0] sm:$0xff] %vm13799_vm8, %v7536_v20  ;;  %v7537_v58 = vmax.f32 %v7503_v21, 0.0 }
 0x698   : > { %7566 = vst.msk [vmem:[%s13050_s16 + $0xe0] sm:$0xff] %vm13800_vm9, %v7534_v31  ;;  %v7535_v3 = vmax.f32 %v7495_v60, 0.0 }
 0x699   : > { %7569 = vst.msk [vmem:[%s13050_s16 + $0xf8] sm:$0xff] %vm13801_vm3, %v7537_v58 }
 0x69a   : > { %7567 = vst.msk [vmem:[%s13050_s16 + $0xe8] sm:$0xff] %vm13802_vm1, %v7535_v3 }
 0x69b PF: > { %s18_s27 = sadd.s32 1, %s8423_s27  }
 0x69c   : > { %p15_p4 = scmp.ge.s32.totalorder %s18_s27, 4  }
 0x69e   :  { %17 = sbr.rel (!%p15_p4) target bundleno = 1 (0x1), region = 89 }

</bundles_post_ra>
